<compile_context>
chip_gen: v7x
topology: tpu7x:2x2x1
jax: 0.10.0
libtpu: 0.0.40
codegen_flags: <defaults>
</compile_context>

<pallas_src>
import functools

import numpy as np
import jax
import jax.numpy as jnp
from jax.experimental import pallas as pl
from jax.experimental.pallas import tpu as pltpu


# ----------------------- fixed architecture constants -----------------------
K1, S1, C1 = 8, 4, 32      # conv1: kernel 8, stride 4, 32 out channels
K2, S2, C2 = 4, 2, 64      # conv2: kernel 4, stride 2, 64 out channels
K3, S3, C3 = 3, 1, 64      # conv3: kernel 3, stride 1, 64 out channels
FC1 = 512                  # hidden width of the first FC layer
LANE = 128                 # TPU lane width


def _conv_out(size, k, s):
    return (size - k) // s + 1


def _round_up(x, m):
    return ((x + m - 1) // m) * m


def _conv_dims(input_shape):
    _, h, w = input_shape
    h1, w1 = _conv_out(h, K1, S1), _conv_out(w, K1, S1)
    h2, w2 = _conv_out(h1, K2, S2), _conv_out(w1, K2, S2)
    h3, w3 = _conv_out(h2, K3, S3), _conv_out(w2, K3, S3)
    return h1, w1, h2, w2, h3, w3


# ------------------------------ Pallas kernel --------------------------------

def _cnn_dqn_kernel(p_ref, w1_ref, b1_ref, w2_ref, b2_ref, w3_ref, b3_ref,
                    f1w_ref, f1b_ref, f2w_ref, f2b_ref, out_ref,
                    s1_ref, s2_ref, *, tb, p2, k2k2, k1cols):
    """Whole CnnDQN forward for one batch tile of TB samples."""
    f32, bf16 = jnp.float32, jnp.bfloat16
    rows = p2 * tb                                       # rows per conv2 offset

    # ---- conv1: one MXU matmul over all (offset, position, sample) patch rows
    patches = p_ref[...].reshape(k2k2 * rows, k1cols)
    a1 = jnp.dot(patches, w1_ref[...], preferred_element_type=f32)  # (k2k2*rows, C1)

    # ---- regroup the 16 contiguous per-offset row blocks into lanes (K = 512),
    #      staged through VMEM scratch (only aligned row slices + lane stores).
    for j in range(k2k2):
        s1_ref[:, j * C1:(j + 1) * C1] = a1[j * rows:(j + 1) * rows, :]
    # conv1 bias + ReLU, lane-dense (bias was tiled per offset at pack time).
    c2_in = jnp.maximum(s1_ref[...] + b1_ref[...], 0.0).astype(bf16)  # (rows, 512)

    # ---- conv2: single K=512 matmul --------------------------------------------
    a2 = jnp.dot(c2_in, w2_ref[...], preferred_element_type=f32)      # (rows, C2)
    a2 = jnp.maximum(a2 + b2_ref[...], 0.0)

    # ---- regroup per-sample conv2 maps into lanes: rows are (position, sample),
    #      so every conv2 position is one contiguous TB-row block.
    for p in range(p2):
        s2_ref[:, p * C2:(p + 1) * C2] = a2[p * tb:(p + 1) * tb, :]
    a2_flat = s2_ref[...].astype(bf16)                                # (TB, p2*C2)

    # ---- conv3 + flatten: one lane-dense matmul against the block-sparse
    #      (conv2-pos x conv3-pos) weight; columns already in torch (c,h,w) order.
    feat = jnp.dot(a2_flat, w3_ref[...], preferred_element_type=f32)  # (TB, p3*C3)
    feat = jnp.maximum(feat + b3_ref[...], 0.0).astype(bf16)

    # ---- fc1 + ReLU, fc2 (output padded to 128 lanes) ---------------------------
    h = jnp.dot(feat, f1w_ref[...], preferred_element_type=f32)       # (TB, FC1)
    h = jnp.maximum(h + f1b_ref[...], 0.0).astype(bf16)
    out_ref[...] = jnp.dot(h, f2w_ref[...], preferred_element_type=f32) + f2b_ref[...]


# -------------------------- per-call JAX glue (tiny) --------------------------

def _make_patches(x, dims):
    """conv1 im2col with rows pre-arranged (conv2-offset, conv2-pos, sample).

    Only static strided slices (no gather).  Returns bf16 array of shape
    (K2*K2*h2o*w2o, N, C*K1*K1); dim0 index = j*p2 + p with j the conv2 kernel
    offset and p the conv2 output position; columns in (c, kh, kw) order.
    """
    h1o, w1o, h2o, w2o, _, _ = dims
    n, c, _, _ = x.shape
    taps = []
    for kh in range(K1):
        for kw in range(K1):
            taps.append(x[:, :, kh:kh + S1 * h1o:S1, kw:kw + S1 * w1o:S1])
    p = jnp.stack(taps, axis=2)                         # (N, C, K1*K1, h1o, w1o)
    p = p.reshape(n, c * K1 * K1, h1o, w1o)
    p = p.transpose(0, 2, 3, 1)                         # (N, h1o, w1o, C*K1*K1)
    offs = []
    for dh2 in range(K2):
        for dw2 in range(K2):
            offs.append(p[:, dh2:dh2 + S2 * h2o:S2, dw2:dw2 + S2 * w2o:S2, :])
    pd = jnp.stack(offs, axis=0)                        # (K2*K2, N, h2o, w2o, CK1K1)
    pd = pd.transpose(0, 2, 3, 1, 4)                    # (K2*K2, h2o, w2o, N, CK1K1)
    return pd.reshape(K2 * K2 * h2o * w2o, n, c * K1 * K1).astype(jnp.bfloat16)


# ------------------------------- parameters ----------------------------------

def init_raw_params(key, input_shape, num_actions):
    """Torch-layout (OIHW / (in,out)) f32 parameters, deterministic."""
    c_in = input_shape[0]
    _, _, _, _, h3o, w3o = _conv_dims(input_shape)
    feat = C3 * h3o * w3o
    ks = jax.random.split(key, 10)
    s = 0.05
    return {
        "c1w": jax.random.normal(ks[0], (C1, c_in, K1, K1), jnp.float32) * s,
        "c1b": jax.random.normal(ks[1], (C1,), jnp.float32) * s,
        "c2w": jax.random.normal(ks[2], (C2, C1, K2, K2), jnp.float32) * s,
        "c2b": jax.random.normal(ks[3], (C2,), jnp.float32) * s,
        "c3w": jax.random.normal(ks[4], (C3, C2, K3, K3), jnp.float32) * s,
        "c3b": jax.random.normal(ks[5], (C3,), jnp.float32) * s,
        "f1w": jax.random.normal(ks[6], (feat, FC1), jnp.float32) * s,
        "f1b": jax.random.normal(ks[7], (FC1,), jnp.float32) * s,
        "f2w": jax.random.normal(ks[8], (FC1, num_actions), jnp.float32) * s,
        "f2b": jax.random.normal(ks[9], (num_actions,), jnp.float32) * s,
    }


def pack_params(raw, input_shape, num_actions):
    """One-time weight packing (transpose / tile / pad / bf16) for the kernel."""
    _, _, h2o, w2o, h3o, w3o = _conv_dims(input_shape)
    p2, p3 = h2o * w2o, h3o * w3o
    a_pad = _round_up(num_actions, LANE)
    bf = jnp.bfloat16

    c1w = np.asarray(raw["c1w"], np.float32)
    c2w = np.asarray(raw["c2w"], np.float32)
    c3w = np.asarray(raw["c3w"], np.float32)

    w1 = c1w.reshape(C1, -1).T                                      # (Cin*K1*K1, C1)
    b1 = np.tile(np.asarray(raw["c1b"], np.float32), K2 * K2)[None, :]   # (1, 512)

    w2 = c2w.transpose(2, 3, 1, 0).reshape(K2 * K2 * C1, C2)        # row = j*C1 + c1
    b2 = np.asarray(raw["c2b"], np.float32)[None, :]

    # conv3 as a dense "all (conv2-pos, conv3-pos) pairs" matrix.  Columns are in
    # torch's (c, h, w) flatten order so the result feeds fc1 with no permutation.
    w3 = np.zeros((p2 * C2, C3 * p3), np.float32)
    for oh3 in range(h3o):
        for ow3 in range(w3o):
            cp = oh3 * w3o + ow3
            for dh in range(K3):
                for dw in range(K3):
                    rp = (oh3 + dh) * w2o + (ow3 + dw)
                    w3[rp * C2:(rp + 1) * C2, cp::p3] = c3w[:, :, dh, dw].T
    b3 = np.repeat(np.asarray(raw["c3b"], np.float32), p3)[None, :]       # (1, 256)

    f1w = np.asarray(raw["f1w"], np.float32)                        # (p3*C3, FC1)
    f1b = np.asarray(raw["f1b"], np.float32)[None, :]

    f2w = np.zeros((FC1, a_pad), np.float32)                        # lane-padded
    f2w[:, :num_actions] = np.asarray(raw["f2w"], np.float32)
    f2b = np.zeros((1, a_pad), np.float32)
    f2b[0, :num_actions] = np.asarray(raw["f2b"], np.float32)

    return {
        "w1": jnp.asarray(w1, bf), "b1": jnp.asarray(b1),
        "w2": jnp.asarray(w2, bf), "b2": jnp.asarray(b2),
        "w3": jnp.asarray(w3, bf), "b3": jnp.asarray(b3),
        "f1w": jnp.asarray(f1w, bf), "f1b": jnp.asarray(f1b),
        "f2w": jnp.asarray(f2w, bf), "f2b": jnp.asarray(f2b),
    }


# --------------------------------- forward ------------------------------------

def make_forward(input_shape, num_actions, batch_tile=16):
    assert batch_tile % 8 == 0, "batch_tile must be a multiple of 8"
    c, _, _ = input_shape
    dims = _conv_dims(input_shape)
    _, _, h2o, w2o, h3o, w3o = dims
    p2, p3 = h2o * w2o, h3o * w3o
    k2k2 = K2 * K2
    k1cols = c * K1 * K1
    a_pad = _round_up(num_actions, LANE)
    tb = batch_tile

    kernel = functools.partial(_cnn_dqn_kernel, tb=tb, p2=p2, k2k2=k2k2,
                               k1cols=k1cols)

    weight_specs = [
        pl.BlockSpec((k1cols, C1), lambda i: (0, 0)),          # w1
        pl.BlockSpec((1, k2k2 * C1), lambda i: (0, 0)),        # b1 (offset-tiled)
        pl.BlockSpec((k2k2 * C1, C2), lambda i: (0, 0)),       # w2 (K folded to 512)
        pl.BlockSpec((1, C2), lambda i: (0, 0)),               # b2
        pl.BlockSpec((p2 * C2, p3 * C3), lambda i: (0, 0)),    # w3 (pos-pair dense)
        pl.BlockSpec((1, p3 * C3), lambda i: (0, 0)),          # b3 (repeated)
        pl.BlockSpec((p3 * C3, FC1), lambda i: (0, 0)),        # f1w
        pl.BlockSpec((1, FC1), lambda i: (0, 0)),              # f1b
        pl.BlockSpec((FC1, a_pad), lambda i: (0, 0)),          # f2w (lane padded)
        pl.BlockSpec((1, a_pad), lambda i: (0, 0)),            # f2b (lane padded)
    ]

    def forward(packed, x):
        n = x.shape[0]
        n_pad = _round_up(n, tb)
        if n_pad != n:
            x = jnp.concatenate(
                [x, jnp.zeros((n_pad - n,) + x.shape[1:], x.dtype)], axis=0)
        patches = _make_patches(x, dims)          # (k2k2*p2, n_pad, k1cols) bf16

        flops = 2 * n_pad * (p2 * k2k2 * k1cols * C1        # conv1
                             + p2 * (k2k2 * C1) * C2        # conv2
                             + (p2 * C2) * (p3 * C3)        # conv3 (+flatten)
                             + (p3 * C3) * FC1              # fc1
                             + FC1 * a_pad)                 # fc2
        bytes_accessed = (k2k2 * p2 * n_pad * k1cols * 2
                          + sum(int(np.prod(v.shape)) * v.dtype.itemsize
                                for v in packed.values())
                          + n_pad * a_pad * 4)

        out = pl.pallas_call(
            kernel,
            out_shape=jax.ShapeDtypeStruct((n_pad, a_pad), jnp.float32),
            grid=(n_pad // tb,),
            in_specs=[pl.BlockSpec((k2k2 * p2, tb, k1cols), lambda i: (0, i, 0))]
                     + weight_specs,
            out_specs=pl.BlockSpec((tb, a_pad), lambda i: (i, 0)),
            scratch_shapes=[
                pltpu.VMEM((p2 * tb, k2k2 * C1), jnp.float32),   # conv2-input staging
                pltpu.VMEM((tb, p2 * C2), jnp.float32),          # flattened conv2 maps
            ],
            compiler_params=pltpu.CompilerParams(
                dimension_semantics=("parallel",),
                vmem_limit_bytes=32 * 1024 * 1024),
            cost_estimate=pl.CostEstimate(
                flops=flops, transcendentals=0, bytes_accessed=bytes_accessed),
        )(patches, packed["w1"], packed["b1"], packed["w2"], packed["b2"],
          packed["w3"], packed["b3"], packed["f1w"], packed["f1b"],
          packed["f2w"], packed["f2b"])
        return out[:n, :num_actions]

    return jax.jit(forward)


# -------------------------------- reference ------------------------------------

def _ref_forward(raw, x):
    dn = ("NCHW", "OIHW", "NCHW")
    y = jax.lax.conv_general_dilated(x, raw["c1w"], (S1, S1), "VALID",
                                     dimension_numbers=dn)
    y = jax.nn.relu(y + raw["c1b"][None, :, None, None])
    y = jax.lax.conv_general_dilated(y, raw["c2w"], (S2, S2), "VALID",
                                     dimension_numbers=dn)
    y = jax.nn.relu(y + raw["c2b"][None, :, None, None])
    y = jax.lax.conv_general_dilated(y, raw["c3w"], (S3, S3), "VALID",
                                     dimension_numbers=dn)
    y = jax.nn.relu(y + raw["c3b"][None, :, None, None])
    y = y.reshape(y.shape[0], -1)
    y = jax.nn.relu(y @ raw["f1w"] + raw["f1b"])
    return y @ raw["f2w"] + raw["f2b"]


# ----------------------------------- main ---------------------------------------

if __name__ == "__main__":
    # Small Atari-like input: 4 stacked 44x44 frames.
    # Conv-stack spatial sizes: 44 -> 10 -> 4 -> 2, feature_size = 64*2*2 = 256.
    # batch=24 pads to 32 -> grid=(2,) with a 16-sample batch tile per step.
    batch, input_shape, num_actions = 24, (4, 44, 44), 6

    key = jax.random.PRNGKey(0)
    k_params, k_x = jax.random.split(key)
    raw = init_raw_params(k_params, input_shape, num_actions)
    packed = pack_params(raw, input_shape, num_actions)
    x = jax.random.uniform(k_x, (batch,) + input_shape, jnp.float32)

    forward = make_forward(input_shape, num_actions, batch_tile=16)
    q = jax.block_until_ready(forward(packed, x))

    q_ref = jax.block_until_ready(_ref_forward(raw, x))
    assert q.shape == (batch, num_actions)
    # bf16 MXU operands (f32 accumulation) vs. an all-f32 reference.
    assert jnp.allclose(q, q_ref, rtol=3e-2, atol=3e-2), (q, q_ref)

    print("KERNEL_OK")
</pallas_src>

<mosaic_0001>
module attributes {stable_mosaic.version = 11 : i64} {
  func.func @_cnn_dqn_kernel(%arg0: i32, %arg1: memref<256x16x256xbf16, #tpu.memory_space<vmem>>, %arg2: memref<256x32xbf16, #tpu.memory_space<vmem>>, %arg3: memref<1x512xf32, #tpu.memory_space<vmem>>, %arg4: memref<512x64xbf16, #tpu.memory_space<vmem>>, %arg5: memref<1x64xf32, #tpu.memory_space<vmem>>, %arg6: memref<1024x256xbf16, #tpu.memory_space<vmem>>, %arg7: memref<1x256xf32, #tpu.memory_space<vmem>>, %arg8: memref<256x512xbf16, #tpu.memory_space<vmem>>, %arg9: memref<1x512xf32, #tpu.memory_space<vmem>>, %arg10: memref<512x128xbf16, #tpu.memory_space<vmem>>, %arg11: memref<1x128xf32, #tpu.memory_space<vmem>>, %arg12: memref<16x128xf32, #tpu.memory_space<vmem>>, %arg13: memref<256x512xf32, #tpu.memory_space<vmem>>, %arg14: memref<16x1024xf32, #tpu.memory_space<vmem>>) attributes {dimension_semantics = [#tpu.dimension_semantics<parallel>], iteration_bounds = array<i64: 2>, scalar_prefetch = 0 : i64, scratch_operands = 2 : i64, tpu.core_type = #tpu.core_type<tc>, window_params = [{transform_indices = @transform_0, window_bounds = array<i64: 256, 16, 256>}, {pipeline_mode = #tpu.pipeline_mode<synchronous>, transform_indices = @transform_1, window_bounds = array<i64: 256, 32>}, {pipeline_mode = #tpu.pipeline_mode<synchronous>, transform_indices = @transform_2, window_bounds = array<i64: 1, 512>}, {pipeline_mode = #tpu.pipeline_mode<synchronous>, transform_indices = @transform_3, window_bounds = array<i64: 512, 64>}, {pipeline_mode = #tpu.pipeline_mode<synchronous>, transform_indices = @transform_4, window_bounds = array<i64: 1, 64>}, {pipeline_mode = #tpu.pipeline_mode<synchronous>, transform_indices = @transform_5, window_bounds = array<i64: 1024, 256>}, {pipeline_mode = #tpu.pipeline_mode<synchronous>, transform_indices = @transform_6, window_bounds = array<i64: 1, 256>}, {pipeline_mode = #tpu.pipeline_mode<synchronous>, transform_indices = @transform_7, window_bounds = array<i64: 256, 512>}, {pipeline_mode = #tpu.pipeline_mode<synchronous>, transform_indices = @transform_8, window_bounds = array<i64: 1, 512>}, {pipeline_mode = #tpu.pipeline_mode<synchronous>, transform_indices = @transform_9, window_bounds = array<i64: 512, 128>}, {pipeline_mode = #tpu.pipeline_mode<synchronous>, transform_indices = @transform_10, window_bounds = array<i64: 1, 128>}, {transform_indices = @transform_11, window_bounds = array<i64: 16, 128>}]} {
    %c0 = arith.constant 0 : index
    %c0_0 = arith.constant 0 : index
    %c0_1 = arith.constant 0 : index
    %0 = vector.load %arg1[%c0, %c0_0, %c0_1] : memref<256x16x256xbf16, #tpu.memory_space<vmem>>, vector<256x16x256xbf16>
    %1 = vector.shape_cast %0 : vector<256x16x256xbf16> to vector<4096x256xbf16>
    %c0_2 = arith.constant 0 : index
    %c0_3 = arith.constant 0 : index
    %2 = vector.load %arg2[%c0_2, %c0_3] : memref<256x32xbf16, #tpu.memory_space<vmem>>, vector<256x32xbf16>
    %cst = arith.constant dense<0.000000e+00> : vector<4096x32xf32>
    %3 = tpu.matmul %1, %2, %cst {dimension_numbers = #tpu.dot_dimension_numbers<[1], [0], [0], [1], [0, 0, 1, 1], [], []>} : vector<4096x256xbf16>, vector<256x32xbf16>, vector<4096x32xf32> -> vector<4096x32xf32>
    %4 = vector.extract_strided_slice %3 {offsets = [0, 0], sizes = [256, 32], strides = [1, 1]} : vector<4096x32xf32> to vector<256x32xf32>
    %c0_4 = arith.constant 0 : index
    %c0_5 = arith.constant 0 : index
    %5 = vector.load %arg13[%c0_4, %c0_5] : memref<256x512xf32, #tpu.memory_space<vmem>>, vector<256x32xf32>
    tpu.vector_store %arg13[%c0_4, %c0_5], %4 {strides = array<i32>} : memref<256x512xf32, #tpu.memory_space<vmem>>, vector<256x32xf32>,
    %6 = vector.extract_strided_slice %3 {offsets = [256, 0], sizes = [256, 32], strides = [1, 1]} : vector<4096x32xf32> to vector<256x32xf32>
    %c0_6 = arith.constant 0 : index
    %c32 = arith.constant 32 : index
    %7 = vector.load %arg13[%c0_6, %c32] : memref<256x512xf32, #tpu.memory_space<vmem>>, vector<256x32xf32>
    tpu.vector_store %arg13[%c0_6, %c32], %6 {strides = array<i32>} : memref<256x512xf32, #tpu.memory_space<vmem>>, vector<256x32xf32>,
    %8 = vector.extract_strided_slice %3 {offsets = [512, 0], sizes = [256, 32], strides = [1, 1]} : vector<4096x32xf32> to vector<256x32xf32>
    %c0_7 = arith.constant 0 : index
    %c64 = arith.constant 64 : index
    %9 = vector.load %arg13[%c0_7, %c64] : memref<256x512xf32, #tpu.memory_space<vmem>>, vector<256x32xf32>
    tpu.vector_store %arg13[%c0_7, %c64], %8 {strides = array<i32>} : memref<256x512xf32, #tpu.memory_space<vmem>>, vector<256x32xf32>,
    %10 = vector.extract_strided_slice %3 {offsets = [768, 0], sizes = [256, 32], strides = [1, 1]} : vector<4096x32xf32> to vector<256x32xf32>
    %c0_8 = arith.constant 0 : index
    %c96 = arith.constant 96 : index
    %11 = vector.load %arg13[%c0_8, %c96] : memref<256x512xf32, #tpu.memory_space<vmem>>, vector<256x32xf32>
    tpu.vector_store %arg13[%c0_8, %c96], %10 {strides = array<i32>} : memref<256x512xf32, #tpu.memory_space<vmem>>, vector<256x32xf32>,
    %12 = vector.extract_strided_slice %3 {offsets = [1024, 0], sizes = [256, 32], strides = [1, 1]} : vector<4096x32xf32> to vector<256x32xf32>
    %c0_9 = arith.constant 0 : index
    %c128 = arith.constant 128 : index
    %13 = vector.load %arg13[%c0_9, %c128] : memref<256x512xf32, #tpu.memory_space<vmem>>, vector<256x32xf32>
    tpu.vector_store %arg13[%c0_9, %c128], %12 {strides = array<i32>} : memref<256x512xf32, #tpu.memory_space<vmem>>, vector<256x32xf32>,
    %14 = vector.extract_strided_slice %3 {offsets = [1280, 0], sizes = [256, 32], strides = [1, 1]} : vector<4096x32xf32> to vector<256x32xf32>
    %c0_10 = arith.constant 0 : index
    %c160 = arith.constant 160 : index
    %15 = vector.load %arg13[%c0_10, %c160] : memref<256x512xf32, #tpu.memory_space<vmem>>, vector<256x32xf32>
    tpu.vector_store %arg13[%c0_10, %c160], %14 {strides = array<i32>} : memref<256x512xf32, #tpu.memory_space<vmem>>, vector<256x32xf32>,
    %16 = vector.extract_strided_slice %3 {offsets = [1536, 0], sizes = [256, 32], strides = [1, 1]} : vector<4096x32xf32> to vector<256x32xf32>
    %c0_11 = arith.constant 0 : index
    %c192 = arith.constant 192 : index
    %17 = vector.load %arg13[%c0_11, %c192] : memref<256x512xf32, #tpu.memory_space<vmem>>, vector<256x32xf32>
    tpu.vector_store %arg13[%c0_11, %c192], %16 {strides = array<i32>} : memref<256x512xf32, #tpu.memory_space<vmem>>, vector<256x32xf32>,
    %18 = vector.extract_strided_slice %3 {offsets = [1792, 0], sizes = [256, 32], strides = [1, 1]} : vector<4096x32xf32> to vector<256x32xf32>
    %c0_12 = arith.constant 0 : index
    %c224 = arith.constant 224 : index
    %19 = vector.load %arg13[%c0_12, %c224] : memref<256x512xf32, #tpu.memory_space<vmem>>, vector<256x32xf32>
    tpu.vector_store %arg13[%c0_12, %c224], %18 {strides = array<i32>} : memref<256x512xf32, #tpu.memory_space<vmem>>, vector<256x32xf32>,
    %20 = vector.extract_strided_slice %3 {offsets = [2048, 0], sizes = [256, 32], strides = [1, 1]} : vector<4096x32xf32> to vector<256x32xf32>
    %c0_13 = arith.constant 0 : index
    %c256 = arith.constant 256 : index
    %21 = vector.load %arg13[%c0_13, %c256] : memref<256x512xf32, #tpu.memory_space<vmem>>, vector<256x32xf32>
    tpu.vector_store %arg13[%c0_13, %c256], %20 {strides = array<i32>} : memref<256x512xf32, #tpu.memory_space<vmem>>, vector<256x32xf32>,
    %22 = vector.extract_strided_slice %3 {offsets = [2304, 0], sizes = [256, 32], strides = [1, 1]} : vector<4096x32xf32> to vector<256x32xf32>
    %c0_14 = arith.constant 0 : index
    %c288 = arith.constant 288 : index
    %23 = vector.load %arg13[%c0_14, %c288] : memref<256x512xf32, #tpu.memory_space<vmem>>, vector<256x32xf32>
    tpu.vector_store %arg13[%c0_14, %c288], %22 {strides = array<i32>} : memref<256x512xf32, #tpu.memory_space<vmem>>, vector<256x32xf32>,
    %24 = vector.extract_strided_slice %3 {offsets = [2560, 0], sizes = [256, 32], strides = [1, 1]} : vector<4096x32xf32> to vector<256x32xf32>
    %c0_15 = arith.constant 0 : index
    %c320 = arith.constant 320 : index
    %25 = vector.load %arg13[%c0_15, %c320] : memref<256x512xf32, #tpu.memory_space<vmem>>, vector<256x32xf32>
    tpu.vector_store %arg13[%c0_15, %c320], %24 {strides = array<i32>} : memref<256x512xf32, #tpu.memory_space<vmem>>, vector<256x32xf32>,
    %26 = vector.extract_strided_slice %3 {offsets = [2816, 0], sizes = [256, 32], strides = [1, 1]} : vector<4096x32xf32> to vector<256x32xf32>
    %c0_16 = arith.constant 0 : index
    %c352 = arith.constant 352 : index
    %27 = vector.load %arg13[%c0_16, %c352] : memref<256x512xf32, #tpu.memory_space<vmem>>, vector<256x32xf32>
    tpu.vector_store %arg13[%c0_16, %c352], %26 {strides = array<i32>} : memref<256x512xf32, #tpu.memory_space<vmem>>, vector<256x32xf32>,
    %28 = vector.extract_strided_slice %3 {offsets = [3072, 0], sizes = [256, 32], strides = [1, 1]} : vector<4096x32xf32> to vector<256x32xf32>
    %c0_17 = arith.constant 0 : index
    %c384 = arith.constant 384 : index
    %29 = vector.load %arg13[%c0_17, %c384] : memref<256x512xf32, #tpu.memory_space<vmem>>, vector<256x32xf32>
    tpu.vector_store %arg13[%c0_17, %c384], %28 {strides = array<i32>} : memref<256x512xf32, #tpu.memory_space<vmem>>, vector<256x32xf32>,
    %30 = vector.extract_strided_slice %3 {offsets = [3328, 0], sizes = [256, 32], strides = [1, 1]} : vector<4096x32xf32> to vector<256x32xf32>
    %c0_18 = arith.constant 0 : index
    %c416 = arith.constant 416 : index
    %31 = vector.load %arg13[%c0_18, %c416] : memref<256x512xf32, #tpu.memory_space<vmem>>, vector<256x32xf32>
    tpu.vector_store %arg13[%c0_18, %c416], %30 {strides = array<i32>} : memref<256x512xf32, #tpu.memory_space<vmem>>, vector<256x32xf32>,
    %32 = vector.extract_strided_slice %3 {offsets = [3584, 0], sizes = [256, 32], strides = [1, 1]} : vector<4096x32xf32> to vector<256x32xf32>
    %c0_19 = arith.constant 0 : index
    %c448 = arith.constant 448 : index
    %33 = vector.load %arg13[%c0_19, %c448] : memref<256x512xf32, #tpu.memory_space<vmem>>, vector<256x32xf32>
    tpu.vector_store %arg13[%c0_19, %c448], %32 {strides = array<i32>} : memref<256x512xf32, #tpu.memory_space<vmem>>, vector<256x32xf32>,
    %34 = vector.extract_strided_slice %3 {offsets = [3840, 0], sizes = [256, 32], strides = [1, 1]} : vector<4096x32xf32> to vector<256x32xf32>
    %c0_20 = arith.constant 0 : index
    %c480 = arith.constant 480 : index
    %35 = vector.load %arg13[%c0_20, %c480] : memref<256x512xf32, #tpu.memory_space<vmem>>, vector<256x32xf32>
    tpu.vector_store %arg13[%c0_20, %c480], %34 {strides = array<i32>} : memref<256x512xf32, #tpu.memory_space<vmem>>, vector<256x32xf32>,
    %c0_21 = arith.constant 0 : index
    %c0_22 = arith.constant 0 : index
    %36 = vector.load %arg13[%c0_21, %c0_22] : memref<256x512xf32, #tpu.memory_space<vmem>>, vector<256x512xf32>
    %c0_23 = arith.constant 0 : index
    %c0_24 = arith.constant 0 : index
    %37 = vector.load %arg3[%c0_23, %c0_24] : memref<1x512xf32, #tpu.memory_space<vmem>>, vector<1x512xf32>
    %38 = vector.broadcast %37 : vector<1x512xf32> to vector<256x512xf32>
    %39 = arith.addf %36, %38 : vector<256x512xf32>
    %cst_25 = arith.constant 0.000000e+00 : f32
    %40 = vector.broadcast %cst_25 : f32 to vector<256x512xf32>
    %41 = arith.maximumf %39, %40 : vector<256x512xf32>
    %42 = arith.truncf %41 : vector<256x512xf32> to vector<256x512xbf16>
    %c0_26 = arith.constant 0 : index
    %c0_27 = arith.constant 0 : index
    %43 = vector.load %arg4[%c0_26, %c0_27] : memref<512x64xbf16, #tpu.memory_space<vmem>>, vector<512x64xbf16>
    %cst_28 = arith.constant dense<0.000000e+00> : vector<256x64xf32>
    %44 = tpu.matmul %42, %43, %cst_28 {dimension_numbers = #tpu.dot_dimension_numbers<[1], [0], [0], [1], [0, 0, 1, 1], [], []>} : vector<256x512xbf16>, vector<512x64xbf16>, vector<256x64xf32> -> vector<256x64xf32>
    %c0_29 = arith.constant 0 : index
    %c0_30 = arith.constant 0 : index
    %45 = vector.load %arg5[%c0_29, %c0_30] : memref<1x64xf32, #tpu.memory_space<vmem>>, vector<1x64xf32>
    %46 = vector.broadcast %45 : vector<1x64xf32> to vector<256x64xf32>
    %47 = arith.addf %44, %46 : vector<256x64xf32>
    %cst_31 = arith.constant 0.000000e+00 : f32
    %48 = vector.broadcast %cst_31 : f32 to vector<256x64xf32>
    %49 = arith.maximumf %47, %48 : vector<256x64xf32>
    %50 = vector.extract_strided_slice %49 {offsets = [0, 0], sizes = [16, 64], strides = [1, 1]} : vector<256x64xf32> to vector<16x64xf32>
    %c0_32 = arith.constant 0 : index
    %c0_33 = arith.constant 0 : index
    %51 = vector.load %arg14[%c0_32, %c0_33] : memref<16x1024xf32, #tpu.memory_space<vmem>>, vector<16x64xf32>
    tpu.vector_store %arg14[%c0_32, %c0_33], %50 {strides = array<i32>} : memref<16x1024xf32, #tpu.memory_space<vmem>>, vector<16x64xf32>,
    %52 = vector.extract_strided_slice %49 {offsets = [16, 0], sizes = [16, 64], strides = [1, 1]} : vector<256x64xf32> to vector<16x64xf32>
    %c0_34 = arith.constant 0 : index
    %c64_35 = arith.constant 64 : index
    %53 = vector.load %arg14[%c0_34, %c64_35] : memref<16x1024xf32, #tpu.memory_space<vmem>>, vector<16x64xf32>
    tpu.vector_store %arg14[%c0_34, %c64_35], %52 {strides = array<i32>} : memref<16x1024xf32, #tpu.memory_space<vmem>>, vector<16x64xf32>,
    %54 = vector.extract_strided_slice %49 {offsets = [32, 0], sizes = [16, 64], strides = [1, 1]} : vector<256x64xf32> to vector<16x64xf32>
    %c0_36 = arith.constant 0 : index
    %c128_37 = arith.constant 128 : index
    %55 = vector.load %arg14[%c0_36, %c128_37] : memref<16x1024xf32, #tpu.memory_space<vmem>>, vector<16x64xf32>
    tpu.vector_store %arg14[%c0_36, %c128_37], %54 {strides = array<i32>} : memref<16x1024xf32, #tpu.memory_space<vmem>>, vector<16x64xf32>,
    %56 = vector.extract_strided_slice %49 {offsets = [48, 0], sizes = [16, 64], strides = [1, 1]} : vector<256x64xf32> to vector<16x64xf32>
    %c0_38 = arith.constant 0 : index
    %c192_39 = arith.constant 192 : index
    %57 = vector.load %arg14[%c0_38, %c192_39] : memref<16x1024xf32, #tpu.memory_space<vmem>>, vector<16x64xf32>
    tpu.vector_store %arg14[%c0_38, %c192_39], %56 {strides = array<i32>} : memref<16x1024xf32, #tpu.memory_space<vmem>>, vector<16x64xf32>,
    %58 = vector.extract_strided_slice %49 {offsets = [64, 0], sizes = [16, 64], strides = [1, 1]} : vector<256x64xf32> to vector<16x64xf32>
    %c0_40 = arith.constant 0 : index
    %c256_41 = arith.constant 256 : index
    %59 = vector.load %arg14[%c0_40, %c256_41] : memref<16x1024xf32, #tpu.memory_space<vmem>>, vector<16x64xf32>
    tpu.vector_store %arg14[%c0_40, %c256_41], %58 {strides = array<i32>} : memref<16x1024xf32, #tpu.memory_space<vmem>>, vector<16x64xf32>,
    %60 = vector.extract_strided_slice %49 {offsets = [80, 0], sizes = [16, 64], strides = [1, 1]} : vector<256x64xf32> to vector<16x64xf32>
    %c0_42 = arith.constant 0 : index
    %c320_43 = arith.constant 320 : index
    %61 = vector.load %arg14[%c0_42, %c320_43] : memref<16x1024xf32, #tpu.memory_space<vmem>>, vector<16x64xf32>
    tpu.vector_store %arg14[%c0_42, %c320_43], %60 {strides = array<i32>} : memref<16x1024xf32, #tpu.memory_space<vmem>>, vector<16x64xf32>,
    %62 = vector.extract_strided_slice %49 {offsets = [96, 0], sizes = [16, 64], strides = [1, 1]} : vector<256x64xf32> to vector<16x64xf32>
    %c0_44 = arith.constant 0 : index
    %c384_45 = arith.constant 384 : index
    %63 = vector.load %arg14[%c0_44, %c384_45] : memref<16x1024xf32, #tpu.memory_space<vmem>>, vector<16x64xf32>
    tpu.vector_store %arg14[%c0_44, %c384_45], %62 {strides = array<i32>} : memref<16x1024xf32, #tpu.memory_space<vmem>>, vector<16x64xf32>,
    %64 = vector.extract_strided_slice %49 {offsets = [112, 0], sizes = [16, 64], strides = [1, 1]} : vector<256x64xf32> to vector<16x64xf32>
    %c0_46 = arith.constant 0 : index
    %c448_47 = arith.constant 448 : index
    %65 = vector.load %arg14[%c0_46, %c448_47] : memref<16x1024xf32, #tpu.memory_space<vmem>>, vector<16x64xf32>
    tpu.vector_store %arg14[%c0_46, %c448_47], %64 {strides = array<i32>} : memref<16x1024xf32, #tpu.memory_space<vmem>>, vector<16x64xf32>,
    %66 = vector.extract_strided_slice %49 {offsets = [128, 0], sizes = [16, 64], strides = [1, 1]} : vector<256x64xf32> to vector<16x64xf32>
    %c0_48 = arith.constant 0 : index
    %c512 = arith.constant 512 : index
    %67 = vector.load %arg14[%c0_48, %c512] : memref<16x1024xf32, #tpu.memory_space<vmem>>, vector<16x64xf32>
    tpu.vector_store %arg14[%c0_48, %c512], %66 {strides = array<i32>} : memref<16x1024xf32, #tpu.memory_space<vmem>>, vector<16x64xf32>,
    %68 = vector.extract_strided_slice %49 {offsets = [144, 0], sizes = [16, 64], strides = [1, 1]} : vector<256x64xf32> to vector<16x64xf32>
    %c0_49 = arith.constant 0 : index
    %c576 = arith.constant 576 : index
    %69 = vector.load %arg14[%c0_49, %c576] : memref<16x1024xf32, #tpu.memory_space<vmem>>, vector<16x64xf32>
    tpu.vector_store %arg14[%c0_49, %c576], %68 {strides = array<i32>} : memref<16x1024xf32, #tpu.memory_space<vmem>>, vector<16x64xf32>,
    %70 = vector.extract_strided_slice %49 {offsets = [160, 0], sizes = [16, 64], strides = [1, 1]} : vector<256x64xf32> to vector<16x64xf32>
    %c0_50 = arith.constant 0 : index
    %c640 = arith.constant 640 : index
    %71 = vector.load %arg14[%c0_50, %c640] : memref<16x1024xf32, #tpu.memory_space<vmem>>, vector<16x64xf32>
    tpu.vector_store %arg14[%c0_50, %c640], %70 {strides = array<i32>} : memref<16x1024xf32, #tpu.memory_space<vmem>>, vector<16x64xf32>,
    %72 = vector.extract_strided_slice %49 {offsets = [176, 0], sizes = [16, 64], strides = [1, 1]} : vector<256x64xf32> to vector<16x64xf32>
    %c0_51 = arith.constant 0 : index
    %c704 = arith.constant 704 : index
    %73 = vector.load %arg14[%c0_51, %c704] : memref<16x1024xf32, #tpu.memory_space<vmem>>, vector<16x64xf32>
    tpu.vector_store %arg14[%c0_51, %c704], %72 {strides = array<i32>} : memref<16x1024xf32, #tpu.memory_space<vmem>>, vector<16x64xf32>,
    %74 = vector.extract_strided_slice %49 {offsets = [192, 0], sizes = [16, 64], strides = [1, 1]} : vector<256x64xf32> to vector<16x64xf32>
    %c0_52 = arith.constant 0 : index
    %c768 = arith.constant 768 : index
    %75 = vector.load %arg14[%c0_52, %c768] : memref<16x1024xf32, #tpu.memory_space<vmem>>, vector<16x64xf32>
    tpu.vector_store %arg14[%c0_52, %c768], %74 {strides = array<i32>} : memref<16x1024xf32, #tpu.memory_space<vmem>>, vector<16x64xf32>,
    %76 = vector.extract_strided_slice %49 {offsets = [208, 0], sizes = [16, 64], strides = [1, 1]} : vector<256x64xf32> to vector<16x64xf32>
    %c0_53 = arith.constant 0 : index
    %c832 = arith.constant 832 : index
    %77 = vector.load %arg14[%c0_53, %c832] : memref<16x1024xf32, #tpu.memory_space<vmem>>, vector<16x64xf32>
    tpu.vector_store %arg14[%c0_53, %c832], %76 {strides = array<i32>} : memref<16x1024xf32, #tpu.memory_space<vmem>>, vector<16x64xf32>,
    %78 = vector.extract_strided_slice %49 {offsets = [224, 0], sizes = [16, 64], strides = [1, 1]} : vector<256x64xf32> to vector<16x64xf32>
    %c0_54 = arith.constant 0 : index
    %c896 = arith.constant 896 : index
    %79 = vector.load %arg14[%c0_54, %c896] : memref<16x1024xf32, #tpu.memory_space<vmem>>, vector<16x64xf32>
    tpu.vector_store %arg14[%c0_54, %c896], %78 {strides = array<i32>} : memref<16x1024xf32, #tpu.memory_space<vmem>>, vector<16x64xf32>,
    %80 = vector.extract_strided_slice %49 {offsets = [240, 0], sizes = [16, 64], strides = [1, 1]} : vector<256x64xf32> to vector<16x64xf32>
    %c0_55 = arith.constant 0 : index
    %c960 = arith.constant 960 : index
    %81 = vector.load %arg14[%c0_55, %c960] : memref<16x1024xf32, #tpu.memory_space<vmem>>, vector<16x64xf32>
    tpu.vector_store %arg14[%c0_55, %c960], %80 {strides = array<i32>} : memref<16x1024xf32, #tpu.memory_space<vmem>>, vector<16x64xf32>,
    %c0_56 = arith.constant 0 : index
    %c0_57 = arith.constant 0 : index
    %82 = vector.load %arg14[%c0_56, %c0_57] : memref<16x1024xf32, #tpu.memory_space<vmem>>, vector<16x1024xf32>
    %83 = arith.truncf %82 : vector<16x1024xf32> to vector<16x1024xbf16>
    %c0_58 = arith.constant 0 : index
    %c0_59 = arith.constant 0 : index
    %84 = vector.load %arg6[%c0_58, %c0_59] : memref<1024x256xbf16, #tpu.memory_space<vmem>>, vector<1024x256xbf16>
    %cst_60 = arith.constant dense<0.000000e+00> : vector<16x256xf32>
    %85 = tpu.matmul %83, %84, %cst_60 {dimension_numbers = #tpu.dot_dimension_numbers<[1], [0], [0], [1], [0, 0, 1, 1], [], []>} : vector<16x1024xbf16>, vector<1024x256xbf16>, vector<16x256xf32> -> vector<16x256xf32>
    %c0_61 = arith.constant 0 : index
    %c0_62 = arith.constant 0 : index
    %86 = vector.load %arg7[%c0_61, %c0_62] : memref<1x256xf32, #tpu.memory_space<vmem>>, vector<1x256xf32>
    %87 = vector.broadcast %86 : vector<1x256xf32> to vector<16x256xf32>
    %88 = arith.addf %85, %87 : vector<16x256xf32>
    %cst_63 = arith.constant 0.000000e+00 : f32
    %89 = vector.broadcast %cst_63 : f32 to vector<16x256xf32>
    %90 = arith.maximumf %88, %89 : vector<16x256xf32>
    %91 = arith.truncf %90 : vector<16x256xf32> to vector<16x256xbf16>
    %c0_64 = arith.constant 0 : index
    %c0_65 = arith.constant 0 : index
    %92 = vector.load %arg8[%c0_64, %c0_65] : memref<256x512xbf16, #tpu.memory_space<vmem>>, vector<256x512xbf16>
    %cst_66 = arith.constant dense<0.000000e+00> : vector<16x512xf32>
    %93 = tpu.matmul %91, %92, %cst_66 {dimension_numbers = #tpu.dot_dimension_numbers<[1], [0], [0], [1], [0, 0, 1, 1], [], []>} : vector<16x256xbf16>, vector<256x512xbf16>, vector<16x512xf32> -> vector<16x512xf32>
    %c0_67 = arith.constant 0 : index
    %c0_68 = arith.constant 0 : index
    %94 = vector.load %arg9[%c0_67, %c0_68] : memref<1x512xf32, #tpu.memory_space<vmem>>, vector<1x512xf32>
    %95 = vector.broadcast %94 : vector<1x512xf32> to vector<16x512xf32>
    %96 = arith.addf %93, %95 : vector<16x512xf32>
    %cst_69 = arith.constant 0.000000e+00 : f32
    %97 = vector.broadcast %cst_69 : f32 to vector<16x512xf32>
    %98 = arith.maximumf %96, %97 : vector<16x512xf32>
    %99 = arith.truncf %98 : vector<16x512xf32> to vector<16x512xbf16>
    %c0_70 = arith.constant 0 : index
    %c0_71 = arith.constant 0 : index
    %100 = vector.load %arg10[%c0_70, %c0_71] : memref<512x128xbf16, #tpu.memory_space<vmem>>, vector<512x128xbf16>
    %cst_72 = arith.constant dense<0.000000e+00> : vector<16x128xf32>
    %101 = tpu.matmul %99, %100, %cst_72 {dimension_numbers = #tpu.dot_dimension_numbers<[1], [0], [0], [1], [0, 0, 1, 1], [], []>} : vector<16x512xbf16>, vector<512x128xbf16>, vector<16x128xf32> -> vector<16x128xf32>
    %c0_73 = arith.constant 0 : index
    %c0_74 = arith.constant 0 : index
    %102 = vector.load %arg11[%c0_73, %c0_74] : memref<1x128xf32, #tpu.memory_space<vmem>>, vector<1x128xf32>
    %103 = vector.broadcast %102 : vector<1x128xf32> to vector<16x128xf32>
    %104 = arith.addf %101, %103 : vector<16x128xf32>
    %c0_75 = arith.constant 0 : index
    %c0_76 = arith.constant 0 : index
    %105 = vector.load %arg12[%c0_75, %c0_76] : memref<16x128xf32, #tpu.memory_space<vmem>>, vector<16x128xf32>
    tpu.vector_store %arg12[%c0_75, %c0_76], %104 {strides = array<i32>} : memref<16x128xf32, #tpu.memory_space<vmem>>, vector<16x128xf32>,
    return
  }
  func.func @transform_0(%arg0: i32) -> (i32, i32, i32) {
    %c0_i32 = arith.constant 0 : i32
    %c0_i32_0 = arith.constant 0 : i32
    %c0_i32_1 = arith.constant 0 : i32
    return %c0_i32, %arg0, %c0_i32_0 : i32, i32, i32
  }
  func.func @transform_1(%arg0: i32) -> (i32, i32) {
    %c0_i32 = arith.constant 0 : i32
    %c0_i32_0 = arith.constant 0 : i32
    %c0_i32_1 = arith.constant 0 : i32
    return %c0_i32, %c0_i32_0 : i32, i32
  }
  func.func @transform_2(%arg0: i32) -> (i32, i32) {
    %c0_i32 = arith.constant 0 : i32
    %c0_i32_0 = arith.constant 0 : i32
    %c0_i32_1 = arith.constant 0 : i32
    return %c0_i32, %c0_i32_0 : i32, i32
  }
  func.func @transform_3(%arg0: i32) -> (i32, i32) {
    %c0_i32 = arith.constant 0 : i32
    %c0_i32_0 = arith.constant 0 : i32
    %c0_i32_1 = arith.constant 0 : i32
    return %c0_i32, %c0_i32_0 : i32, i32
  }
  func.func @transform_4(%arg0: i32) -> (i32, i32) {
    %c0_i32 = arith.constant 0 : i32
    %c0_i32_0 = arith.constant 0 : i32
    %c0_i32_1 = arith.constant 0 : i32
    return %c0_i32, %c0_i32_0 : i32, i32
  }
  func.func @transform_5(%arg0: i32) -> (i32, i32) {
    %c0_i32 = arith.constant 0 : i32
    %c0_i32_0 = arith.constant 0 : i32
    %c0_i32_1 = arith.constant 0 : i32
    return %c0_i32, %c0_i32_0 : i32, i32
  }
  func.func @transform_6(%arg0: i32) -> (i32, i32) {
    %c0_i32 = arith.constant 0 : i32
    %c0_i32_0 = arith.constant 0 : i32
    %c0_i32_1 = arith.constant 0 : i32
    return %c0_i32, %c0_i32_0 : i32, i32
  }
  func.func @transform_7(%arg0: i32) -> (i32, i32) {
    %c0_i32 = arith.constant 0 : i32
    %c0_i32_0 = arith.constant 0 : i32
    %c0_i32_1 = arith.constant 0 : i32
    return %c0_i32, %c0_i32_0 : i32, i32
  }
  func.func @transform_8(%arg0: i32) -> (i32, i32) {
    %c0_i32 = arith.constant 0 : i32
    %c0_i32_0 = arith.constant 0 : i32
    %c0_i32_1 = arith.constant 0 : i32
    return %c0_i32, %c0_i32_0 : i32, i32
  }
  func.func @transform_9(%arg0: i32) -> (i32, i32) {
    %c0_i32 = arith.constant 0 : i32
    %c0_i32_0 = arith.constant 0 : i32
    %c0_i32_1 = arith.constant 0 : i32
    return %c0_i32, %c0_i32_0 : i32, i32
  }
  func.func @transform_10(%arg0: i32) -> (i32, i32) {
    %c0_i32 = arith.constant 0 : i32
    %c0_i32_0 = arith.constant 0 : i32
    %c0_i32_1 = arith.constant 0 : i32
    return %c0_i32, %c0_i32_0 : i32, i32
  }
  func.func @transform_11(%arg0: i32) -> (i32, i32) {
    %c0_i32 = arith.constant 0 : i32
    %c0_i32_0 = arith.constant 0 : i32
    return %arg0, %c0_i32 : i32, i32
  }
}

</mosaic_0001>

<bundles_post_ra>
// kernel: forward.1
= control target key start
LH: loop header
LB: loop body
LE: loop exit
PB: predicated region body
PF: predicated region fallthrough
CT: control target
= control target key end

     0   :  { %s17344_s17 = smov 0   ;;  %s17346_s18 = smov 0   ;;  %s21452_s0 = inlined_call_operand.vmem [shape: bf16[256,32,256], index: 0, kind: input, shape index: {}]   ;;  %s21453_s1 = inlined_call_operand.vmem [shape: bf16[256,32], index: 1, kind: input, shape index: {}]   ;;  %s21454_s2 = inlined_call_operand.vmem [shape: f32[1,512], index: 2, kind: input, shape index: {}]   ;;  %s21455_s3 = inlined_call_operand.vmem [shape: bf16[512,64], index: 3, kind: input, shape index: {}]   ;;  %s21456_s4 = inlined_call_operand.vmem [shape: f32[1,64], index: 4, kind: input, shape index: {}]   ;;  %s21457_s5 = inlined_call_operand.vmem [shape: bf16[1024,256], index: 5, kind: input, shape index: {}]   ;;  %s21458_s6 = inlined_call_operand.vmem [shape: f32[1,256], index: 6, kind: input, shape index: {}]   ;;  %s21459_s7 = inlined_call_operand.vmem [shape: bf16[256,512], index: 7, kind: input, shape index: {}]   ;;  %s21460_s8 = inlined_call_operand.vmem [shape: f32[1,512], index: 8, kind: input, shape index: {}]   ;;  %s21461_s9 = inlined_call_operand.vmem [shape: bf16[512,128], index: 9, kind: input, shape index: {}]   ;;  %s21462_s10 = inlined_call_operand.vmem [shape: f32[1,128], index: 10, kind: input, shape index: {}]   ;;  %s21463_s11 = inlined_call_operand.vmem [shape: f32[32,128], index: 11, kind: output, shape index: {}]  }
   0x1   :  { %s17348_s19 = smov 0  }
   0x2 LB: > { %s14979_s20 = sadd.s32 4294967295, %s17278_s19   ;;  %s17361_s21 = sadd.s32 1, %s17278_s19   ;;  %s17278_s19 = sphi %s17348_s19, %s21618_s19   ;;  %s17274_s18 = sphi %s17346_s18, %s21617_s18   ;;  %s17270_s17 = sphi %s17344_s17, %s21616_s17  }
   0x3   : > { %s25_s22 = ssub.s32 %s17278_s19, %s17361_s21  ;;  %s28_s23 = sadd.s32 1, %s17274_s18 }
   0x4   : > { %p26_p0 = scmp.eq.s32.totalorder %s25_s22, 0  ;;  %p35_p1 = scmp.ne.s32.totalorder %s17274_s18, %s17270_s17 }
   0x5   : > { %p36_p2 = scmp.eq.s32.totalorder %s17278_s19, 0  ;;  %p14982_p4 = scmp.ge.s32.totalorder %s17278_s19, 2 }
   0x6   : > { %s17370_s24 = scalar_select %p26_p0, %s17274_s18, %s28_s23  }
   0x7   : > { %p37_p3 = por %p36_p2, %p35_p1  ;;  %327 = sbr.rel (%p14982_p4) target bundleno = 274 (0x112), region = 56 }
   0xe   : > { %330 = sbr.rel (!%p37_p3) target bundleno = 274 (0x112), region = 60  ;;  %s332_s25 = sand.u32 (%p37_p3), 1, %s17274_s18  }
   0xf   : > { %s15780_s26 = sshll.u32 (%p37_p3), %s17278_s19, 4  ;;  %s14983_s27 = sshll.u32 (%p37_p3), %s332_s25, 12 }
  0x10   : > { %s17378_s30 = scalar_lea.vmem (%p37_p3), %s21452_s0, %s15780_s26  ;;  %s17383_s12 = scalar_lea.vmem (%p37_p3), [#allocation4], %s14983_s27 }
  0x11   : > { %v1391_v0 = vld [vmem:[%s17378_s30] sm:$0xff] (%p37_p3)  ;;  %v1393_v1 = vld [vmem:[%s17378_s30 + $0x8] sm:$0xff] (%p37_p3) }
  0x12   : > { %v1395_v2 = vld [vmem:[%s17378_s30 + $0x20] sm:$0xff] (%p37_p3)  ;;  %1392 = vst [vmem:[%s17383_s12] sm:$0xff] (%p37_p3), %v1391_v0  ;;  %1394 = vst [vmem:[%s17383_s12 + $0x8] sm:$0xff] (%p37_p3), %v1393_v1  ;;  %v1397_v3 = vld [vmem:[%s17378_s30 + $0x28] sm:$0xff] (%p37_p3) }
  0x13   : > { %1396 = vst [vmem:[%s17383_s12 + $0x10] sm:$0xff] (%p37_p3), %v1395_v2  ;;  %v1399_v4 = vld [vmem:[%s17378_s30 + $0x40] sm:$0xff] (%p37_p3)  ;;  %v1401_v5 = vld [vmem:[%s17378_s30 + $0x48] sm:$0xff] (%p37_p3)  ;;  %1398 = vst [vmem:[%s17383_s12 + $0x18] sm:$0xff] (%p37_p3), %v1397_v3 }
  0x14   : > { %1400 = vst [vmem:[%s17383_s12 + $0x20] sm:$0xff] (%p37_p3), %v1399_v4  ;;  %1402 = vst [vmem:[%s17383_s12 + $0x28] sm:$0xff] (%p37_p3), %v1401_v5  ;;  %v1403_v6 = vld [vmem:[%s17378_s30 + $0x60] sm:$0xff] (%p37_p3)  ;;  %v1405_v7 = vld [vmem:[%s17378_s30 + $0x68] sm:$0xff] (%p37_p3) }
  0x15   : > { %v1407_v8 = vld [vmem:[%s17378_s30 + $0x80] sm:$0xff]  ;;  %1404 = vst [vmem:[%s17383_s12 + $0x30] sm:$0xff] %v1403_v6  ;;  %1406 = vst [vmem:[%s17383_s12 + $0x38] sm:$0xff] %v1405_v7  ;;  %v1409_v9 = vld [vmem:[%s17378_s30 + $0x88] sm:$0xff] }
  0x16   : > { %1408 = vst [vmem:[%s17383_s12 + $0x40] sm:$0xff] %v1407_v8  ;;  %v1411_v10 = vld [vmem:[%s17378_s30 + $0xa0] sm:$0xff]  ;;  %v1413_v11 = vld [vmem:[%s17378_s30 + $0xa8] sm:$0xff]  ;;  %1410 = vst [vmem:[%s17383_s12 + $0x48] sm:$0xff] %v1409_v9 }
  0x17   : > { %1412 = vst [vmem:[%s17383_s12 + $0x50] sm:$0xff] %v1411_v10  ;;  %1414 = vst [vmem:[%s17383_s12 + $0x58] sm:$0xff] %v1413_v11  ;;  %v1415_v12 = vld [vmem:[%s17378_s30 + $0xc0] sm:$0xff]  ;;  %v1417_v13 = vld [vmem:[%s17378_s30 + $0xc8] sm:$0xff] }
  0x18   : > { %v1419_v14 = vld [vmem:[%s17378_s30 + $0xe0] sm:$0xff]  ;;  %1416 = vst [vmem:[%s17383_s12 + $0x60] sm:$0xff] %v1415_v12  ;;  %1418 = vst [vmem:[%s17383_s12 + $0x68] sm:$0xff] %v1417_v13  ;;  %v1421_v15 = vld [vmem:[%s17378_s30 + $0xe8] sm:$0xff] }
  0x19   : > { %1420 = vst [vmem:[%s17383_s12 + $0x70] sm:$0xff] %v1419_v14  ;;  %v1423_v16 = vld [vmem:[%s17378_s30 + $0x100] sm:$0xff]  ;;  %v1425_v17 = vld [vmem:[%s17378_s30 + $0x108] sm:$0xff]  ;;  %1422 = vst [vmem:[%s17383_s12 + $0x78] sm:$0xff] %v1421_v15 }
  0x1a   : > { %1424 = vst [vmem:[%s17383_s12 + $0x80] sm:$0xff] %v1423_v16  ;;  %1426 = vst [vmem:[%s17383_s12 + $0x88] sm:$0xff] %v1425_v17  ;;  %v1427_v18 = vld [vmem:[%s17378_s30 + $0x120] sm:$0xff]  ;;  %v1429_v19 = vld [vmem:[%s17378_s30 + $0x128] sm:$0xff] }
  0x1b   : > { %v1431_v20 = vld [vmem:[%s17378_s30 + $0x140] sm:$0xff]  ;;  %1428 = vst [vmem:[%s17383_s12 + $0x90] sm:$0xff] %v1427_v18  ;;  %1430 = vst [vmem:[%s17383_s12 + $0x98] sm:$0xff] %v1429_v19  ;;  %v1433_v21 = vld [vmem:[%s17378_s30 + $0x148] sm:$0xff] }
  0x1c   : > { %1432 = vst [vmem:[%s17383_s12 + $0xa0] sm:$0xff] %v1431_v20  ;;  %v1435_v22 = vld [vmem:[%s17378_s30 + $0x160] sm:$0xff]  ;;  %v1437_v23 = vld [vmem:[%s17378_s30 + $0x168] sm:$0xff]  ;;  %1434 = vst [vmem:[%s17383_s12 + $0xa8] sm:$0xff] %v1433_v21 }
  0x1d   : > { %1436 = vst [vmem:[%s17383_s12 + $0xb0] sm:$0xff] %v1435_v22  ;;  %1438 = vst [vmem:[%s17383_s12 + $0xb8] sm:$0xff] %v1437_v23  ;;  %v1439_v24 = vld [vmem:[%s17378_s30 + $0x180] sm:$0xff]  ;;  %v1441_v25 = vld [vmem:[%s17378_s30 + $0x188] sm:$0xff] }
  0x1e   : > { %v1443_v26 = vld [vmem:[%s17378_s30 + $0x1a0] sm:$0xff]  ;;  %1440 = vst [vmem:[%s17383_s12 + $0xc0] sm:$0xff] %v1439_v24  ;;  %1442 = vst [vmem:[%s17383_s12 + $0xc8] sm:$0xff] %v1441_v25  ;;  %v1445_v27 = vld [vmem:[%s17378_s30 + $0x1a8] sm:$0xff] }
  0x1f   : > { %1444 = vst [vmem:[%s17383_s12 + $0xd0] sm:$0xff] %v1443_v26  ;;  %v1447_v28 = vld [vmem:[%s17378_s30 + $0x1c0] sm:$0xff]  ;;  %v1449_v29 = vld [vmem:[%s17378_s30 + $0x1c8] sm:$0xff]  ;;  %1446 = vst [vmem:[%s17383_s12 + $0xd8] sm:$0xff] %v1445_v27 }
  0x20   : > { %1448 = vst [vmem:[%s17383_s12 + $0xe0] sm:$0xff] %v1447_v28  ;;  %1450 = vst [vmem:[%s17383_s12 + $0xe8] sm:$0xff] %v1449_v29  ;;  %v1451_v30 = vld [vmem:[%s17378_s30 + $0x1e0] sm:$0xff]  ;;  %v1453_v31 = vld [vmem:[%s17378_s30 + $0x1e8] sm:$0xff] }
  0x21   : > { %v1455_v32 = vld [vmem:[%s17378_s30 + $0x200] sm:$0xff]  ;;  %1452 = vst [vmem:[%s17383_s12 + $0xf0] sm:$0xff] %v1451_v30  ;;  %1454 = vst [vmem:[%s17383_s12 + $0xf8] sm:$0xff] %v1453_v31  ;;  %v1457_v33 = vld [vmem:[%s17378_s30 + $0x208] sm:$0xff] }
  0x22   : > { %1456 = vst [vmem:[%s17383_s12 + $0x100] sm:$0xff] %v1455_v32  ;;  %v1459_v34 = vld [vmem:[%s17378_s30 + $0x220] sm:$0xff]  ;;  %v1461_v35 = vld [vmem:[%s17378_s30 + $0x228] sm:$0xff]  ;;  %1458 = vst [vmem:[%s17383_s12 + $0x108] sm:$0xff] %v1457_v33 }
  0x23   : > { %1460 = vst [vmem:[%s17383_s12 + $0x110] sm:$0xff] %v1459_v34  ;;  %1462 = vst [vmem:[%s17383_s12 + $0x118] sm:$0xff] %v1461_v35  ;;  %v1463_v36 = vld [vmem:[%s17378_s30 + $0x240] sm:$0xff]  ;;  %v1465_v37 = vld [vmem:[%s17378_s30 + $0x248] sm:$0xff] }
  0x24   : > { %v1467_v38 = vld [vmem:[%s17378_s30 + $0x260] sm:$0xff]  ;;  %1464 = vst [vmem:[%s17383_s12 + $0x120] sm:$0xff] %v1463_v36  ;;  %1466 = vst [vmem:[%s17383_s12 + $0x128] sm:$0xff] %v1465_v37  ;;  %v1469_v39 = vld [vmem:[%s17378_s30 + $0x268] sm:$0xff] }
  0x25   : > { %1468 = vst [vmem:[%s17383_s12 + $0x130] sm:$0xff] %v1467_v38  ;;  %v1471_v40 = vld [vmem:[%s17378_s30 + $0x280] sm:$0xff]  ;;  %v1473_v41 = vld [vmem:[%s17378_s30 + $0x288] sm:$0xff]  ;;  %1470 = vst [vmem:[%s17383_s12 + $0x138] sm:$0xff] %v1469_v39 }
  0x26   : > { %1472 = vst [vmem:[%s17383_s12 + $0x140] sm:$0xff] %v1471_v40  ;;  %1474 = vst [vmem:[%s17383_s12 + $0x148] sm:$0xff] %v1473_v41  ;;  %v1475_v42 = vld [vmem:[%s17378_s30 + $0x2a0] sm:$0xff]  ;;  %v1477_v43 = vld [vmem:[%s17378_s30 + $0x2a8] sm:$0xff] }
  0x27   : > { %v1479_v44 = vld [vmem:[%s17378_s30 + $0x2c0] sm:$0xff]  ;;  %1476 = vst [vmem:[%s17383_s12 + $0x150] sm:$0xff] %v1475_v42  ;;  %1478 = vst [vmem:[%s17383_s12 + $0x158] sm:$0xff] %v1477_v43  ;;  %v1481_v45 = vld [vmem:[%s17378_s30 + $0x2c8] sm:$0xff] }
  0x28   : > { %1480 = vst [vmem:[%s17383_s12 + $0x160] sm:$0xff] %v1479_v44  ;;  %v1483_v46 = vld [vmem:[%s17378_s30 + $0x2e0] sm:$0xff]  ;;  %v1485_v47 = vld [vmem:[%s17378_s30 + $0x2e8] sm:$0xff]  ;;  %1482 = vst [vmem:[%s17383_s12 + $0x168] sm:$0xff] %v1481_v45 }
  0x29   : > { %1484 = vst [vmem:[%s17383_s12 + $0x170] sm:$0xff] %v1483_v46  ;;  %1486 = vst [vmem:[%s17383_s12 + $0x178] sm:$0xff] %v1485_v47  ;;  %v1487_v48 = vld [vmem:[%s17378_s30 + $0x300] sm:$0xff]  ;;  %v1489_v49 = vld [vmem:[%s17378_s30 + $0x308] sm:$0xff] }
  0x2a   : > { %v1491_v50 = vld [vmem:[%s17378_s30 + $0x320] sm:$0xff]  ;;  %1488 = vst [vmem:[%s17383_s12 + $0x180] sm:$0xff] %v1487_v48  ;;  %1490 = vst [vmem:[%s17383_s12 + $0x188] sm:$0xff] %v1489_v49  ;;  %v1493_v51 = vld [vmem:[%s17378_s30 + $0x328] sm:$0xff] }
  0x2b   : > { %1492 = vst [vmem:[%s17383_s12 + $0x190] sm:$0xff] %v1491_v50  ;;  %v1495_v52 = vld [vmem:[%s17378_s30 + $0x340] sm:$0xff]  ;;  %v1497_v53 = vld [vmem:[%s17378_s30 + $0x348] sm:$0xff]  ;;  %1494 = vst [vmem:[%s17383_s12 + $0x198] sm:$0xff] %v1493_v51 }
  0x2c   : > { %1496 = vst [vmem:[%s17383_s12 + $0x1a0] sm:$0xff] %v1495_v52  ;;  %1498 = vst [vmem:[%s17383_s12 + $0x1a8] sm:$0xff] %v1497_v53  ;;  %v1499_v54 = vld [vmem:[%s17378_s30 + $0x360] sm:$0xff]  ;;  %v1501_v55 = vld [vmem:[%s17378_s30 + $0x368] sm:$0xff] }
  0x2d   : > { %v1503_v56 = vld [vmem:[%s17378_s30 + $0x380] sm:$0xff]  ;;  %1500 = vst [vmem:[%s17383_s12 + $0x1b0] sm:$0xff] %v1499_v54  ;;  %1502 = vst [vmem:[%s17383_s12 + $0x1b8] sm:$0xff] %v1501_v55  ;;  %v1505_v57 = vld [vmem:[%s17378_s30 + $0x388] sm:$0xff] }
  0x2e   : > { %1504 = vst [vmem:[%s17383_s12 + $0x1c0] sm:$0xff] %v1503_v56  ;;  %v1507_v58 = vld [vmem:[%s17378_s30 + $0x3a0] sm:$0xff]  ;;  %v1509_v59 = vld [vmem:[%s17378_s30 + $0x3a8] sm:$0xff]  ;;  %1506 = vst [vmem:[%s17383_s12 + $0x1c8] sm:$0xff] %v1505_v57 }
  0x2f   : > { %1508 = vst [vmem:[%s17383_s12 + $0x1d0] sm:$0xff] %v1507_v58  ;;  %1510 = vst [vmem:[%s17383_s12 + $0x1d8] sm:$0xff] %v1509_v59  ;;  %v1511_v60 = vld [vmem:[%s17378_s30 + $0x3c0] sm:$0xff]  ;;  %v1513_v61 = vld [vmem:[%s17378_s30 + $0x3c8] sm:$0xff] }
  0x30   : > { %v1515_v62 = vld [vmem:[%s17378_s30 + $0x3e0] sm:$0xff]  ;;  %1512 = vst [vmem:[%s17383_s12 + $0x1e0] sm:$0xff] %v1511_v60  ;;  %1514 = vst [vmem:[%s17383_s12 + $0x1e8] sm:$0xff] %v1513_v61  ;;  %v1517_v63 = vld [vmem:[%s17378_s30 + $0x3e8] sm:$0xff] }
  0x31   : > { %1516 = vst [vmem:[%s17383_s12 + $0x1f0] sm:$0xff] %v1515_v62  ;;  %v1519_v0 = vld [vmem:[%s17378_s30 + $0x400] sm:$0xff]  ;;  %v1521_v1 = vld [vmem:[%s17378_s30 + $0x408] sm:$0xff]  ;;  %1518 = vst [vmem:[%s17383_s12 + $0x1f8] sm:$0xff] %v1517_v63 }
  0x32   : > { %1520 = vst [vmem:[%s17383_s12 + $0x200] sm:$0xff] %v1519_v0  ;;  %1522 = vst [vmem:[%s17383_s12 + $0x208] sm:$0xff] %v1521_v1  ;;  %v1523_v2 = vld [vmem:[%s17378_s30 + $0x420] sm:$0xff]  ;;  %v1525_v3 = vld [vmem:[%s17378_s30 + $0x428] sm:$0xff] }
  0x33   : > { %v1527_v4 = vld [vmem:[%s17378_s30 + $0x440] sm:$0xff]  ;;  %1524 = vst [vmem:[%s17383_s12 + $0x210] sm:$0xff] %v1523_v2  ;;  %1526 = vst [vmem:[%s17383_s12 + $0x218] sm:$0xff] %v1525_v3  ;;  %v1529_v5 = vld [vmem:[%s17378_s30 + $0x448] sm:$0xff] }
  0x34   : > { %1528 = vst [vmem:[%s17383_s12 + $0x220] sm:$0xff] %v1527_v4  ;;  %v1531_v6 = vld [vmem:[%s17378_s30 + $0x460] sm:$0xff]  ;;  %v1533_v7 = vld [vmem:[%s17378_s30 + $0x468] sm:$0xff]  ;;  %1530 = vst [vmem:[%s17383_s12 + $0x228] sm:$0xff] %v1529_v5 }
  0x35   : > { %1532 = vst [vmem:[%s17383_s12 + $0x230] sm:$0xff] %v1531_v6  ;;  %1534 = vst [vmem:[%s17383_s12 + $0x238] sm:$0xff] %v1533_v7  ;;  %v1535_v8 = vld [vmem:[%s17378_s30 + $0x480] sm:$0xff]  ;;  %v1537_v9 = vld [vmem:[%s17378_s30 + $0x488] sm:$0xff] }
  0x36   : > { %v1539_v10 = vld [vmem:[%s17378_s30 + $0x4a0] sm:$0xff]  ;;  %1536 = vst [vmem:[%s17383_s12 + $0x240] sm:$0xff] %v1535_v8  ;;  %1538 = vst [vmem:[%s17383_s12 + $0x248] sm:$0xff] %v1537_v9  ;;  %v1541_v11 = vld [vmem:[%s17378_s30 + $0x4a8] sm:$0xff] }
  0x37   : > { %1540 = vst [vmem:[%s17383_s12 + $0x250] sm:$0xff] %v1539_v10  ;;  %v1543_v12 = vld [vmem:[%s17378_s30 + $0x4c0] sm:$0xff]  ;;  %v1545_v13 = vld [vmem:[%s17378_s30 + $0x4c8] sm:$0xff]  ;;  %1542 = vst [vmem:[%s17383_s12 + $0x258] sm:$0xff] %v1541_v11 }
  0x38   : > { %1544 = vst [vmem:[%s17383_s12 + $0x260] sm:$0xff] %v1543_v12  ;;  %1546 = vst [vmem:[%s17383_s12 + $0x268] sm:$0xff] %v1545_v13  ;;  %v1547_v14 = vld [vmem:[%s17378_s30 + $0x4e0] sm:$0xff]  ;;  %v1549_v15 = vld [vmem:[%s17378_s30 + $0x4e8] sm:$0xff] }
  0x39   : > { %v1551_v16 = vld [vmem:[%s17378_s30 + $0x500] sm:$0xff]  ;;  %1548 = vst [vmem:[%s17383_s12 + $0x270] sm:$0xff] %v1547_v14  ;;  %1550 = vst [vmem:[%s17383_s12 + $0x278] sm:$0xff] %v1549_v15  ;;  %v1553_v17 = vld [vmem:[%s17378_s30 + $0x508] sm:$0xff] }
  0x3a   : > { %1552 = vst [vmem:[%s17383_s12 + $0x280] sm:$0xff] %v1551_v16  ;;  %v1555_v18 = vld [vmem:[%s17378_s30 + $0x520] sm:$0xff]  ;;  %v1557_v19 = vld [vmem:[%s17378_s30 + $0x528] sm:$0xff]  ;;  %1554 = vst [vmem:[%s17383_s12 + $0x288] sm:$0xff] %v1553_v17 }
  0x3b   : > { %1556 = vst [vmem:[%s17383_s12 + $0x290] sm:$0xff] %v1555_v18  ;;  %1558 = vst [vmem:[%s17383_s12 + $0x298] sm:$0xff] %v1557_v19  ;;  %v1559_v20 = vld [vmem:[%s17378_s30 + $0x540] sm:$0xff]  ;;  %v1561_v21 = vld [vmem:[%s17378_s30 + $0x548] sm:$0xff] }
  0x3c   : > { %v1563_v22 = vld [vmem:[%s17378_s30 + $0x560] sm:$0xff]  ;;  %1560 = vst [vmem:[%s17383_s12 + $0x2a0] sm:$0xff] %v1559_v20  ;;  %1562 = vst [vmem:[%s17383_s12 + $0x2a8] sm:$0xff] %v1561_v21  ;;  %v1565_v23 = vld [vmem:[%s17378_s30 + $0x568] sm:$0xff] }
  0x3d   : > { %1564 = vst [vmem:[%s17383_s12 + $0x2b0] sm:$0xff] %v1563_v22  ;;  %v1567_v24 = vld [vmem:[%s17378_s30 + $0x580] sm:$0xff]  ;;  %v1569_v25 = vld [vmem:[%s17378_s30 + $0x588] sm:$0xff]  ;;  %1566 = vst [vmem:[%s17383_s12 + $0x2b8] sm:$0xff] %v1565_v23 }
  0x3e   : > { %1568 = vst [vmem:[%s17383_s12 + $0x2c0] sm:$0xff] %v1567_v24  ;;  %1570 = vst [vmem:[%s17383_s12 + $0x2c8] sm:$0xff] %v1569_v25  ;;  %v1571_v26 = vld [vmem:[%s17378_s30 + $0x5a0] sm:$0xff]  ;;  %v1573_v27 = vld [vmem:[%s17378_s30 + $0x5a8] sm:$0xff] }
  0x3f   : > { %v1575_v28 = vld [vmem:[%s17378_s30 + $0x5c0] sm:$0xff]  ;;  %1572 = vst [vmem:[%s17383_s12 + $0x2d0] sm:$0xff] %v1571_v26  ;;  %1574 = vst [vmem:[%s17383_s12 + $0x2d8] sm:$0xff] %v1573_v27  ;;  %v1577_v29 = vld [vmem:[%s17378_s30 + $0x5c8] sm:$0xff] }
  0x40   : > { %1576 = vst [vmem:[%s17383_s12 + $0x2e0] sm:$0xff] %v1575_v28  ;;  %v1579_v30 = vld [vmem:[%s17378_s30 + $0x5e0] sm:$0xff]  ;;  %v1581_v31 = vld [vmem:[%s17378_s30 + $0x5e8] sm:$0xff]  ;;  %1578 = vst [vmem:[%s17383_s12 + $0x2e8] sm:$0xff] %v1577_v29 }
  0x41   : > { %1580 = vst [vmem:[%s17383_s12 + $0x2f0] sm:$0xff] %v1579_v30  ;;  %1582 = vst [vmem:[%s17383_s12 + $0x2f8] sm:$0xff] %v1581_v31  ;;  %v1583_v32 = vld [vmem:[%s17378_s30 + $0x600] sm:$0xff]  ;;  %v1585_v33 = vld [vmem:[%s17378_s30 + $0x608] sm:$0xff] }
  0x42   : > { %v1587_v34 = vld [vmem:[%s17378_s30 + $0x620] sm:$0xff]  ;;  %1584 = vst [vmem:[%s17383_s12 + $0x300] sm:$0xff] %v1583_v32  ;;  %1586 = vst [vmem:[%s17383_s12 + $0x308] sm:$0xff] %v1585_v33  ;;  %v1589_v35 = vld [vmem:[%s17378_s30 + $0x628] sm:$0xff] }
  0x43   : > { %1588 = vst [vmem:[%s17383_s12 + $0x310] sm:$0xff] %v1587_v34  ;;  %v1591_v36 = vld [vmem:[%s17378_s30 + $0x640] sm:$0xff]  ;;  %v1593_v37 = vld [vmem:[%s17378_s30 + $0x648] sm:$0xff]  ;;  %1590 = vst [vmem:[%s17383_s12 + $0x318] sm:$0xff] %v1589_v35 }
  0x44   : > { %1592 = vst [vmem:[%s17383_s12 + $0x320] sm:$0xff] %v1591_v36  ;;  %1594 = vst [vmem:[%s17383_s12 + $0x328] sm:$0xff] %v1593_v37  ;;  %v1595_v38 = vld [vmem:[%s17378_s30 + $0x660] sm:$0xff]  ;;  %v1597_v39 = vld [vmem:[%s17378_s30 + $0x668] sm:$0xff] }
  0x45   : > { %v1599_v40 = vld [vmem:[%s17378_s30 + $0x680] sm:$0xff]  ;;  %1596 = vst [vmem:[%s17383_s12 + $0x330] sm:$0xff] %v1595_v38  ;;  %1598 = vst [vmem:[%s17383_s12 + $0x338] sm:$0xff] %v1597_v39  ;;  %v1601_v41 = vld [vmem:[%s17378_s30 + $0x688] sm:$0xff] }
  0x46   : > { %1600 = vst [vmem:[%s17383_s12 + $0x340] sm:$0xff] %v1599_v40  ;;  %v1603_v42 = vld [vmem:[%s17378_s30 + $0x6a0] sm:$0xff]  ;;  %v1605_v43 = vld [vmem:[%s17378_s30 + $0x6a8] sm:$0xff]  ;;  %1602 = vst [vmem:[%s17383_s12 + $0x348] sm:$0xff] %v1601_v41 }
  0x47   : > { %1604 = vst [vmem:[%s17383_s12 + $0x350] sm:$0xff] %v1603_v42  ;;  %1606 = vst [vmem:[%s17383_s12 + $0x358] sm:$0xff] %v1605_v43  ;;  %v1607_v44 = vld [vmem:[%s17378_s30 + $0x6c0] sm:$0xff]  ;;  %v1609_v45 = vld [vmem:[%s17378_s30 + $0x6c8] sm:$0xff] }
  0x48   : > { %v1611_v46 = vld [vmem:[%s17378_s30 + $0x6e0] sm:$0xff]  ;;  %1608 = vst [vmem:[%s17383_s12 + $0x360] sm:$0xff] %v1607_v44  ;;  %1610 = vst [vmem:[%s17383_s12 + $0x368] sm:$0xff] %v1609_v45  ;;  %v1613_v47 = vld [vmem:[%s17378_s30 + $0x6e8] sm:$0xff] }
  0x49   : > { %1612 = vst [vmem:[%s17383_s12 + $0x370] sm:$0xff] %v1611_v46  ;;  %v1615_v48 = vld [vmem:[%s17378_s30 + $0x700] sm:$0xff]  ;;  %v1617_v49 = vld [vmem:[%s17378_s30 + $0x708] sm:$0xff]  ;;  %1614 = vst [vmem:[%s17383_s12 + $0x378] sm:$0xff] %v1613_v47 }
  0x4a   : > { %1616 = vst [vmem:[%s17383_s12 + $0x380] sm:$0xff] %v1615_v48  ;;  %1618 = vst [vmem:[%s17383_s12 + $0x388] sm:$0xff] %v1617_v49  ;;  %v1619_v50 = vld [vmem:[%s17378_s30 + $0x720] sm:$0xff]  ;;  %v1621_v51 = vld [vmem:[%s17378_s30 + $0x728] sm:$0xff] }
  0x4b   : > { %v1623_v52 = vld [vmem:[%s17378_s30 + $0x740] sm:$0xff]  ;;  %1620 = vst [vmem:[%s17383_s12 + $0x390] sm:$0xff] %v1619_v50  ;;  %1622 = vst [vmem:[%s17383_s12 + $0x398] sm:$0xff] %v1621_v51  ;;  %v1625_v53 = vld [vmem:[%s17378_s30 + $0x748] sm:$0xff] }
  0x4c   : > { %1624 = vst [vmem:[%s17383_s12 + $0x3a0] sm:$0xff] %v1623_v52  ;;  %v1627_v54 = vld [vmem:[%s17378_s30 + $0x760] sm:$0xff]  ;;  %v1629_v55 = vld [vmem:[%s17378_s30 + $0x768] sm:$0xff]  ;;  %1626 = vst [vmem:[%s17383_s12 + $0x3a8] sm:$0xff] %v1625_v53 }
  0x4d   : > { %1628 = vst [vmem:[%s17383_s12 + $0x3b0] sm:$0xff] %v1627_v54  ;;  %1630 = vst [vmem:[%s17383_s12 + $0x3b8] sm:$0xff] %v1629_v55  ;;  %v1631_v56 = vld [vmem:[%s17378_s30 + $0x780] sm:$0xff]  ;;  %v1633_v57 = vld [vmem:[%s17378_s30 + $0x788] sm:$0xff] }
  0x4e   : > { %v1635_v58 = vld [vmem:[%s17378_s30 + $0x7a0] sm:$0xff]  ;;  %1632 = vst [vmem:[%s17383_s12 + $0x3c0] sm:$0xff] %v1631_v56  ;;  %1634 = vst [vmem:[%s17383_s12 + $0x3c8] sm:$0xff] %v1633_v57  ;;  %v1637_v59 = vld [vmem:[%s17378_s30 + $0x7a8] sm:$0xff] }
  0x4f   : > { %1636 = vst [vmem:[%s17383_s12 + $0x3d0] sm:$0xff] %v1635_v58  ;;  %v1639_v60 = vld [vmem:[%s17378_s30 + $0x7c0] sm:$0xff]  ;;  %v1641_v61 = vld [vmem:[%s17378_s30 + $0x7c8] sm:$0xff]  ;;  %1638 = vst [vmem:[%s17383_s12 + $0x3d8] sm:$0xff] %v1637_v59 }
  0x50   : > { %1640 = vst [vmem:[%s17383_s12 + $0x3e0] sm:$0xff] %v1639_v60  ;;  %1642 = vst [vmem:[%s17383_s12 + $0x3e8] sm:$0xff] %v1641_v61  ;;  %v1643_v62 = vld [vmem:[%s17378_s30 + $0x7e0] sm:$0xff]  ;;  %v1645_v63 = vld [vmem:[%s17378_s30 + $0x7e8] sm:$0xff] }
  0x51   : > { %v1647_v0 = vld [vmem:[%s17378_s30 + $0x800] sm:$0xff]  ;;  %1644 = vst [vmem:[%s17383_s12 + $0x3f0] sm:$0xff] %v1643_v62  ;;  %1646 = vst [vmem:[%s17383_s12 + $0x3f8] sm:$0xff] %v1645_v63  ;;  %v1649_v1 = vld [vmem:[%s17378_s30 + $0x808] sm:$0xff] }
  0x52   : > { %1648 = vst [vmem:[%s17383_s12 + $0x400] sm:$0xff] %v1647_v0  ;;  %v1651_v2 = vld [vmem:[%s17378_s30 + $0x820] sm:$0xff]  ;;  %v1653_v3 = vld [vmem:[%s17378_s30 + $0x828] sm:$0xff]  ;;  %1650 = vst [vmem:[%s17383_s12 + $0x408] sm:$0xff] %v1649_v1 }
  0x53   : > { %1652 = vst [vmem:[%s17383_s12 + $0x410] sm:$0xff] %v1651_v2  ;;  %1654 = vst [vmem:[%s17383_s12 + $0x418] sm:$0xff] %v1653_v3  ;;  %v1655_v4 = vld [vmem:[%s17378_s30 + $0x840] sm:$0xff]  ;;  %v1657_v5 = vld [vmem:[%s17378_s30 + $0x848] sm:$0xff] }
  0x54   : > { %v1659_v6 = vld [vmem:[%s17378_s30 + $0x860] sm:$0xff]  ;;  %1656 = vst [vmem:[%s17383_s12 + $0x420] sm:$0xff] %v1655_v4  ;;  %1658 = vst [vmem:[%s17383_s12 + $0x428] sm:$0xff] %v1657_v5  ;;  %v1661_v7 = vld [vmem:[%s17378_s30 + $0x868] sm:$0xff] }
  0x55   : > { %1660 = vst [vmem:[%s17383_s12 + $0x430] sm:$0xff] %v1659_v6  ;;  %v1663_v8 = vld [vmem:[%s17378_s30 + $0x880] sm:$0xff]  ;;  %v1665_v9 = vld [vmem:[%s17378_s30 + $0x888] sm:$0xff]  ;;  %1662 = vst [vmem:[%s17383_s12 + $0x438] sm:$0xff] %v1661_v7 }
  0x56   : > { %1664 = vst [vmem:[%s17383_s12 + $0x440] sm:$0xff] %v1663_v8  ;;  %1666 = vst [vmem:[%s17383_s12 + $0x448] sm:$0xff] %v1665_v9  ;;  %v1667_v10 = vld [vmem:[%s17378_s30 + $0x8a0] sm:$0xff]  ;;  %v1669_v11 = vld [vmem:[%s17378_s30 + $0x8a8] sm:$0xff] }
  0x57   : > { %v1671_v12 = vld [vmem:[%s17378_s30 + $0x8c0] sm:$0xff]  ;;  %1668 = vst [vmem:[%s17383_s12 + $0x450] sm:$0xff] %v1667_v10  ;;  %1670 = vst [vmem:[%s17383_s12 + $0x458] sm:$0xff] %v1669_v11  ;;  %v1673_v13 = vld [vmem:[%s17378_s30 + $0x8c8] sm:$0xff] }
  0x58   : > { %1672 = vst [vmem:[%s17383_s12 + $0x460] sm:$0xff] %v1671_v12  ;;  %v1675_v14 = vld [vmem:[%s17378_s30 + $0x8e0] sm:$0xff]  ;;  %v1677_v15 = vld [vmem:[%s17378_s30 + $0x8e8] sm:$0xff]  ;;  %1674 = vst [vmem:[%s17383_s12 + $0x468] sm:$0xff] %v1673_v13 }
  0x59   : > { %1676 = vst [vmem:[%s17383_s12 + $0x470] sm:$0xff] %v1675_v14  ;;  %1678 = vst [vmem:[%s17383_s12 + $0x478] sm:$0xff] %v1677_v15  ;;  %v1679_v16 = vld [vmem:[%s17378_s30 + $0x900] sm:$0xff]  ;;  %v1681_v17 = vld [vmem:[%s17378_s30 + $0x908] sm:$0xff] }
  0x5a   : > { %v1683_v18 = vld [vmem:[%s17378_s30 + $0x920] sm:$0xff]  ;;  %1680 = vst [vmem:[%s17383_s12 + $0x480] sm:$0xff] %v1679_v16  ;;  %1682 = vst [vmem:[%s17383_s12 + $0x488] sm:$0xff] %v1681_v17  ;;  %v1685_v19 = vld [vmem:[%s17378_s30 + $0x928] sm:$0xff] }
  0x5b   : > { %1684 = vst [vmem:[%s17383_s12 + $0x490] sm:$0xff] %v1683_v18  ;;  %v1687_v20 = vld [vmem:[%s17378_s30 + $0x940] sm:$0xff]  ;;  %v1689_v21 = vld [vmem:[%s17378_s30 + $0x948] sm:$0xff]  ;;  %1686 = vst [vmem:[%s17383_s12 + $0x498] sm:$0xff] %v1685_v19 }
  0x5c   : > { %1688 = vst [vmem:[%s17383_s12 + $0x4a0] sm:$0xff] %v1687_v20  ;;  %1690 = vst [vmem:[%s17383_s12 + $0x4a8] sm:$0xff] %v1689_v21  ;;  %v1691_v22 = vld [vmem:[%s17378_s30 + $0x960] sm:$0xff]  ;;  %v1693_v23 = vld [vmem:[%s17378_s30 + $0x968] sm:$0xff] }
  0x5d   : > { %v1695_v24 = vld [vmem:[%s17378_s30 + $0x980] sm:$0xff]  ;;  %1692 = vst [vmem:[%s17383_s12 + $0x4b0] sm:$0xff] %v1691_v22  ;;  %1694 = vst [vmem:[%s17383_s12 + $0x4b8] sm:$0xff] %v1693_v23  ;;  %v1697_v25 = vld [vmem:[%s17378_s30 + $0x988] sm:$0xff] }
  0x5e   : > { %1696 = vst [vmem:[%s17383_s12 + $0x4c0] sm:$0xff] %v1695_v24  ;;  %v1699_v26 = vld [vmem:[%s17378_s30 + $0x9a0] sm:$0xff]  ;;  %v1701_v27 = vld [vmem:[%s17378_s30 + $0x9a8] sm:$0xff]  ;;  %1698 = vst [vmem:[%s17383_s12 + $0x4c8] sm:$0xff] %v1697_v25 }
  0x5f   : > { %1700 = vst [vmem:[%s17383_s12 + $0x4d0] sm:$0xff] %v1699_v26  ;;  %1702 = vst [vmem:[%s17383_s12 + $0x4d8] sm:$0xff] %v1701_v27  ;;  %v1703_v28 = vld [vmem:[%s17378_s30 + $0x9c0] sm:$0xff]  ;;  %v1705_v29 = vld [vmem:[%s17378_s30 + $0x9c8] sm:$0xff] }
  0x60   : > { %v1707_v30 = vld [vmem:[%s17378_s30 + $0x9e0] sm:$0xff]  ;;  %1704 = vst [vmem:[%s17383_s12 + $0x4e0] sm:$0xff] %v1703_v28  ;;  %1706 = vst [vmem:[%s17383_s12 + $0x4e8] sm:$0xff] %v1705_v29  ;;  %v1709_v31 = vld [vmem:[%s17378_s30 + $0x9e8] sm:$0xff] }
  0x61   : > { %1708 = vst [vmem:[%s17383_s12 + $0x4f0] sm:$0xff] %v1707_v30  ;;  %v1711_v32 = vld [vmem:[%s17378_s30 + $0xa00] sm:$0xff]  ;;  %v1713_v33 = vld [vmem:[%s17378_s30 + $0xa08] sm:$0xff]  ;;  %1710 = vst [vmem:[%s17383_s12 + $0x4f8] sm:$0xff] %v1709_v31 }
  0x62   : > { %1712 = vst [vmem:[%s17383_s12 + $0x500] sm:$0xff] %v1711_v32  ;;  %1714 = vst [vmem:[%s17383_s12 + $0x508] sm:$0xff] %v1713_v33  ;;  %v1715_v34 = vld [vmem:[%s17378_s30 + $0xa20] sm:$0xff]  ;;  %v1717_v35 = vld [vmem:[%s17378_s30 + $0xa28] sm:$0xff] }
  0x63   : > { %v1719_v36 = vld [vmem:[%s17378_s30 + $0xa40] sm:$0xff]  ;;  %1716 = vst [vmem:[%s17383_s12 + $0x510] sm:$0xff] %v1715_v34  ;;  %1718 = vst [vmem:[%s17383_s12 + $0x518] sm:$0xff] %v1717_v35  ;;  %v1721_v37 = vld [vmem:[%s17378_s30 + $0xa48] sm:$0xff] }
  0x64   : > { %1720 = vst [vmem:[%s17383_s12 + $0x520] sm:$0xff] %v1719_v36  ;;  %v1723_v38 = vld [vmem:[%s17378_s30 + $0xa60] sm:$0xff]  ;;  %v1725_v39 = vld [vmem:[%s17378_s30 + $0xa68] sm:$0xff]  ;;  %1722 = vst [vmem:[%s17383_s12 + $0x528] sm:$0xff] %v1721_v37 }
  0x65   : > { %1724 = vst [vmem:[%s17383_s12 + $0x530] sm:$0xff] %v1723_v38  ;;  %1726 = vst [vmem:[%s17383_s12 + $0x538] sm:$0xff] %v1725_v39  ;;  %v1727_v40 = vld [vmem:[%s17378_s30 + $0xa80] sm:$0xff]  ;;  %v1729_v41 = vld [vmem:[%s17378_s30 + $0xa88] sm:$0xff] }
  0x66   : > { %v1731_v42 = vld [vmem:[%s17378_s30 + $0xaa0] sm:$0xff]  ;;  %1728 = vst [vmem:[%s17383_s12 + $0x540] sm:$0xff] %v1727_v40  ;;  %1730 = vst [vmem:[%s17383_s12 + $0x548] sm:$0xff] %v1729_v41  ;;  %v1733_v43 = vld [vmem:[%s17378_s30 + $0xaa8] sm:$0xff] }
  0x67   : > { %1732 = vst [vmem:[%s17383_s12 + $0x550] sm:$0xff] %v1731_v42  ;;  %v1735_v44 = vld [vmem:[%s17378_s30 + $0xac0] sm:$0xff]  ;;  %v1737_v45 = vld [vmem:[%s17378_s30 + $0xac8] sm:$0xff]  ;;  %1734 = vst [vmem:[%s17383_s12 + $0x558] sm:$0xff] %v1733_v43 }
  0x68   : > { %1736 = vst [vmem:[%s17383_s12 + $0x560] sm:$0xff] %v1735_v44  ;;  %1738 = vst [vmem:[%s17383_s12 + $0x568] sm:$0xff] %v1737_v45  ;;  %v1739_v46 = vld [vmem:[%s17378_s30 + $0xae0] sm:$0xff]  ;;  %v1741_v47 = vld [vmem:[%s17378_s30 + $0xae8] sm:$0xff] }
  0x69   : > { %v1743_v48 = vld [vmem:[%s17378_s30 + $0xb00] sm:$0xff]  ;;  %1740 = vst [vmem:[%s17383_s12 + $0x570] sm:$0xff] %v1739_v46  ;;  %1742 = vst [vmem:[%s17383_s12 + $0x578] sm:$0xff] %v1741_v47  ;;  %v1745_v49 = vld [vmem:[%s17378_s30 + $0xb08] sm:$0xff] }
  0x6a   : > { %1744 = vst [vmem:[%s17383_s12 + $0x580] sm:$0xff] %v1743_v48  ;;  %v1747_v50 = vld [vmem:[%s17378_s30 + $0xb20] sm:$0xff]  ;;  %v1749_v51 = vld [vmem:[%s17378_s30 + $0xb28] sm:$0xff]  ;;  %1746 = vst [vmem:[%s17383_s12 + $0x588] sm:$0xff] %v1745_v49 }
  0x6b   : > { %1748 = vst [vmem:[%s17383_s12 + $0x590] sm:$0xff] %v1747_v50  ;;  %1750 = vst [vmem:[%s17383_s12 + $0x598] sm:$0xff] %v1749_v51  ;;  %v1751_v52 = vld [vmem:[%s17378_s30 + $0xb40] sm:$0xff]  ;;  %v1753_v53 = vld [vmem:[%s17378_s30 + $0xb48] sm:$0xff] }
  0x6c   : > { %v1755_v54 = vld [vmem:[%s17378_s30 + $0xb60] sm:$0xff]  ;;  %1752 = vst [vmem:[%s17383_s12 + $0x5a0] sm:$0xff] %v1751_v52  ;;  %1754 = vst [vmem:[%s17383_s12 + $0x5a8] sm:$0xff] %v1753_v53  ;;  %v1757_v55 = vld [vmem:[%s17378_s30 + $0xb68] sm:$0xff] }
  0x6d   : > { %1756 = vst [vmem:[%s17383_s12 + $0x5b0] sm:$0xff] %v1755_v54  ;;  %v1759_v56 = vld [vmem:[%s17378_s30 + $0xb80] sm:$0xff]  ;;  %v1761_v57 = vld [vmem:[%s17378_s30 + $0xb88] sm:$0xff]  ;;  %1758 = vst [vmem:[%s17383_s12 + $0x5b8] sm:$0xff] %v1757_v55 }
  0x6e   : > { %1760 = vst [vmem:[%s17383_s12 + $0x5c0] sm:$0xff] %v1759_v56  ;;  %1762 = vst [vmem:[%s17383_s12 + $0x5c8] sm:$0xff] %v1761_v57  ;;  %v1763_v58 = vld [vmem:[%s17378_s30 + $0xba0] sm:$0xff]  ;;  %v1765_v59 = vld [vmem:[%s17378_s30 + $0xba8] sm:$0xff] }
  0x6f   : > { %v1767_v60 = vld [vmem:[%s17378_s30 + $0xbc0] sm:$0xff]  ;;  %1764 = vst [vmem:[%s17383_s12 + $0x5d0] sm:$0xff] %v1763_v58  ;;  %1766 = vst [vmem:[%s17383_s12 + $0x5d8] sm:$0xff] %v1765_v59  ;;  %v1769_v61 = vld [vmem:[%s17378_s30 + $0xbc8] sm:$0xff] }
  0x70   : > { %1768 = vst [vmem:[%s17383_s12 + $0x5e0] sm:$0xff] %v1767_v60  ;;  %v1771_v62 = vld [vmem:[%s17378_s30 + $0xbe0] sm:$0xff]  ;;  %v1773_v63 = vld [vmem:[%s17378_s30 + $0xbe8] sm:$0xff]  ;;  %1770 = vst [vmem:[%s17383_s12 + $0x5e8] sm:$0xff] %v1769_v61 }
  0x71   : > { %1772 = vst [vmem:[%s17383_s12 + $0x5f0] sm:$0xff] %v1771_v62  ;;  %1774 = vst [vmem:[%s17383_s12 + $0x5f8] sm:$0xff] %v1773_v63  ;;  %v1775_v0 = vld [vmem:[%s17378_s30 + $0xc00] sm:$0xff]  ;;  %v1777_v1 = vld [vmem:[%s17378_s30 + $0xc08] sm:$0xff] }
  0x72   : > { %v1779_v2 = vld [vmem:[%s17378_s30 + $0xc20] sm:$0xff]  ;;  %1776 = vst [vmem:[%s17383_s12 + $0x600] sm:$0xff] %v1775_v0  ;;  %1778 = vst [vmem:[%s17383_s12 + $0x608] sm:$0xff] %v1777_v1  ;;  %v1781_v3 = vld [vmem:[%s17378_s30 + $0xc28] sm:$0xff] }
  0x73   : > { %1780 = vst [vmem:[%s17383_s12 + $0x610] sm:$0xff] %v1779_v2  ;;  %v1783_v4 = vld [vmem:[%s17378_s30 + $0xc40] sm:$0xff]  ;;  %v1785_v5 = vld [vmem:[%s17378_s30 + $0xc48] sm:$0xff]  ;;  %1782 = vst [vmem:[%s17383_s12 + $0x618] sm:$0xff] %v1781_v3 }
  0x74   : > { %1784 = vst [vmem:[%s17383_s12 + $0x620] sm:$0xff] %v1783_v4  ;;  %1786 = vst [vmem:[%s17383_s12 + $0x628] sm:$0xff] %v1785_v5  ;;  %v1787_v6 = vld [vmem:[%s17378_s30 + $0xc60] sm:$0xff]  ;;  %v1789_v7 = vld [vmem:[%s17378_s30 + $0xc68] sm:$0xff] }
  0x75   : > { %v1791_v8 = vld [vmem:[%s17378_s30 + $0xc80] sm:$0xff]  ;;  %1788 = vst [vmem:[%s17383_s12 + $0x630] sm:$0xff] %v1787_v6  ;;  %1790 = vst [vmem:[%s17383_s12 + $0x638] sm:$0xff] %v1789_v7  ;;  %v1793_v9 = vld [vmem:[%s17378_s30 + $0xc88] sm:$0xff] }
  0x76   : > { %1792 = vst [vmem:[%s17383_s12 + $0x640] sm:$0xff] %v1791_v8  ;;  %v1795_v10 = vld [vmem:[%s17378_s30 + $0xca0] sm:$0xff]  ;;  %v1797_v11 = vld [vmem:[%s17378_s30 + $0xca8] sm:$0xff]  ;;  %1794 = vst [vmem:[%s17383_s12 + $0x648] sm:$0xff] %v1793_v9 }
  0x77   : > { %1796 = vst [vmem:[%s17383_s12 + $0x650] sm:$0xff] %v1795_v10  ;;  %1798 = vst [vmem:[%s17383_s12 + $0x658] sm:$0xff] %v1797_v11  ;;  %v1799_v12 = vld [vmem:[%s17378_s30 + $0xcc0] sm:$0xff]  ;;  %v1801_v13 = vld [vmem:[%s17378_s30 + $0xcc8] sm:$0xff] }
  0x78   : > { %v1803_v14 = vld [vmem:[%s17378_s30 + $0xce0] sm:$0xff]  ;;  %1800 = vst [vmem:[%s17383_s12 + $0x660] sm:$0xff] %v1799_v12  ;;  %1802 = vst [vmem:[%s17383_s12 + $0x668] sm:$0xff] %v1801_v13  ;;  %v1805_v15 = vld [vmem:[%s17378_s30 + $0xce8] sm:$0xff] }
  0x79   : > { %1804 = vst [vmem:[%s17383_s12 + $0x670] sm:$0xff] %v1803_v14  ;;  %v1807_v16 = vld [vmem:[%s17378_s30 + $0xd00] sm:$0xff]  ;;  %v1809_v17 = vld [vmem:[%s17378_s30 + $0xd08] sm:$0xff]  ;;  %1806 = vst [vmem:[%s17383_s12 + $0x678] sm:$0xff] %v1805_v15 }
  0x7a   : > { %1808 = vst [vmem:[%s17383_s12 + $0x680] sm:$0xff] %v1807_v16  ;;  %1810 = vst [vmem:[%s17383_s12 + $0x688] sm:$0xff] %v1809_v17  ;;  %v1811_v18 = vld [vmem:[%s17378_s30 + $0xd20] sm:$0xff]  ;;  %v1813_v19 = vld [vmem:[%s17378_s30 + $0xd28] sm:$0xff] }
  0x7b   : > { %v1815_v20 = vld [vmem:[%s17378_s30 + $0xd40] sm:$0xff]  ;;  %1812 = vst [vmem:[%s17383_s12 + $0x690] sm:$0xff] %v1811_v18  ;;  %1814 = vst [vmem:[%s17383_s12 + $0x698] sm:$0xff] %v1813_v19  ;;  %v1817_v21 = vld [vmem:[%s17378_s30 + $0xd48] sm:$0xff] }
  0x7c   : > { %1816 = vst [vmem:[%s17383_s12 + $0x6a0] sm:$0xff] %v1815_v20  ;;  %v1819_v22 = vld [vmem:[%s17378_s30 + $0xd60] sm:$0xff]  ;;  %v1821_v23 = vld [vmem:[%s17378_s30 + $0xd68] sm:$0xff]  ;;  %1818 = vst [vmem:[%s17383_s12 + $0x6a8] sm:$0xff] %v1817_v21 }
  0x7d   : > { %1820 = vst [vmem:[%s17383_s12 + $0x6b0] sm:$0xff] %v1819_v22  ;;  %1822 = vst [vmem:[%s17383_s12 + $0x6b8] sm:$0xff] %v1821_v23  ;;  %v1823_v24 = vld [vmem:[%s17378_s30 + $0xd80] sm:$0xff]  ;;  %v1825_v25 = vld [vmem:[%s17378_s30 + $0xd88] sm:$0xff] }
  0x7e   : > { %v1827_v26 = vld [vmem:[%s17378_s30 + $0xda0] sm:$0xff]  ;;  %1824 = vst [vmem:[%s17383_s12 + $0x6c0] sm:$0xff] %v1823_v24  ;;  %1826 = vst [vmem:[%s17383_s12 + $0x6c8] sm:$0xff] %v1825_v25  ;;  %v1829_v27 = vld [vmem:[%s17378_s30 + $0xda8] sm:$0xff] }
  0x7f   : > { %1828 = vst [vmem:[%s17383_s12 + $0x6d0] sm:$0xff] %v1827_v26  ;;  %v1831_v28 = vld [vmem:[%s17378_s30 + $0xdc0] sm:$0xff]  ;;  %v1833_v29 = vld [vmem:[%s17378_s30 + $0xdc8] sm:$0xff]  ;;  %1830 = vst [vmem:[%s17383_s12 + $0x6d8] sm:$0xff] %v1829_v27 }
  0x80   : > { %1832 = vst [vmem:[%s17383_s12 + $0x6e0] sm:$0xff] %v1831_v28  ;;  %1834 = vst [vmem:[%s17383_s12 + $0x6e8] sm:$0xff] %v1833_v29  ;;  %v1835_v30 = vld [vmem:[%s17378_s30 + $0xde0] sm:$0xff]  ;;  %v1837_v31 = vld [vmem:[%s17378_s30 + $0xde8] sm:$0xff] }
  0x81   : > { %v1839_v32 = vld [vmem:[%s17378_s30 + $0xe00] sm:$0xff]  ;;  %1836 = vst [vmem:[%s17383_s12 + $0x6f0] sm:$0xff] %v1835_v30  ;;  %1838 = vst [vmem:[%s17383_s12 + $0x6f8] sm:$0xff] %v1837_v31  ;;  %v1841_v33 = vld [vmem:[%s17378_s30 + $0xe08] sm:$0xff] }
  0x82   : > { %1840 = vst [vmem:[%s17383_s12 + $0x700] sm:$0xff] %v1839_v32  ;;  %v1843_v34 = vld [vmem:[%s17378_s30 + $0xe20] sm:$0xff]  ;;  %v1845_v35 = vld [vmem:[%s17378_s30 + $0xe28] sm:$0xff]  ;;  %1842 = vst [vmem:[%s17383_s12 + $0x708] sm:$0xff] %v1841_v33 }
  0x83   : > { %1844 = vst [vmem:[%s17383_s12 + $0x710] sm:$0xff] %v1843_v34  ;;  %1846 = vst [vmem:[%s17383_s12 + $0x718] sm:$0xff] %v1845_v35  ;;  %v1847_v36 = vld [vmem:[%s17378_s30 + $0xe40] sm:$0xff]  ;;  %v1849_v37 = vld [vmem:[%s17378_s30 + $0xe48] sm:$0xff] }
  0x84   : > { %v1851_v38 = vld [vmem:[%s17378_s30 + $0xe60] sm:$0xff]  ;;  %1848 = vst [vmem:[%s17383_s12 + $0x720] sm:$0xff] %v1847_v36  ;;  %1850 = vst [vmem:[%s17383_s12 + $0x728] sm:$0xff] %v1849_v37  ;;  %v1853_v39 = vld [vmem:[%s17378_s30 + $0xe68] sm:$0xff] }
  0x85   : > { %1852 = vst [vmem:[%s17383_s12 + $0x730] sm:$0xff] %v1851_v38  ;;  %v1855_v40 = vld [vmem:[%s17378_s30 + $0xe80] sm:$0xff]  ;;  %v1857_v41 = vld [vmem:[%s17378_s30 + $0xe88] sm:$0xff]  ;;  %1854 = vst [vmem:[%s17383_s12 + $0x738] sm:$0xff] %v1853_v39 }
  0x86   : > { %1856 = vst [vmem:[%s17383_s12 + $0x740] sm:$0xff] %v1855_v40  ;;  %1858 = vst [vmem:[%s17383_s12 + $0x748] sm:$0xff] %v1857_v41  ;;  %v1859_v42 = vld [vmem:[%s17378_s30 + $0xea0] sm:$0xff]  ;;  %v1861_v43 = vld [vmem:[%s17378_s30 + $0xea8] sm:$0xff] }
  0x87   : > { %v1863_v44 = vld [vmem:[%s17378_s30 + $0xec0] sm:$0xff]  ;;  %1860 = vst [vmem:[%s17383_s12 + $0x750] sm:$0xff] %v1859_v42  ;;  %1862 = vst [vmem:[%s17383_s12 + $0x758] sm:$0xff] %v1861_v43  ;;  %v1865_v45 = vld [vmem:[%s17378_s30 + $0xec8] sm:$0xff] }
  0x88   : > { %1864 = vst [vmem:[%s17383_s12 + $0x760] sm:$0xff] %v1863_v44  ;;  %v1867_v46 = vld [vmem:[%s17378_s30 + $0xee0] sm:$0xff]  ;;  %v1869_v47 = vld [vmem:[%s17378_s30 + $0xee8] sm:$0xff]  ;;  %1866 = vst [vmem:[%s17383_s12 + $0x768] sm:$0xff] %v1865_v45 }
  0x89   : > { %1868 = vst [vmem:[%s17383_s12 + $0x770] sm:$0xff] %v1867_v46  ;;  %1870 = vst [vmem:[%s17383_s12 + $0x778] sm:$0xff] %v1869_v47  ;;  %v1871_v48 = vld [vmem:[%s17378_s30 + $0xf00] sm:$0xff]  ;;  %v1873_v49 = vld [vmem:[%s17378_s30 + $0xf08] sm:$0xff] }
  0x8a   : > { %v1875_v50 = vld [vmem:[%s17378_s30 + $0xf20] sm:$0xff]  ;;  %1872 = vst [vmem:[%s17383_s12 + $0x780] sm:$0xff] %v1871_v48  ;;  %1874 = vst [vmem:[%s17383_s12 + $0x788] sm:$0xff] %v1873_v49  ;;  %v1877_v51 = vld [vmem:[%s17378_s30 + $0xf28] sm:$0xff] }
  0x8b   : > { %1876 = vst [vmem:[%s17383_s12 + $0x790] sm:$0xff] %v1875_v50  ;;  %v1879_v52 = vld [vmem:[%s17378_s30 + $0xf40] sm:$0xff]  ;;  %v1881_v53 = vld [vmem:[%s17378_s30 + $0xf48] sm:$0xff]  ;;  %1878 = vst [vmem:[%s17383_s12 + $0x798] sm:$0xff] %v1877_v51 }
  0x8c   : > { %1880 = vst [vmem:[%s17383_s12 + $0x7a0] sm:$0xff] %v1879_v52  ;;  %1882 = vst [vmem:[%s17383_s12 + $0x7a8] sm:$0xff] %v1881_v53  ;;  %v1883_v54 = vld [vmem:[%s17378_s30 + $0xf60] sm:$0xff]  ;;  %v1885_v55 = vld [vmem:[%s17378_s30 + $0xf68] sm:$0xff] }
  0x8d   : > { %v1887_v56 = vld [vmem:[%s17378_s30 + $0xf80] sm:$0xff]  ;;  %1884 = vst [vmem:[%s17383_s12 + $0x7b0] sm:$0xff] %v1883_v54  ;;  %1886 = vst [vmem:[%s17383_s12 + $0x7b8] sm:$0xff] %v1885_v55  ;;  %v1889_v57 = vld [vmem:[%s17378_s30 + $0xf88] sm:$0xff] }
  0x8e   : > { %1888 = vst [vmem:[%s17383_s12 + $0x7c0] sm:$0xff] %v1887_v56  ;;  %v1891_v58 = vld [vmem:[%s17378_s30 + $0xfa0] sm:$0xff]  ;;  %v1893_v59 = vld [vmem:[%s17378_s30 + $0xfa8] sm:$0xff]  ;;  %1890 = vst [vmem:[%s17383_s12 + $0x7c8] sm:$0xff] %v1889_v57 }
  0x8f   : > { %1892 = vst [vmem:[%s17383_s12 + $0x7d0] sm:$0xff] %v1891_v58  ;;  %1894 = vst [vmem:[%s17383_s12 + $0x7d8] sm:$0xff] %v1893_v59  ;;  %v1895_v60 = vld [vmem:[%s17378_s30 + $0xfc0] sm:$0xff]  ;;  %v1897_v61 = vld [vmem:[%s17378_s30 + $0xfc8] sm:$0xff] }
  0x90   : > { %v1899_v62 = vld [vmem:[%s17378_s30 + $0xfe0] sm:$0xff]  ;;  %1896 = vst [vmem:[%s17383_s12 + $0x7e0] sm:$0xff] %v1895_v60  ;;  %1898 = vst [vmem:[%s17383_s12 + $0x7e8] sm:$0xff] %v1897_v61  ;;  %v1901_v63 = vld [vmem:[%s17378_s30 + $0xfe8] sm:$0xff] }
  0x91   : > { %1900 = vst [vmem:[%s17383_s12 + $0x7f0] sm:$0xff] %v1899_v62  ;;  %v1903_v0 = vld [vmem:[%s17378_s30 + $0x1000] sm:$0xff]  ;;  %v1905_v1 = vld [vmem:[%s17378_s30 + $0x1008] sm:$0xff]  ;;  %1902 = vst [vmem:[%s17383_s12 + $0x7f8] sm:$0xff] %v1901_v63 }
  0x92   : > { %1904 = vst [vmem:[%s17383_s12 + $0x800] sm:$0xff] %v1903_v0  ;;  %1906 = vst [vmem:[%s17383_s12 + $0x808] sm:$0xff] %v1905_v1  ;;  %v1907_v2 = vld [vmem:[%s17378_s30 + $0x1020] sm:$0xff]  ;;  %v1909_v3 = vld [vmem:[%s17378_s30 + $0x1028] sm:$0xff] }
  0x93   : > { %v1911_v4 = vld [vmem:[%s17378_s30 + $0x1040] sm:$0xff]  ;;  %1908 = vst [vmem:[%s17383_s12 + $0x810] sm:$0xff] %v1907_v2  ;;  %1910 = vst [vmem:[%s17383_s12 + $0x818] sm:$0xff] %v1909_v3  ;;  %v1913_v5 = vld [vmem:[%s17378_s30 + $0x1048] sm:$0xff] }
  0x94   : > { %1912 = vst [vmem:[%s17383_s12 + $0x820] sm:$0xff] %v1911_v4  ;;  %v1915_v6 = vld [vmem:[%s17378_s30 + $0x1060] sm:$0xff]  ;;  %v1917_v7 = vld [vmem:[%s17378_s30 + $0x1068] sm:$0xff]  ;;  %1914 = vst [vmem:[%s17383_s12 + $0x828] sm:$0xff] %v1913_v5 }
  0x95   : > { %1916 = vst [vmem:[%s17383_s12 + $0x830] sm:$0xff] %v1915_v6  ;;  %1918 = vst [vmem:[%s17383_s12 + $0x838] sm:$0xff] %v1917_v7  ;;  %v1919_v8 = vld [vmem:[%s17378_s30 + $0x1080] sm:$0xff]  ;;  %v1921_v9 = vld [vmem:[%s17378_s30 + $0x1088] sm:$0xff] }
  0x96   : > { %v1923_v10 = vld [vmem:[%s17378_s30 + $0x10a0] sm:$0xff]  ;;  %1920 = vst [vmem:[%s17383_s12 + $0x840] sm:$0xff] %v1919_v8  ;;  %1922 = vst [vmem:[%s17383_s12 + $0x848] sm:$0xff] %v1921_v9  ;;  %v1925_v11 = vld [vmem:[%s17378_s30 + $0x10a8] sm:$0xff] }
  0x97   : > { %1924 = vst [vmem:[%s17383_s12 + $0x850] sm:$0xff] %v1923_v10  ;;  %v1927_v12 = vld [vmem:[%s17378_s30 + $0x10c0] sm:$0xff]  ;;  %v1929_v13 = vld [vmem:[%s17378_s30 + $0x10c8] sm:$0xff]  ;;  %1926 = vst [vmem:[%s17383_s12 + $0x858] sm:$0xff] %v1925_v11 }
  0x98   : > { %1928 = vst [vmem:[%s17383_s12 + $0x860] sm:$0xff] %v1927_v12  ;;  %1930 = vst [vmem:[%s17383_s12 + $0x868] sm:$0xff] %v1929_v13  ;;  %v1931_v14 = vld [vmem:[%s17378_s30 + $0x10e0] sm:$0xff]  ;;  %v1933_v15 = vld [vmem:[%s17378_s30 + $0x10e8] sm:$0xff] }
  0x99   : > { %v1935_v16 = vld [vmem:[%s17378_s30 + $0x1100] sm:$0xff]  ;;  %1932 = vst [vmem:[%s17383_s12 + $0x870] sm:$0xff] %v1931_v14  ;;  %1934 = vst [vmem:[%s17383_s12 + $0x878] sm:$0xff] %v1933_v15  ;;  %v1937_v17 = vld [vmem:[%s17378_s30 + $0x1108] sm:$0xff] }
  0x9a   : > { %1936 = vst [vmem:[%s17383_s12 + $0x880] sm:$0xff] %v1935_v16  ;;  %v1939_v18 = vld [vmem:[%s17378_s30 + $0x1120] sm:$0xff]  ;;  %v1941_v19 = vld [vmem:[%s17378_s30 + $0x1128] sm:$0xff]  ;;  %1938 = vst [vmem:[%s17383_s12 + $0x888] sm:$0xff] %v1937_v17 }
  0x9b   : > { %1940 = vst [vmem:[%s17383_s12 + $0x890] sm:$0xff] %v1939_v18  ;;  %1942 = vst [vmem:[%s17383_s12 + $0x898] sm:$0xff] %v1941_v19  ;;  %v1943_v20 = vld [vmem:[%s17378_s30 + $0x1140] sm:$0xff]  ;;  %v1945_v21 = vld [vmem:[%s17378_s30 + $0x1148] sm:$0xff] }
  0x9c   : > { %v1947_v22 = vld [vmem:[%s17378_s30 + $0x1160] sm:$0xff]  ;;  %1944 = vst [vmem:[%s17383_s12 + $0x8a0] sm:$0xff] %v1943_v20  ;;  %1946 = vst [vmem:[%s17383_s12 + $0x8a8] sm:$0xff] %v1945_v21  ;;  %v1949_v23 = vld [vmem:[%s17378_s30 + $0x1168] sm:$0xff] }
  0x9d   : > { %1948 = vst [vmem:[%s17383_s12 + $0x8b0] sm:$0xff] %v1947_v22  ;;  %v1951_v24 = vld [vmem:[%s17378_s30 + $0x1180] sm:$0xff]  ;;  %v1953_v25 = vld [vmem:[%s17378_s30 + $0x1188] sm:$0xff]  ;;  %1950 = vst [vmem:[%s17383_s12 + $0x8b8] sm:$0xff] %v1949_v23 }
  0x9e   : > { %1952 = vst [vmem:[%s17383_s12 + $0x8c0] sm:$0xff] %v1951_v24  ;;  %1954 = vst [vmem:[%s17383_s12 + $0x8c8] sm:$0xff] %v1953_v25  ;;  %v1955_v26 = vld [vmem:[%s17378_s30 + $0x11a0] sm:$0xff]  ;;  %v1957_v27 = vld [vmem:[%s17378_s30 + $0x11a8] sm:$0xff] }
  0x9f   : > { %v1959_v28 = vld [vmem:[%s17378_s30 + $0x11c0] sm:$0xff]  ;;  %1956 = vst [vmem:[%s17383_s12 + $0x8d0] sm:$0xff] %v1955_v26  ;;  %1958 = vst [vmem:[%s17383_s12 + $0x8d8] sm:$0xff] %v1957_v27  ;;  %v1961_v29 = vld [vmem:[%s17378_s30 + $0x11c8] sm:$0xff] }
  0xa0   : > { %1960 = vst [vmem:[%s17383_s12 + $0x8e0] sm:$0xff] %v1959_v28  ;;  %v1963_v30 = vld [vmem:[%s17378_s30 + $0x11e0] sm:$0xff]  ;;  %v1965_v31 = vld [vmem:[%s17378_s30 + $0x11e8] sm:$0xff]  ;;  %1962 = vst [vmem:[%s17383_s12 + $0x8e8] sm:$0xff] %v1961_v29 }
  0xa1   : > { %1964 = vst [vmem:[%s17383_s12 + $0x8f0] sm:$0xff] %v1963_v30  ;;  %1966 = vst [vmem:[%s17383_s12 + $0x8f8] sm:$0xff] %v1965_v31  ;;  %v1967_v32 = vld [vmem:[%s17378_s30 + $0x1200] sm:$0xff]  ;;  %v1969_v33 = vld [vmem:[%s17378_s30 + $0x1208] sm:$0xff] }
  0xa2   : > { %v1971_v34 = vld [vmem:[%s17378_s30 + $0x1220] sm:$0xff]  ;;  %1968 = vst [vmem:[%s17383_s12 + $0x900] sm:$0xff] %v1967_v32  ;;  %1970 = vst [vmem:[%s17383_s12 + $0x908] sm:$0xff] %v1969_v33  ;;  %v1973_v35 = vld [vmem:[%s17378_s30 + $0x1228] sm:$0xff] }
  0xa3   : > { %1972 = vst [vmem:[%s17383_s12 + $0x910] sm:$0xff] %v1971_v34  ;;  %v1975_v36 = vld [vmem:[%s17378_s30 + $0x1240] sm:$0xff]  ;;  %v1977_v37 = vld [vmem:[%s17378_s30 + $0x1248] sm:$0xff]  ;;  %1974 = vst [vmem:[%s17383_s12 + $0x918] sm:$0xff] %v1973_v35 }
  0xa4   : > { %1976 = vst [vmem:[%s17383_s12 + $0x920] sm:$0xff] %v1975_v36  ;;  %1978 = vst [vmem:[%s17383_s12 + $0x928] sm:$0xff] %v1977_v37  ;;  %v1979_v38 = vld [vmem:[%s17378_s30 + $0x1260] sm:$0xff]  ;;  %v1981_v39 = vld [vmem:[%s17378_s30 + $0x1268] sm:$0xff] }
  0xa5   : > { %v1983_v40 = vld [vmem:[%s17378_s30 + $0x1280] sm:$0xff]  ;;  %1980 = vst [vmem:[%s17383_s12 + $0x930] sm:$0xff] %v1979_v38  ;;  %1982 = vst [vmem:[%s17383_s12 + $0x938] sm:$0xff] %v1981_v39  ;;  %v1985_v41 = vld [vmem:[%s17378_s30 + $0x1288] sm:$0xff] }
  0xa6   : > { %1984 = vst [vmem:[%s17383_s12 + $0x940] sm:$0xff] %v1983_v40  ;;  %v1987_v42 = vld [vmem:[%s17378_s30 + $0x12a0] sm:$0xff]  ;;  %v1989_v43 = vld [vmem:[%s17378_s30 + $0x12a8] sm:$0xff]  ;;  %1986 = vst [vmem:[%s17383_s12 + $0x948] sm:$0xff] %v1985_v41 }
  0xa7   : > { %1988 = vst [vmem:[%s17383_s12 + $0x950] sm:$0xff] %v1987_v42  ;;  %1990 = vst [vmem:[%s17383_s12 + $0x958] sm:$0xff] %v1989_v43  ;;  %v1991_v44 = vld [vmem:[%s17378_s30 + $0x12c0] sm:$0xff]  ;;  %v1993_v45 = vld [vmem:[%s17378_s30 + $0x12c8] sm:$0xff] }
  0xa8   : > { %v1995_v46 = vld [vmem:[%s17378_s30 + $0x12e0] sm:$0xff]  ;;  %1992 = vst [vmem:[%s17383_s12 + $0x960] sm:$0xff] %v1991_v44  ;;  %1994 = vst [vmem:[%s17383_s12 + $0x968] sm:$0xff] %v1993_v45  ;;  %v1997_v47 = vld [vmem:[%s17378_s30 + $0x12e8] sm:$0xff] }
  0xa9   : > { %1996 = vst [vmem:[%s17383_s12 + $0x970] sm:$0xff] %v1995_v46  ;;  %v1999_v48 = vld [vmem:[%s17378_s30 + $0x1300] sm:$0xff]  ;;  %v2001_v49 = vld [vmem:[%s17378_s30 + $0x1308] sm:$0xff]  ;;  %1998 = vst [vmem:[%s17383_s12 + $0x978] sm:$0xff] %v1997_v47 }
  0xaa   : > { %2000 = vst [vmem:[%s17383_s12 + $0x980] sm:$0xff] %v1999_v48  ;;  %2002 = vst [vmem:[%s17383_s12 + $0x988] sm:$0xff] %v2001_v49  ;;  %v2003_v50 = vld [vmem:[%s17378_s30 + $0x1320] sm:$0xff]  ;;  %v2005_v51 = vld [vmem:[%s17378_s30 + $0x1328] sm:$0xff] }
  0xab   : > { %v2007_v52 = vld [vmem:[%s17378_s30 + $0x1340] sm:$0xff]  ;;  %2004 = vst [vmem:[%s17383_s12 + $0x990] sm:$0xff] %v2003_v50  ;;  %2006 = vst [vmem:[%s17383_s12 + $0x998] sm:$0xff] %v2005_v51  ;;  %v2009_v53 = vld [vmem:[%s17378_s30 + $0x1348] sm:$0xff] }
  0xac   : > { %2008 = vst [vmem:[%s17383_s12 + $0x9a0] sm:$0xff] %v2007_v52  ;;  %v2011_v54 = vld [vmem:[%s17378_s30 + $0x1360] sm:$0xff]  ;;  %v2013_v55 = vld [vmem:[%s17378_s30 + $0x1368] sm:$0xff]  ;;  %2010 = vst [vmem:[%s17383_s12 + $0x9a8] sm:$0xff] %v2009_v53 }
  0xad   : > { %2012 = vst [vmem:[%s17383_s12 + $0x9b0] sm:$0xff] %v2011_v54  ;;  %2014 = vst [vmem:[%s17383_s12 + $0x9b8] sm:$0xff] %v2013_v55  ;;  %v2015_v56 = vld [vmem:[%s17378_s30 + $0x1380] sm:$0xff]  ;;  %v2017_v57 = vld [vmem:[%s17378_s30 + $0x1388] sm:$0xff] }
  0xae   : > { %v2019_v58 = vld [vmem:[%s17378_s30 + $0x13a0] sm:$0xff]  ;;  %2016 = vst [vmem:[%s17383_s12 + $0x9c0] sm:$0xff] %v2015_v56  ;;  %2018 = vst [vmem:[%s17383_s12 + $0x9c8] sm:$0xff] %v2017_v57  ;;  %v2021_v59 = vld [vmem:[%s17378_s30 + $0x13a8] sm:$0xff] }
  0xaf   : > { %2020 = vst [vmem:[%s17383_s12 + $0x9d0] sm:$0xff] %v2019_v58  ;;  %v2023_v60 = vld [vmem:[%s17378_s30 + $0x13c0] sm:$0xff]  ;;  %v2025_v61 = vld [vmem:[%s17378_s30 + $0x13c8] sm:$0xff]  ;;  %2022 = vst [vmem:[%s17383_s12 + $0x9d8] sm:$0xff] %v2021_v59 }
  0xb0   : > { %2024 = vst [vmem:[%s17383_s12 + $0x9e0] sm:$0xff] %v2023_v60  ;;  %2026 = vst [vmem:[%s17383_s12 + $0x9e8] sm:$0xff] %v2025_v61  ;;  %v2027_v62 = vld [vmem:[%s17378_s30 + $0x13e0] sm:$0xff]  ;;  %v2029_v63 = vld [vmem:[%s17378_s30 + $0x13e8] sm:$0xff] }
  0xb1   : > { %v2031_v0 = vld [vmem:[%s17378_s30 + $0x1400] sm:$0xff]  ;;  %2028 = vst [vmem:[%s17383_s12 + $0x9f0] sm:$0xff] %v2027_v62  ;;  %2030 = vst [vmem:[%s17383_s12 + $0x9f8] sm:$0xff] %v2029_v63  ;;  %v2033_v1 = vld [vmem:[%s17378_s30 + $0x1408] sm:$0xff] }
  0xb2   : > { %2032 = vst [vmem:[%s17383_s12 + $0xa00] sm:$0xff] %v2031_v0  ;;  %v2035_v2 = vld [vmem:[%s17378_s30 + $0x1420] sm:$0xff]  ;;  %v2037_v3 = vld [vmem:[%s17378_s30 + $0x1428] sm:$0xff]  ;;  %2034 = vst [vmem:[%s17383_s12 + $0xa08] sm:$0xff] %v2033_v1 }
  0xb3   : > { %2036 = vst [vmem:[%s17383_s12 + $0xa10] sm:$0xff] %v2035_v2  ;;  %2038 = vst [vmem:[%s17383_s12 + $0xa18] sm:$0xff] %v2037_v3  ;;  %v2039_v4 = vld [vmem:[%s17378_s30 + $0x1440] sm:$0xff]  ;;  %v2041_v5 = vld [vmem:[%s17378_s30 + $0x1448] sm:$0xff] }
  0xb4   : > { %v2043_v6 = vld [vmem:[%s17378_s30 + $0x1460] sm:$0xff]  ;;  %2040 = vst [vmem:[%s17383_s12 + $0xa20] sm:$0xff] %v2039_v4  ;;  %2042 = vst [vmem:[%s17383_s12 + $0xa28] sm:$0xff] %v2041_v5  ;;  %v2045_v7 = vld [vmem:[%s17378_s30 + $0x1468] sm:$0xff] }
  0xb5   : > { %2044 = vst [vmem:[%s17383_s12 + $0xa30] sm:$0xff] %v2043_v6  ;;  %v2047_v8 = vld [vmem:[%s17378_s30 + $0x1480] sm:$0xff]  ;;  %v2049_v9 = vld [vmem:[%s17378_s30 + $0x1488] sm:$0xff]  ;;  %2046 = vst [vmem:[%s17383_s12 + $0xa38] sm:$0xff] %v2045_v7 }
  0xb6   : > { %2048 = vst [vmem:[%s17383_s12 + $0xa40] sm:$0xff] %v2047_v8  ;;  %2050 = vst [vmem:[%s17383_s12 + $0xa48] sm:$0xff] %v2049_v9  ;;  %v2051_v10 = vld [vmem:[%s17378_s30 + $0x14a0] sm:$0xff]  ;;  %v2053_v11 = vld [vmem:[%s17378_s30 + $0x14a8] sm:$0xff] }
  0xb7   : > { %v2055_v12 = vld [vmem:[%s17378_s30 + $0x14c0] sm:$0xff]  ;;  %2052 = vst [vmem:[%s17383_s12 + $0xa50] sm:$0xff] %v2051_v10  ;;  %2054 = vst [vmem:[%s17383_s12 + $0xa58] sm:$0xff] %v2053_v11  ;;  %v2057_v13 = vld [vmem:[%s17378_s30 + $0x14c8] sm:$0xff] }
  0xb8   : > { %2056 = vst [vmem:[%s17383_s12 + $0xa60] sm:$0xff] %v2055_v12  ;;  %v2059_v14 = vld [vmem:[%s17378_s30 + $0x14e0] sm:$0xff]  ;;  %v2061_v15 = vld [vmem:[%s17378_s30 + $0x14e8] sm:$0xff]  ;;  %2058 = vst [vmem:[%s17383_s12 + $0xa68] sm:$0xff] %v2057_v13 }
  0xb9   : > { %2060 = vst [vmem:[%s17383_s12 + $0xa70] sm:$0xff] %v2059_v14  ;;  %2062 = vst [vmem:[%s17383_s12 + $0xa78] sm:$0xff] %v2061_v15  ;;  %v2063_v16 = vld [vmem:[%s17378_s30 + $0x1500] sm:$0xff]  ;;  %v2065_v17 = vld [vmem:[%s17378_s30 + $0x1508] sm:$0xff] }
  0xba   : > { %v2067_v18 = vld [vmem:[%s17378_s30 + $0x1520] sm:$0xff]  ;;  %2064 = vst [vmem:[%s17383_s12 + $0xa80] sm:$0xff] %v2063_v16  ;;  %2066 = vst [vmem:[%s17383_s12 + $0xa88] sm:$0xff] %v2065_v17  ;;  %v2069_v19 = vld [vmem:[%s17378_s30 + $0x1528] sm:$0xff] }
  0xbb   : > { %2068 = vst [vmem:[%s17383_s12 + $0xa90] sm:$0xff] %v2067_v18  ;;  %v2071_v20 = vld [vmem:[%s17378_s30 + $0x1540] sm:$0xff]  ;;  %v2073_v21 = vld [vmem:[%s17378_s30 + $0x1548] sm:$0xff]  ;;  %2070 = vst [vmem:[%s17383_s12 + $0xa98] sm:$0xff] %v2069_v19 }
  0xbc   : > { %2072 = vst [vmem:[%s17383_s12 + $0xaa0] sm:$0xff] %v2071_v20  ;;  %2074 = vst [vmem:[%s17383_s12 + $0xaa8] sm:$0xff] %v2073_v21  ;;  %v2075_v22 = vld [vmem:[%s17378_s30 + $0x1560] sm:$0xff]  ;;  %v2077_v23 = vld [vmem:[%s17378_s30 + $0x1568] sm:$0xff] }
  0xbd   : > { %v2079_v24 = vld [vmem:[%s17378_s30 + $0x1580] sm:$0xff]  ;;  %2076 = vst [vmem:[%s17383_s12 + $0xab0] sm:$0xff] %v2075_v22  ;;  %2078 = vst [vmem:[%s17383_s12 + $0xab8] sm:$0xff] %v2077_v23  ;;  %v2081_v25 = vld [vmem:[%s17378_s30 + $0x1588] sm:$0xff] }
  0xbe   : > { %2080 = vst [vmem:[%s17383_s12 + $0xac0] sm:$0xff] %v2079_v24  ;;  %v2083_v26 = vld [vmem:[%s17378_s30 + $0x15a0] sm:$0xff]  ;;  %v2085_v27 = vld [vmem:[%s17378_s30 + $0x15a8] sm:$0xff]  ;;  %2082 = vst [vmem:[%s17383_s12 + $0xac8] sm:$0xff] %v2081_v25 }
  0xbf   : > { %2084 = vst [vmem:[%s17383_s12 + $0xad0] sm:$0xff] %v2083_v26  ;;  %2086 = vst [vmem:[%s17383_s12 + $0xad8] sm:$0xff] %v2085_v27  ;;  %v2087_v28 = vld [vmem:[%s17378_s30 + $0x15c0] sm:$0xff]  ;;  %v2089_v29 = vld [vmem:[%s17378_s30 + $0x15c8] sm:$0xff] }
  0xc0   : > { %v2091_v30 = vld [vmem:[%s17378_s30 + $0x15e0] sm:$0xff]  ;;  %2088 = vst [vmem:[%s17383_s12 + $0xae0] sm:$0xff] %v2087_v28  ;;  %2090 = vst [vmem:[%s17383_s12 + $0xae8] sm:$0xff] %v2089_v29  ;;  %v2093_v31 = vld [vmem:[%s17378_s30 + $0x15e8] sm:$0xff] }
  0xc1   : > { %2092 = vst [vmem:[%s17383_s12 + $0xaf0] sm:$0xff] %v2091_v30  ;;  %v2095_v32 = vld [vmem:[%s17378_s30 + $0x1600] sm:$0xff]  ;;  %v2097_v33 = vld [vmem:[%s17378_s30 + $0x1608] sm:$0xff]  ;;  %2094 = vst [vmem:[%s17383_s12 + $0xaf8] sm:$0xff] %v2093_v31 }
  0xc2   : > { %2096 = vst [vmem:[%s17383_s12 + $0xb00] sm:$0xff] %v2095_v32  ;;  %2098 = vst [vmem:[%s17383_s12 + $0xb08] sm:$0xff] %v2097_v33  ;;  %v2099_v34 = vld [vmem:[%s17378_s30 + $0x1620] sm:$0xff]  ;;  %v2101_v35 = vld [vmem:[%s17378_s30 + $0x1628] sm:$0xff] }
  0xc3   : > { %v2103_v36 = vld [vmem:[%s17378_s30 + $0x1640] sm:$0xff]  ;;  %2100 = vst [vmem:[%s17383_s12 + $0xb10] sm:$0xff] %v2099_v34  ;;  %2102 = vst [vmem:[%s17383_s12 + $0xb18] sm:$0xff] %v2101_v35  ;;  %v2105_v37 = vld [vmem:[%s17378_s30 + $0x1648] sm:$0xff] }
  0xc4   : > { %2104 = vst [vmem:[%s17383_s12 + $0xb20] sm:$0xff] %v2103_v36  ;;  %v2107_v38 = vld [vmem:[%s17378_s30 + $0x1660] sm:$0xff]  ;;  %v2109_v39 = vld [vmem:[%s17378_s30 + $0x1668] sm:$0xff]  ;;  %2106 = vst [vmem:[%s17383_s12 + $0xb28] sm:$0xff] %v2105_v37 }
  0xc5   : > { %2108 = vst [vmem:[%s17383_s12 + $0xb30] sm:$0xff] %v2107_v38  ;;  %2110 = vst [vmem:[%s17383_s12 + $0xb38] sm:$0xff] %v2109_v39  ;;  %v2111_v40 = vld [vmem:[%s17378_s30 + $0x1680] sm:$0xff]  ;;  %v2113_v41 = vld [vmem:[%s17378_s30 + $0x1688] sm:$0xff] }
  0xc6   : > { %v2115_v42 = vld [vmem:[%s17378_s30 + $0x16a0] sm:$0xff]  ;;  %2112 = vst [vmem:[%s17383_s12 + $0xb40] sm:$0xff] %v2111_v40  ;;  %2114 = vst [vmem:[%s17383_s12 + $0xb48] sm:$0xff] %v2113_v41  ;;  %v2117_v43 = vld [vmem:[%s17378_s30 + $0x16a8] sm:$0xff] }
  0xc7   : > { %2116 = vst [vmem:[%s17383_s12 + $0xb50] sm:$0xff] %v2115_v42  ;;  %v2119_v44 = vld [vmem:[%s17378_s30 + $0x16c0] sm:$0xff]  ;;  %v2121_v45 = vld [vmem:[%s17378_s30 + $0x16c8] sm:$0xff]  ;;  %2118 = vst [vmem:[%s17383_s12 + $0xb58] sm:$0xff] %v2117_v43 }
  0xc8   : > { %2120 = vst [vmem:[%s17383_s12 + $0xb60] sm:$0xff] %v2119_v44  ;;  %2122 = vst [vmem:[%s17383_s12 + $0xb68] sm:$0xff] %v2121_v45  ;;  %v2123_v46 = vld [vmem:[%s17378_s30 + $0x16e0] sm:$0xff]  ;;  %v2125_v47 = vld [vmem:[%s17378_s30 + $0x16e8] sm:$0xff] }
  0xc9   : > { %v2127_v48 = vld [vmem:[%s17378_s30 + $0x1700] sm:$0xff]  ;;  %2124 = vst [vmem:[%s17383_s12 + $0xb70] sm:$0xff] %v2123_v46  ;;  %2126 = vst [vmem:[%s17383_s12 + $0xb78] sm:$0xff] %v2125_v47  ;;  %v2129_v49 = vld [vmem:[%s17378_s30 + $0x1708] sm:$0xff] }
  0xca   : > { %2128 = vst [vmem:[%s17383_s12 + $0xb80] sm:$0xff] %v2127_v48  ;;  %v2131_v50 = vld [vmem:[%s17378_s30 + $0x1720] sm:$0xff]  ;;  %v2133_v51 = vld [vmem:[%s17378_s30 + $0x1728] sm:$0xff]  ;;  %2130 = vst [vmem:[%s17383_s12 + $0xb88] sm:$0xff] %v2129_v49 }
  0xcb   : > { %2132 = vst [vmem:[%s17383_s12 + $0xb90] sm:$0xff] %v2131_v50  ;;  %2134 = vst [vmem:[%s17383_s12 + $0xb98] sm:$0xff] %v2133_v51  ;;  %v2135_v52 = vld [vmem:[%s17378_s30 + $0x1740] sm:$0xff]  ;;  %v2137_v53 = vld [vmem:[%s17378_s30 + $0x1748] sm:$0xff] }
  0xcc   : > { %v2139_v54 = vld [vmem:[%s17378_s30 + $0x1760] sm:$0xff]  ;;  %2136 = vst [vmem:[%s17383_s12 + $0xba0] sm:$0xff] %v2135_v52  ;;  %2138 = vst [vmem:[%s17383_s12 + $0xba8] sm:$0xff] %v2137_v53  ;;  %v2141_v55 = vld [vmem:[%s17378_s30 + $0x1768] sm:$0xff] }
  0xcd   : > { %2140 = vst [vmem:[%s17383_s12 + $0xbb0] sm:$0xff] %v2139_v54  ;;  %v2143_v56 = vld [vmem:[%s17378_s30 + $0x1780] sm:$0xff]  ;;  %v2145_v57 = vld [vmem:[%s17378_s30 + $0x1788] sm:$0xff]  ;;  %2142 = vst [vmem:[%s17383_s12 + $0xbb8] sm:$0xff] %v2141_v55 }
  0xce   : > { %2144 = vst [vmem:[%s17383_s12 + $0xbc0] sm:$0xff] %v2143_v56  ;;  %2146 = vst [vmem:[%s17383_s12 + $0xbc8] sm:$0xff] %v2145_v57  ;;  %v2147_v58 = vld [vmem:[%s17378_s30 + $0x17a0] sm:$0xff]  ;;  %v2149_v59 = vld [vmem:[%s17378_s30 + $0x17a8] sm:$0xff] }
  0xcf   : > { %v2151_v60 = vld [vmem:[%s17378_s30 + $0x17c0] sm:$0xff]  ;;  %2148 = vst [vmem:[%s17383_s12 + $0xbd0] sm:$0xff] %v2147_v58  ;;  %2150 = vst [vmem:[%s17383_s12 + $0xbd8] sm:$0xff] %v2149_v59  ;;  %v2153_v61 = vld [vmem:[%s17378_s30 + $0x17c8] sm:$0xff] }
  0xd0   : > { %2152 = vst [vmem:[%s17383_s12 + $0xbe0] sm:$0xff] %v2151_v60  ;;  %v2155_v62 = vld [vmem:[%s17378_s30 + $0x17e0] sm:$0xff]  ;;  %v2157_v63 = vld [vmem:[%s17378_s30 + $0x17e8] sm:$0xff]  ;;  %2154 = vst [vmem:[%s17383_s12 + $0xbe8] sm:$0xff] %v2153_v61 }
  0xd1   : > { %2156 = vst [vmem:[%s17383_s12 + $0xbf0] sm:$0xff] %v2155_v62  ;;  %2158 = vst [vmem:[%s17383_s12 + $0xbf8] sm:$0xff] %v2157_v63  ;;  %v2159_v0 = vld [vmem:[%s17378_s30 + $0x1800] sm:$0xff]  ;;  %v2161_v1 = vld [vmem:[%s17378_s30 + $0x1808] sm:$0xff] }
  0xd2   : > { %v2163_v2 = vld [vmem:[%s17378_s30 + $0x1820] sm:$0xff]  ;;  %2160 = vst [vmem:[%s17383_s12 + $0xc00] sm:$0xff] %v2159_v0  ;;  %2162 = vst [vmem:[%s17383_s12 + $0xc08] sm:$0xff] %v2161_v1  ;;  %v2165_v3 = vld [vmem:[%s17378_s30 + $0x1828] sm:$0xff] }
  0xd3   : > { %2164 = vst [vmem:[%s17383_s12 + $0xc10] sm:$0xff] %v2163_v2  ;;  %v2167_v4 = vld [vmem:[%s17378_s30 + $0x1840] sm:$0xff]  ;;  %v2169_v5 = vld [vmem:[%s17378_s30 + $0x1848] sm:$0xff]  ;;  %2166 = vst [vmem:[%s17383_s12 + $0xc18] sm:$0xff] %v2165_v3 }
  0xd4   : > { %2168 = vst [vmem:[%s17383_s12 + $0xc20] sm:$0xff] %v2167_v4  ;;  %2170 = vst [vmem:[%s17383_s12 + $0xc28] sm:$0xff] %v2169_v5  ;;  %v2171_v6 = vld [vmem:[%s17378_s30 + $0x1860] sm:$0xff]  ;;  %v2173_v7 = vld [vmem:[%s17378_s30 + $0x1868] sm:$0xff] }
  0xd5   : > { %v2175_v8 = vld [vmem:[%s17378_s30 + $0x1880] sm:$0xff]  ;;  %2172 = vst [vmem:[%s17383_s12 + $0xc30] sm:$0xff] %v2171_v6  ;;  %2174 = vst [vmem:[%s17383_s12 + $0xc38] sm:$0xff] %v2173_v7  ;;  %v2177_v9 = vld [vmem:[%s17378_s30 + $0x1888] sm:$0xff] }
  0xd6   : > { %2176 = vst [vmem:[%s17383_s12 + $0xc40] sm:$0xff] %v2175_v8  ;;  %v2179_v10 = vld [vmem:[%s17378_s30 + $0x18a0] sm:$0xff]  ;;  %v2181_v11 = vld [vmem:[%s17378_s30 + $0x18a8] sm:$0xff]  ;;  %2178 = vst [vmem:[%s17383_s12 + $0xc48] sm:$0xff] %v2177_v9 }
  0xd7   : > { %2180 = vst [vmem:[%s17383_s12 + $0xc50] sm:$0xff] %v2179_v10  ;;  %2182 = vst [vmem:[%s17383_s12 + $0xc58] sm:$0xff] %v2181_v11  ;;  %v2183_v12 = vld [vmem:[%s17378_s30 + $0x18c0] sm:$0xff]  ;;  %v2185_v13 = vld [vmem:[%s17378_s30 + $0x18c8] sm:$0xff] }
  0xd8   : > { %v2187_v14 = vld [vmem:[%s17378_s30 + $0x18e0] sm:$0xff]  ;;  %2184 = vst [vmem:[%s17383_s12 + $0xc60] sm:$0xff] %v2183_v12  ;;  %2186 = vst [vmem:[%s17383_s12 + $0xc68] sm:$0xff] %v2185_v13  ;;  %v2189_v15 = vld [vmem:[%s17378_s30 + $0x18e8] sm:$0xff] }
  0xd9   : > { %2188 = vst [vmem:[%s17383_s12 + $0xc70] sm:$0xff] %v2187_v14  ;;  %v2191_v16 = vld [vmem:[%s17378_s30 + $0x1900] sm:$0xff]  ;;  %v2193_v17 = vld [vmem:[%s17378_s30 + $0x1908] sm:$0xff]  ;;  %2190 = vst [vmem:[%s17383_s12 + $0xc78] sm:$0xff] %v2189_v15 }
  0xda   : > { %2192 = vst [vmem:[%s17383_s12 + $0xc80] sm:$0xff] %v2191_v16  ;;  %2194 = vst [vmem:[%s17383_s12 + $0xc88] sm:$0xff] %v2193_v17  ;;  %v2195_v18 = vld [vmem:[%s17378_s30 + $0x1920] sm:$0xff]  ;;  %v2197_v19 = vld [vmem:[%s17378_s30 + $0x1928] sm:$0xff] }
  0xdb   : > { %v2199_v20 = vld [vmem:[%s17378_s30 + $0x1940] sm:$0xff]  ;;  %2196 = vst [vmem:[%s17383_s12 + $0xc90] sm:$0xff] %v2195_v18  ;;  %2198 = vst [vmem:[%s17383_s12 + $0xc98] sm:$0xff] %v2197_v19  ;;  %v2201_v21 = vld [vmem:[%s17378_s30 + $0x1948] sm:$0xff] }
  0xdc   : > { %2200 = vst [vmem:[%s17383_s12 + $0xca0] sm:$0xff] %v2199_v20  ;;  %v2203_v22 = vld [vmem:[%s17378_s30 + $0x1960] sm:$0xff]  ;;  %v2205_v23 = vld [vmem:[%s17378_s30 + $0x1968] sm:$0xff]  ;;  %2202 = vst [vmem:[%s17383_s12 + $0xca8] sm:$0xff] %v2201_v21 }
  0xdd   : > { %2204 = vst [vmem:[%s17383_s12 + $0xcb0] sm:$0xff] %v2203_v22  ;;  %2206 = vst [vmem:[%s17383_s12 + $0xcb8] sm:$0xff] %v2205_v23  ;;  %v2207_v24 = vld [vmem:[%s17378_s30 + $0x1980] sm:$0xff]  ;;  %v2209_v25 = vld [vmem:[%s17378_s30 + $0x1988] sm:$0xff] }
  0xde   : > { %v2211_v26 = vld [vmem:[%s17378_s30 + $0x19a0] sm:$0xff]  ;;  %2208 = vst [vmem:[%s17383_s12 + $0xcc0] sm:$0xff] %v2207_v24  ;;  %2210 = vst [vmem:[%s17383_s12 + $0xcc8] sm:$0xff] %v2209_v25  ;;  %v2213_v27 = vld [vmem:[%s17378_s30 + $0x19a8] sm:$0xff] }
  0xdf   : > { %2212 = vst [vmem:[%s17383_s12 + $0xcd0] sm:$0xff] %v2211_v26  ;;  %v2215_v28 = vld [vmem:[%s17378_s30 + $0x19c0] sm:$0xff]  ;;  %v2217_v29 = vld [vmem:[%s17378_s30 + $0x19c8] sm:$0xff]  ;;  %2214 = vst [vmem:[%s17383_s12 + $0xcd8] sm:$0xff] %v2213_v27 }
  0xe0   : > { %2216 = vst [vmem:[%s17383_s12 + $0xce0] sm:$0xff] %v2215_v28  ;;  %2218 = vst [vmem:[%s17383_s12 + $0xce8] sm:$0xff] %v2217_v29  ;;  %v2219_v30 = vld [vmem:[%s17378_s30 + $0x19e0] sm:$0xff]  ;;  %v2221_v31 = vld [vmem:[%s17378_s30 + $0x19e8] sm:$0xff] }
  0xe1   : > { %v2223_v32 = vld [vmem:[%s17378_s30 + $0x1a00] sm:$0xff]  ;;  %2220 = vst [vmem:[%s17383_s12 + $0xcf0] sm:$0xff] %v2219_v30  ;;  %2222 = vst [vmem:[%s17383_s12 + $0xcf8] sm:$0xff] %v2221_v31  ;;  %v2225_v33 = vld [vmem:[%s17378_s30 + $0x1a08] sm:$0xff] }
  0xe2   : > { %2224 = vst [vmem:[%s17383_s12 + $0xd00] sm:$0xff] %v2223_v32  ;;  %v2227_v34 = vld [vmem:[%s17378_s30 + $0x1a20] sm:$0xff]  ;;  %v2229_v35 = vld [vmem:[%s17378_s30 + $0x1a28] sm:$0xff]  ;;  %2226 = vst [vmem:[%s17383_s12 + $0xd08] sm:$0xff] %v2225_v33 }
  0xe3   : > { %2228 = vst [vmem:[%s17383_s12 + $0xd10] sm:$0xff] %v2227_v34  ;;  %2230 = vst [vmem:[%s17383_s12 + $0xd18] sm:$0xff] %v2229_v35  ;;  %v2231_v36 = vld [vmem:[%s17378_s30 + $0x1a40] sm:$0xff]  ;;  %v2233_v37 = vld [vmem:[%s17378_s30 + $0x1a48] sm:$0xff] }
  0xe4   : > { %v2235_v38 = vld [vmem:[%s17378_s30 + $0x1a60] sm:$0xff]  ;;  %2232 = vst [vmem:[%s17383_s12 + $0xd20] sm:$0xff] %v2231_v36  ;;  %2234 = vst [vmem:[%s17383_s12 + $0xd28] sm:$0xff] %v2233_v37  ;;  %v2237_v39 = vld [vmem:[%s17378_s30 + $0x1a68] sm:$0xff] }
  0xe5   : > { %2236 = vst [vmem:[%s17383_s12 + $0xd30] sm:$0xff] %v2235_v38  ;;  %v2239_v40 = vld [vmem:[%s17378_s30 + $0x1a80] sm:$0xff]  ;;  %v2241_v41 = vld [vmem:[%s17378_s30 + $0x1a88] sm:$0xff]  ;;  %2238 = vst [vmem:[%s17383_s12 + $0xd38] sm:$0xff] %v2237_v39 }
  0xe6   : > { %2240 = vst [vmem:[%s17383_s12 + $0xd40] sm:$0xff] %v2239_v40  ;;  %2242 = vst [vmem:[%s17383_s12 + $0xd48] sm:$0xff] %v2241_v41  ;;  %v2243_v42 = vld [vmem:[%s17378_s30 + $0x1aa0] sm:$0xff]  ;;  %v2245_v43 = vld [vmem:[%s17378_s30 + $0x1aa8] sm:$0xff] }
  0xe7   : > { %v2247_v44 = vld [vmem:[%s17378_s30 + $0x1ac0] sm:$0xff]  ;;  %2244 = vst [vmem:[%s17383_s12 + $0xd50] sm:$0xff] %v2243_v42  ;;  %2246 = vst [vmem:[%s17383_s12 + $0xd58] sm:$0xff] %v2245_v43  ;;  %v2249_v45 = vld [vmem:[%s17378_s30 + $0x1ac8] sm:$0xff] }
  0xe8   : > { %2248 = vst [vmem:[%s17383_s12 + $0xd60] sm:$0xff] %v2247_v44  ;;  %v2251_v46 = vld [vmem:[%s17378_s30 + $0x1ae0] sm:$0xff]  ;;  %v2253_v47 = vld [vmem:[%s17378_s30 + $0x1ae8] sm:$0xff]  ;;  %2250 = vst [vmem:[%s17383_s12 + $0xd68] sm:$0xff] %v2249_v45 }
  0xe9   : > { %2252 = vst [vmem:[%s17383_s12 + $0xd70] sm:$0xff] %v2251_v46  ;;  %2254 = vst [vmem:[%s17383_s12 + $0xd78] sm:$0xff] %v2253_v47  ;;  %v2255_v48 = vld [vmem:[%s17378_s30 + $0x1b00] sm:$0xff]  ;;  %v2257_v49 = vld [vmem:[%s17378_s30 + $0x1b08] sm:$0xff] }
  0xea   : > { %v2259_v50 = vld [vmem:[%s17378_s30 + $0x1b20] sm:$0xff]  ;;  %2256 = vst [vmem:[%s17383_s12 + $0xd80] sm:$0xff] %v2255_v48  ;;  %2258 = vst [vmem:[%s17383_s12 + $0xd88] sm:$0xff] %v2257_v49  ;;  %v2261_v51 = vld [vmem:[%s17378_s30 + $0x1b28] sm:$0xff] }
  0xeb   : > { %2260 = vst [vmem:[%s17383_s12 + $0xd90] sm:$0xff] %v2259_v50  ;;  %v2263_v52 = vld [vmem:[%s17378_s30 + $0x1b40] sm:$0xff]  ;;  %v2265_v53 = vld [vmem:[%s17378_s30 + $0x1b48] sm:$0xff]  ;;  %2262 = vst [vmem:[%s17383_s12 + $0xd98] sm:$0xff] %v2261_v51 }
  0xec   : > { %2264 = vst [vmem:[%s17383_s12 + $0xda0] sm:$0xff] %v2263_v52  ;;  %2266 = vst [vmem:[%s17383_s12 + $0xda8] sm:$0xff] %v2265_v53  ;;  %v2267_v54 = vld [vmem:[%s17378_s30 + $0x1b60] sm:$0xff]  ;;  %v2269_v55 = vld [vmem:[%s17378_s30 + $0x1b68] sm:$0xff] }
  0xed   : > { %v2271_v56 = vld [vmem:[%s17378_s30 + $0x1b80] sm:$0xff]  ;;  %2268 = vst [vmem:[%s17383_s12 + $0xdb0] sm:$0xff] %v2267_v54  ;;  %2270 = vst [vmem:[%s17383_s12 + $0xdb8] sm:$0xff] %v2269_v55  ;;  %v2273_v57 = vld [vmem:[%s17378_s30 + $0x1b88] sm:$0xff] }
  0xee   : > { %2272 = vst [vmem:[%s17383_s12 + $0xdc0] sm:$0xff] %v2271_v56  ;;  %v2275_v58 = vld [vmem:[%s17378_s30 + $0x1ba0] sm:$0xff]  ;;  %v2277_v59 = vld [vmem:[%s17378_s30 + $0x1ba8] sm:$0xff]  ;;  %2274 = vst [vmem:[%s17383_s12 + $0xdc8] sm:$0xff] %v2273_v57 }
  0xef   : > { %2276 = vst [vmem:[%s17383_s12 + $0xdd0] sm:$0xff] %v2275_v58  ;;  %2278 = vst [vmem:[%s17383_s12 + $0xdd8] sm:$0xff] %v2277_v59  ;;  %v2279_v60 = vld [vmem:[%s17378_s30 + $0x1bc0] sm:$0xff]  ;;  %v2281_v61 = vld [vmem:[%s17378_s30 + $0x1bc8] sm:$0xff] }
  0xf0   : > { %v2283_v62 = vld [vmem:[%s17378_s30 + $0x1be0] sm:$0xff]  ;;  %2280 = vst [vmem:[%s17383_s12 + $0xde0] sm:$0xff] %v2279_v60  ;;  %2282 = vst [vmem:[%s17383_s12 + $0xde8] sm:$0xff] %v2281_v61  ;;  %v2285_v63 = vld [vmem:[%s17378_s30 + $0x1be8] sm:$0xff] }
  0xf1   : > { %2284 = vst [vmem:[%s17383_s12 + $0xdf0] sm:$0xff] %v2283_v62  ;;  %v2287_v0 = vld [vmem:[%s17378_s30 + $0x1c00] sm:$0xff]  ;;  %v2289_v1 = vld [vmem:[%s17378_s30 + $0x1c08] sm:$0xff]  ;;  %2286 = vst [vmem:[%s17383_s12 + $0xdf8] sm:$0xff] %v2285_v63 }
  0xf2   : > { %2288 = vst [vmem:[%s17383_s12 + $0xe00] sm:$0xff] %v2287_v0  ;;  %2290 = vst [vmem:[%s17383_s12 + $0xe08] sm:$0xff] %v2289_v1  ;;  %v2291_v2 = vld [vmem:[%s17378_s30 + $0x1c20] sm:$0xff]  ;;  %v2293_v3 = vld [vmem:[%s17378_s30 + $0x1c28] sm:$0xff] }
  0xf3   : > { %v2295_v4 = vld [vmem:[%s17378_s30 + $0x1c40] sm:$0xff]  ;;  %2292 = vst [vmem:[%s17383_s12 + $0xe10] sm:$0xff] %v2291_v2  ;;  %2294 = vst [vmem:[%s17383_s12 + $0xe18] sm:$0xff] %v2293_v3  ;;  %v2297_v5 = vld [vmem:[%s17378_s30 + $0x1c48] sm:$0xff] }
  0xf4   : > { %2296 = vst [vmem:[%s17383_s12 + $0xe20] sm:$0xff] %v2295_v4  ;;  %v2299_v6 = vld [vmem:[%s17378_s30 + $0x1c60] sm:$0xff]  ;;  %v2301_v7 = vld [vmem:[%s17378_s30 + $0x1c68] sm:$0xff]  ;;  %2298 = vst [vmem:[%s17383_s12 + $0xe28] sm:$0xff] %v2297_v5 }
  0xf5   : > { %2300 = vst [vmem:[%s17383_s12 + $0xe30] sm:$0xff] %v2299_v6  ;;  %2302 = vst [vmem:[%s17383_s12 + $0xe38] sm:$0xff] %v2301_v7  ;;  %v2303_v8 = vld [vmem:[%s17378_s30 + $0x1c80] sm:$0xff]  ;;  %v2305_v9 = vld [vmem:[%s17378_s30 + $0x1c88] sm:$0xff] }
  0xf6   : > { %v2307_v10 = vld [vmem:[%s17378_s30 + $0x1ca0] sm:$0xff]  ;;  %2304 = vst [vmem:[%s17383_s12 + $0xe40] sm:$0xff] %v2303_v8  ;;  %2306 = vst [vmem:[%s17383_s12 + $0xe48] sm:$0xff] %v2305_v9  ;;  %v2309_v11 = vld [vmem:[%s17378_s30 + $0x1ca8] sm:$0xff] }
  0xf7   : > { %2308 = vst [vmem:[%s17383_s12 + $0xe50] sm:$0xff] %v2307_v10  ;;  %v2311_v12 = vld [vmem:[%s17378_s30 + $0x1cc0] sm:$0xff]  ;;  %v2313_v13 = vld [vmem:[%s17378_s30 + $0x1cc8] sm:$0xff]  ;;  %2310 = vst [vmem:[%s17383_s12 + $0xe58] sm:$0xff] %v2309_v11 }
  0xf8   : > { %2312 = vst [vmem:[%s17383_s12 + $0xe60] sm:$0xff] %v2311_v12  ;;  %2314 = vst [vmem:[%s17383_s12 + $0xe68] sm:$0xff] %v2313_v13  ;;  %v2315_v14 = vld [vmem:[%s17378_s30 + $0x1ce0] sm:$0xff]  ;;  %v2317_v15 = vld [vmem:[%s17378_s30 + $0x1ce8] sm:$0xff] }
  0xf9   : > { %v2319_v16 = vld [vmem:[%s17378_s30 + $0x1d00] sm:$0xff]  ;;  %2316 = vst [vmem:[%s17383_s12 + $0xe70] sm:$0xff] %v2315_v14  ;;  %2318 = vst [vmem:[%s17383_s12 + $0xe78] sm:$0xff] %v2317_v15  ;;  %v2321_v17 = vld [vmem:[%s17378_s30 + $0x1d08] sm:$0xff] }
  0xfa   : > { %2320 = vst [vmem:[%s17383_s12 + $0xe80] sm:$0xff] %v2319_v16  ;;  %v2323_v18 = vld [vmem:[%s17378_s30 + $0x1d20] sm:$0xff]  ;;  %v2325_v19 = vld [vmem:[%s17378_s30 + $0x1d28] sm:$0xff]  ;;  %2322 = vst [vmem:[%s17383_s12 + $0xe88] sm:$0xff] %v2321_v17 }
  0xfb   : > { %2324 = vst [vmem:[%s17383_s12 + $0xe90] sm:$0xff] %v2323_v18  ;;  %2326 = vst [vmem:[%s17383_s12 + $0xe98] sm:$0xff] %v2325_v19  ;;  %v2327_v20 = vld [vmem:[%s17378_s30 + $0x1d40] sm:$0xff]  ;;  %v2329_v21 = vld [vmem:[%s17378_s30 + $0x1d48] sm:$0xff] }
  0xfc   : > { %v2331_v22 = vld [vmem:[%s17378_s30 + $0x1d60] sm:$0xff]  ;;  %2328 = vst [vmem:[%s17383_s12 + $0xea0] sm:$0xff] %v2327_v20  ;;  %2330 = vst [vmem:[%s17383_s12 + $0xea8] sm:$0xff] %v2329_v21  ;;  %v2333_v23 = vld [vmem:[%s17378_s30 + $0x1d68] sm:$0xff] }
  0xfd   : > { %2332 = vst [vmem:[%s17383_s12 + $0xeb0] sm:$0xff] %v2331_v22  ;;  %v2335_v24 = vld [vmem:[%s17378_s30 + $0x1d80] sm:$0xff]  ;;  %v2337_v25 = vld [vmem:[%s17378_s30 + $0x1d88] sm:$0xff]  ;;  %2334 = vst [vmem:[%s17383_s12 + $0xeb8] sm:$0xff] %v2333_v23 }
  0xfe   : > { %2336 = vst [vmem:[%s17383_s12 + $0xec0] sm:$0xff] %v2335_v24  ;;  %2338 = vst [vmem:[%s17383_s12 + $0xec8] sm:$0xff] %v2337_v25  ;;  %v2339_v26 = vld [vmem:[%s17378_s30 + $0x1da0] sm:$0xff]  ;;  %v2341_v27 = vld [vmem:[%s17378_s30 + $0x1da8] sm:$0xff] }
  0xff   : > { %v2343_v28 = vld [vmem:[%s17378_s30 + $0x1dc0] sm:$0xff]  ;;  %2340 = vst [vmem:[%s17383_s12 + $0xed0] sm:$0xff] %v2339_v26  ;;  %2342 = vst [vmem:[%s17383_s12 + $0xed8] sm:$0xff] %v2341_v27  ;;  %v2345_v29 = vld [vmem:[%s17378_s30 + $0x1dc8] sm:$0xff] }
 0x100   : > { %2344 = vst [vmem:[%s17383_s12 + $0xee0] sm:$0xff] %v2343_v28  ;;  %v2347_v30 = vld [vmem:[%s17378_s30 + $0x1de0] sm:$0xff]  ;;  %v2349_v31 = vld [vmem:[%s17378_s30 + $0x1de8] sm:$0xff]  ;;  %2346 = vst [vmem:[%s17383_s12 + $0xee8] sm:$0xff] %v2345_v29 }
 0x101   : > { %2348 = vst [vmem:[%s17383_s12 + $0xef0] sm:$0xff] %v2347_v30  ;;  %2350 = vst [vmem:[%s17383_s12 + $0xef8] sm:$0xff] %v2349_v31  ;;  %v2351_v32 = vld [vmem:[%s17378_s30 + $0x1e00] sm:$0xff]  ;;  %v2353_v33 = vld [vmem:[%s17378_s30 + $0x1e08] sm:$0xff] }
 0x102   : > { %v2355_v34 = vld [vmem:[%s17378_s30 + $0x1e20] sm:$0xff]  ;;  %2352 = vst [vmem:[%s17383_s12 + $0xf00] sm:$0xff] %v2351_v32  ;;  %2354 = vst [vmem:[%s17383_s12 + $0xf08] sm:$0xff] %v2353_v33  ;;  %v2357_v35 = vld [vmem:[%s17378_s30 + $0x1e28] sm:$0xff] }
 0x103   : > { %2356 = vst [vmem:[%s17383_s12 + $0xf10] sm:$0xff] %v2355_v34  ;;  %v2359_v36 = vld [vmem:[%s17378_s30 + $0x1e40] sm:$0xff]  ;;  %v2361_v37 = vld [vmem:[%s17378_s30 + $0x1e48] sm:$0xff]  ;;  %2358 = vst [vmem:[%s17383_s12 + $0xf18] sm:$0xff] %v2357_v35 }
 0x104   : > { %2360 = vst [vmem:[%s17383_s12 + $0xf20] sm:$0xff] %v2359_v36  ;;  %2362 = vst [vmem:[%s17383_s12 + $0xf28] sm:$0xff] %v2361_v37  ;;  %v2363_v38 = vld [vmem:[%s17378_s30 + $0x1e60] sm:$0xff]  ;;  %v2365_v39 = vld [vmem:[%s17378_s30 + $0x1e68] sm:$0xff] }
 0x105   : > { %v2367_v40 = vld [vmem:[%s17378_s30 + $0x1e80] sm:$0xff]  ;;  %2364 = vst [vmem:[%s17383_s12 + $0xf30] sm:$0xff] %v2363_v38  ;;  %2366 = vst [vmem:[%s17383_s12 + $0xf38] sm:$0xff] %v2365_v39  ;;  %v2369_v41 = vld [vmem:[%s17378_s30 + $0x1e88] sm:$0xff] }
 0x106   : > { %2368 = vst [vmem:[%s17383_s12 + $0xf40] sm:$0xff] %v2367_v40  ;;  %v2371_v42 = vld [vmem:[%s17378_s30 + $0x1ea0] sm:$0xff]  ;;  %v2373_v43 = vld [vmem:[%s17378_s30 + $0x1ea8] sm:$0xff]  ;;  %2370 = vst [vmem:[%s17383_s12 + $0xf48] sm:$0xff] %v2369_v41 }
 0x107   : > { %2372 = vst [vmem:[%s17383_s12 + $0xf50] sm:$0xff] %v2371_v42  ;;  %2374 = vst [vmem:[%s17383_s12 + $0xf58] sm:$0xff] %v2373_v43  ;;  %v2375_v44 = vld [vmem:[%s17378_s30 + $0x1ec0] sm:$0xff]  ;;  %v2377_v45 = vld [vmem:[%s17378_s30 + $0x1ec8] sm:$0xff] }
 0x108   : > { %v2379_v46 = vld [vmem:[%s17378_s30 + $0x1ee0] sm:$0xff]  ;;  %2376 = vst [vmem:[%s17383_s12 + $0xf60] sm:$0xff] %v2375_v44  ;;  %2378 = vst [vmem:[%s17383_s12 + $0xf68] sm:$0xff] %v2377_v45  ;;  %v2381_v47 = vld [vmem:[%s17378_s30 + $0x1ee8] sm:$0xff] }
 0x109   : > { %2380 = vst [vmem:[%s17383_s12 + $0xf70] sm:$0xff] %v2379_v46  ;;  %v2383_v48 = vld [vmem:[%s17378_s30 + $0x1f00] sm:$0xff]  ;;  %v2385_v49 = vld [vmem:[%s17378_s30 + $0x1f08] sm:$0xff]  ;;  %2382 = vst [vmem:[%s17383_s12 + $0xf78] sm:$0xff] %v2381_v47 }
 0x10a   : > { %2384 = vst [vmem:[%s17383_s12 + $0xf80] sm:$0xff] %v2383_v48  ;;  %2386 = vst [vmem:[%s17383_s12 + $0xf88] sm:$0xff] %v2385_v49  ;;  %v2387_v50 = vld [vmem:[%s17378_s30 + $0x1f20] sm:$0xff]  ;;  %v2389_v51 = vld [vmem:[%s17378_s30 + $0x1f28] sm:$0xff] }
 0x10b   : > { %v2391_v52 = vld [vmem:[%s17378_s30 + $0x1f40] sm:$0xff]  ;;  %2388 = vst [vmem:[%s17383_s12 + $0xf90] sm:$0xff] %v2387_v50  ;;  %2390 = vst [vmem:[%s17383_s12 + $0xf98] sm:$0xff] %v2389_v51  ;;  %v2393_v53 = vld [vmem:[%s17378_s30 + $0x1f48] sm:$0xff] }
 0x10c   : > { %2392 = vst [vmem:[%s17383_s12 + $0xfa0] sm:$0xff] %v2391_v52  ;;  %v2395_v54 = vld [vmem:[%s17378_s30 + $0x1f60] sm:$0xff]  ;;  %v2397_v55 = vld [vmem:[%s17378_s30 + $0x1f68] sm:$0xff]  ;;  %2394 = vst [vmem:[%s17383_s12 + $0xfa8] sm:$0xff] %v2393_v53 }
 0x10d   : > { %2396 = vst [vmem:[%s17383_s12 + $0xfb0] sm:$0xff] %v2395_v54  ;;  %2398 = vst [vmem:[%s17383_s12 + $0xfb8] sm:$0xff] %v2397_v55  ;;  %v2399_v56 = vld [vmem:[%s17378_s30 + $0x1f80] sm:$0xff]  ;;  %v2401_v57 = vld [vmem:[%s17378_s30 + $0x1f88] sm:$0xff] }
 0x10e   : > { %v2403_v58 = vld [vmem:[%s17378_s30 + $0x1fa0] sm:$0xff]  ;;  %2400 = vst [vmem:[%s17383_s12 + $0xfc0] sm:$0xff] %v2399_v56  ;;  %2402 = vst [vmem:[%s17383_s12 + $0xfc8] sm:$0xff] %v2401_v57  ;;  %v2405_v59 = vld [vmem:[%s17378_s30 + $0x1fa8] sm:$0xff] }
 0x10f   : > { %2404 = vst [vmem:[%s17383_s12 + $0xfd0] sm:$0xff] %v2403_v58  ;;  %v2407_v60 = vld [vmem:[%s17378_s30 + $0x1fc0] sm:$0xff]  ;;  %v2409_v61 = vld [vmem:[%s17378_s30 + $0x1fc8] sm:$0xff]  ;;  %2406 = vst [vmem:[%s17383_s12 + $0xfd8] sm:$0xff] %v2405_v59 }
 0x110   : > { %2408 = vst [vmem:[%s17383_s12 + $0xfe0] sm:$0xff] %v2407_v60  ;;  %2410 = vst [vmem:[%s17383_s12 + $0xfe8] sm:$0xff] %v2409_v61  ;;  %v2411_v62 = vld [vmem:[%s17378_s30 + $0x1fe0] sm:$0xff]  ;;  %v2413_v63 = vld [vmem:[%s17378_s30 + $0x1fe8] sm:$0xff] }
 0x111   : > { %2412 = vst [vmem:[%s17383_s12 + $0xff0] sm:$0xff] %v2411_v62  ;;  %2414 = vst [vmem:[%s17383_s12 + $0xff8] sm:$0xff] %v2413_v63 }
 0x112 PF: > { %p14987_p5 = scmp.ge.s32.totalorder %s17278_s19, 1  ;;  %p4503_p6 = scmp.lt.s32.totalorder %s17278_s19, 3 }
 0x114   : > { %p4504_p7 = pnand %p14987_p5, %p4503_p6 }
 0x116   : > { %4507 = sbr.rel (%p4504_p7) target bundleno = 3268 (0xcc4), region = 112 }
 0x11d   : > { %v16125_v0 = vld [vmem:[%s21453_s1] sm:$0xff]   ;;  %v17280_v1 = vmov 0   ;;  %v16126_v2 = vld [vmem:[%s21453_s1 + $0x8] sm:$0xff]   ;;  %v16127_v3 = vld [vmem:[%s21453_s1 + $0x10] sm:$0xff]   ;;  %s4510_s25 = sand.u32 1, %s17270_s17   ;;  %vm9838_vm0 = vcmask 261120  }
 0x11e   : > { %7757 = vmatprep.subr.bf16.mxu0 %v17280_v1  ;;  %16049 = vmatprep.subr.bf16.mxu1 %v17280_v1  ;;  %v16128_v4 = vld [vmem:[%s21453_s1 + $0x18] sm:$0xff]   ;;  %s14988_s28 = sshll.u32 %s4510_s25, 12  ;;  %v16129_v5 = vld [vmem:[%s21453_s1 + $0x20] sm:$0xff]   ;;  %v16130_v7 = vld [vmem:[%s21453_s1 + $0x28] sm:$0xff]   ;;  %s17281_s27 = smov 96   ;;  %vm9999_vm1 = vcmask 523520  }
 0x11f   : > { %7758 = vmatpush1.bf16.msra.mxu0 %v16125_v0  ;;  %16065 = vmatpush1.bf16.msra.mxu1 %v16125_v0  ;;  %s18434_s17 = scalar_lea.vmem [#allocation4], %s14988_s28  ;;  %v16131_v9 = vld [vmem:[%s21453_s1 + $0x30] sm:$0xff]   ;;  %v16132_v10 = vld [vmem:[%s21453_s1 + $0x38] sm:$0xff]   ;;  %v16133_v11 = vld [vmem:[%s21453_s1 + $0x40] sm:$0xff]   ;;  %s17282_s28 = smov 32   ;;  %vm10160_vm2 = vcmask 785920  }
 0x120   : > { %7759 = vmatprep.subr.bf16.mxu0 %v17280_v1  ;;  %16050 = vmatprep.subr.bf16.mxu1 %v17280_v1  ;;  %v16143_v6 = vld [vmem:[%s18434_s17 + $0x4] ss:$8 sps:$4 sm:$0xff]   ;;  %v16146_v8 = vld [vmem:[%s18434_s17 + $0xa94] ss:$8 sps:$4 sm:$0xff]   ;;  %v16141_v19 = vld [vmem:[%s18434_s17] ss:$8 sps:$4 sm:$0xff]  }
 0x121   : > { %7789 = vmatprep.mubr.bf16.mxu0 %v16143_v6  ;;  %9141 = vmatprep.mubr.bf16.mxu1 %v16146_v8  ;;  %v16134_v12 = vld [vmem:[%s21453_s1 + $0x48] sm:$0xff]   ;;  %v16135_v13 = vld [vmem:[%s21453_s1 + $0x50] sm:$0xff]   ;;  %v16136_v14 = vld [vmem:[%s21453_s1 + $0x58] sm:$0xff]   ;;  %s17283_s29 = smov 64   ;;  %vm10321_vm3 = vcmask 1048320   ;;  %vm12977_vm4 = vcmask 523264  }
 0x122   : > { %v16137_v15 = vld [vmem:[%s21453_s1 + $0x60] sm:$0xff]   ;;  %v16138_v16 = vld [vmem:[%s21453_s1 + $0x68] sm:$0xff]   ;;  %v16139_v17 = vld [vmem:[%s21453_s1 + $0x70] sm:$0xff]   ;;  %vm12988_vm5 = vcmask 1048064  }
 0x123   : > { %7760 = vmatpush1.bf16.msra.mxu0 %v16126_v2  ;;  %16066 = vmatpush1.bf16.msra.mxu1 %v16126_v2  ;;  %v16140_v18 = vld [vmem:[%s21453_s1 + $0x78] sm:$0xff]   ;;  %v16150_v22 = vld [vmem:[%s18434_s17 + $0xaa4] ss:$8 sps:$4 sm:$0xff]   ;;  %v16152_v24 = vld [vmem:[%s18434_s17 + $0xaa0] ss:$8 sps:$4 sm:$0xff]  }
 0x124   : > { %7761 = vmatprep.subr.bf16.mxu0 %v17280_v1  ;;  %16051 = vmatprep.subr.bf16.mxu1 %v17280_v1  ;;  %v16144_v20 = vld [vmem:[%s18434_s17 + $0xa90] ss:$8 sps:$4 sm:$0xff]   ;;  %v16147_v21 = vld [vmem:[%s18434_s17 + $0x14] ss:$8 sps:$4 sm:$0xff]   ;;  %v16153_v25 = vld [vmem:[%s18434_s17 + $0x24] ss:$8 sps:$4 sm:$0xff]  }
 0x125   : > { %v16149_v23 = vld [vmem:[%s18434_s17 + $0x10] ss:$8 sps:$4 sm:$0xff]   ;;  %v16156_v26 = vld [vmem:[%s18434_s17 + $0xab4] ss:$8 sps:$4 sm:$0xff]   ;;  %v16155_v27 = vld [vmem:[%s18434_s17 + $0x20] ss:$8 sps:$4 sm:$0xff]  }
 0x126   : > { %v16158_v28 = vld [vmem:[%s18434_s17 + $0xab0] ss:$8 sps:$4 sm:$0xff]   ;;  %v16159_v29 = vld [vmem:[%s18434_s17 + $0x34] ss:$8 sps:$4 sm:$0xff]   ;;  %v16162_v30 = vld [vmem:[%s18434_s17 + $0xac4] ss:$8 sps:$4 sm:$0xff]  }
 0x127   : > { %7762 = vmatpush1.bf16.msra.mxu0 %v16127_v3  ;;  %16067 = vmatpush1.bf16.msra.mxu1 %v16127_v3  ;;  %v16161_v31 = vld [vmem:[%s18434_s17 + $0x30] ss:$8 sps:$4 sm:$0xff]   ;;  %v16164_v32 = vld [vmem:[%s18434_s17 + $0xac0] ss:$8 sps:$4 sm:$0xff]   ;;  %v16165_v33 = vld [vmem:[%s18434_s17 + $0x44] ss:$8 sps:$4 sm:$0xff]  }
 0x128   : > { %7763 = vmatprep.subr.bf16.mxu0 %v17280_v1  ;;  %16052 = vmatprep.subr.bf16.mxu1 %v17280_v1  ;;  %v16168_v34 = vld [vmem:[%s18434_s17 + $0xad4] ss:$8 sps:$4 sm:$0xff]   ;;  %v16167_v35 = vld [vmem:[%s18434_s17 + $0x40] ss:$8 sps:$4 sm:$0xff]   ;;  %v16170_v36 = vld [vmem:[%s18434_s17 + $0xad0] ss:$8 sps:$4 sm:$0xff]  }
 0x129   : > { %v16171_v37 = vld [vmem:[%s18434_s17 + $0x54] ss:$8 sps:$4 sm:$0xff]   ;;  %v16174_v38 = vld [vmem:[%s18434_s17 + $0xae4] ss:$8 sps:$4 sm:$0xff]   ;;  %v16173_v39 = vld [vmem:[%s18434_s17 + $0x50] ss:$8 sps:$4 sm:$0xff]  }
 0x12a   : > { %v16176_v40 = vld [vmem:[%s18434_s17 + $0xae0] ss:$8 sps:$4 sm:$0xff]   ;;  %v16177_v41 = vld [vmem:[%s18434_s17 + $0x64] ss:$8 sps:$4 sm:$0xff]   ;;  %v16180_v42 = vld [vmem:[%s18434_s17 + $0xaf4] ss:$8 sps:$4 sm:$0xff]  }
 0x12b   : > { %7764 = vmatpush1.bf16.msra.mxu0 %v16128_v4  ;;  %16068 = vmatpush1.bf16.msra.mxu1 %v16128_v4  ;;  %v16179_v43 = vld [vmem:[%s18434_s17 + $0x60] ss:$8 sps:$4 sm:$0xff]   ;;  %v16182_v44 = vld [vmem:[%s18434_s17 + $0xaf0] ss:$8 sps:$4 sm:$0xff]   ;;  %v16183_v45 = vld [vmem:[%s18434_s17 + $0x74] ss:$8 sps:$4 sm:$0xff]  }
 0x12c   : > { %7765 = vmatprep.subr.bf16.mxu0 %v17280_v1  ;;  %16053 = vmatprep.subr.bf16.mxu1 %v17280_v1  ;;  %v16186_v46 = vld [vmem:[%s18434_s17 + $0xb04] ss:$8 sps:$4 sm:$0xff]   ;;  %v16185_v47 = vld [vmem:[%s18434_s17 + $0x70] ss:$8 sps:$4 sm:$0xff]   ;;  %v16188_v48 = vld [vmem:[%s18434_s17 + $0xb00] ss:$8 sps:$4 sm:$0xff]  }
 0x12d   : > { %v16189_v49 = vld [vmem:[%s18434_s17 + $0x84] ss:$8 sps:$4 sm:$0xff]   ;;  %v16192_v50 = vld [vmem:[%s18434_s17 + $0xb14] ss:$8 sps:$4 sm:$0xff]   ;;  %v16191_v51 = vld [vmem:[%s18434_s17 + $0x80] ss:$8 sps:$4 sm:$0xff]  }
 0x12e   : > { %v16194_v52 = vld [vmem:[%s18434_s17 + $0xb10] ss:$8 sps:$4 sm:$0xff]   ;;  %v16195_v53 = vld [vmem:[%s18434_s17 + $0x94] ss:$8 sps:$4 sm:$0xff]   ;;  %v16198_v54 = vld [vmem:[%s18434_s17 + $0xb24] ss:$8 sps:$4 sm:$0xff]  }
 0x12f   : > { %7766 = vmatpush1.bf16.msra.mxu0 %v16129_v5  ;;  %16069 = vmatpush1.bf16.msra.mxu1 %v16129_v5  ;;  %v16197_v55 = vld [vmem:[%s18434_s17 + $0x90] ss:$8 sps:$4 sm:$0xff]   ;;  %v16200_v56 = vld [vmem:[%s18434_s17 + $0xb20] ss:$8 sps:$4 sm:$0xff]   ;;  %v16201_v57 = vld [vmem:[%s18434_s17 + $0xa4] ss:$8 sps:$4 sm:$0xff]  }
 0x130   : > { %7767 = vmatprep.subr.bf16.mxu0 %v17280_v1  ;;  %16054 = vmatprep.subr.bf16.mxu1 %v17280_v1  ;;  %v16204_v58 = vld [vmem:[%s18434_s17 + $0xb34] ss:$8 sps:$4 sm:$0xff]   ;;  %v16203_v59 = vld [vmem:[%s18434_s17 + $0xa0] ss:$8 sps:$4 sm:$0xff]   ;;  %v16206_v60 = vld [vmem:[%s18434_s17 + $0xb30] ss:$8 sps:$4 sm:$0xff]  }
 0x131   : > { %v16207_v61 = vld [vmem:[%s18434_s17 + $0xb4] ss:$8 sps:$4 sm:$0xff]   ;;  %v16210_v62 = vld [vmem:[%s18434_s17 + $0xb44] ss:$8 sps:$4 sm:$0xff]   ;;  %v16209_v63 = vld [vmem:[%s18434_s17 + $0xb0] ss:$8 sps:$4 sm:$0xff]  }
 0x132   : > { %v16212_v0 = vld [vmem:[%s18434_s17 + $0xb40] ss:$8 sps:$4 sm:$0xff]   ;;  %v16216_v2 = vld [vmem:[%s18434_s17 + $0xb54] ss:$8 sps:$4 sm:$0xff]   ;;  %v16218_v4 = vld [vmem:[%s18434_s17 + $0xb50] ss:$8 sps:$4 sm:$0xff]  }
 0x133   : > { %7768 = vmatpush1.bf16.msra.mxu0 %v16130_v7  ;;  %16070 = vmatpush1.bf16.msra.mxu1 %v16130_v7  ;;  %v16215_v3 = vld [vmem:[%s18434_s17 + $0xc0] ss:$8 sps:$4 sm:$0xff]   ;;  %v16219_v5 = vld [vmem:[%s18434_s17 + $0xd4] ss:$8 sps:$4 sm:$0xff]   ;;  %v16222_v6 = vld [vmem:[%s18434_s17 + $0xb64] ss:$8 sps:$4 sm:$0xff]  }
 0x134   : > { %7769 = vmatprep.subr.bf16.mxu0 %v17280_v1  ;;  %16055 = vmatprep.subr.bf16.mxu1 %v17280_v1  ;;  %v16221_v7 = vld [vmem:[%s18434_s17 + $0xd0] ss:$8 sps:$4 sm:$0xff]   ;;  %v16224_v8 = vld [vmem:[%s18434_s17 + $0xb60] ss:$8 sps:$4 sm:$0xff]  }
 0x137   : > { %7770 = vmatpush1.bf16.msra.mxu0 %v16131_v9  ;;  %16071 = vmatpush1.bf16.msra.mxu1 %v16131_v9  ;;  %v16225_v9 = vld [vmem:[%s18434_s17 + $0xe4] ss:$8 sps:$4 sm:$0xff]  }
 0x138   : > { %7771 = vmatprep.subr.bf16.mxu0 %v17280_v1  ;;  %16056 = vmatprep.subr.bf16.mxu1 %v17280_v1 }
 0x13b   : > { %7772 = vmatpush1.bf16.msra.mxu0 %v16132_v10  ;;  %16072 = vmatpush1.bf16.msra.mxu1 %v16132_v10  ;;  %v16228_v10 = vld [vmem:[%s18434_s17 + $0xb74] ss:$8 sps:$4 sm:$0xff]  }
 0x13c   : > { %7773 = vmatprep.subr.bf16.mxu0 %v17280_v1  ;;  %16057 = vmatprep.subr.bf16.mxu1 %v17280_v1 }
 0x13f   : > { %7774 = vmatpush1.bf16.msra.mxu0 %v16133_v11  ;;  %16073 = vmatpush1.bf16.msra.mxu1 %v16133_v11  ;;  %v16227_v11 = vld [vmem:[%s18434_s17 + $0xe0] ss:$8 sps:$4 sm:$0xff]  }
 0x140   : > { %7775 = vmatprep.subr.bf16.mxu0 %v17280_v1  ;;  %16058 = vmatprep.subr.bf16.mxu1 %v17280_v1 }
 0x143   : > { %7776 = vmatpush1.bf16.msra.mxu0 %v16134_v12  ;;  %16074 = vmatpush1.bf16.msra.mxu1 %v16134_v12  ;;  %v16230_v12 = vld [vmem:[%s18434_s17 + $0xb70] ss:$8 sps:$4 sm:$0xff]  }
 0x144   : > { %7777 = vmatprep.subr.bf16.mxu0 %v17280_v1  ;;  %16059 = vmatprep.subr.bf16.mxu1 %v17280_v1 }
 0x147   : > { %7778 = vmatpush1.bf16.msra.mxu0 %v16135_v13  ;;  %16075 = vmatpush1.bf16.msra.mxu1 %v16135_v13  ;;  %v16231_v13 = vld [vmem:[%s18434_s17 + $0xf4] ss:$8 sps:$4 sm:$0xff]  }
 0x148   : > { %7779 = vmatprep.subr.bf16.mxu0 %v17280_v1  ;;  %16060 = vmatprep.subr.bf16.mxu1 %v17280_v1 }
 0x14b   : > { %7780 = vmatpush1.bf16.msra.mxu0 %v16136_v14  ;;  %16076 = vmatpush1.bf16.msra.mxu1 %v16136_v14  ;;  %v16234_v14 = vld [vmem:[%s18434_s17 + $0xb84] ss:$8 sps:$4 sm:$0xff]  }
 0x14c   : > { %7781 = vmatprep.subr.bf16.mxu0 %v17280_v1  ;;  %16061 = vmatprep.subr.bf16.mxu1 %v17280_v1 }
 0x14f   : > { %7782 = vmatpush1.bf16.msra.mxu0 %v16137_v15  ;;  %16077 = vmatpush1.bf16.msra.mxu1 %v16137_v15  ;;  %v16233_v15 = vld [vmem:[%s18434_s17 + $0xf0] ss:$8 sps:$4 sm:$0xff]  }
 0x150   : > { %7783 = vmatprep.subr.bf16.mxu0 %v17280_v1  ;;  %16062 = vmatprep.subr.bf16.mxu1 %v17280_v1 }
 0x153   : > { %7784 = vmatpush1.bf16.msra.mxu0 %v16138_v16  ;;  %16078 = vmatpush1.bf16.msra.mxu1 %v16138_v16  ;;  %v16236_v16 = vld [vmem:[%s18434_s17 + $0xb80] ss:$8 sps:$4 sm:$0xff]  }
 0x154   : > { %7785 = vmatprep.subr.bf16.mxu0 %v17280_v1  ;;  %16063 = vmatprep.subr.bf16.mxu1 %v17280_v1 }
 0x157   : > { %7786 = vmatpush1.bf16.msra.mxu0 %v16139_v17  ;;  %16079 = vmatpush1.bf16.msra.mxu1 %v16139_v17  ;;  %v16237_v17 = vld [vmem:[%s18434_s17 + $0x104] ss:$8 sps:$4 sm:$0xff]  }
 0x158   : > { %7787 = vmatprep.subr.bf16.mxu0 %v17280_v1  ;;  %16064 = vmatprep.subr.bf16.mxu1 %v17280_v1  ;;  %v16213_v1 = vld [vmem:[%s18434_s17 + $0xc4] ss:$8 sps:$4 sm:$0xff]  }
 0x15b   : > { %7788 = vmatpush1.bf16.msra.mxu0 %v16140_v18  ;;  %16080 = vmatpush1.bf16.msra.mxu1 %v16140_v18  ;;  %v16240_v18 = vld [vmem:[%s18434_s17 + $0xb94] ss:$8 sps:$4 sm:$0xff]  }
 0x15e   : > { %7790 = vmatmul.mubr.bf16.vlgmr.msra.gmra.mrb[0].mxu0 %v16141_v19  ;;  %9142 = vmatmul.mubr.bf16.vlgmr.msra.gmra.mrb[0].mxu1 %v16144_v20  ;;  %v16239_v19 = vld [vmem:[%s18434_s17 + $0x100] ss:$8 sps:$4 sm:$0xff]   ;;  %v16242_v20 = vld [vmem:[%s18434_s17 + $0xb90] ss:$8 sps:$4 sm:$0xff]  }
 0x15f   : > { %7797 = vmatprep.mubr.bf16.mxu0 %v16147_v21  ;;  %9149 = vmatprep.mubr.bf16.mxu1 %v16150_v22  ;;  %v16243_v21 = vld [vmem:[%s18434_s17 + $0x114] ss:$8 sps:$4 sm:$0xff]   ;;  %v16246_v22 = vld [vmem:[%s18434_s17 + $0xba4] ss:$8 sps:$4 sm:$0xff]  }
 0x166   : > { %7798 = vmatmul.mubr.bf16.gmra.mrb[4].mxu0 %v16149_v23  ;;  %9150 = vmatmul.mubr.bf16.gmra.mrb[4].mxu1 %v16152_v24  ;;  %v16245_v23 = vld [vmem:[%s18434_s17 + $0x110] ss:$8 sps:$4 sm:$0xff]   ;;  %v16248_v24 = vld [vmem:[%s18434_s17 + $0xba0] ss:$8 sps:$4 sm:$0xff]  }
 0x167   : > { %7805 = vmatprep.mubr.bf16.mxu0 %v16153_v25  ;;  %9157 = vmatprep.mubr.bf16.mxu1 %v16156_v26  ;;  %v16249_v25 = vld [vmem:[%s18434_s17 + $0x124] ss:$8 sps:$4 sm:$0xff]   ;;  %v16252_v26 = vld [vmem:[%s18434_s17 + $0xbb4] ss:$8 sps:$4 sm:$0xff]  }
 0x16e   : > { %7806 = vmatmul.mubr.bf16.gmra.mrb[8].mxu0 %v16155_v27  ;;  %9158 = vmatmul.mubr.bf16.gmra.mrb[8].mxu1 %v16158_v28  ;;  %v16251_v27 = vld [vmem:[%s18434_s17 + $0x120] ss:$8 sps:$4 sm:$0xff]   ;;  %v16254_v28 = vld [vmem:[%s18434_s17 + $0xbb0] ss:$8 sps:$4 sm:$0xff]  }
 0x16f   : > { %7813 = vmatprep.mubr.bf16.mxu0 %v16159_v29  ;;  %9165 = vmatprep.mubr.bf16.mxu1 %v16162_v30  ;;  %v16255_v29 = vld [vmem:[%s18434_s17 + $0x134] ss:$8 sps:$4 sm:$0xff]   ;;  %v16258_v30 = vld [vmem:[%s18434_s17 + $0xbc4] ss:$8 sps:$4 sm:$0xff]  }
 0x176   : > { %7814 = vmatmul.mubr.bf16.gmra.mrb[12].mxu0 %v16161_v31  ;;  %9166 = vmatmul.mubr.bf16.gmra.mrb[12].mxu1 %v16164_v32  ;;  %v16257_v31 = vld [vmem:[%s18434_s17 + $0x130] ss:$8 sps:$4 sm:$0xff]   ;;  %v16260_v32 = vld [vmem:[%s18434_s17 + $0xbc0] ss:$8 sps:$4 sm:$0xff]  }
 0x177   : > { %7821 = vmatprep.mubr.bf16.mxu0 %v16165_v33  ;;  %9173 = vmatprep.mubr.bf16.mxu1 %v16168_v34  ;;  %v16261_v33 = vld [vmem:[%s18434_s17 + $0x144] ss:$8 sps:$4 sm:$0xff]   ;;  %v16264_v34 = vld [vmem:[%s18434_s17 + $0xbd4] ss:$8 sps:$4 sm:$0xff]  }
 0x17e   : > { %7822 = vmatmul.mubr.bf16.gmra.mrb[16].mxu0 %v16167_v35  ;;  %9174 = vmatmul.mubr.bf16.gmra.mrb[16].mxu1 %v16170_v36  ;;  %v16263_v35 = vld [vmem:[%s18434_s17 + $0x140] ss:$8 sps:$4 sm:$0xff]   ;;  %v16266_v36 = vld [vmem:[%s18434_s17 + $0xbd0] ss:$8 sps:$4 sm:$0xff]  }
 0x17f   : > { %7829 = vmatprep.mubr.bf16.mxu0 %v16171_v37  ;;  %9181 = vmatprep.mubr.bf16.mxu1 %v16174_v38  ;;  %v16267_v37 = vld [vmem:[%s18434_s17 + $0x154] ss:$8 sps:$4 sm:$0xff]   ;;  %v16270_v38 = vld [vmem:[%s18434_s17 + $0xbe4] ss:$8 sps:$4 sm:$0xff]  }
 0x186   : > { %7830 = vmatmul.mubr.bf16.gmra.mrb[20].mxu0 %v16173_v39  ;;  %9182 = vmatmul.mubr.bf16.gmra.mrb[20].mxu1 %v16176_v40  ;;  %v16269_v39 = vld [vmem:[%s18434_s17 + $0x150] ss:$8 sps:$4 sm:$0xff]   ;;  %v16272_v40 = vld [vmem:[%s18434_s17 + $0xbe0] ss:$8 sps:$4 sm:$0xff]  }
 0x187   : > { %7837 = vmatprep.mubr.bf16.mxu0 %v16177_v41  ;;  %9189 = vmatprep.mubr.bf16.mxu1 %v16180_v42  ;;  %v16273_v41 = vld [vmem:[%s18434_s17 + $0x164] ss:$8 sps:$4 sm:$0xff]   ;;  %v16276_v42 = vld [vmem:[%s18434_s17 + $0xbf4] ss:$8 sps:$4 sm:$0xff]  }
 0x18e   : > { %7838 = vmatmul.mubr.bf16.gmra.mrb[24].mxu0 %v16179_v43  ;;  %9190 = vmatmul.mubr.bf16.gmra.mrb[24].mxu1 %v16182_v44  ;;  %v16275_v43 = vld [vmem:[%s18434_s17 + $0x160] ss:$8 sps:$4 sm:$0xff]   ;;  %v16278_v44 = vld [vmem:[%s18434_s17 + $0xbf0] ss:$8 sps:$4 sm:$0xff]  }
 0x18f   : > { %7845 = vmatprep.mubr.bf16.mxu0 %v16183_v45  ;;  %9197 = vmatprep.mubr.bf16.mxu1 %v16186_v46  ;;  %v16279_v45 = vld [vmem:[%s18434_s17 + $0x174] ss:$8 sps:$4 sm:$0xff]   ;;  %v16282_v46 = vld [vmem:[%s18434_s17 + $0xc04] ss:$8 sps:$4 sm:$0xff]  }
 0x196   : > { %7846 = vmatmul.mubr.bf16.gmra.mrb[28].mxu0 %v16185_v47  ;;  %9198 = vmatmul.mubr.bf16.gmra.mrb[28].mxu1 %v16188_v48  ;;  %v16281_v47 = vld [vmem:[%s18434_s17 + $0x170] ss:$8 sps:$4 sm:$0xff]   ;;  %v16284_v48 = vld [vmem:[%s18434_s17 + $0xc00] ss:$8 sps:$4 sm:$0xff]  }
 0x197   : > { %7853 = vmatprep.mubr.bf16.mxu0 %v16189_v49  ;;  %9205 = vmatprep.mubr.bf16.mxu1 %v16192_v50  ;;  %v16285_v49 = vld [vmem:[%s18434_s17 + $0x184] ss:$8 sps:$4 sm:$0xff]   ;;  %v16288_v50 = vld [vmem:[%s18434_s17 + $0xc14] ss:$8 sps:$4 sm:$0xff]  }
 0x19e   : > { %7854 = vmatmul.mubr.bf16.gmra.mrb[32].mxu0 %v16191_v51  ;;  %9206 = vmatmul.mubr.bf16.gmra.mrb[32].mxu1 %v16194_v52  ;;  %v16287_v51 = vld [vmem:[%s18434_s17 + $0x180] ss:$8 sps:$4 sm:$0xff]   ;;  %v16290_v52 = vld [vmem:[%s18434_s17 + $0xc10] ss:$8 sps:$4 sm:$0xff]  }
 0x19f   : > { %7861 = vmatprep.mubr.bf16.mxu0 %v16195_v53  ;;  %9213 = vmatprep.mubr.bf16.mxu1 %v16198_v54  ;;  %v16291_v53 = vld [vmem:[%s18434_s17 + $0x194] ss:$8 sps:$4 sm:$0xff]   ;;  %v16294_v54 = vld [vmem:[%s18434_s17 + $0xc24] ss:$8 sps:$4 sm:$0xff]  }
 0x1a6   : > { %7862 = vmatmul.mubr.bf16.gmra.mrb[36].mxu0 %v16197_v55  ;;  %9214 = vmatmul.mubr.bf16.gmra.mrb[36].mxu1 %v16200_v56  ;;  %v16293_v55 = vld [vmem:[%s18434_s17 + $0x190] ss:$8 sps:$4 sm:$0xff]   ;;  %v16296_v56 = vld [vmem:[%s18434_s17 + $0xc20] ss:$8 sps:$4 sm:$0xff]  }
 0x1a7   : > { %7869 = vmatprep.mubr.bf16.mxu0 %v16201_v57  ;;  %9221 = vmatprep.mubr.bf16.mxu1 %v16204_v58  ;;  %v16297_v57 = vld [vmem:[%s18434_s17 + $0x1a4] ss:$8 sps:$4 sm:$0xff]   ;;  %v16300_v58 = vld [vmem:[%s18434_s17 + $0xc34] ss:$8 sps:$4 sm:$0xff]  }
 0x1ae   : > { %7870 = vmatmul.mubr.bf16.gmra.mrb[40].mxu0 %v16203_v59  ;;  %9222 = vmatmul.mubr.bf16.gmra.mrb[40].mxu1 %v16206_v60  ;;  %v16299_v59 = vld [vmem:[%s18434_s17 + $0x1a0] ss:$8 sps:$4 sm:$0xff]   ;;  %v16302_v60 = vld [vmem:[%s18434_s17 + $0xc30] ss:$8 sps:$4 sm:$0xff]  }
 0x1af   : > { %7877 = vmatprep.mubr.bf16.mxu0 %v16207_v61  ;;  %9229 = vmatprep.mubr.bf16.mxu1 %v16210_v62  ;;  %v16303_v61 = vld [vmem:[%s18434_s17 + $0x1b4] ss:$8 sps:$4 sm:$0xff]   ;;  %v16306_v62 = vld [vmem:[%s18434_s17 + $0xc44] ss:$8 sps:$4 sm:$0xff]  }
 0x1b6   : > { %7878 = vmatmul.mubr.bf16.gmra.mrb[44].mxu0 %v16209_v63  ;;  %9230 = vmatmul.mubr.bf16.gmra.mrb[44].mxu1 %v16212_v0  ;;  %v16305_v63 = vld [vmem:[%s18434_s17 + $0x1b0] ss:$8 sps:$4 sm:$0xff]   ;;  %v16308_v0 = vld [vmem:[%s18434_s17 + $0xc40] ss:$8 sps:$4 sm:$0xff]  }
 0x1b7   : > { %7885 = vmatprep.mubr.bf16.mxu0 %v16213_v1  ;;  %9237 = vmatprep.mubr.bf16.mxu1 %v16216_v2  ;;  %v16309_v2 = vld [vmem:[%s18434_s17 + $0x1c4] ss:$8 sps:$4 sm:$0xff]  }
 0x1be   : > { %7886 = vmatmul.mubr.bf16.gmra.mrb[48].mxu0 %v16215_v3  ;;  %9238 = vmatmul.mubr.bf16.gmra.mrb[48].mxu1 %v16218_v4 }
 0x1bf   : > { %7893 = vmatprep.mubr.bf16.mxu0 %v16219_v5  ;;  %9245 = vmatprep.mubr.bf16.mxu1 %v16222_v6 }
 0x1c6   : > { %7894 = vmatmul.mubr.bf16.gmra.mrb[52].mxu0 %v16221_v7  ;;  %9246 = vmatmul.mubr.bf16.gmra.mrb[52].mxu1 %v16224_v8  ;;  %v16312_v7 = vld [vmem:[%s18434_s17 + $0xc54] ss:$8 sps:$4 sm:$0xff]  }
 0x1c7   : > { %7901 = vmatprep.mubr.bf16.mxu0 %v16225_v9  ;;  %9253 = vmatprep.mubr.bf16.mxu1 %v16228_v10 }
 0x1ce   : > { %7902 = vmatmul.mubr.bf16.gmra.mrb[56].mxu0 %v16227_v11  ;;  %9254 = vmatmul.mubr.bf16.gmra.mrb[56].mxu1 %v16230_v12  ;;  %v16311_v11 = vld [vmem:[%s18434_s17 + $0x1c0] ss:$8 sps:$4 sm:$0xff]   ;;  %v16314_v12 = vld [vmem:[%s18434_s17 + $0xc50] ss:$8 sps:$4 sm:$0xff]  }
 0x1cf   : > { %7909 = vmatprep.mubr.bf16.mxu0 %v16231_v13  ;;  %9261 = vmatprep.mubr.bf16.mxu1 %v16234_v14  ;;  %v16315_v14 = vld [vmem:[%s18434_s17 + $0x1d4] ss:$8 sps:$4 sm:$0xff]  }
 0x1d6   : > { %7910 = vmatmul.mubr.bf16.gmra.mrb[60].mxu0 %v16233_v15  ;;  %9262 = vmatmul.mubr.bf16.gmra.mrb[60].mxu1 %v16236_v16 }
 0x1d7   : > { %7917 = vmatprep.mubr.bf16.mxu0 %v16237_v17  ;;  %9269 = vmatprep.mubr.bf16.mxu1 %v16240_v18 }
 0x1de   : > { %7918 = vmatmul.mubr.bf16.gmra.mrb[64].mxu0 %v16239_v19  ;;  %9270 = vmatmul.mubr.bf16.gmra.mrb[64].mxu1 %v16242_v20  ;;  %v16318_v19 = vld [vmem:[%s18434_s17 + $0xc64] ss:$8 sps:$4 sm:$0xff]  }
 0x1df   : > { %7925 = vmatprep.mubr.bf16.mxu0 %v16243_v21  ;;  %9277 = vmatprep.mubr.bf16.mxu1 %v16246_v22 }
 0x1e6   : > { %7926 = vmatmul.mubr.bf16.gmra.mrb[68].mxu0 %v16245_v23  ;;  %9278 = vmatmul.mubr.bf16.gmra.mrb[68].mxu1 %v16248_v24  ;;  %v16317_v23 = vld [vmem:[%s18434_s17 + $0x1d0] ss:$8 sps:$4 sm:$0xff]   ;;  %v16320_v24 = vld [vmem:[%s18434_s17 + $0xc60] ss:$8 sps:$4 sm:$0xff]  }
 0x1e7   : > { %7933 = vmatprep.mubr.bf16.mxu0 %v16249_v25  ;;  %9285 = vmatprep.mubr.bf16.mxu1 %v16252_v26  ;;  %v16321_v26 = vld [vmem:[%s18434_s17 + $0x1e4] ss:$8 sps:$4 sm:$0xff]  }
 0x1ee   : > { %7934 = vmatmul.mubr.bf16.gmra.mrb[72].mxu0 %v16251_v27  ;;  %9286 = vmatmul.mubr.bf16.gmra.mrb[72].mxu1 %v16254_v28 }
 0x1ef   : > { %7941 = vmatprep.mubr.bf16.mxu0 %v16255_v29  ;;  %9293 = vmatprep.mubr.bf16.mxu1 %v16258_v30 }
 0x1f6   : > { %7942 = vmatmul.mubr.bf16.gmra.mrb[76].mxu0 %v16257_v31  ;;  %9294 = vmatmul.mubr.bf16.gmra.mrb[76].mxu1 %v16260_v32  ;;  %v16324_v31 = vld [vmem:[%s18434_s17 + $0xc74] ss:$8 sps:$4 sm:$0xff]  }
 0x1f7   : > { %7949 = vmatprep.mubr.bf16.mxu0 %v16261_v33  ;;  %9301 = vmatprep.mubr.bf16.mxu1 %v16264_v34 }
 0x1fe   : > { %7950 = vmatmul.mubr.bf16.gmra.mrb[80].mxu0 %v16263_v35  ;;  %9302 = vmatmul.mubr.bf16.gmra.mrb[80].mxu1 %v16266_v36  ;;  %v16323_v35 = vld [vmem:[%s18434_s17 + $0x1e0] ss:$8 sps:$4 sm:$0xff]   ;;  %v16326_v36 = vld [vmem:[%s18434_s17 + $0xc70] ss:$8 sps:$4 sm:$0xff]  }
 0x1ff   : > { %7957 = vmatprep.mubr.bf16.mxu0 %v16267_v37  ;;  %9309 = vmatprep.mubr.bf16.mxu1 %v16270_v38  ;;  %v16327_v38 = vld [vmem:[%s18434_s17 + $0x1f4] ss:$8 sps:$4 sm:$0xff]  }
 0x206   : > { %7958 = vmatmul.mubr.bf16.gmra.mrb[84].mxu0 %v16269_v39  ;;  %9310 = vmatmul.mubr.bf16.gmra.mrb[84].mxu1 %v16272_v40 }
 0x207   : > { %7965 = vmatprep.mubr.bf16.mxu0 %v16273_v41  ;;  %9317 = vmatprep.mubr.bf16.mxu1 %v16276_v42 }
 0x20e   : > { %7966 = vmatmul.mubr.bf16.gmra.mrb[88].mxu0 %v16275_v43  ;;  %9318 = vmatmul.mubr.bf16.gmra.mrb[88].mxu1 %v16278_v44  ;;  %v16330_v43 = vld [vmem:[%s18434_s17 + $0xc84] ss:$8 sps:$4 sm:$0xff]  }
 0x20f   : > { %7973 = vmatprep.mubr.bf16.mxu0 %v16279_v45  ;;  %9325 = vmatprep.mubr.bf16.mxu1 %v16282_v46 }
 0x216   : > { %7974 = vmatmul.mubr.bf16.gmra.mrb[92].mxu0 %v16281_v47  ;;  %9326 = vmatmul.mubr.bf16.gmra.mrb[92].mxu1 %v16284_v48  ;;  %v16329_v47 = vld [vmem:[%s18434_s17 + $0x1f0] ss:$8 sps:$4 sm:$0xff]   ;;  %v16332_v48 = vld [vmem:[%s18434_s17 + $0xc80] ss:$8 sps:$4 sm:$0xff]  }
 0x217   : > { %7981 = vmatprep.mubr.bf16.mxu0 %v16285_v49  ;;  %9333 = vmatprep.mubr.bf16.mxu1 %v16288_v50  ;;  %v16333_v50 = vld [vmem:[%s18434_s17 + $0x204] ss:$8 sps:$4 sm:$0xff]  }
 0x21e   : > { %7982 = vmatmul.mubr.bf16.gmra.mrb[96].mxu0 %v16287_v51  ;;  %9334 = vmatmul.mubr.bf16.gmra.mrb[96].mxu1 %v16290_v52 }
 0x21f   : > { %7989 = vmatprep.mubr.bf16.mxu0 %v16291_v53  ;;  %9341 = vmatprep.mubr.bf16.mxu1 %v16294_v54 }
 0x226   : > { %7990 = vmatmul.mubr.bf16.gmra.mrb[100].mxu0 %v16293_v55  ;;  %9342 = vmatmul.mubr.bf16.gmra.mrb[100].mxu1 %v16296_v56  ;;  %v16336_v55 = vld [vmem:[%s18434_s17 + $0xc94] ss:$8 sps:$4 sm:$0xff]  }
 0x227   : > { %7997 = vmatprep.mubr.bf16.mxu0 %v16297_v57  ;;  %9349 = vmatprep.mubr.bf16.mxu1 %v16300_v58 }
 0x22e   : > { %7998 = vmatmul.mubr.bf16.gmra.mrb[104].mxu0 %v16299_v59  ;;  %9350 = vmatmul.mubr.bf16.gmra.mrb[104].mxu1 %v16302_v60  ;;  %v16335_v59 = vld [vmem:[%s18434_s17 + $0x200] ss:$8 sps:$4 sm:$0xff]   ;;  %v16338_v60 = vld [vmem:[%s18434_s17 + $0xc90] ss:$8 sps:$4 sm:$0xff]  }
 0x22f   : > { %8005 = vmatprep.mubr.bf16.mxu0 %v16303_v61  ;;  %9357 = vmatprep.mubr.bf16.mxu1 %v16306_v62  ;;  %v16339_v62 = vld [vmem:[%s18434_s17 + $0x214] ss:$8 sps:$4 sm:$0xff]  }
 0x231   : > { %v7791_v1 = vpop.f32.mrb[0].mxu0  ;;  %v18604_v3 = vpop.f32.mrb[0].mxu1 }
 0x232   : > { %9839 = vst.msk [vmem:[#allocation2] sm:$0xff] %vm9838_vm0, %v7791_v1  ;;  %v7793_v4 = vpop.f32.mrb[1].mxu0  ;;  %v9145_v5 = vpop.f32.mrb[1].mxu1 }
 0x233   : > { %v7794_v6 = vpop.f32.mrb[2].mxu0  ;;  %v18608_v8 = vpop.f32.mrb[2].mxu1  ;;  %v16342_v4 = vld [vmem:[%s18434_s17 + $0xca4] ss:$8 sps:$4 sm:$0xff]  }
 0x234   : > { %9840 = vst.msk [vmem:[#allocation2 + $0x20] sm:$0xff] %vm9838_vm0, %v7794_v6  ;;  %v7796_v9 = vpop.f32.mrb[3].mxu0  ;;  %v9148_v10 = vpop.f32.mrb[3].mxu1 }
 0x235   : > { %v16341_v9 = vld [vmem:[%s18434_s17 + $0x210] ss:$8 sps:$4 sm:$0xff]   ;;  %v16344_v10 = vld [vmem:[%s18434_s17 + $0xca0] ss:$8 sps:$4 sm:$0xff]  }
 0x236   : > { %8006 = vmatmul.mubr.bf16.gmra.mrb[108].mxu0 %v16305_v63  ;;  %9358 = vmatmul.mubr.bf16.gmra.mrb[108].mxu1 %v16308_v0 }
 0x237   : > { %8013 = vmatprep.mubr.bf16.mxu0 %v16309_v2  ;;  %9365 = vmatprep.mubr.bf16.mxu1 %v16312_v7 }
 0x239   : > { %v7799_v13 = vpop.f32.mrb[4].mxu0  ;;  %v18614_v15 = vpop.f32.mrb[4].mxu1 }
 0x23a   : > { %9841 = vst.msk [vmem:[#allocation2 + $0x40] sm:$0xff] %vm9838_vm0, %v7799_v13  ;;  %v7801_v16 = vpop.f32.mrb[5].mxu0  ;;  %v9153_v17 = vpop.f32.mrb[5].mxu1 }
 0x23b   : > { %v7802_v18 = vpop.f32.mrb[6].mxu0  ;;  %v18618_v20 = vpop.f32.mrb[6].mxu1 }
 0x23c   : > { %9842 = vst.msk [vmem:[#allocation2 + $0x60] sm:$0xff] %vm9838_vm0, %v7802_v18  ;;  %v7804_v21 = vpop.f32.mrb[7].mxu0  ;;  %v9156_v22 = vpop.f32.mrb[7].mxu1  ;;  %v16348_v18 = vld [vmem:[%s18434_s17 + $0xcb4] ss:$8 sps:$4 sm:$0xff]  }
 0x23e   : > { %8014 = vmatmul.mubr.bf16.gmra.mrb[112].mxu0 %v16311_v11  ;;  %9366 = vmatmul.mubr.bf16.gmra.mrb[112].mxu1 %v16314_v12  ;;  %v16345_v12 = vld [vmem:[%s18434_s17 + $0x224] ss:$8 sps:$4 sm:$0xff]  }
 0x23f   : > { %8021 = vmatprep.mubr.bf16.mxu0 %v16315_v14  ;;  %9373 = vmatprep.mubr.bf16.mxu1 %v16318_v19 }
 0x241   : > { %v7807_v25 = vpop.f32.mrb[8].mxu0  ;;  %v18624_v27 = vpop.f32.mrb[8].mxu1 }
 0x242   : > { %9843 = vst.msk [vmem:[#allocation2 + $0x80] sm:$0xff] %vm9838_vm0, %v7807_v25  ;;  %v7809_v28 = vpop.f32.mrb[9].mxu0  ;;  %v9161_v29 = vpop.f32.mrb[9].mxu1 }
 0x243   : > { %v7810_v30 = vpop.f32.mrb[10].mxu0  ;;  %v18628_v32 = vpop.f32.mrb[10].mxu1 }
 0x244   : > { %9844 = vst.msk [vmem:[#allocation2 + $0xa0] sm:$0xff] %vm9838_vm0, %v7810_v30  ;;  %v7812_v33 = vpop.f32.mrb[11].mxu0  ;;  %v9164_v34 = vpop.f32.mrb[11].mxu1 }
 0x245   : > { %v16354_v33 = vld [vmem:[%s18434_s17 + $0xcc4] ss:$8 sps:$4 sm:$0xff]  }
 0x246   : > { %8022 = vmatmul.mubr.bf16.gmra.mrb[116].mxu0 %v16317_v23  ;;  %9374 = vmatmul.mubr.bf16.gmra.mrb[116].mxu1 %v16320_v24  ;;  %v16347_v23 = vld [vmem:[%s18434_s17 + $0x220] ss:$8 sps:$4 sm:$0xff]   ;;  %v16350_v24 = vld [vmem:[%s18434_s17 + $0xcb0] ss:$8 sps:$4 sm:$0xff]  }
 0x247   : > { %8029 = vmatprep.mubr.bf16.mxu0 %v16321_v26  ;;  %9381 = vmatprep.mubr.bf16.mxu1 %v16324_v31  ;;  %v16351_v26 = vld [vmem:[%s18434_s17 + $0x234] ss:$8 sps:$4 sm:$0xff]  }
 0x249   : > { %v7815_v37 = vpop.f32.mrb[12].mxu0  ;;  %v18634_v39 = vpop.f32.mrb[12].mxu1 }
 0x24a   : > { %21471 = vst [vmem:[#allocation5_spill] sm:$0xff] %v18634_v39  ;;  %9845 = vst.msk [vmem:[#allocation2 + $0xc0] sm:$0xff] %vm9838_vm0, %v7815_v37  ;;  %v7817_v40 = vpop.f32.mrb[13].mxu0  ;;  %v9169_v41 = vpop.f32.mrb[13].mxu1  ;;  %v16353_v37 = vld [vmem:[%s18434_s17 + $0x230] ss:$8 sps:$4 sm:$0xff]  }
 0x24b   : > { %v7818_v42 = vpop.f32.mrb[14].mxu0  ;;  %v18638_v44 = vpop.f32.mrb[14].mxu1  ;;  %v16357_v41 = vld [vmem:[%s18434_s17 + $0x244] ss:$8 sps:$4 sm:$0xff]   ;;  %v16659_v39 = vld [vmem:[%s18434_s17 + $0x614] ss:$8 sps:$4 sm:$0xff]  }
 0x24c   : > { %21472 = vst [vmem:[#allocation6_spill] sm:$0xff] %v18638_v44  ;;  %9846 = vst.msk [vmem:[#allocation2 + $0xe0] sm:$0xff] %vm9838_vm0, %v7818_v42  ;;  %v7820_v45 = vpop.f32.mrb[15].mxu0  ;;  %v9172_v46 = vpop.f32.mrb[15].mxu1 }
 0x24e   : > { %8030 = vmatmul.mubr.bf16.gmra.mrb[120].mxu0 %v16323_v35  ;;  %9382 = vmatmul.mubr.bf16.gmra.mrb[120].mxu1 %v16326_v36 }
 0x24f   : > { %8037 = vmatprep.mubr.bf16.mxu0 %v16327_v38  ;;  %9389 = vmatprep.mubr.bf16.mxu1 %v16330_v43  ;;  %v16356_v38 = vld [vmem:[%s18434_s17 + $0xcc0] ss:$8 sps:$4 sm:$0xff]  }
 0x251   : > { %v7823_v49 = vpop.f32.mrb[16].mxu0  ;;  %v18644_v51 = vpop.f32.mrb[16].mxu1 }
 0x252   : > { %21473 = vst [vmem:[#allocation7_spill] sm:$0xff] %v18644_v51  ;;  %9847 = vst.msk [vmem:[#allocation2 + $0x100] sm:$0xff] %vm9838_vm0, %v7823_v49  ;;  %v7825_v52 = vpop.f32.mrb[17].mxu0  ;;  %v9177_v53 = vpop.f32.mrb[17].mxu1 }
 0x253   : > { %v7826_v54 = vpop.f32.mrb[18].mxu0  ;;  %v18648_v56 = vpop.f32.mrb[18].mxu1  ;;  %v16359_v52 = vld [vmem:[%s18434_s17 + $0x240] ss:$8 sps:$4 sm:$0xff]   ;;  %v16362_v53 = vld [vmem:[%s18434_s17 + $0xcd0] ss:$8 sps:$4 sm:$0xff]  }
 0x254   : > { %21474 = vst [vmem:[#allocation8_spill] sm:$0xff] %v18648_v56  ;;  %9848 = vst.msk [vmem:[#allocation2 + $0x120] sm:$0xff] %vm9838_vm0, %v7826_v54  ;;  %v7828_v57 = vpop.f32.mrb[19].mxu0  ;;  %v9180_v58 = vpop.f32.mrb[19].mxu1 }
 0x256   : > { %8038 = vmatmul.mubr.bf16.gmra.mrb[124].mxu0 %v16329_v47  ;;  %9390 = vmatmul.mubr.bf16.gmra.mrb[124].mxu1 %v16332_v48  ;;  %v16360_v47 = vld [vmem:[%s18434_s17 + $0xcd4] ss:$8 sps:$4 sm:$0xff]  }
 0x257   : > { %8045 = vmatprep.mubr.bf16.mxu0 %v16333_v50  ;;  %9397 = vmatprep.mubr.bf16.mxu1 %v16336_v55  ;;  %v16363_v55 = vld [vmem:[%s18434_s17 + $0x254] ss:$8 sps:$4 sm:$0xff]  }
 0x259   : > { %v7831_v61 = vpop.f32.mrb[20].mxu0  ;;  %v18654_v63 = vpop.f32.mrb[20].mxu1 }
 0x25a   : > { %21475 = vst [vmem:[#allocation9_spill] sm:$0xff] %v18654_v63  ;;  %9849 = vst.msk [vmem:[#allocation2 + $0x140] sm:$0xff] %vm9838_vm0, %v7831_v61  ;;  %v7833_v0 = vpop.f32.mrb[21].mxu0  ;;  %v9185_v1 = vpop.f32.mrb[21].mxu1  ;;  %v16366_v61 = vld [vmem:[%s18434_s17 + $0xce4] ss:$8 sps:$4 sm:$0xff]  }
 0x25b   : > { %v7834_v2 = vpop.f32.mrb[22].mxu0  ;;  %v18658_v5 = vpop.f32.mrb[22].mxu1 }
 0x25c   : > { %21476 = vst [vmem:[#allocation10_spill] sm:$0xff] %v18658_v5  ;;  %9850 = vst.msk [vmem:[#allocation2 + $0x160] sm:$0xff] %vm9838_vm0, %v7834_v2  ;;  %v7836_v6 = vpop.f32.mrb[23].mxu0  ;;  %v9188_v7 = vpop.f32.mrb[23].mxu1  ;;  %v16365_v2 = vld [vmem:[%s18434_s17 + $0x250] ss:$8 sps:$4 sm:$0xff]  }
 0x25d   : > { %v16369_v7 = vld [vmem:[%s18434_s17 + $0x264] ss:$8 sps:$4 sm:$0xff]  }
 0x25e   : > { %8046 = vmatmul.mubr.bf16.gmra.mrb[128].mxu0 %v16335_v59  ;;  %9398 = vmatmul.mubr.bf16.gmra.mrb[128].mxu1 %v16338_v60 }
 0x25f   : > { %8053 = vmatprep.mubr.bf16.mxu0 %v16339_v62  ;;  %9405 = vmatprep.mubr.bf16.mxu1 %v16342_v4  ;;  %v16368_v4 = vld [vmem:[%s18434_s17 + $0xce0] ss:$8 sps:$4 sm:$0xff]  }
 0x261   : > { %v7839_v11 = vpop.f32.mrb[24].mxu0  ;;  %v18664_v13 = vpop.f32.mrb[24].mxu1 }
 0x262   : > { %21477 = vst [vmem:[#allocation11_spill] sm:$0xff] %v18664_v13  ;;  %9851 = vst.msk [vmem:[#allocation2 + $0x180] sm:$0xff] %vm9838_vm0, %v7839_v11  ;;  %v7841_v14 = vpop.f32.mrb[25].mxu0  ;;  %v9193_v16 = vpop.f32.mrb[25].mxu1 }
 0x263   : > { %v7842_v17 = vpop.f32.mrb[26].mxu0  ;;  %v18668_v19 = vpop.f32.mrb[26].mxu1  ;;  %v16372_v14 = vld [vmem:[%s18434_s17 + $0xcf4] ss:$8 sps:$4 sm:$0xff]  }
 0x264   : > { %21478 = vst [vmem:[#allocation12_spill] sm:$0xff] %v18668_v19  ;;  %9852 = vst.msk [vmem:[#allocation2 + $0x1a0] sm:$0xff] %vm9838_vm0, %v7842_v17  ;;  %v7844_v21 = vpop.f32.mrb[27].mxu0  ;;  %v9196_v22 = vpop.f32.mrb[27].mxu1 }
 0x265   : > { %v16371_v21 = vld [vmem:[%s18434_s17 + $0x260] ss:$8 sps:$4 sm:$0xff]   ;;  %v16374_v22 = vld [vmem:[%s18434_s17 + $0xcf0] ss:$8 sps:$4 sm:$0xff]  }
 0x266   : > { %8054 = vmatmul.mubr.bf16.gmra.mrb[132].mxu0 %v16341_v9  ;;  %9406 = vmatmul.mubr.bf16.gmra.mrb[132].mxu1 %v16344_v10 }
 0x267   : > { %8061 = vmatprep.mubr.bf16.mxu0 %v16345_v12  ;;  %9413 = vmatprep.mubr.bf16.mxu1 %v16348_v18 }
 0x269   : > { %v7847_v25 = vpop.f32.mrb[28].mxu0  ;;  %v9199_v28 = vpop.f32.mrb[28].mxu1 }
 0x26a   : > { %9853 = vst.msk [vmem:[#allocation2 + $0x1c0] sm:$0xff] %vm9838_vm0, %v7847_v25  ;;  %v7849_v29 = vpop.f32.mrb[29].mxu0  ;;  %v9201_v30 = vpop.f32.mrb[29].mxu1  ;;  %11250 = vrot.lane.b32.xlu0 %v9199_v28, %s17281_s27 }
 0x26b   : > { %v7850_v31 = vpop.f32.mrb[30].mxu0  ;;  %v9202_v34 = vpop.f32.mrb[30].mxu1  ;;  %v16378_v30 = vld [vmem:[%s18434_s17 + $0xd04] ss:$8 sps:$4 sm:$0xff]  }
 0x26c   : > { %9854 = vst.msk [vmem:[#allocation2 + $0x1e0] sm:$0xff] %vm9838_vm0, %v7850_v31  ;;  %v7852_v35 = vpop.f32.mrb[31].mxu0  ;;  %11252 = vrot.lane.b32.xlu1 %v9202_v34, %s17281_s27  ;;  %v9204_v36 = vpop.f32.mrb[31].mxu1 }
 0x26e   : > { %8062 = vmatmul.mubr.bf16.gmra.mrb[136].mxu0 %v16347_v23  ;;  %9414 = vmatmul.mubr.bf16.gmra.mrb[136].mxu1 %v16350_v24  ;;  %v16375_v24 = vld [vmem:[%s18434_s17 + $0x274] ss:$8 sps:$4 sm:$0xff]  }
 0x26f   : > { %8069 = vmatprep.mubr.bf16.mxu0 %v16351_v26  ;;  %9421 = vmatprep.mubr.bf16.mxu1 %v16354_v33 }
 0x271   : > { %v7855_v40 = vpop.f32.mrb[32].mxu0  ;;  %v9207_v42 = vpop.f32.mrb[32].mxu1 }
 0x272   : > { %9855 = vst.msk [vmem:[#allocation2 + $0x200] sm:$0xff] %vm9838_vm0, %v7855_v40  ;;  %v7857_v43 = vpop.f32.mrb[33].mxu0  ;;  %v9209_v45 = vpop.f32.mrb[33].mxu1  ;;  %11254 = vrot.lane.b32.xlu0 %v9207_v42, %s17281_s27  ;;  %v16380_v40 = vld [vmem:[%s18434_s17 + $0xd00] ss:$8 sps:$4 sm:$0xff]  }
 0x273   : > { %v7858_v46 = vpop.f32.mrb[34].mxu0  ;;  %v9210_v48 = vpop.f32.mrb[34].mxu1  ;;  %v16381_v43 = vld [vmem:[%s18434_s17 + $0x284] ss:$8 sps:$4 sm:$0xff]   ;;  %v16384_v45 = vld [vmem:[%s18434_s17 + $0xd14] ss:$8 sps:$4 sm:$0xff]  }
 0x274   : > { %9856 = vst.msk [vmem:[#allocation2 + $0x220] sm:$0xff] %vm9838_vm0, %v7858_v46  ;;  %v7860_v49 = vpop.f32.mrb[35].mxu0  ;;  %11256 = vrot.lane.b32.xlu1 %v9210_v48, %s17281_s27  ;;  %v9212_v50 = vpop.f32.mrb[35].mxu1 }
 0x276   : > { %8070 = vmatmul.mubr.bf16.gmra.mrb[140].mxu0 %v16353_v37  ;;  %9422 = vmatmul.mubr.bf16.gmra.mrb[140].mxu1 %v16356_v38  ;;  %v16377_v38 = vld [vmem:[%s18434_s17 + $0x270] ss:$8 sps:$4 sm:$0xff]  }
 0x277   : > { %8077 = vmatprep.mubr.bf16.mxu0 %v16357_v41  ;;  %9429 = vmatprep.mubr.bf16.mxu1 %v16360_v47 }
 0x279   : > { %v7863_v54 = vpop.f32.mrb[36].mxu0  ;;  %v9215_v57 = vpop.f32.mrb[36].mxu1 }
 0x27a   : > { %9857 = vst.msk [vmem:[#allocation2 + $0x240] sm:$0xff] %vm9838_vm0, %v7863_v54  ;;  %v7865_v58 = vpop.f32.mrb[37].mxu0  ;;  %v9217_v59 = vpop.f32.mrb[37].mxu1  ;;  %11258 = vrot.lane.b32.xlu0 %v9215_v57, %s17281_s27  ;;  %v16386_v54 = vld [vmem:[%s18434_s17 + $0xd10] ss:$8 sps:$4 sm:$0xff]  }
 0x27b   : > { %v7866_v60 = vpop.f32.mrb[38].mxu0  ;;  %v9218_v62 = vpop.f32.mrb[38].mxu1  ;;  %v16387_v58 = vld [vmem:[%s18434_s17 + $0x294] ss:$8 sps:$4 sm:$0xff]   ;;  %v16390_v59 = vld [vmem:[%s18434_s17 + $0xd24] ss:$8 sps:$4 sm:$0xff]  }
 0x27c   : > { %9858 = vst.msk [vmem:[#allocation2 + $0x260] sm:$0xff] %vm9838_vm0, %v7866_v60  ;;  %v7868_v0 = vpop.f32.mrb[39].mxu0  ;;  %11260 = vrot.lane.b32.xlu1 %v9218_v62, %s17281_s27  ;;  %v9220_v1 = vpop.f32.mrb[39].mxu1 }
 0x27e   : > { %8078 = vmatmul.mubr.bf16.gmra.mrb[144].mxu0 %v16359_v52  ;;  %9430 = vmatmul.mubr.bf16.gmra.mrb[144].mxu1 %v16362_v53  ;;  %v16383_v53 = vld [vmem:[%s18434_s17 + $0x280] ss:$8 sps:$4 sm:$0xff]  }
 0x27f   : > { %8085 = vmatprep.mubr.bf16.mxu0 %v16363_v55  ;;  %9437 = vmatprep.mubr.bf16.mxu1 %v16366_v61 }
 0x281   : > { %v7871_v6 = vpop.f32.mrb[40].mxu0  ;;  %v9223_v9 = vpop.f32.mrb[40].mxu1 }
 0x282   : > { %9859 = vst.msk [vmem:[#allocation2 + $0x280] sm:$0xff] %vm9838_vm0, %v7871_v6  ;;  %v7873_v10 = vpop.f32.mrb[41].mxu0  ;;  %v9225_v11 = vpop.f32.mrb[41].mxu1  ;;  %11262 = vrot.lane.b32.xlu0 %v9223_v9, %s17281_s27  ;;  %v16392_v6 = vld [vmem:[%s18434_s17 + $0xd20] ss:$8 sps:$4 sm:$0xff]  }
 0x283   : > { %v7874_v12 = vpop.f32.mrb[42].mxu0  ;;  %v9226_v16 = vpop.f32.mrb[42].mxu1  ;;  %v16393_v10 = vld [vmem:[%s18434_s17 + $0x2a4] ss:$8 sps:$4 sm:$0xff]   ;;  %v16396_v11 = vld [vmem:[%s18434_s17 + $0xd34] ss:$8 sps:$4 sm:$0xff]  }
 0x284   : > { %9860 = vst.msk [vmem:[#allocation2 + $0x2a0] sm:$0xff] %vm9838_vm0, %v7874_v12  ;;  %v7876_v17 = vpop.f32.mrb[43].mxu0  ;;  %11264 = vrot.lane.b32.xlu1 %v9226_v16, %s17281_s27  ;;  %v9228_v18 = vpop.f32.mrb[43].mxu1 }
 0x286   : > { %8086 = vmatmul.mubr.bf16.gmra.mrb[148].mxu0 %v16365_v2  ;;  %9438 = vmatmul.mubr.bf16.gmra.mrb[148].mxu1 %v16368_v4  ;;  %v16389_v4 = vld [vmem:[%s18434_s17 + $0x290] ss:$8 sps:$4 sm:$0xff]  }
 0x287   : > { %8093 = vmatprep.mubr.bf16.mxu0 %v16369_v7  ;;  %9445 = vmatprep.mubr.bf16.mxu1 %v16372_v14 }
 0x289   : > { %v7879_v23 = vpop.f32.mrb[44].mxu0  ;;  %v9231_v25 = vpop.f32.mrb[44].mxu1 }
 0x28a   : > { %9861 = vst.msk [vmem:[#allocation2 + $0x2c0] sm:$0xff] %vm9838_vm0, %v7879_v23  ;;  %v7881_v26 = vpop.f32.mrb[45].mxu0  ;;  %v9233_v28 = vpop.f32.mrb[45].mxu1  ;;  %11266 = vrot.lane.b32.xlu0 %v9231_v25, %s17281_s27  ;;  %v16398_v23 = vld [vmem:[%s18434_s17 + $0xd30] ss:$8 sps:$4 sm:$0xff]  }
 0x28b   : > { %v7882_v29 = vpop.f32.mrb[46].mxu0  ;;  %v9234_v31 = vpop.f32.mrb[46].mxu1  ;;  %v16399_v26 = vld [vmem:[%s18434_s17 + $0x2b4] ss:$8 sps:$4 sm:$0xff]   ;;  %v16402_v28 = vld [vmem:[%s18434_s17 + $0xd44] ss:$8 sps:$4 sm:$0xff]  }
 0x28c   : > { %9862 = vst.msk [vmem:[#allocation2 + $0x2e0] sm:$0xff] %vm9838_vm0, %v7882_v29  ;;  %v7884_v33 = vpop.f32.mrb[47].mxu0  ;;  %11268 = vrot.lane.b32.xlu1 %v9234_v31, %s17281_s27  ;;  %v9236_v34 = vpop.f32.mrb[47].mxu1 }
 0x28e   : > { %8094 = vmatmul.mubr.bf16.gmra.mrb[152].mxu0 %v16371_v21  ;;  %9446 = vmatmul.mubr.bf16.gmra.mrb[152].mxu1 %v16374_v22  ;;  %v16395_v22 = vld [vmem:[%s18434_s17 + $0x2a0] ss:$8 sps:$4 sm:$0xff]  }
 0x28f   : > { %8101 = vmatprep.mubr.bf16.mxu0 %v16375_v24  ;;  %9453 = vmatprep.mubr.bf16.mxu1 %v16378_v30 }
 0x291   : > { %v7887_v35 = vpop.f32.mrb[48].mxu0  ;;  %v9239_v36 = vpop.f32.mrb[48].mxu1 }
 0x292   : > { %9863 = vst.msk [vmem:[#allocation2 + $0x300] sm:$0xff] %vm9838_vm0, %v7887_v35  ;;  %v7889_v37 = vpop.f32.mrb[49].mxu0  ;;  %v9241_v41 = vpop.f32.mrb[49].mxu1  ;;  %11270 = vrot.lane.b32.xlu0 %v9239_v36, %s17281_s27  ;;  %v16401_v36 = vld [vmem:[%s18434_s17 + $0x2b0] ss:$8 sps:$4 sm:$0xff]  }
 0x293   : > { %v7890_v42 = vpop.f32.mrb[50].mxu0  ;;  %v9242_v46 = vpop.f32.mrb[50].mxu1  ;;  %v16405_v41 = vld [vmem:[%s18434_s17 + $0x2c4] ss:$8 sps:$4 sm:$0xff]  }
 0x294   : > { %9864 = vst.msk [vmem:[#allocation2 + $0x320] sm:$0xff] %vm9838_vm0, %v7890_v42  ;;  %v7892_v47 = vpop.f32.mrb[51].mxu0  ;;  %11272 = vrot.lane.b32.xlu1 %v9242_v46, %s17281_s27  ;;  %v9244_v48 = vpop.f32.mrb[51].mxu1 }
 0x296   : > { %8102 = vmatmul.mubr.bf16.gmra.mrb[156].mxu0 %v16377_v38  ;;  %9454 = vmatmul.mubr.bf16.gmra.mrb[156].mxu1 %v16380_v40  ;;  %v16404_v40 = vld [vmem:[%s18434_s17 + $0xd40] ss:$8 sps:$4 sm:$0xff]  }
 0x297   : > { %8109 = vmatprep.mubr.bf16.mxu0 %v16381_v43  ;;  %9461 = vmatprep.mubr.bf16.mxu1 %v16384_v45  ;;  %v16408_v45 = vld [vmem:[%s18434_s17 + $0xd54] ss:$8 sps:$4 sm:$0xff]  }
 0x299   : > { %v7895_v49 = vpop.f32.mrb[52].mxu0  ;;  %v18719_v50 = vpop.f32.mrb[52].mxu1 }
 0x29a   : > { %9865 = vst.msk [vmem:[#allocation2 + $0x340] sm:$0xff] %vm9838_vm0, %v7895_v49  ;;  %v7897_v52 = vpop.f32.mrb[53].mxu0  ;;  %v9249_v55 = vpop.f32.mrb[53].mxu1 }
 0x29b   : > { %v7898_v57 = vpop.f32.mrb[54].mxu0  ;;  %v18726_v60 = vpop.f32.mrb[54].mxu1  ;;  %v16407_v52 = vld [vmem:[%s18434_s17 + $0x2c0] ss:$8 sps:$4 sm:$0xff]   ;;  %v16410_v55 = vld [vmem:[%s18434_s17 + $0xd50] ss:$8 sps:$4 sm:$0xff]  }
 0x29c   : > { %9866 = vst.msk [vmem:[#allocation2 + $0x360] sm:$0xff] %vm9838_vm0, %v7898_v57  ;;  %v7900_v61 = vpop.f32.mrb[55].mxu0  ;;  %v9252_v62 = vpop.f32.mrb[55].mxu1  ;;  %v16411_v57 = vld [vmem:[%s18434_s17 + $0x2d4] ss:$8 sps:$4 sm:$0xff]  }
 0x29d   : > { %v16414_v61 = vld [vmem:[%s18434_s17 + $0xd64] ss:$8 sps:$4 sm:$0xff]  }
 0x29e   : > { %8110 = vmatmul.mubr.bf16.gmra.mrb[160].mxu0 %v16383_v53  ;;  %9462 = vmatmul.mubr.bf16.gmra.mrb[160].mxu1 %v16386_v54 }
 0x29f   : > { %8117 = vmatprep.mubr.bf16.mxu0 %v16387_v58  ;;  %9469 = vmatprep.mubr.bf16.mxu1 %v16390_v59 }
 0x2a1   : > { %v7903_v0 = vpop.f32.mrb[56].mxu0  ;;  %v18729_v1 = vpop.f32.mrb[56].mxu1 }
 0x2a2   : > { %9867 = vst.msk [vmem:[#allocation2 + $0x380] sm:$0xff] %vm9838_vm0, %v7903_v0  ;;  %v7905_v2 = vpop.f32.mrb[57].mxu0  ;;  %v9257_v7 = vpop.f32.mrb[57].mxu1 }
 0x2a3   : > { %v7906_v9 = vpop.f32.mrb[58].mxu0  ;;  %v18736_v12 = vpop.f32.mrb[58].mxu1 }
 0x2a4   : > { %9868 = vst.msk [vmem:[#allocation2 + $0x3a0] sm:$0xff] %vm9838_vm0, %v7906_v9  ;;  %v7908_v14 = vpop.f32.mrb[59].mxu0  ;;  %v9260_v16 = vpop.f32.mrb[59].mxu1 }
 0x2a6   : > { %8118 = vmatmul.mubr.bf16.gmra.mrb[164].mxu0 %v16389_v4  ;;  %9470 = vmatmul.mubr.bf16.gmra.mrb[164].mxu1 %v16392_v6  ;;  %v16413_v6 = vld [vmem:[%s18434_s17 + $0x2d0] ss:$8 sps:$4 sm:$0xff]  }
 0x2a7   : > { %8125 = vmatprep.mubr.bf16.mxu0 %v16393_v10  ;;  %9477 = vmatprep.mubr.bf16.mxu1 %v16396_v11  ;;  %v16416_v10 = vld [vmem:[%s18434_s17 + $0xd60] ss:$8 sps:$4 sm:$0xff]   ;;  %v16417_v11 = vld [vmem:[%s18434_s17 + $0x2e4] ss:$8 sps:$4 sm:$0xff]  }
 0x2a9   : > { %v7911_v17 = vpop.f32.mrb[60].mxu0  ;;  %v18739_v18 = vpop.f32.mrb[60].mxu1 }
 0x2aa   : > { %9869 = vst.msk [vmem:[#allocation2 + $0x3c0] sm:$0xff] %vm9838_vm0, %v7911_v17  ;;  %v7913_v21 = vpop.f32.mrb[61].mxu0  ;;  %v9265_v24 = vpop.f32.mrb[61].mxu1  ;;  %v16420_v17 = vld [vmem:[%s18434_s17 + $0xd74] ss:$8 sps:$4 sm:$0xff]  }
 0x2ab   : > { %v7914_v25 = vpop.f32.mrb[62].mxu0  ;;  %v18746_v29 = vpop.f32.mrb[62].mxu1 }
 0x2ac   : > { %9870 = vst.msk [vmem:[#allocation2 + $0x3e0] sm:$0xff] %vm9838_vm0, %v7914_v25  ;;  %v7916_v30 = vpop.f32.mrb[63].mxu0  ;;  %v9268_v31 = vpop.f32.mrb[63].mxu1  ;;  %v16419_v25 = vld [vmem:[%s18434_s17 + $0x2e0] ss:$8 sps:$4 sm:$0xff]  }
 0x2ad   : > { %v16422_v30 = vld [vmem:[%s18434_s17 + $0xd70] ss:$8 sps:$4 sm:$0xff]   ;;  %v16423_v31 = vld [vmem:[%s18434_s17 + $0x2f4] ss:$8 sps:$4 sm:$0xff]  }
 0x2ae   : > { %8126 = vmatmul.mubr.bf16.gmra.mrb[168].mxu0 %v16395_v22  ;;  %9478 = vmatmul.mubr.bf16.gmra.mrb[168].mxu1 %v16398_v23 }
 0x2af   : > { %8133 = vmatprep.mubr.bf16.mxu0 %v16399_v26  ;;  %9485 = vmatprep.mubr.bf16.mxu1 %v16402_v28 }
 0x2b1   : > { %v7919_v33 = vpop.f32.mrb[64].mxu0  ;;  %v18749_v34 = vpop.f32.mrb[64].mxu1 }
 0x2b2   : > { %9903 = vrot.lane.b32.xlu1 %v7919_v33, %s17282_s28  ;;  %v7921_v35 = vpop.f32.mrb[65].mxu0  ;;  %v9273_v37 = vpop.f32.mrb[65].mxu1 }
 0x2b3   : > { %v7922_v38 = vpop.f32.mrb[66].mxu0  ;;  %v18755_v42 = vpop.f32.mrb[66].mxu1 }
 0x2b4   : > { %v7924_v43 = vpop.f32.mrb[67].mxu0  ;;  %v9276_v46 = vpop.f32.mrb[67].mxu1 }
 0x2b5   : > { %v16425_v43 = vld [vmem:[%s18434_s17 + $0x2f0] ss:$8 sps:$4 sm:$0xff]  }
 0x2b6   : > { %8134 = vmatmul.mubr.bf16.gmra.mrb[172].mxu0 %v16401_v36  ;;  %9905 = vrot.lane.b32.xlu1 %v7922_v38, %s17282_s28  ;;  %v16426_v36 = vld [vmem:[%s18434_s17 + $0xd84] ss:$8 sps:$4 sm:$0xff]  }
 0x2b7   : > { %9486 = vmatmul.mubr.bf16.gmra.mrb[172].mxu1 %v16404_v40  ;;  %8141 = vmatprep.mubr.bf16.mxu0 %v16405_v41 }
 0x2b8   : > { %9493 = vmatprep.mubr.bf16.mxu1 %v16408_v45 }
 0x2b9   : > { %v7927_v47 = vpop.f32.mrb[68].mxu0  ;;  %v18759_v48 = vpop.f32.mrb[68].mxu1 }
 0x2ba   : > { %9907 = vrot.lane.b32.xlu0 %v7927_v47, %s17282_s28  ;;  %v7929_v49 = vpop.f32.mrb[69].mxu0  ;;  %v9281_v53 = vpop.f32.mrb[69].mxu1  ;;  %v16428_v47 = vld [vmem:[%s18434_s17 + $0xd80] ss:$8 sps:$4 sm:$0xff]  }
 0x2bb   : > { %v7930_v54 = vpop.f32.mrb[70].mxu0  ;;  %v18765_v58 = vpop.f32.mrb[70].mxu1  ;;  %v16429_v49 = vld [vmem:[%s18434_s17 + $0x304] ss:$8 sps:$4 sm:$0xff]  }
 0x2bc   : > { %9909 = vrot.lane.b32.xlu1 %v7930_v54, %s17282_s28  ;;  %v7932_v59 = vpop.f32.mrb[71].mxu0  ;;  %v9284_v62 = vpop.f32.mrb[71].mxu1  ;;  %v16432_v54 = vld [vmem:[%s18434_s17 + $0xd94] ss:$8 sps:$4 sm:$0xff]  }
 0x2bd   : > { %v16431_v62 = vld [vmem:[%s18434_s17 + $0x300] ss:$8 sps:$4 sm:$0xff]  }
 0x2be   : > { %8142 = vmatmul.mubr.bf16.gmra.mrb[176].mxu0 %v16407_v52 }
 0x2bf   : > { %9494 = vmatmul.mubr.bf16.gmra.mrb[176].mxu1 %v16410_v55  ;;  %8149 = vmatprep.mubr.bf16.mxu0 %v16411_v57 }
 0x2c0   : > { %9501 = vmatprep.mubr.bf16.mxu1 %v16414_v61 }
 0x2c1   : > { %v7935_v0 = vpop.f32.mrb[72].mxu0  ;;  %v18769_v2 = vpop.f32.mrb[72].mxu1 }
 0x2c2   : > { %9911 = vrot.lane.b32.xlu0 %v7935_v0, %s17282_s28  ;;  %v7937_v4 = vpop.f32.mrb[73].mxu0  ;;  %v9289_v7 = vpop.f32.mrb[73].mxu1 }
 0x2c3   : > { %v7938_v9 = vpop.f32.mrb[74].mxu0  ;;  %v18775_v14 = vpop.f32.mrb[74].mxu1  ;;  %v16435_v7 = vld [vmem:[%s18434_s17 + $0x314] ss:$8 sps:$4 sm:$0xff]  }
 0x2c4   : > { %9913 = vrot.lane.b32.xlu1 %v7938_v9, %s17282_s28  ;;  %v7940_v16 = vpop.f32.mrb[75].mxu0  ;;  %v9292_v21 = vpop.f32.mrb[75].mxu1 }
 0x2c6   : > { %8150 = vmatmul.mubr.bf16.gmra.mrb[180].mxu0 %v16413_v6  ;;  %v16434_v6 = vld [vmem:[%s18434_s17 + $0xd90] ss:$8 sps:$4 sm:$0xff]  }
 0x2c7   : > { %9502 = vmatmul.mubr.bf16.gmra.mrb[180].mxu1 %v16416_v10  ;;  %8157 = vmatprep.mubr.bf16.mxu0 %v16417_v11  ;;  %v16438_v11 = vld [vmem:[%s18434_s17 + $0xda4] ss:$8 sps:$4 sm:$0xff]  }
 0x2c8   : > { %9509 = vmatprep.mubr.bf16.mxu1 %v16420_v17 }
 0x2c9   : > { %v7943_v22 = vpop.f32.mrb[76].mxu0  ;;  %v18779_v23 = vpop.f32.mrb[76].mxu1 }
 0x2ca   : > { %21479 = vst [vmem:[#allocation13_spill] sm:$0xff] %v18779_v23  ;;  %9915 = vrot.lane.b32.xlu0 %v7943_v22, %s17282_s28  ;;  %v7945_v24 = vpop.f32.mrb[77].mxu0  ;;  %v9297_v26 = vpop.f32.mrb[77].mxu1 }
 0x2cb   : > { %v7946_v28 = vpop.f32.mrb[78].mxu0  ;;  %v18785_v33 = vpop.f32.mrb[78].mxu1  ;;  %v16437_v24 = vld [vmem:[%s18434_s17 + $0x310] ss:$8 sps:$4 sm:$0xff]  }
 0x2cc   : > { %21480 = vst [vmem:[#allocation14_spill] sm:$0xff] %v18785_v33  ;;  %9917 = vrot.lane.b32.xlu1 %v7946_v28, %s17282_s28  ;;  %v7948_v35 = vpop.f32.mrb[79].mxu0  ;;  %v9300_v37 = vpop.f32.mrb[79].mxu1  ;;  %v16440_v28 = vld [vmem:[%s18434_s17 + $0xda0] ss:$8 sps:$4 sm:$0xff]  }
 0x2ce   : > { %8158 = vmatmul.mubr.bf16.gmra.mrb[184].mxu0 %v16419_v25 }
 0x2cf   : > { %9510 = vmatmul.mubr.bf16.gmra.mrb[184].mxu1 %v16422_v30  ;;  %8165 = vmatprep.mubr.bf16.mxu0 %v16423_v31  ;;  %v16441_v30 = vld [vmem:[%s18434_s17 + $0x324] ss:$8 sps:$4 sm:$0xff]  }
 0x2d0   : > { %9517 = vmatprep.mubr.bf16.mxu1 %v16426_v36  ;;  %v16444_v36 = vld [vmem:[%s18434_s17 + $0xdb4] ss:$8 sps:$4 sm:$0xff]  }
 0x2d1   : > { %v7951_v38 = vpop.f32.mrb[80].mxu0  ;;  %v18789_v40 = vpop.f32.mrb[80].mxu1 }
 0x2d2   : > { %21481 = vst [vmem:[#allocation15_spill] sm:$0xff] %v18789_v40  ;;  %9919 = vrot.lane.b32.xlu0 %v7951_v38, %s17282_s28  ;;  %v7953_v41 = vpop.f32.mrb[81].mxu0  ;;  %v9305_v45 = vpop.f32.mrb[81].mxu1 }
 0x2d3   : > { %v7954_v46 = vpop.f32.mrb[82].mxu0  ;;  %v18795_v52 = vpop.f32.mrb[82].mxu1  ;;  %v16443_v45 = vld [vmem:[%s18434_s17 + $0x320] ss:$8 sps:$4 sm:$0xff]  }
 0x2d4   : > { %21482 = vst [vmem:[#allocation16_spill] sm:$0xff] %v18795_v52  ;;  %9921 = vrot.lane.b32.xlu1 %v7954_v46, %s17282_s28  ;;  %v7956_v53 = vpop.f32.mrb[83].mxu0  ;;  %v9308_v55 = vpop.f32.mrb[83].mxu1 }
 0x2d5   : > { %v16447_v53 = vld [vmem:[%s18434_s17 + $0x334] ss:$8 sps:$4 sm:$0xff]  }
 0x2d6   : > { %8166 = vmatmul.mubr.bf16.gmra.mrb[188].mxu0 %v16425_v43 }
 0x2d7   : > { %9518 = vmatmul.mubr.bf16.gmra.mrb[188].mxu1 %v16428_v47  ;;  %8173 = vmatprep.mubr.bf16.mxu0 %v16429_v49  ;;  %v16446_v49 = vld [vmem:[%s18434_s17 + $0xdb0] ss:$8 sps:$4 sm:$0xff]  }
 0x2d8   : > { %9525 = vmatprep.mubr.bf16.mxu1 %v16432_v54 }
 0x2d9   : > { %v7959_v57 = vpop.f32.mrb[84].mxu0  ;;  %v18799_v59 = vpop.f32.mrb[84].mxu1 }
 0x2da   : > { %21483 = vst [vmem:[#allocation17_spill] sm:$0xff] %v18799_v59  ;;  %9923 = vrot.lane.b32.xlu0 %v7959_v57, %s17282_s28  ;;  %v7961_v61 = vpop.f32.mrb[85].mxu0  ;;  %v9313_v0 = vpop.f32.mrb[85].mxu1  ;;  %v16450_v57 = vld [vmem:[%s18434_s17 + $0xdc4] ss:$8 sps:$4 sm:$0xff]  }
 0x2db   : > { %v7962_v4 = vpop.f32.mrb[86].mxu0  ;;  %v18805_v9 = vpop.f32.mrb[86].mxu1 }
 0x2dc   : > { %21484 = vst [vmem:[#allocation18_spill] sm:$0xff] %v18805_v9  ;;  %9925 = vrot.lane.b32.xlu1 %v7962_v4, %s17282_s28  ;;  %v7964_v10 = vpop.f32.mrb[87].mxu0  ;;  %v9316_v16 = vpop.f32.mrb[87].mxu1 }
 0x2dd   : > { %v16453_v16 = vld [vmem:[%s18434_s17 + $0x344] ss:$8 sps:$4 sm:$0xff]  }
 0x2de   : > { %8174 = vmatmul.mubr.bf16.gmra.mrb[192].mxu0 %v16431_v62 }
 0x2df   : > { %9526 = vmatmul.mubr.bf16.gmra.mrb[192].mxu1 %v16434_v6  ;;  %8181 = vmatprep.mubr.bf16.mxu0 %v16435_v7  ;;  %v16449_v6 = vld [vmem:[%s18434_s17 + $0x330] ss:$8 sps:$4 sm:$0xff]  }
 0x2e0   : > { %9533 = vmatprep.mubr.bf16.mxu1 %v16438_v11  ;;  %v16452_v11 = vld [vmem:[%s18434_s17 + $0xdc0] ss:$8 sps:$4 sm:$0xff]  }
 0x2e1   : > { %v7967_v17 = vpop.f32.mrb[88].mxu0  ;;  %v18809_v21 = vpop.f32.mrb[88].mxu1 }
 0x2e2   : > { %21485 = vst [vmem:[#allocation19_spill] sm:$0xff] %v18809_v21  ;;  %9927 = vrot.lane.b32.xlu0 %v7967_v17, %s17282_s28  ;;  %v7969_v22 = vpop.f32.mrb[89].mxu0  ;;  %v9321_v25 = vpop.f32.mrb[89].mxu1  ;;  %v16603_v21 = vld [vmem:[%s18434_s17 + $0xf50] ss:$8 sps:$4 sm:$0xff]  }
 0x2e3   : > { %v7970_v26 = vpop.f32.mrb[90].mxu0  ;;  %v18815_v31 = vpop.f32.mrb[90].mxu1 }
 0x2e4   : > { %21486 = vst [vmem:[#allocation20_spill] sm:$0xff] %v18815_v31  ;;  %9929 = vrot.lane.b32.xlu1 %v7970_v26, %s17282_s28  ;;  %v7972_v35 = vpop.f32.mrb[91].mxu0  ;;  %v9324_v37 = vpop.f32.mrb[91].mxu1 }
 0x2e5   : > { %v18835_v26 = vpop.permute.xlu1 %11252 }
 0x2e6   : > { %8182 = vmatmul.mubr.bf16.gmra.mrb[196].mxu0 %v16437_v24  ;;  %v16456_v24 = vld [vmem:[%s18434_s17 + $0xdd4] ss:$8 sps:$4 sm:$0xff]  }
 0x2e7   : > { %9534 = vmatmul.mubr.bf16.gmra.mrb[196].mxu1 %v16440_v28  ;;  %8189 = vmatprep.mubr.bf16.mxu0 %v16441_v30 }
 0x2e8   : > { %9541 = vmatprep.mubr.bf16.mxu1 %v16444_v36  ;;  %v16455_v36 = vld [vmem:[%s18434_s17 + $0x340] ss:$8 sps:$4 sm:$0xff]  }
 0x2e9   : > { %v7975_v38 = vpop.f32.mrb[92].mxu0  ;;  %v9327_v41 = vpop.f32.mrb[92].mxu1 }
 0x2ea   : > { %9931 = vrot.lane.b32.xlu0 %v7975_v38, %s17282_s28  ;;  %v7977_v43 = vpop.f32.mrb[93].mxu0  ;;  %11378 = vst.msk [vmem:[#allocation2 + $0x18] sm:$0xff] %vm9838_vm0, %v9327_v41  ;;  %v9329_v46 = vpop.f32.mrb[93].mxu1  ;;  %v16458_v41 = vld [vmem:[%s18434_s17 + $0xdd0] ss:$8 sps:$4 sm:$0xff]  }
 0x2eb   : > { %v7978_v47 = vpop.f32.mrb[94].mxu0  ;;  %v9330_v54 = vpop.f32.mrb[94].mxu1  ;;  %v16459_v43 = vld [vmem:[%s18434_s17 + $0x354] ss:$8 sps:$4 sm:$0xff]  }
 0x2ec   : > { %9933 = vrot.lane.b32.xlu1 %v7978_v47, %s17282_s28  ;;  %v7980_v55 = vpop.f32.mrb[95].mxu0  ;;  %11379 = vst.msk [vmem:[#allocation2 + $0x38] sm:$0xff] %vm9838_vm0, %v9330_v54  ;;  %v9332_v61 = vpop.f32.mrb[95].mxu1  ;;  %v16462_v47 = vld [vmem:[%s18434_s17 + $0xde4] ss:$8 sps:$4 sm:$0xff]  }
 0x2ed   : > { %v18847_v54 = vpop.permute.xlu0 %11250 }
 0x2ee   : > { %8190 = vmatmul.mubr.bf16.gmra.mrb[200].mxu0 %v16443_v45 }
 0x2ef   : > { %9542 = vmatmul.mubr.bf16.gmra.mrb[200].mxu1 %v16446_v49  ;;  %8197 = vmatprep.mubr.bf16.mxu0 %v16447_v53  ;;  %v18845_v53 = vpop.permute.xlu1 %11256 }
 0x2f0   : > { %9549 = vmatprep.mubr.bf16.mxu1 %v16450_v57  ;;  %21487 = vst [vmem:[#allocation21_spill] sm:$0xff] %v18845_v53 }
 0x2f1   : > { %v7983_v62 = vpop.f32.mrb[96].mxu0  ;;  %v9335_v0 = vpop.f32.mrb[96].mxu1 }
 0x2f2   : > { %9935 = vrot.lane.b32.xlu0 %v7983_v62, %s17282_s28  ;;  %v7985_v4 = vpop.f32.mrb[97].mxu0  ;;  %11380 = vst.msk [vmem:[#allocation2 + $0x58] sm:$0xff] %vm9838_vm0, %v9335_v0  ;;  %v9337_v7 = vpop.f32.mrb[97].mxu1  ;;  %v16461_v62 = vld [vmem:[%s18434_s17 + $0x350] ss:$8 sps:$4 sm:$0xff]  }
 0x2f3   : > { %v7986_v10 = vpop.f32.mrb[98].mxu0  ;;  %v9338_v17 = vpop.f32.mrb[98].mxu1  ;;  %v16465_v7 = vld [vmem:[%s18434_s17 + $0x364] ss:$8 sps:$4 sm:$0xff]  }
 0x2f4   : > { %9937 = vrot.lane.b32.xlu1 %v7986_v10, %s17282_s28  ;;  %v7988_v22 = vpop.f32.mrb[99].mxu0  ;;  %11381 = vst.msk [vmem:[#allocation2 + $0x78] sm:$0xff] %vm9838_vm0, %v9338_v17  ;;  %v9340_v25 = vpop.f32.mrb[99].mxu1 }
 0x2f5   : > { %v18857_v22 = vpop.permute.xlu1 %11260 }
 0x2f6   : > { %8198 = vmatmul.mubr.bf16.gmra.mrb[204].mxu0 %v16449_v6  ;;  %v16464_v6 = vld [vmem:[%s18434_s17 + $0xde0] ss:$8 sps:$4 sm:$0xff]   ;;  %21488 = vst [vmem:[#allocation22_spill] sm:$0xff] %v18857_v22 }
 0x2f7   : > { %9550 = vmatmul.mubr.bf16.gmra.mrb[204].mxu1 %v16452_v11  ;;  %8205 = vmatprep.mubr.bf16.mxu0 %v16453_v16  ;;  %v16468_v16 = vld [vmem:[%s18434_s17 + $0xdf4] ss:$8 sps:$4 sm:$0xff]  }
 0x2f8   : > { %9557 = vmatprep.mubr.bf16.mxu1 %v16456_v24  ;;  %v18859_v24 = vpop.permute.xlu0 %11254 }
 0x2f9   : > { %v7991_v28 = vpop.f32.mrb[100].mxu0  ;;  %v9343_v30 = vpop.f32.mrb[100].mxu1  ;;  %21489 = vst [vmem:[#allocation23_spill] sm:$0xff] %v18859_v24 }
 0x2fa   : > { %9939 = vrot.lane.b32.xlu0 %v7991_v28, %s17282_s28  ;;  %v7993_v35 = vpop.f32.mrb[101].mxu0  ;;  %11382 = vst.msk [vmem:[#allocation2 + $0x98] sm:$0xff] %vm9838_vm0, %v9343_v30  ;;  %v9345_v37 = vpop.f32.mrb[101].mxu1 }
 0x2fb   : > { %v7994_v38 = vpop.f32.mrb[102].mxu0  ;;  %v9346_v45 = vpop.f32.mrb[102].mxu1  ;;  %v16467_v35 = vld [vmem:[%s18434_s17 + $0x360] ss:$8 sps:$4 sm:$0xff]  }
 0x2fc   : > { %9941 = vrot.lane.b32.xlu1 %v7994_v38, %s17282_s28  ;;  %v7996_v46 = vpop.f32.mrb[103].mxu0  ;;  %11383 = vst.msk [vmem:[#allocation2 + $0xb8] sm:$0xff] %vm9838_vm0, %v9346_v45  ;;  %v9348_v49 = vpop.f32.mrb[103].mxu1  ;;  %v16470_v38 = vld [vmem:[%s18434_s17 + $0xdf0] ss:$8 sps:$4 sm:$0xff]  }
 0x2fd   : > { %v16474_v46 = vld [vmem:[%s18434_s17 + $0xe04] ss:$8 sps:$4 sm:$0xff]   ;;  %v18869_v49 = vpop.permute.xlu1 %11264 }
 0x2fe   : > { %8206 = vmatmul.mubr.bf16.gmra.mrb[208].mxu0 %v16455_v36  ;;  %21490 = vst [vmem:[#allocation24_spill] sm:$0xff] %v18869_v49 }
 0x2ff   : > { %9558 = vmatmul.mubr.bf16.gmra.mrb[208].mxu1 %v16458_v41  ;;  %8213 = vmatprep.mubr.bf16.mxu0 %v16459_v43  ;;  %v16471_v41 = vld [vmem:[%s18434_s17 + $0x374] ss:$8 sps:$4 sm:$0xff]  }
 0x300   : > { %9565 = vmatprep.mubr.bf16.mxu1 %v16462_v47 }
 0x301   : > { %v7999_v55 = vpop.f32.mrb[104].mxu0  ;;  %v9351_v57 = vpop.f32.mrb[104].mxu1 }
 0x302   : > { %9943 = vrot.lane.b32.xlu0 %v7999_v55, %s17282_s28  ;;  %v8001_v61 = vpop.f32.mrb[105].mxu0  ;;  %11384 = vst.msk [vmem:[#allocation2 + $0xd8] sm:$0xff] %vm9838_vm0, %v9351_v57  ;;  %v9353_v0 = vpop.f32.mrb[105].mxu1 }
 0x303   : > { %v8002_v4 = vpop.f32.mrb[106].mxu0  ;;  %v9354_v10 = vpop.f32.mrb[106].mxu1  ;;  %v16473_v0 = vld [vmem:[%s18434_s17 + $0x370] ss:$8 sps:$4 sm:$0xff]  }
 0x304   : > { %9945 = vrot.lane.b32.xlu1 %v8002_v4, %s17282_s28  ;;  %v8004_v11 = vpop.f32.mrb[107].mxu0  ;;  %11385 = vst.msk [vmem:[#allocation2 + $0xf8] sm:$0xff] %vm9838_vm0, %v9354_v10  ;;  %v9356_v17 = vpop.f32.mrb[107].mxu1  ;;  %v16477_v10 = vld [vmem:[%s18434_s17 + $0x384] ss:$8 sps:$4 sm:$0xff]  }
 0x305   : > { %v18871_v55 = vpop.permute.xlu0 %11258  ;;  %v16480_v17 = vld [vmem:[%s18434_s17 + $0xe14] ss:$8 sps:$4 sm:$0xff]  }
 0x306   : > { %8214 = vmatmul.mubr.bf16.gmra.mrb[212].mxu0 %v16461_v62  ;;  %21491 = vst [vmem:[#allocation25_spill] sm:$0xff] %v18871_v55  ;;  %v16909_v55 = vld [vmem:[%s18434_s17 + $0xa54] ss:$8 sps:$4 sm:$0xff]  }
 0x307   : > { %9566 = vmatmul.mubr.bf16.gmra.mrb[212].mxu1 %v16464_v6  ;;  %8221 = vmatprep.mubr.bf16.mxu0 %v16465_v7  ;;  %v16476_v7 = vld [vmem:[%s18434_s17 + $0xe00] ss:$8 sps:$4 sm:$0xff]  }
 0x308   : > { %9573 = vmatprep.mubr.bf16.mxu1 %v16468_v16 }
 0x309   : > { %v8007_v25 = vpop.f32.mrb[108].mxu0  ;;  %v9359_v28 = vpop.f32.mrb[108].mxu1 }
 0x30a   : > { %9947 = vrot.lane.b32.xlu0 %v8007_v25, %s17282_s28  ;;  %v8009_v30 = vpop.f32.mrb[109].mxu0  ;;  %11386 = vst.msk [vmem:[#allocation2 + $0x118] sm:$0xff] %vm9838_vm0, %v9359_v28  ;;  %v9361_v36 = vpop.f32.mrb[109].mxu1 }
 0x30b   : > { %v8010_v37 = vpop.f32.mrb[110].mxu0  ;;  %v9362_v43 = vpop.f32.mrb[110].mxu1 }
 0x30c   : > { %9949 = vrot.lane.b32.xlu1 %v8010_v37, %s17282_s28  ;;  %v8012_v45 = vpop.f32.mrb[111].mxu0  ;;  %11387 = vst.msk [vmem:[#allocation2 + $0x138] sm:$0xff] %vm9838_vm0, %v9362_v43  ;;  %v9364_v47 = vpop.f32.mrb[111].mxu1 }
 0x30d   : > { %v18881_v28 = vpop.permute.xlu1 %11268  ;;  %v18883_v30 = vpop.permute.xlu0 %11262  ;;  %v16482_v45 = vld [vmem:[%s18434_s17 + $0xe10] ss:$8 sps:$4 sm:$0xff]  }
 0x30e   : > { %8222 = vmatmul.mubr.bf16.gmra.mrb[216].mxu0 %v16467_v35  ;;  %21492 = vst [vmem:[#allocation26_spill] sm:$0xff] %v18881_v28  ;;  %21493 = vst [vmem:[#allocation27_spill] sm:$0xff] %v18883_v30  ;;  %v16656_v30 = vld [vmem:[%s18434_s17 + $0x604] ss:$8 sps:$4 sm:$0xff]  }
 0x30f   : > { %9574 = vmatmul.mubr.bf16.gmra.mrb[216].mxu1 %v16470_v38  ;;  %8229 = vmatprep.mubr.bf16.mxu0 %v16471_v41  ;;  %v16479_v38 = vld [vmem:[%s18434_s17 + $0x380] ss:$8 sps:$4 sm:$0xff]  }
 0x310   : > { %9581 = vmatprep.mubr.bf16.mxu1 %v16474_v46  ;;  %v16483_v46 = vld [vmem:[%s18434_s17 + $0x394] ss:$8 sps:$4 sm:$0xff]  }
 0x311   : > { %v8015_v57 = vpop.f32.mrb[112].mxu0  ;;  %v9367_v61 = vpop.f32.mrb[112].mxu1 }
 0x312   : > { %9951 = vrot.lane.b32.xlu0 %v8015_v57, %s17282_s28  ;;  %v8017_v62 = vpop.f32.mrb[113].mxu0  ;;  %11388 = vst.msk [vmem:[#allocation2 + $0x158] sm:$0xff] %vm9838_vm0, %v9367_v61  ;;  %v9369_v4 = vpop.f32.mrb[113].mxu1  ;;  %v16486_v61 = vld [vmem:[%s18434_s17 + $0xe24] ss:$8 sps:$4 sm:$0xff]  }
 0x313   : > { %v8018_v6 = vpop.f32.mrb[114].mxu0  ;;  %v9370_v11 = vpop.f32.mrb[114].mxu1 }
 0x314   : > { %9953 = vrot.lane.b32.xlu1 %v8018_v6, %s17282_s28  ;;  %v8020_v16 = vpop.f32.mrb[115].mxu0  ;;  %11389 = vst.msk [vmem:[#allocation2 + $0x178] sm:$0xff] %vm9838_vm0, %v9370_v11  ;;  %v9372_v25 = vpop.f32.mrb[115].mxu1  ;;  %v16485_v11 = vld [vmem:[%s18434_s17 + $0x390] ss:$8 sps:$4 sm:$0xff]  }
 0x315   : > { %v18895_v4 = vpop.permute.xlu0 %11266  ;;  %v16488_v25 = vld [vmem:[%s18434_s17 + $0xe20] ss:$8 sps:$4 sm:$0xff]  }
 0x316   : > { %8230 = vmatmul.mubr.bf16.gmra.mrb[220].mxu0 %v16473_v0  ;;  %v18893_v0 = vpop.permute.xlu1 %11272  ;;  %21495 = vst [vmem:[#allocation29_spill] sm:$0xff] %v18895_v4 }
 0x317   : > { %9582 = vmatmul.mubr.bf16.gmra.mrb[220].mxu1 %v16476_v7  ;;  %8237 = vmatprep.mubr.bf16.mxu0 %v16477_v10  ;;  %21494 = vst [vmem:[#allocation28_spill] sm:$0xff] %v18893_v0 }
 0x318   : > { %9589 = vmatprep.mubr.bf16.mxu1 %v16480_v17 }
 0x319   : > { %v8023_v35 = vpop.f32.mrb[116].mxu0  ;;  %v9375_v36 = vpop.f32.mrb[116].mxu1 }
 0x31a   : > { %9955 = vrot.lane.b32.xlu0 %v8023_v35, %s17282_s28  ;;  %v8025_v37 = vpop.f32.mrb[117].mxu0  ;;  %11390 = vst.msk [vmem:[#allocation2 + $0x198] sm:$0xff] %vm9838_vm0, %v9375_v36  ;;  %v9377_v41 = vpop.f32.mrb[117].mxu1  ;;  %v16489_v35 = vld [vmem:[%s18434_s17 + $0x3a4] ss:$8 sps:$4 sm:$0xff]  }
 0x31b   : > { %v8026_v43 = vpop.f32.mrb[118].mxu0  ;;  %v9378_v47 = vpop.f32.mrb[118].mxu1  ;;  %v16491_v41 = vld [vmem:[%s18434_s17 + $0xe34] ss:$8 sps:$4 sm:$0xff]  }
 0x31c   : > { %9957 = vrot.lane.b32.xlu1 %v8026_v43, %s17282_s28  ;;  %v8028_v57 = vpop.f32.mrb[119].mxu0  ;;  %11391 = vst.msk [vmem:[#allocation2 + $0x1b8] sm:$0xff] %vm9838_vm0, %v9378_v47  ;;  %v9380_v62 = vpop.f32.mrb[119].mxu1  ;;  %v4674_v47 = vld [vmem:[%s18434_s17 + $0x3a8] sm:$0xff] }
 0x31e   : > { %8238 = vmatmul.mubr.bf16.gmra.mrb[224].mxu0 %v16479_v38 }
 0x31f   : > { %9590 = vmatmul.mubr.bf16.gmra.mrb[224].mxu1 %v16482_v45  ;;  %8245 = vmatprep.mubr.bf16.mxu0 %v16483_v46  ;;  %v18906_v45 = vpop.permute.xlu0 %11270  ;;  %v4673_v46 = vld [vmem:[%s18434_s17 + $0x3a0] sm:$0xff] }
 0x320   : > { %9597 = vmatprep.mubr.bf16.mxu1 %v16486_v61  ;;  %21496 = vst [vmem:[#allocation30_spill] sm:$0xff] %v18906_v45 }
 0x321   : > { %v8031_v6 = vpop.f32.mrb[120].mxu0  ;;  %v9383_v7 = vpop.f32.mrb[120].mxu1 }
 0x322   : > { %9959 = vrot.lane.b32.xlu0 %v8031_v6, %s17282_s28  ;;  %v8033_v10 = vpop.f32.mrb[121].mxu0  ;;  %11392 = vst.msk [vmem:[#allocation2 + $0x1d8] sm:$0xff] %vm9838_vm0, %v9383_v7  ;;  %v9385_v16 = vpop.f32.mrb[121].mxu1  ;;  %v15107_v7 = vcombine.low %v4673_v46, %v4674_v47  ;;  %v4676_v46 = vld [vmem:[%s18434_s17 + $0x3b8] sm:$0xff] }
 0x323   : > { %v8034_v17 = vpop.f32.mrb[122].mxu0  ;;  %v9386_v36 = vpop.f32.mrb[122].mxu1  ;;  %v16493_v16 = vld [vmem:[%s18434_s17 + $0xe30] ss:$8 sps:$4 sm:$0xff]  }
 0x324   : > { %v9904_v37 = vpop.permute.xlu1 %9903  ;;  %9961 = vrot.lane.b32.xlu1 %v8034_v17, %s17282_s28  ;;  %v8036_v38 = vpop.f32.mrb[123].mxu0  ;;  %11393 = vst.msk [vmem:[#allocation2 + $0x1f8] sm:$0xff] %vm9838_vm0, %v9386_v36  ;;  %v16494_v17 = vld [vmem:[%s18434_s17 + $0x3b4] ss:$8 sps:$4 sm:$0xff]  }
 0x325   : > { %10000 = vst.msk [vmem:[#allocation2] sm:$0xff] %vm9999_vm1, %v9904_v37  ;;  %v9388_v43 = vpop.f32.mrb[123].mxu1  ;;  %v16496_v37 = vld [vmem:[%s18434_s17 + $0xe44] ss:$8 sps:$4 sm:$0xff]  }
 0x326   : > { %8246 = vmatmul.mubr.bf16.gmra.mrb[228].mxu0 %v16485_v11  ;;  %v4675_v43 = vld [vmem:[%s18434_s17 + $0x3b0] sm:$0xff] }
 0x327   : > { %9598 = vmatmul.mubr.bf16.gmra.mrb[228].mxu1 %v16488_v25  ;;  %8253 = vmatprep.mubr.bf16.mxu0 %v16489_v35 }
 0x328   : > { %v9906_v57 = vpop.permute.xlu1 %9905  ;;  %9605 = vmatprep.mubr.bf16.mxu1 %v16491_v41 }
 0x329   : > { %10001 = vst.msk [vmem:[#allocation2 + $0x20] sm:$0xff] %vm9999_vm1, %v9906_v57  ;;  %v8039_v61 = vpop.f32.mrb[124].mxu0  ;;  %v9391_v62 = vpop.f32.mrb[124].mxu1 }
 0x32a   : > { %9963 = vrot.lane.b32.xlu0 %v8039_v61, %s17282_s28  ;;  %v8041_v6 = vpop.f32.mrb[125].mxu0  ;;  %11394 = vst.msk [vmem:[#allocation2 + $0x218] sm:$0xff] %vm9838_vm0, %v9391_v62  ;;  %v9393_v10 = vpop.f32.mrb[125].mxu1  ;;  %v15109_v62 = vcombine.low %v4675_v43, %v4676_v46 }
 0x32b   : > { %v8042_v11 = vpop.f32.mrb[126].mxu0  ;;  %v9394_v25 = vpop.f32.mrb[126].mxu1  ;;  %v16498_v10 = vld [vmem:[%s18434_s17 + $0xe40] ss:$8 sps:$4 sm:$0xff]  }
 0x32c   : > { %v9908_v35 = vpop.permute.xlu0 %9907  ;;  %9965 = vrot.lane.b32.xlu1 %v8042_v11, %s17282_s28  ;;  %v8044_v36 = vpop.f32.mrb[127].mxu0  ;;  %11395 = vst.msk [vmem:[#allocation2 + $0x238] sm:$0xff] %vm9838_vm0, %v9394_v25  ;;  %v16499_v11 = vld [vmem:[%s18434_s17 + $0x3c4] ss:$8 sps:$4 sm:$0xff]  }
 0x32d   : > { %10002 = vst.msk [vmem:[#allocation2 + $0x40] sm:$0xff] %vm9999_vm1, %v9908_v35  ;;  %v9396_v38 = vpop.f32.mrb[127].mxu1  ;;  %v16501_v35 = vld [vmem:[%s18434_s17 + $0xe54] ss:$8 sps:$4 sm:$0xff]  }
 0x32e   : > { %8254 = vmatmul.mubr.bf16.gmra.mrb[232].mxu0 %v15107_v7  ;;  %v9910_v41 = vpop.permute.xlu1 %9909  ;;  %v4677_v38 = vld [vmem:[%s18434_s17 + $0x3c0] sm:$0xff] }
 0x32f   : > { %10003 = vst.msk [vmem:[#allocation2 + $0x60] sm:$0xff] %vm9999_vm1, %v9910_v41  ;;  %9606 = vmatmul.mubr.bf16.gmra.mrb[232].mxu1 %v16493_v16  ;;  %8261 = vmatprep.mubr.bf16.mxu0 %v16494_v17  ;;  %v4678_v41 = vld [vmem:[%s18434_s17 + $0x3c8] sm:$0xff] }
 0x330   : > { %9613 = vmatprep.mubr.bf16.mxu1 %v16496_v37 }
 0x331   : > { %v8047_v47 = vpop.f32.mrb[128].mxu0  ;;  %v9399_v57 = vpop.f32.mrb[128].mxu1 }
 0x332   : > { %10064 = vrot.lane.b32.xlu0 %v8047_v47, %s17283_s29  ;;  %v8049_v61 = vpop.f32.mrb[129].mxu0  ;;  %11396 = vst.msk [vmem:[#allocation2 + $0x258] sm:$0xff] %vm9838_vm0, %v9399_v57  ;;  %v9401_v6 = vpop.f32.mrb[129].mxu1  ;;  %v15111_v57 = vcombine.low %v4677_v38, %v4678_v41 }
 0x333   : > { %v8050_v7 = vpop.f32.mrb[130].mxu0  ;;  %v9402_v16 = vpop.f32.mrb[130].mxu1  ;;  %v16503_v6 = vld [vmem:[%s18434_s17 + $0xe50] ss:$8 sps:$4 sm:$0xff]  }
 0x334   : > { %v9912_v25 = vpop.permute.xlu0 %9911  ;;  %10066 = vrot.lane.b32.xlu1 %v8050_v7, %s17283_s29  ;;  %v8052_v17 = vpop.f32.mrb[131].mxu0  ;;  %11397 = vst.msk [vmem:[#allocation2 + $0x278] sm:$0xff] %vm9838_vm0, %v9402_v16  ;;  %v16504_v7 = vld [vmem:[%s18434_s17 + $0x3d4] ss:$8 sps:$4 sm:$0xff]  }
 0x335   : > { %10004 = vst.msk [vmem:[#allocation2 + $0x80] sm:$0xff] %vm9999_vm1, %v9912_v25  ;;  %v9404_v36 = vpop.f32.mrb[131].mxu1  ;;  %v16513_v25 = vld [vmem:[%s18434_s17 + $0xe64] ss:$8 sps:$4 sm:$0xff]  }
 0x336   : > { %8262 = vmatmul.mubr.bf16.gmra.mrb[236].mxu0 %v15109_v62  ;;  %v9914_v37 = vpop.permute.xlu1 %9913  ;;  %v4679_v36 = vld [vmem:[%s18434_s17 + $0x3d0] sm:$0xff] }
 0x337   : > { %10005 = vst.msk [vmem:[#allocation2 + $0xa0] sm:$0xff] %vm9999_vm1, %v9914_v37  ;;  %9614 = vmatmul.mubr.bf16.gmra.mrb[236].mxu1 %v16498_v10  ;;  %8269 = vmatprep.mubr.bf16.mxu0 %v16499_v11  ;;  %v4680_v37 = vld [vmem:[%s18434_s17 + $0x3d8] sm:$0xff] }
 0x338   : > { %9621 = vmatprep.mubr.bf16.mxu1 %v16501_v35 }
 0x339   : > { %v8055_v43 = vpop.f32.mrb[132].mxu0  ;;  %v9407_v46 = vpop.f32.mrb[132].mxu1 }
 0x33a   : > { %10068 = vrot.lane.b32.xlu0 %v8055_v43, %s17283_s29  ;;  %v8057_v47 = vpop.f32.mrb[133].mxu0  ;;  %11398 = vst.msk [vmem:[#allocation2 + $0x298] sm:$0xff] %vm9838_vm0, %v9407_v46  ;;  %v9409_v61 = vpop.f32.mrb[133].mxu1  ;;  %v15113_v46 = vcombine.low %v4679_v36, %v4680_v37 }
 0x33b   : > { %v8058_v62 = vpop.f32.mrb[134].mxu0  ;;  %v9410_v10 = vpop.f32.mrb[134].mxu1  ;;  %v16506_v61 = vld [vmem:[%s18434_s17 + $0x3e4] ss:$8 sps:$4 sm:$0xff]  }
 0x33c   : > { %v9916_v16 = vpop.permute.xlu0 %9915  ;;  %10070 = vrot.lane.b32.xlu1 %v8058_v62, %s17283_s29  ;;  %v8060_v11 = vpop.f32.mrb[135].mxu0  ;;  %11399 = vst.msk [vmem:[#allocation2 + $0x2b8] sm:$0xff] %vm9838_vm0, %v9410_v10 }
 0x33d   : > { %10006 = vst.msk [vmem:[#allocation2 + $0xc0] sm:$0xff] %vm9999_vm1, %v9916_v16  ;;  %v9412_v17 = vpop.f32.mrb[135].mxu1  ;;  %v16519_v16 = vld [vmem:[%s18434_s17 + $0xe74] ss:$8 sps:$4 sm:$0xff]  }
 0x33e   : > { %8270 = vmatmul.mubr.bf16.gmra.mrb[240].mxu0 %v15111_v57  ;;  %v9918_v35 = vpop.permute.xlu1 %9917  ;;  %v4681_v17 = vld [vmem:[%s18434_s17 + $0x3e0] sm:$0xff] }
 0x33f   : > { %10007 = vst.msk [vmem:[#allocation2 + $0xe0] sm:$0xff] %vm9999_vm1, %v9918_v35  ;;  %9622 = vmatmul.mubr.bf16.gmra.mrb[240].mxu1 %v16503_v6  ;;  %8277 = vmatprep.mubr.bf16.mxu0 %v16504_v7  ;;  %v16515_v6 = vld [vmem:[%s18434_s17 + $0xe60] ss:$8 sps:$4 sm:$0xff]  }
 0x340   : > { %9629 = vmatprep.mubr.bf16.mxu1 %v16513_v25  ;;  %v4682_v35 = vld [vmem:[%s18434_s17 + $0x3e8] sm:$0xff] }
 0x341   : > { %v8063_v38 = vpop.f32.mrb[136].mxu0  ;;  %v9415_v41 = vpop.f32.mrb[136].mxu1 }
 0x342   : > { %10072 = vrot.lane.b32.xlu0 %v8063_v38, %s17283_s29  ;;  %v8065_v43 = vpop.f32.mrb[137].mxu0  ;;  %11400 = vst.msk [vmem:[#allocation2 + $0x2d8] sm:$0xff] %vm9838_vm0, %v9415_v41  ;;  %v9417_v47 = vpop.f32.mrb[137].mxu1  ;;  %v15115_v41 = vcombine.low %v4681_v17, %v4682_v35 }
 0x343   : > { %v8066_v57 = vpop.f32.mrb[138].mxu0  ;;  %v9418_v62 = vpop.f32.mrb[138].mxu1  ;;  %v16508_v47 = vld [vmem:[%s18434_s17 + $0x3f4] ss:$8 sps:$4 sm:$0xff]  }
 0x344   : > { %v9920_v10 = vpop.permute.xlu0 %9919  ;;  %10074 = vrot.lane.b32.xlu1 %v8066_v57, %s17283_s29  ;;  %v8068_v7 = vpop.f32.mrb[139].mxu0  ;;  %11401 = vst.msk [vmem:[#allocation2 + $0x2f8] sm:$0xff] %vm9838_vm0, %v9418_v62  ;;  %v16521_v62 = vld [vmem:[%s18434_s17 + $0xe70] ss:$8 sps:$4 sm:$0xff]  }
 0x345   : > { %10008 = vst.msk [vmem:[#allocation2 + $0x100] sm:$0xff] %vm9999_vm1, %v9920_v10  ;;  %v9420_v11 = vpop.f32.mrb[139].mxu1 }
 0x346   : > { %8278 = vmatmul.mubr.bf16.gmra.mrb[244].mxu0 %v15113_v46  ;;  %v9922_v25 = vpop.permute.xlu1 %9921  ;;  %v4683_v11 = vld [vmem:[%s18434_s17 + $0x3f0] sm:$0xff] }
 0x347   : > { %10009 = vst.msk [vmem:[#allocation2 + $0x120] sm:$0xff] %vm9999_vm1, %v9922_v25  ;;  %8285 = vmatprep.mubr.bf16.mxu0 %v16506_v61  ;;  %9630 = vmatmul.mubr.bf16.gmra.mrb[244].mxu1 %v16515_v6  ;;  %v16525_v6 = vld [vmem:[%s18434_s17 + $0xe84] ss:$8 sps:$4 sm:$0xff]   ;;  %v4684_v25 = vld [vmem:[%s18434_s17 + $0x3f8] sm:$0xff] }
 0x348   : > { %9637 = vmatprep.mubr.bf16.mxu1 %v16519_v16 }
 0x349   : > { %v8071_v36 = vpop.f32.mrb[140].mxu0  ;;  %v9423_v37 = vpop.f32.mrb[140].mxu1 }
 0x34a   : > { %10076 = vrot.lane.b32.xlu0 %v8071_v36, %s17283_s29  ;;  %v8073_v38 = vpop.f32.mrb[141].mxu0  ;;  %11402 = vst.msk [vmem:[#allocation2 + $0x318] sm:$0xff] %vm9838_vm0, %v9423_v37  ;;  %v9425_v43 = vpop.f32.mrb[141].mxu1  ;;  %v15117_v37 = vcombine.low %v4683_v11, %v4684_v25  ;;  %v16510_v25 = vld [vmem:[%s18434_s17 + $0x400] ss:$8 sps:$4 sm:$0xff]  }
 0x34b   : > { %v8074_v46 = vpop.f32.mrb[142].mxu0  ;;  %v9426_v57 = vpop.f32.mrb[142].mxu1  ;;  %v16512_v43 = vld [vmem:[%s18434_s17 + $0x404] ss:$8 sps:$4 sm:$0xff]  }
 0x34c   : > { %v9924_v10 = vpop.permute.xlu0 %9923  ;;  %10078 = vrot.lane.b32.xlu1 %v8074_v46, %s17283_s29  ;;  %v8076_v61 = vpop.f32.mrb[143].mxu0  ;;  %11403 = vst.msk [vmem:[#allocation2 + $0x338] sm:$0xff] %vm9838_vm0, %v9426_v57  ;;  %v16527_v57 = vld [vmem:[%s18434_s17 + $0xe80] ss:$8 sps:$4 sm:$0xff]  }
 0x34d   : > { %10010 = vst.msk [vmem:[#allocation2 + $0x140] sm:$0xff] %vm9999_vm1, %v9924_v10  ;;  %v9428_v7 = vpop.f32.mrb[143].mxu1 }
 0x34e   : > { %8286 = vmatmul.mubr.bf16.gmra.mrb[248].mxu0 %v15115_v41  ;;  %v9926_v16 = vpop.permute.xlu1 %9925 }
 0x34f   : > { %10011 = vst.msk [vmem:[#allocation2 + $0x160] sm:$0xff] %vm9999_vm1, %v9926_v16  ;;  %8293 = vmatprep.mubr.bf16.mxu0 %v16508_v47  ;;  %9638 = vmatmul.mubr.bf16.gmra.mrb[248].mxu1 %v16521_v62  ;;  %v16533_v62 = vld [vmem:[%s18434_s17 + $0xe94] ss:$8 sps:$4 sm:$0xff]  }
 0x350   : > { %9645 = vmatprep.mubr.bf16.mxu1 %v16525_v6 }
 0x351   : > { %v8079_v17 = vpop.f32.mrb[144].mxu0  ;;  %v9431_v35 = vpop.f32.mrb[144].mxu1 }
 0x352   : > { %10080 = vrot.lane.b32.xlu0 %v8079_v17, %s17283_s29  ;;  %v8081_v36 = vpop.f32.mrb[145].mxu0  ;;  %11404 = vst.msk [vmem:[#allocation2 + $0x358] sm:$0xff] %vm9838_vm0, %v9431_v35  ;;  %v9433_v38 = vpop.f32.mrb[145].mxu1 }
 0x353   : > { %v8082_v41 = vpop.f32.mrb[146].mxu0  ;;  %v9434_v46 = vpop.f32.mrb[146].mxu1  ;;  %v16518_v36 = vld [vmem:[%s18434_s17 + $0x414] ss:$8 sps:$4 sm:$0xff]   ;;  %v16531_v38 = vld [vmem:[%s18434_s17 + $0xe90] ss:$8 sps:$4 sm:$0xff]  }
 0x354   : > { %v9928_v10 = vpop.permute.xlu0 %9927  ;;  %10082 = vrot.lane.b32.xlu1 %v8082_v41, %s17283_s29  ;;  %v8084_v47 = vpop.f32.mrb[147].mxu0  ;;  %11405 = vst.msk [vmem:[#allocation2 + $0x378] sm:$0xff] %vm9838_vm0, %v9434_v46  ;;  %v16539_v46 = vld [vmem:[%s18434_s17 + $0xea4] ss:$8 sps:$4 sm:$0xff]  }
 0x355   : > { %10012 = vst.msk [vmem:[#allocation2 + $0x180] sm:$0xff] %vm9999_vm1, %v9928_v10  ;;  %v9436_v61 = vpop.f32.mrb[147].mxu1 }
 0x356   : > { %8294 = vmatmul.mubr.bf16.gmra.mrb[252].mxu0 %v15117_v37  ;;  %v9930_v6 = vpop.permute.xlu1 %9929 }
 0x357   : > { %10013 = vst.msk [vmem:[#allocation2 + $0x1a0] sm:$0xff] %vm9999_vm1, %v9930_v6  ;;  %8301 = vmatprep.mubr.bf16.mxu0 %v16512_v43  ;;  %9646 = vmatmul.mubr.bf16.gmra.mrb[252].mxu1 %v16527_v57  ;;  %v16516_v6 = vld [vmem:[%s18434_s17 + $0x410] ss:$8 sps:$4 sm:$0xff]  }
 0x358   : > { %9653 = vmatprep.mubr.bf16.mxu1 %v16533_v62 }
 0x359   : > { %v8087_v7 = vpop.f32.mrb[148].mxu0  ;;  %v9439_v16 = vpop.f32.mrb[148].mxu1 }
 0x35a   : > { %10084 = vrot.lane.b32.xlu0 %v8087_v7, %s17283_s29  ;;  %v8089_v11 = vpop.f32.mrb[149].mxu0  ;;  %11406 = vst.msk [vmem:[#allocation2 + $0x398] sm:$0xff] %vm9838_vm0, %v9439_v16  ;;  %v9441_v17 = vpop.f32.mrb[149].mxu1 }
 0x35b   : > { %v8090_v35 = vpop.f32.mrb[150].mxu0  ;;  %v9442_v37 = vpop.f32.mrb[150].mxu1  ;;  %v16537_v17 = vld [vmem:[%s18434_s17 + $0xea0] ss:$8 sps:$4 sm:$0xff]  }
 0x35c   : > { %v9932_v41 = vpop.permute.xlu0 %9931  ;;  %10086 = vrot.lane.b32.xlu1 %v8090_v35, %s17283_s29  ;;  %v8092_v43 = vpop.f32.mrb[151].mxu0  ;;  %11407 = vst.msk [vmem:[#allocation2 + $0x3b8] sm:$0xff] %vm9838_vm0, %v9442_v37  ;;  %v16545_v37 = vld [vmem:[%s18434_s17 + $0xeb4] ss:$8 sps:$4 sm:$0xff]  }
 0x35d   : > { %10014 = vst.msk [vmem:[#allocation2 + $0x1c0] sm:$0xff] %vm9999_vm1, %v9932_v41  ;;  %v9444_v57 = vpop.f32.mrb[151].mxu1 }
 0x35e   : > { %8302 = vmatmul.mubr.bf16.gmra.mrb[0].mxu0 %v16510_v25  ;;  %v9934_v10 = vpop.permute.xlu1 %9933  ;;  %v16524_v25 = vld [vmem:[%s18434_s17 + $0x424] ss:$8 sps:$4 sm:$0xff]  }
 0x35f   : > { %10015 = vst.msk [vmem:[#allocation2 + $0x1e0] sm:$0xff] %vm9999_vm1, %v9934_v10  ;;  %8309 = vmatprep.mubr.bf16.mxu0 %v16518_v36  ;;  %9654 = vmatmul.mubr.bf16.gmra.mrb[0].mxu1 %v16531_v38  ;;  %v16522_v10 = vld [vmem:[%s18434_s17 + $0x420] ss:$8 sps:$4 sm:$0xff]  }
 0x360   : > { %9661 = vmatprep.mubr.bf16.mxu1 %v16539_v46 }
 0x361   : > { %v8095_v47 = vpop.f32.mrb[152].mxu0  ;;  %v9447_v62 = vpop.f32.mrb[152].mxu1 }
 0x362   : > { %10088 = vrot.lane.b32.xlu0 %v8095_v47, %s17283_s29  ;;  %v8097_v61 = vpop.f32.mrb[153].mxu0  ;;  %11408 = vst.msk [vmem:[#allocation2 + $0x3d8] sm:$0xff] %vm9838_vm0, %v9447_v62  ;;  %v9449_v7 = vpop.f32.mrb[153].mxu1 }
 0x363   : > { %v8098_v16 = vpop.f32.mrb[154].mxu0  ;;  %v9450_v11 = vpop.f32.mrb[154].mxu1  ;;  %v16530_v7 = vld [vmem:[%s18434_s17 + $0x434] ss:$8 sps:$4 sm:$0xff]  }
 0x364   : > { %v9936_v35 = vpop.permute.xlu0 %9935  ;;  %10090 = vrot.lane.b32.xlu1 %v8098_v16, %s17283_s29  ;;  %v8100_v36 = vpop.f32.mrb[155].mxu0  ;;  %11409 = vst.msk [vmem:[#allocation2 + $0x3f8] sm:$0xff] %vm9838_vm0, %v9450_v11  ;;  %v16543_v16 = vld [vmem:[%s18434_s17 + $0xeb0] ss:$8 sps:$4 sm:$0xff]  }
 0x365   : > { %10016 = vst.msk [vmem:[#allocation2 + $0x200] sm:$0xff] %vm9999_vm1, %v9936_v35  ;;  %v9452_v38 = vpop.f32.mrb[155].mxu1 }
 0x366   : > { %8310 = vmatmul.mubr.bf16.gmra.mrb[4].mxu0 %v16516_v6  ;;  %v9938_v41 = vpop.permute.xlu1 %9937 }
 0x367   : > { %10017 = vst.msk [vmem:[#allocation2 + $0x220] sm:$0xff] %vm9999_vm1, %v9938_v41  ;;  %8317 = vmatprep.mubr.bf16.mxu0 %v16524_v25  ;;  %9662 = vmatmul.mubr.bf16.gmra.mrb[4].mxu1 %v16537_v17  ;;  %v16551_v25 = vld [vmem:[%s18434_s17 + $0xec4] ss:$8 sps:$4 sm:$0xff]   ;;  %v16528_v41 = vld [vmem:[%s18434_s17 + $0x430] ss:$8 sps:$4 sm:$0xff]  }
 0x368   : > { %9669 = vmatprep.mubr.bf16.mxu1 %v16545_v37 }
 0x369   : > { %v8103_v43 = vpop.f32.mrb[156].mxu0  ;;  %v9455_v46 = vpop.f32.mrb[156].mxu1 }
 0x36a   : > { %10092 = vrot.lane.b32.xlu0 %v8103_v43, %s17283_s29  ;;  %v8105_v57 = vpop.f32.mrb[157].mxu0  ;;  %v9457_v47 = vpop.f32.mrb[157].mxu1 }
 0x36b   : > { %v8106_v62 = vpop.f32.mrb[158].mxu0  ;;  %v9458_v61 = vpop.f32.mrb[158].mxu1  ;;  %v16536_v47 = vld [vmem:[%s18434_s17 + $0x444] ss:$8 sps:$4 sm:$0xff]  }
 0x36c   : > { %v9940_v11 = vpop.permute.xlu0 %9939  ;;  %10094 = vrot.lane.b32.xlu1 %v8106_v62, %s17283_s29  ;;  %v8108_v6 = vpop.f32.mrb[159].mxu0  ;;  %v16549_v62 = vld [vmem:[%s18434_s17 + $0xec0] ss:$8 sps:$4 sm:$0xff]  }
 0x36d   : > { %10018 = vst.msk [vmem:[#allocation2 + $0x240] sm:$0xff] %vm9999_vm1, %v9940_v11  ;;  %v9460_v17 = vpop.f32.mrb[159].mxu1 }
 0x36e   : > { %8318 = vmatmul.mubr.bf16.gmra.mrb[8].mxu0 %v16522_v10  ;;  %v9942_v35 = vpop.permute.xlu1 %9941  ;;  %11442 = vrot.lane.b32.xlu0 %v9455_v46, %s17282_s28 }
 0x36f   : > { %10019 = vst.msk [vmem:[#allocation2 + $0x260] sm:$0xff] %vm9999_vm1, %v9942_v35  ;;  %8325 = vmatprep.mubr.bf16.mxu0 %v16530_v7  ;;  %9670 = vmatmul.mubr.bf16.gmra.mrb[8].mxu1 %v16543_v16  ;;  %v16557_v16 = vld [vmem:[%s18434_s17 + $0xed4] ss:$8 sps:$4 sm:$0xff]   ;;  %v16534_v35 = vld [vmem:[%s18434_s17 + $0x440] ss:$8 sps:$4 sm:$0xff]  }
 0x370   : > { %11444 = vrot.lane.b32.xlu1 %v9458_v61, %s17282_s28  ;;  %9677 = vmatprep.mubr.bf16.mxu1 %v16551_v25 }
 0x371   : > { %v8111_v36 = vpop.f32.mrb[160].mxu0  ;;  %v9463_v37 = vpop.f32.mrb[160].mxu1 }
 0x372   : > { %10096 = vrot.lane.b32.xlu0 %v8111_v36, %s17283_s29  ;;  %v8113_v38 = vpop.f32.mrb[161].mxu0  ;;  %v9465_v43 = vpop.f32.mrb[161].mxu1 }
 0x373   : > { %v8114_v57 = vpop.f32.mrb[162].mxu0  ;;  %v9466_v10 = vpop.f32.mrb[162].mxu1  ;;  %v16542_v43 = vld [vmem:[%s18434_s17 + $0x454] ss:$8 sps:$4 sm:$0xff]  }
 0x374   : > { %v9944_v46 = vpop.permute.xlu0 %9943  ;;  %10098 = vrot.lane.b32.xlu1 %v8114_v57, %s17283_s29  ;;  %v8116_v7 = vpop.f32.mrb[163].mxu0  ;;  %v16555_v57 = vld [vmem:[%s18434_s17 + $0xed0] ss:$8 sps:$4 sm:$0xff]  }
 0x375   : > { %10020 = vst.msk [vmem:[#allocation2 + $0x280] sm:$0xff] %vm9999_vm1, %v9944_v46  ;;  %v9468_v61 = vpop.f32.mrb[163].mxu1 }
 0x376   : > { %8326 = vmatmul.mubr.bf16.gmra.mrb[12].mxu0 %v16528_v41  ;;  %v9946_v11 = vpop.permute.xlu1 %9945  ;;  %11446 = vrot.lane.b32.xlu0 %v9463_v37, %s17282_s28 }
 0x377   : > { %10021 = vst.msk [vmem:[#allocation2 + $0x2a0] sm:$0xff] %vm9999_vm1, %v9946_v11  ;;  %8333 = vmatprep.mubr.bf16.mxu0 %v16536_v47  ;;  %9678 = vmatmul.mubr.bf16.gmra.mrb[12].mxu1 %v16549_v62  ;;  %v16563_v62 = vld [vmem:[%s18434_s17 + $0xee4] ss:$8 sps:$4 sm:$0xff]   ;;  %v16540_v11 = vld [vmem:[%s18434_s17 + $0x450] ss:$8 sps:$4 sm:$0xff]  }
 0x378   : > { %11448 = vrot.lane.b32.xlu1 %v9466_v10, %s17282_s28  ;;  %9685 = vmatprep.mubr.bf16.mxu1 %v16557_v16 }
 0x379   : > { %v8119_v6 = vpop.f32.mrb[164].mxu0  ;;  %v9471_v25 = vpop.f32.mrb[164].mxu1 }
 0x37a   : > { %10100 = vrot.lane.b32.xlu0 %v8119_v6, %s17283_s29  ;;  %v8121_v17 = vpop.f32.mrb[165].mxu0  ;;  %v9473_v36 = vpop.f32.mrb[165].mxu1 }
 0x37b   : > { %v8122_v38 = vpop.f32.mrb[166].mxu0  ;;  %v9474_v41 = vpop.f32.mrb[166].mxu1  ;;  %v16548_v36 = vld [vmem:[%s18434_s17 + $0x464] ss:$8 sps:$4 sm:$0xff]  }
 0x37c   : > { %v9948_v37 = vpop.permute.xlu0 %9947  ;;  %10102 = vrot.lane.b32.xlu1 %v8122_v38, %s17283_s29  ;;  %v8124_v47 = vpop.f32.mrb[167].mxu0  ;;  %v16561_v38 = vld [vmem:[%s18434_s17 + $0xee0] ss:$8 sps:$4 sm:$0xff]  }
 0x37d   : > { %10022 = vst.msk [vmem:[#allocation2 + $0x2c0] sm:$0xff] %vm9999_vm1, %v9948_v37  ;;  %v9476_v10 = vpop.f32.mrb[167].mxu1 }
 0x37e   : > { %8334 = vmatmul.mubr.bf16.gmra.mrb[16].mxu0 %v16534_v35  ;;  %v9950_v46 = vpop.permute.xlu1 %9949  ;;  %11450 = vrot.lane.b32.xlu0 %v9471_v25, %s17282_s28  ;;  %v16546_v10 = vld [vmem:[%s18434_s17 + $0x460] ss:$8 sps:$4 sm:$0xff]  }
 0x37f   : > { %10023 = vst.msk [vmem:[#allocation2 + $0x2e0] sm:$0xff] %vm9999_vm1, %v9950_v46  ;;  %8341 = vmatprep.mubr.bf16.mxu0 %v16542_v43  ;;  %9686 = vmatmul.mubr.bf16.gmra.mrb[16].mxu1 %v16555_v57  ;;  %v16569_v57 = vld [vmem:[%s18434_s17 + $0xef4] ss:$8 sps:$4 sm:$0xff]  }
 0x380   : > { %11452 = vrot.lane.b32.xlu1 %v9474_v41, %s17282_s28  ;;  %9693 = vmatprep.mubr.bf16.mxu1 %v16563_v62 }
 0x381   : > { %v8127_v7 = vpop.f32.mrb[168].mxu0  ;;  %v9479_v16 = vpop.f32.mrb[168].mxu1 }
 0x382   : > { %10104 = vrot.lane.b32.xlu0 %v8127_v7, %s17283_s29  ;;  %v8129_v61 = vpop.f32.mrb[169].mxu0  ;;  %v9481_v6 = vpop.f32.mrb[169].mxu1 }
 0x383   : > { %v8130_v17 = vpop.f32.mrb[170].mxu0  ;;  %v9482_v35 = vpop.f32.mrb[170].mxu1  ;;  %v16567_v6 = vld [vmem:[%s18434_s17 + $0xef0] ss:$8 sps:$4 sm:$0xff]  }
 0x384   : > { %v9952_v25 = vpop.permute.xlu0 %9951  ;;  %10106 = vrot.lane.b32.xlu1 %v8130_v17, %s17283_s29  ;;  %v8132_v43 = vpop.f32.mrb[171].mxu0 }
 0x385   : > { %10024 = vst.msk [vmem:[#allocation2 + $0x300] sm:$0xff] %vm9999_vm1, %v9952_v25  ;;  %v9484_v41 = vpop.f32.mrb[171].mxu1 }
 0x386   : > { %8342 = vmatmul.mubr.bf16.gmra.mrb[20].mxu0 %v16540_v11  ;;  %v9954_v37 = vpop.permute.xlu1 %9953  ;;  %11454 = vrot.lane.b32.xlu0 %v9479_v16, %s17282_s28  ;;  %v16554_v11 = vld [vmem:[%s18434_s17 + $0x474] ss:$8 sps:$4 sm:$0xff]   ;;  %v16552_v41 = vld [vmem:[%s18434_s17 + $0x470] ss:$8 sps:$4 sm:$0xff]  }
 0x387   : > { %10025 = vst.msk [vmem:[#allocation2 + $0x320] sm:$0xff] %vm9999_vm1, %v9954_v37  ;;  %8349 = vmatprep.mubr.bf16.mxu0 %v16548_v36  ;;  %9694 = vmatmul.mubr.bf16.gmra.mrb[20].mxu1 %v16561_v38  ;;  %v16575_v36 = vld [vmem:[%s18434_s17 + $0xf04] ss:$8 sps:$4 sm:$0xff]  }
 0x388   : > { %11456 = vrot.lane.b32.xlu1 %v9482_v35, %s17282_s28  ;;  %9701 = vmatprep.mubr.bf16.mxu1 %v16569_v57 }
 0x389   : > { %v8135_v47 = vpop.f32.mrb[172].mxu0 }
 0x38a   : > { %10108 = vrot.lane.b32.xlu0 %v8135_v47, %s17283_s29  ;;  %v8137_v62 = vpop.f32.mrb[173].mxu0  ;;  %v9487_v46 = vpop.f32.mrb[172].mxu1 }
 0x38b   : > { %v8138_v7 = vpop.f32.mrb[174].mxu0  ;;  %v9489_v61 = vpop.f32.mrb[173].mxu1 }
 0x38c   : > { %v9956_v17 = vpop.permute.xlu0 %9955  ;;  %10110 = vrot.lane.b32.xlu1 %v8138_v7, %s17283_s29  ;;  %v8140_v16 = vpop.f32.mrb[175].mxu0  ;;  %v16573_v7 = vld [vmem:[%s18434_s17 + $0xf00] ss:$8 sps:$4 sm:$0xff]  }
 0x38d   : > { %10026 = vst.msk [vmem:[#allocation2 + $0x340] sm:$0xff] %vm9999_vm1, %v9956_v17  ;;  %v9490_v35 = vpop.f32.mrb[174].mxu1 }
 0x38e   : > { %8350 = vmatmul.mubr.bf16.gmra.mrb[24].mxu0 %v16546_v10  ;;  %v9958_v38 = vpop.permute.xlu1 %9957  ;;  %11458 = vrot.lane.b32.xlu0 %v9487_v46, %s17282_s28  ;;  %v9492_v25 = vpop.f32.mrb[175].mxu1  ;;  %v16560_v10 = vld [vmem:[%s18434_s17 + $0x484] ss:$8 sps:$4 sm:$0xff]  }
 0x38f   : > { %10027 = vst.msk [vmem:[#allocation2 + $0x360] sm:$0xff] %vm9999_vm1, %v9958_v38  ;;  %8357 = vmatprep.mubr.bf16.mxu0 %v16554_v11  ;;  %9702 = vmatmul.mubr.bf16.gmra.mrb[24].mxu1 %v16567_v6  ;;  %v16581_v11 = vld [vmem:[%s18434_s17 + $0xf14] ss:$8 sps:$4 sm:$0xff]   ;;  %v16558_v38 = vld [vmem:[%s18434_s17 + $0x480] ss:$8 sps:$4 sm:$0xff]  }
 0x390   : > { %11460 = vrot.lane.b32.xlu1 %v9490_v35, %s17282_s28  ;;  %9709 = vmatprep.mubr.bf16.mxu1 %v16575_v36 }
 0x391   : > { %v8143_v43 = vpop.f32.mrb[176].mxu0 }
 0x392   : > { %10112 = vrot.lane.b32.xlu0 %v8143_v43, %s17283_s29  ;;  %v8145_v57 = vpop.f32.mrb[177].mxu0  ;;  %v9495_v37 = vpop.f32.mrb[176].mxu1 }
 0x393   : > { %v8146_v47 = vpop.f32.mrb[178].mxu0  ;;  %v9497_v62 = vpop.f32.mrb[177].mxu1 }
 0x394   : > { %v9960_v46 = vpop.permute.xlu0 %9959  ;;  %10114 = vrot.lane.b32.xlu1 %v8146_v47, %s17283_s29  ;;  %v8148_v61 = vpop.f32.mrb[179].mxu0  ;;  %v16579_v47 = vld [vmem:[%s18434_s17 + $0xf10] ss:$8 sps:$4 sm:$0xff]  }
 0x395   : > { %10028 = vst.msk [vmem:[#allocation2 + $0x380] sm:$0xff] %vm9999_vm1, %v9960_v46  ;;  %v9498_v6 = vpop.f32.mrb[178].mxu1 }
 0x396   : > { %8358 = vmatmul.mubr.bf16.gmra.mrb[28].mxu0 %v16552_v41  ;;  %v9962_v17 = vpop.permute.xlu1 %9961  ;;  %11462 = vrot.lane.b32.xlu0 %v9495_v37, %s17282_s28  ;;  %v9500_v16 = vpop.f32.mrb[179].mxu1  ;;  %v16566_v41 = vld [vmem:[%s18434_s17 + $0x494] ss:$8 sps:$4 sm:$0xff]  }
 0x397   : > { %10029 = vst.msk [vmem:[#allocation2 + $0x3a0] sm:$0xff] %vm9999_vm1, %v9962_v17  ;;  %8365 = vmatprep.mubr.bf16.mxu0 %v16560_v10  ;;  %9710 = vmatmul.mubr.bf16.gmra.mrb[28].mxu1 %v16573_v7  ;;  %v16587_v10 = vld [vmem:[%s18434_s17 + $0xf24] ss:$8 sps:$4 sm:$0xff]   ;;  %v16564_v17 = vld [vmem:[%s18434_s17 + $0x490] ss:$8 sps:$4 sm:$0xff]  }
 0x398   : > { %11464 = vrot.lane.b32.xlu1 %v9498_v6, %s17282_s28  ;;  %9717 = vmatprep.mubr.bf16.mxu1 %v16581_v11 }
 0x399   : > { %v8151_v36 = vpop.f32.mrb[180].mxu0 }
 0x39a   : > { %10116 = vrot.lane.b32.xlu0 %v8151_v36, %s17283_s29  ;;  %v8153_v35 = vpop.f32.mrb[181].mxu0  ;;  %v9503_v25 = vpop.f32.mrb[180].mxu1 }
 0x39b   : > { %v8154_v43 = vpop.f32.mrb[182].mxu0  ;;  %v9505_v57 = vpop.f32.mrb[181].mxu1  ;;  %v16572_v35 = vld [vmem:[%s18434_s17 + $0x4a4] ss:$8 sps:$4 sm:$0xff]  }
 0x39c   : > { %v9964_v37 = vpop.permute.xlu0 %9963  ;;  %10118 = vrot.lane.b32.xlu1 %v8154_v43, %s17283_s29  ;;  %v8156_v62 = vpop.f32.mrb[183].mxu0 }
 0x39d   : > { %10030 = vst.msk [vmem:[#allocation2 + $0x3c0] sm:$0xff] %vm9999_vm1, %v9964_v37  ;;  %v9506_v7 = vpop.f32.mrb[182].mxu1 }
 0x39e   : > { %8366 = vmatmul.mubr.bf16.gmra.mrb[32].mxu0 %v16558_v38  ;;  %v9966_v46 = vpop.permute.xlu1 %9965  ;;  %11466 = vrot.lane.b32.xlu0 %v9503_v25, %s17282_s28  ;;  %v9508_v61 = vpop.f32.mrb[183].mxu1  ;;  %v16585_v38 = vld [vmem:[%s18434_s17 + $0xf20] ss:$8 sps:$4 sm:$0xff]  }
 0x39f   : > { %10031 = vst.msk [vmem:[#allocation2 + $0x3e0] sm:$0xff] %vm9999_vm1, %v9966_v46  ;;  %8373 = vmatprep.mubr.bf16.mxu0 %v16566_v41  ;;  %9718 = vmatmul.mubr.bf16.gmra.mrb[32].mxu1 %v16579_v47  ;;  %v16593_v41 = vld [vmem:[%s18434_s17 + $0xf34] ss:$8 sps:$4 sm:$0xff]   ;;  %v16570_v46 = vld [vmem:[%s18434_s17 + $0x4a0] ss:$8 sps:$4 sm:$0xff]  }
 0x3a0   : > { %11468 = vrot.lane.b32.xlu1 %v9506_v7, %s17282_s28  ;;  %9725 = vmatprep.mubr.bf16.mxu1 %v16587_v10 }
 0x3a1   : > { %v8159_v11 = vpop.f32.mrb[184].mxu0 }
 0x3a2   : > { %10120 = vrot.lane.b32.xlu0 %v8159_v11, %s17283_s29  ;;  %v8161_v6 = vpop.f32.mrb[185].mxu0  ;;  %v19067_v16 = vpop.f32.mrb[184].mxu1 }
 0x3a3   : > { %v8162_v36 = vpop.f32.mrb[186].mxu0  ;;  %v9513_v25 = vpop.f32.mrb[185].mxu1  ;;  %v16578_v6 = vld [vmem:[%s18434_s17 + $0x4b4] ss:$8 sps:$4 sm:$0xff]  }
 0x3a4   : > { %v10065_v43 = vpop.permute.xlu0 %10064  ;;  %10122 = vrot.lane.b32.xlu1 %v8162_v36, %s17283_s29  ;;  %v8164_v57 = vpop.f32.mrb[187].mxu0  ;;  %v16591_v36 = vld [vmem:[%s18434_s17 + $0xf30] ss:$8 sps:$4 sm:$0xff]  }
 0x3a5   : > { %10161 = vst.msk [vmem:[#allocation2] sm:$0xff] %vm10160_vm2, %v10065_v43  ;;  %v19074_v47 = vpop.f32.mrb[186].mxu1  ;;  %v16599_v57 = vld [vmem:[%s18434_s17 + $0xf44] ss:$8 sps:$4 sm:$0xff]  }
 0x3a6   : > { %8374 = vmatmul.mubr.bf16.gmra.mrb[36].mxu0 %v16564_v17  ;;  %v10067_v37 = vpop.permute.xlu1 %10066  ;;  %v9516_v62 = vpop.f32.mrb[187].mxu1 }
 0x3a7   : > { %10162 = vst.msk [vmem:[#allocation2 + $0x20] sm:$0xff] %vm10160_vm2, %v10067_v37  ;;  %8381 = vmatprep.mubr.bf16.mxu0 %v16572_v35  ;;  %9726 = vmatmul.mubr.bf16.gmra.mrb[36].mxu1 %v16585_v38 }
 0x3a8   : > { %9733 = vmatprep.mubr.bf16.mxu1 %v16593_v41 }
 0x3a9   : > { %v8167_v10 = vpop.f32.mrb[188].mxu0 }
 0x3aa   : > { %10124 = vrot.lane.b32.xlu0 %v8167_v10, %s17283_s29  ;;  %v8169_v7 = vpop.f32.mrb[189].mxu0  ;;  %v19079_v61 = vpop.f32.mrb[188].mxu1  ;;  %v16576_v10 = vld [vmem:[%s18434_s17 + $0x4b0] ss:$8 sps:$4 sm:$0xff]  }
 0x3ab   : > { %v8170_v11 = vpop.f32.mrb[190].mxu0  ;;  %v9521_v25 = vpop.f32.mrb[189].mxu1 }
 0x3ac   : > { %v10069_v17 = vpop.permute.xlu0 %10068  ;;  %10126 = vrot.lane.b32.xlu1 %v8170_v11, %s17283_s29  ;;  %v8172_v43 = vpop.f32.mrb[191].mxu0  ;;  %v16584_v25 = vld [vmem:[%s18434_s17 + $0x4c4] ss:$8 sps:$4 sm:$0xff]  }
 0x3ad   : > { %10163 = vst.msk [vmem:[#allocation2 + $0x40] sm:$0xff] %vm10160_vm2, %v10069_v17  ;;  %v19086_v35 = vpop.f32.mrb[190].mxu1  ;;  %v16597_v17 = vld [vmem:[%s18434_s17 + $0xf40] ss:$8 sps:$4 sm:$0xff]  }
 0x3ae   : > { %8382 = vmatmul.mubr.bf16.gmra.mrb[40].mxu0 %v16570_v46  ;;  %v10071_v38 = vpop.permute.xlu1 %10070  ;;  %v9524_v41 = vpop.f32.mrb[191].mxu1 }
 0x3af   : > { %10164 = vst.msk [vmem:[#allocation2 + $0x60] sm:$0xff] %vm10160_vm2, %v10071_v38  ;;  %8389 = vmatprep.mubr.bf16.mxu0 %v16578_v6  ;;  %9734 = vmatmul.mubr.bf16.gmra.mrb[40].mxu1 %v16591_v36  ;;  %v16605_v41 = vld [vmem:[%s18434_s17 + $0xf54] ss:$8 sps:$4 sm:$0xff]  }
 0x3b0   : > { %9741 = vmatprep.mubr.bf16.mxu1 %v16599_v57 }
 0x3b1   : > { %v8175_v37 = vpop.f32.mrb[192].mxu0 }
 0x3b2   : > { %10225 = vrot.lane.b32.xlu0 %v8175_v37, %s17281_s27  ;;  %v8177_v62 = vpop.f32.mrb[193].mxu0  ;;  %v19091_v7 = vpop.f32.mrb[192].mxu1 }
 0x3b3   : > { %v8178_v11 = vpop.f32.mrb[194].mxu0  ;;  %v9529_v43 = vpop.f32.mrb[193].mxu1 }
 0x3b4   : > { %v10073_v46 = vpop.permute.xlu0 %10072  ;;  %10227 = vrot.lane.b32.xlu1 %v8178_v11, %s17281_s27  ;;  %v8180_v38 = vpop.f32.mrb[195].mxu0  ;;  %v16582_v11 = vld [vmem:[%s18434_s17 + $0x4c0] ss:$8 sps:$4 sm:$0xff]  }
 0x3b5   : > { %10165 = vst.msk [vmem:[#allocation2 + $0x80] sm:$0xff] %vm10160_vm2, %v10073_v46  ;;  %v19098_v6 = vpop.f32.mrb[194].mxu1  ;;  %v16590_v46 = vld [vmem:[%s18434_s17 + $0x4d4] ss:$8 sps:$4 sm:$0xff]  }
 0x3b6   : > { %8390 = vmatmul.mubr.bf16.gmra.mrb[44].mxu0 %v16576_v10  ;;  %v10075_v36 = vpop.permute.xlu1 %10074  ;;  %v9532_v57 = vpop.f32.mrb[195].mxu1 }
 0x3b7   : > { %10166 = vst.msk [vmem:[#allocation2 + $0xa0] sm:$0xff] %vm10160_vm2, %v10075_v36  ;;  %8397 = vmatprep.mubr.bf16.mxu0 %v16584_v25  ;;  %9742 = vmatmul.mubr.bf16.gmra.mrb[44].mxu1 %v16597_v17 }
 0x3b8   : > { %9749 = vmatprep.mubr.bf16.mxu1 %v16605_v41 }
 0x3b9   : > { %v8183_v37 = vpop.f32.mrb[196].mxu0 }
 0x3ba   : > { %10229 = vrot.lane.b32.xlu0 %v8183_v37, %s17281_s27  ;;  %v8185_v62 = vpop.f32.mrb[197].mxu0  ;;  %v19103_v43 = vpop.f32.mrb[196].mxu1  ;;  %v16588_v37 = vld [vmem:[%s18434_s17 + $0x4d0] ss:$8 sps:$4 sm:$0xff]  }
 0x3bb   : > { %v8186_v38 = vpop.f32.mrb[198].mxu0  ;;  %v9537_v31 = vpop.f32.mrb[197].mxu1 }
 0x3bc   : > { %v10077_v10 = vpop.permute.xlu0 %10076  ;;  %10231 = vrot.lane.b32.xlu1 %v8186_v38, %s17281_s27  ;;  %v8188_v36 = vpop.f32.mrb[199].mxu0 }
 0x3bd   : > { %10167 = vst.msk [vmem:[#allocation2 + $0xc0] sm:$0xff] %vm10160_vm2, %v10077_v10  ;;  %v19109_v25 = vpop.f32.mrb[198].mxu1  ;;  %v16596_v36 = vld [vmem:[%s18434_s17 + $0x4e4] ss:$8 sps:$4 sm:$0xff]  }
 0x3be   : > { %8398 = vmatmul.mubr.bf16.gmra.mrb[48].mxu0 %v16582_v11  ;;  %v10079_v17 = vpop.permute.xlu1 %10078  ;;  %v9540_v41 = vpop.f32.mrb[199].mxu1 }
 0x3bf   : > { %10168 = vst.msk [vmem:[#allocation2 + $0xe0] sm:$0xff] %vm10160_vm2, %v10079_v17  ;;  %8405 = vmatprep.mubr.bf16.mxu0 %v16590_v46  ;;  %9750 = vmatmul.mubr.bf16.gmra.mrb[48].mxu1 %v16603_v21 }
 0x3c1   : > { %v8191_v57 = vpop.f32.mrb[200].mxu0 }
 0x3c2   : > { %10233 = vrot.lane.b32.xlu0 %v8191_v57, %s17281_s27  ;;  %v8193_v31 = vpop.f32.mrb[201].mxu0  ;;  %v19114_v62 = vpop.f32.mrb[200].mxu1 }
 0x3c3   : > { %v8194_v38 = vpop.f32.mrb[202].mxu0  ;;  %v9545_v10 = vpop.f32.mrb[201].mxu1  ;;  %v16594_v31 = vld [vmem:[%s18434_s17 + $0x4e0] ss:$8 sps:$4 sm:$0xff]  }
 0x3c4   : > { %v10081_v19 = vpop.permute.xlu0 %10080  ;;  %10235 = vrot.lane.b32.xlu1 %v8194_v38, %s17281_s27  ;;  %v8196_v11 = vpop.f32.mrb[203].mxu0  ;;  %v16602_v38 = vld [vmem:[%s18434_s17 + $0x4f4] ss:$8 sps:$4 sm:$0xff]  }
 0x3c5   : > { %10169 = vst.msk [vmem:[#allocation2 + $0x100] sm:$0xff] %vm10160_vm2, %v10081_v19  ;;  %v19119_v46 = vpop.f32.mrb[202].mxu1 }
 0x3c6   : > { %8406 = vmatmul.mubr.bf16.gmra.mrb[52].mxu0 %v16588_v37  ;;  %v10083_v21 = vpop.permute.xlu1 %10082  ;;  %v9548_v17 = vpop.f32.mrb[203].mxu1 }
 0x3c7   : > { %10170 = vst.msk [vmem:[#allocation2 + $0x120] sm:$0xff] %vm10160_vm2, %v10083_v21  ;;  %8413 = vmatprep.mubr.bf16.mxu0 %v16596_v36 }
 0x3c9   : > { %v8199_v41 = vpop.f32.mrb[204].mxu0 }
 0x3ca   : > { %10237 = vrot.lane.b32.xlu0 %v8199_v41, %s17281_s27  ;;  %v8201_v57 = vpop.f32.mrb[205].mxu0  ;;  %v19124_v10 = vpop.f32.mrb[204].mxu1 }
 0x3cb   : > { %v8202_v13 = vpop.f32.mrb[206].mxu0  ;;  %v9553_v11 = vpop.f32.mrb[205].mxu1 }
 0x3cc   : > { %v10085_v19 = vpop.permute.xlu0 %10084  ;;  %10239 = vrot.lane.b32.xlu1 %v8202_v13, %s17281_s27  ;;  %v8204_v37 = vpop.f32.mrb[207].mxu0  ;;  %v16600_v11 = vld [vmem:[%s18434_s17 + $0x4f0] ss:$8 sps:$4 sm:$0xff]   ;;  %v16608_v13 = vld [vmem:[%s18434_s17 + $0x504] ss:$8 sps:$4 sm:$0xff]  }
 0x3cd   : > { %10171 = vst.msk [vmem:[#allocation2 + $0x140] sm:$0xff] %vm10160_vm2, %v10085_v19  ;;  %v19129_v21 = vpop.f32.mrb[206].mxu1 }
 0x3ce   : > { %21497 = vst [vmem:[#allocation31_spill] sm:$0xff] %v19129_v21  ;;  %8414 = vmatmul.mubr.bf16.gmra.mrb[56].mxu0 %v16594_v31  ;;  %v10087_v36 = vpop.permute.xlu1 %10086  ;;  %v9556_v17 = vpop.f32.mrb[207].mxu1 }
 0x3cf   : > { %10172 = vst.msk [vmem:[#allocation2 + $0x160] sm:$0xff] %vm10160_vm2, %v10087_v36  ;;  %8421 = vmatprep.mubr.bf16.mxu0 %v16602_v38 }
 0x3d1   : > { %v8207_v41 = vpop.f32.mrb[208].mxu0 }
 0x3d2   : > { %10241 = vrot.lane.b32.xlu0 %v8207_v41, %s17281_s27  ;;  %v8209_v57 = vpop.f32.mrb[209].mxu0  ;;  %v19134_v9 = vpop.f32.mrb[208].mxu1 }
 0x3d3   : > { %21498 = vst [vmem:[#allocation32_spill] sm:$0xff] %v19134_v9  ;;  %v8210_v59 = vpop.f32.mrb[210].mxu0  ;;  %v9561_v37 = vpop.f32.mrb[209].mxu1 }
 0x3d4   : > { %v10089_v19 = vpop.permute.xlu0 %10088  ;;  %10243 = vrot.lane.b32.xlu1 %v8210_v59, %s17281_s27  ;;  %v8212_v31 = vpop.f32.mrb[211].mxu0  ;;  %v16606_v37 = vld [vmem:[%s18434_s17 + $0x500] ss:$8 sps:$4 sm:$0xff]   ;;  %v16611_v59 = vld [vmem:[%s18434_s17 + $0x514] ss:$8 sps:$4 sm:$0xff]  }
 0x3d5   : > { %10173 = vst.msk [vmem:[#allocation2 + $0x180] sm:$0xff] %vm10160_vm2, %v10089_v19  ;;  %v19139_v36 = vpop.f32.mrb[210].mxu1 }
 0x3d6   : > { %21499 = vst [vmem:[#allocation33_spill] sm:$0xff] %v19139_v36  ;;  %8422 = vmatmul.mubr.bf16.gmra.mrb[60].mxu0 %v16600_v11  ;;  %v10091_v38 = vpop.permute.xlu1 %10090  ;;  %v9564_v17 = vpop.f32.mrb[211].mxu1 }
 0x3d7   : > { %10174 = vst.msk [vmem:[#allocation2 + $0x1a0] sm:$0xff] %vm10160_vm2, %v10091_v38  ;;  %8429 = vmatprep.mubr.bf16.mxu0 %v16608_v13 }
 0x3d9   : > { %v8215_v41 = vpop.f32.mrb[212].mxu0 }
 0x3da   : > { %10245 = vrot.lane.b32.xlu0 %v8215_v41, %s17281_s27  ;;  %v8217_v57 = vpop.f32.mrb[213].mxu0  ;;  %v19144_v0 = vpop.f32.mrb[212].mxu1 }
 0x3db   : > { %21500 = vst [vmem:[#allocation34_spill] sm:$0xff] %v19144_v0  ;;  %v8218_v45 = vpop.f32.mrb[214].mxu0  ;;  %v9569_v31 = vpop.f32.mrb[213].mxu1 }
 0x3dc   : > { %v10093_v5 = vpop.permute.xlu0 %10092  ;;  %10247 = vrot.lane.b32.xlu1 %v8218_v45, %s17281_s27  ;;  %v8220_v11 = vpop.f32.mrb[215].mxu0  ;;  %v16609_v31 = vld [vmem:[%s18434_s17 + $0x510] ss:$8 sps:$4 sm:$0xff]  }
 0x3dd   : > { %10175 = vst.msk [vmem:[#allocation2 + $0x1c0] sm:$0xff] %vm10160_vm2, %v10093_v5  ;;  %v19149_v19 = vpop.f32.mrb[214].mxu1 }
 0x3de   : > { %21501 = vst [vmem:[#allocation35_spill] sm:$0xff] %v19149_v19  ;;  %8430 = vmatmul.mubr.bf16.gmra.mrb[64].mxu0 %v16606_v37  ;;  %v10095_v13 = vpop.permute.xlu1 %10094  ;;  %v9572_v38 = vpop.f32.mrb[215].mxu1  ;;  %v16614_v37 = vld [vmem:[%s18434_s17 + $0x524] ss:$8 sps:$4 sm:$0xff]  }
 0x3df   : > { %10176 = vst.msk [vmem:[#allocation2 + $0x1e0] sm:$0xff] %vm10160_vm2, %v10095_v13  ;;  %8437 = vmatprep.mubr.bf16.mxu0 %v16611_v59 }
 0x3e0   : > { %v11443_v17 = vpop.permute.xlu0 %11442 }
 0x3e1   : > { %11538 = vst.msk [vmem:[#allocation2 + $0x18] sm:$0xff] %vm9999_vm1, %v11443_v17  ;;  %v8223_v41 = vpop.f32.mrb[216].mxu0 }
 0x3e2   : > { %v11445_v57 = vpop.permute.xlu1 %11444  ;;  %10249 = vrot.lane.b32.xlu0 %v8223_v41, %s17281_s27  ;;  %v8225_v45 = vpop.f32.mrb[217].mxu0 }
 0x3e3   : > { %11539 = vst.msk [vmem:[#allocation2 + $0x38] sm:$0xff] %vm9999_vm1, %v11445_v57  ;;  %v8226_v5 = vpop.f32.mrb[218].mxu0  ;;  %v19156_v11 = vpop.f32.mrb[216].mxu1 }
 0x3e4   : > { %21502 = vst [vmem:[#allocation36_spill] sm:$0xff] %v19156_v11  ;;  %v10097_v63 = vpop.permute.xlu0 %10096  ;;  %10251 = vrot.lane.b32.xlu1 %v8226_v5, %s17281_s27  ;;  %v8228_v59 = vpop.f32.mrb[219].mxu0 }
 0x3e5   : > { %10177 = vst.msk [vmem:[#allocation2 + $0x200] sm:$0xff] %vm10160_vm2, %v10097_v63  ;;  %v9577_v13 = vpop.f32.mrb[217].mxu1  ;;  %v16612_v59 = vld [vmem:[%s18434_s17 + $0x520] ss:$8 sps:$4 sm:$0xff]  }
 0x3e6   : > { %8438 = vmatmul.mubr.bf16.gmra.mrb[68].mxu0 %v16609_v31  ;;  %v10099_v38 = vpop.permute.xlu1 %10098  ;;  %v19161_v17 = vpop.f32.mrb[218].mxu1  ;;  %v16617_v13 = vld [vmem:[%s18434_s17 + $0x534] ss:$8 sps:$4 sm:$0xff]  }
 0x3e7   : > { %21503 = vst [vmem:[#allocation37_spill] sm:$0xff] %v19161_v17  ;;  %10178 = vst.msk [vmem:[#allocation2 + $0x220] sm:$0xff] %vm10160_vm2, %v10099_v38  ;;  %v9580_v41 = vpop.f32.mrb[219].mxu1  ;;  %8445 = vmatprep.mubr.bf16.mxu0 %v16614_v37 }
 0x3e8   : > { %v11447_v57 = vpop.permute.xlu0 %11446 }
 0x3e9   : > { %11540 = vst.msk [vmem:[#allocation2 + $0x58] sm:$0xff] %vm9999_vm1, %v11447_v57  ;;  %v8231_v45 = vpop.f32.mrb[220].mxu0 }
 0x3ea   : > { %v11449_v11 = vpop.permute.xlu1 %11448  ;;  %10253 = vrot.lane.b32.xlu0 %v8231_v45, %s17281_s27  ;;  %v8233_v5 = vpop.f32.mrb[221].mxu0 }
 0x3eb   : > { %11541 = vst.msk [vmem:[#allocation2 + $0x78] sm:$0xff] %vm9999_vm1, %v11449_v11  ;;  %v8234_v63 = vpop.f32.mrb[222].mxu0  ;;  %v9583_v31 = vpop.f32.mrb[220].mxu1 }
 0x3ec   : > { %v10101_v28 = vpop.permute.xlu0 %10100  ;;  %10255 = vrot.lane.b32.xlu1 %v8234_v63, %s17281_s27  ;;  %v8236_v38 = vpop.f32.mrb[223].mxu0 }
 0x3ed   : > { %10179 = vst.msk [vmem:[#allocation2 + $0x240] sm:$0xff] %vm10160_vm2, %v10101_v28  ;;  %v9585_v37 = vpop.f32.mrb[221].mxu1 }
 0x3ee   : > { %8446 = vmatmul.mubr.bf16.gmra.mrb[72].mxu0 %v16612_v59  ;;  %v10103_v41 = vpop.permute.xlu1 %10102  ;;  %11602 = vrot.lane.b32.xlu0 %v9583_v31, %s17283_s29  ;;  %v9586_v57 = vpop.f32.mrb[222].mxu1  ;;  %v16615_v59 = vld [vmem:[%s18434_s17 + $0x530] ss:$8 sps:$4 sm:$0xff]   ;;  %v16620_v37 = vld [vmem:[%s18434_s17 + $0x544] ss:$8 sps:$4 sm:$0xff]  }
 0x3ef   : > { %10180 = vst.msk [vmem:[#allocation2 + $0x260] sm:$0xff] %vm10160_vm2, %v10103_v41  ;;  %v9588_v11 = vpop.f32.mrb[223].mxu1  ;;  %8453 = vmatprep.mubr.bf16.mxu0 %v16617_v13 }
 0x3f0   : > { %v11451_v45 = vpop.permute.xlu0 %11450  ;;  %11604 = vrot.lane.b32.xlu1 %v9586_v57, %s17283_s29 }
 0x3f1   : > { %11542 = vst.msk [vmem:[#allocation2 + $0x98] sm:$0xff] %vm9999_vm1, %v11451_v45  ;;  %v8239_v5 = vpop.f32.mrb[224].mxu0 }
 0x3f2   : > { %v11453_v63 = vpop.permute.xlu1 %11452  ;;  %10257 = vrot.lane.b32.xlu0 %v8239_v5, %s17281_s27  ;;  %v8241_v28 = vpop.f32.mrb[225].mxu0 }
 0x3f3   : > { %11543 = vst.msk [vmem:[#allocation2 + $0xb8] sm:$0xff] %vm9999_vm1, %v11453_v63  ;;  %v8242_v31 = vpop.f32.mrb[226].mxu0  ;;  %v9591_v38 = vpop.f32.mrb[224].mxu1 }
 0x3f4   : > { %v10105_v17 = vpop.permute.xlu0 %10104  ;;  %10259 = vrot.lane.b32.xlu1 %v8242_v31, %s17281_s27  ;;  %v8244_v13 = vpop.f32.mrb[227].mxu0 }
 0x3f5   : > { %10181 = vst.msk [vmem:[#allocation2 + $0x280] sm:$0xff] %vm10160_vm2, %v10105_v17  ;;  %v9593_v41 = vpop.f32.mrb[225].mxu1  ;;  %v16623_v13 = vld [vmem:[%s18434_s17 + $0x554] ss:$8 sps:$4 sm:$0xff]  }
 0x3f6   : > { %8454 = vmatmul.mubr.bf16.gmra.mrb[76].mxu0 %v16615_v59  ;;  %v10107_v57 = vpop.permute.xlu1 %10106  ;;  %11606 = vrot.lane.b32.xlu0 %v9591_v38, %s17283_s29  ;;  %v9594_v11 = vpop.f32.mrb[226].mxu1  ;;  %v16618_v59 = vld [vmem:[%s18434_s17 + $0x540] ss:$8 sps:$4 sm:$0xff]  }
 0x3f7   : > { %10182 = vst.msk [vmem:[#allocation2 + $0x2a0] sm:$0xff] %vm10160_vm2, %v10107_v57  ;;  %v9596_v45 = vpop.f32.mrb[227].mxu1  ;;  %8461 = vmatprep.mubr.bf16.mxu0 %v16620_v37 }
 0x3f8   : > { %v11455_v5 = vpop.permute.xlu0 %11454  ;;  %11608 = vrot.lane.b32.xlu1 %v9594_v11, %s17283_s29  ;;  %v16669_v11 = vld [vmem:[%s21455_s3 + $0x40] sm:$0xff]  }
 0x3f9   : > { %11544 = vst.msk [vmem:[#allocation2 + $0xd8] sm:$0xff] %vm9999_vm1, %v11455_v5  ;;  %v8247_v63 = vpop.f32.mrb[228].mxu0  ;;  %15781 = vmatprep.subr.bf16.mxu1 %v16669_v11 }
 0x3fa   : > { %v11457_v28 = vpop.permute.xlu1 %11456  ;;  %10261 = vrot.lane.b32.xlu0 %v8247_v63, %s17281_s27  ;;  %v8249_v17 = vpop.f32.mrb[229].mxu0  ;;  %v16670_v63 = vld [vmem:[%s21455_s3] sm:$0xff]  }
 0x3fb   : > { %11545 = vst.msk [vmem:[#allocation2 + $0xf8] sm:$0xff] %vm9999_vm1, %v11457_v28  ;;  %v8250_v31 = vpop.f32.mrb[230].mxu0  ;;  %v9599_v38 = vpop.f32.mrb[228].mxu1  ;;  %15782 = vmatpush3.bf16.msra.mxu1 %v16670_v63 }
 0x3fc   : > { %v10109_v41 = vpop.permute.xlu0 %10108  ;;  %10263 = vrot.lane.b32.xlu1 %v8250_v31, %s17281_s27  ;;  %v8252_v37 = vpop.f32.mrb[231].mxu0 }
 0x3fd   : > { %10183 = vst.msk [vmem:[#allocation2 + $0x2c0] sm:$0xff] %vm10160_vm2, %v10109_v41  ;;  %v9601_v57 = vpop.f32.mrb[229].mxu1  ;;  %v16621_v41 = vld [vmem:[%s18434_s17 + $0x550] ss:$8 sps:$4 sm:$0xff]  }
 0x3fe   : > { %8462 = vmatmul.mubr.bf16.gmra.mrb[80].mxu0 %v16618_v59  ;;  %v10111_v45 = vpop.permute.xlu1 %10110  ;;  %11610 = vrot.lane.b32.xlu0 %v9599_v38, %s17283_s29  ;;  %v9602_v5 = vpop.f32.mrb[230].mxu1 }
 0x3ff   : > { %10184 = vst.msk [vmem:[#allocation2 + $0x2e0] sm:$0xff] %vm10160_vm2, %v10111_v45  ;;  %v9604_v28 = vpop.f32.mrb[231].mxu1  ;;  %8469 = vmatprep.mubr.bf16.mxu0 %v16623_v13  ;;  %v16626_v45 = vld [vmem:[%s18434_s17 + $0x564] ss:$8 sps:$4 sm:$0xff]  }
 0x400   : > { %v11459_v17 = vpop.permute.xlu0 %11458  ;;  %11612 = vrot.lane.b32.xlu1 %v9602_v5, %s17283_s29 }
 0x401   : > { %11546 = vst.msk [vmem:[#allocation2 + $0x118] sm:$0xff] %vm9999_vm1, %v11459_v17  ;;  %v8255_v59 = vpop.f32.mrb[232].mxu0 }
 0x402   : > { %v11461_v31 = vpop.permute.xlu1 %11460  ;;  %10265 = vrot.lane.b32.xlu0 %v8255_v59, %s17281_s27  ;;  %v8257_v38 = vpop.f32.mrb[233].mxu0 }
 0x403   : > { %11547 = vst.msk [vmem:[#allocation2 + $0x138] sm:$0xff] %vm9999_vm1, %v11461_v31  ;;  %v8258_v37 = vpop.f32.mrb[234].mxu0  ;;  %v9607_v57 = vpop.f32.mrb[232].mxu1 }
 0x404   : > { %v10113_v28 = vpop.permute.xlu0 %10112  ;;  %10267 = vrot.lane.b32.xlu1 %v8258_v37, %s17281_s27  ;;  %v8260_v13 = vpop.f32.mrb[235].mxu0 }
 0x405   : > { %10185 = vst.msk [vmem:[#allocation2 + $0x300] sm:$0xff] %vm10160_vm2, %v10113_v28  ;;  %v9609_v11 = vpop.f32.mrb[233].mxu1  ;;  %v16629_v13 = vld [vmem:[%s18434_s17 + $0x574] ss:$8 sps:$4 sm:$0xff]  }
 0x406   : > { %8470 = vmatmul.mubr.bf16.gmra.mrb[84].mxu0 %v16621_v41  ;;  %v10115_v5 = vpop.permute.xlu1 %10114  ;;  %11614 = vrot.lane.b32.xlu0 %v9607_v57, %s17283_s29  ;;  %v9610_v63 = vpop.f32.mrb[234].mxu1  ;;  %v16624_v41 = vld [vmem:[%s18434_s17 + $0x560] ss:$8 sps:$4 sm:$0xff]  }
 0x407   : > { %10186 = vst.msk [vmem:[#allocation2 + $0x320] sm:$0xff] %vm10160_vm2, %v10115_v5  ;;  %v9612_v17 = vpop.f32.mrb[235].mxu1  ;;  %8477 = vmatprep.mubr.bf16.mxu0 %v16626_v45 }
 0x408   : > { %v11463_v59 = vpop.permute.xlu0 %11462  ;;  %11616 = vrot.lane.b32.xlu1 %v9610_v63, %s17283_s29 }
 0x409   : > { %11548 = vst.msk [vmem:[#allocation2 + $0x158] sm:$0xff] %vm9999_vm1, %v11463_v59  ;;  %v8263_v31 = vpop.f32.mrb[236].mxu0 }
 0x40a   : > { %v11465_v38 = vpop.permute.xlu1 %11464  ;;  %10269 = vrot.lane.b32.xlu0 %v8263_v31, %s17281_s27  ;;  %v8265_v37 = vpop.f32.mrb[237].mxu0 }
 0x40b   : > { %11549 = vst.msk [vmem:[#allocation2 + $0x178] sm:$0xff] %vm9999_vm1, %v11465_v38  ;;  %v8266_v57 = vpop.f32.mrb[238].mxu0  ;;  %v9615_v28 = vpop.f32.mrb[236].mxu1 }
 0x40c   : > { %v10117_v11 = vpop.permute.xlu0 %10116  ;;  %10271 = vrot.lane.b32.xlu1 %v8266_v57, %s17281_s27  ;;  %v8268_v45 = vpop.f32.mrb[239].mxu0 }
 0x40d   : > { %10187 = vst.msk [vmem:[#allocation2 + $0x340] sm:$0xff] %vm10160_vm2, %v10117_v11  ;;  %v9617_v5 = vpop.f32.mrb[237].mxu1  ;;  %v16632_v45 = vld [vmem:[%s18434_s17 + $0x584] ss:$8 sps:$4 sm:$0xff]  }
 0x40e   : > { %8478 = vmatmul.mubr.bf16.gmra.mrb[88].mxu0 %v16624_v41  ;;  %v10119_v63 = vpop.permute.xlu1 %10118  ;;  %11618 = vrot.lane.b32.xlu0 %v9615_v28, %s17283_s29  ;;  %v9618_v17 = vpop.f32.mrb[238].mxu1  ;;  %v16627_v41 = vld [vmem:[%s18434_s17 + $0x570] ss:$8 sps:$4 sm:$0xff]  }
 0x40f   : > { %10188 = vst.msk [vmem:[#allocation2 + $0x360] sm:$0xff] %vm10160_vm2, %v10119_v63  ;;  %v9620_v59 = vpop.f32.mrb[239].mxu1  ;;  %8485 = vmatprep.mubr.bf16.mxu0 %v16629_v13 }
 0x410   : > { %v11467_v31 = vpop.permute.xlu0 %11466  ;;  %11620 = vrot.lane.b32.xlu1 %v9618_v17, %s17283_s29 }
 0x411   : > { %11550 = vst.msk [vmem:[#allocation2 + $0x198] sm:$0xff] %vm9999_vm1, %v11467_v31  ;;  %v8271_v38 = vpop.f32.mrb[240].mxu0 }
 0x412   : > { %v11469_v37 = vpop.permute.xlu1 %11468  ;;  %10273 = vrot.lane.b32.xlu0 %v8271_v38, %s17281_s27  ;;  %v8273_v57 = vpop.f32.mrb[241].mxu0 }
 0x413   : > { %11551 = vst.msk [vmem:[#allocation2 + $0x1b8] sm:$0xff] %vm9999_vm1, %v11469_v37  ;;  %v8274_v28 = vpop.f32.mrb[242].mxu0  ;;  %v9623_v11 = vpop.f32.mrb[240].mxu1  ;;  %v16630_v57 = vld [vmem:[%s18434_s17 + $0x580] ss:$8 sps:$4 sm:$0xff]  }
 0x414   : > { %v10121_v5 = vpop.permute.xlu0 %10120  ;;  %10275 = vrot.lane.b32.xlu1 %v8274_v28, %s17281_s27  ;;  %v8276_v13 = vpop.f32.mrb[243].mxu0 }
 0x415   : > { %10189 = vst.msk [vmem:[#allocation2 + $0x380] sm:$0xff] %vm10160_vm2, %v10121_v5  ;;  %v9625_v63 = vpop.f32.mrb[241].mxu1  ;;  %v16635_v13 = vld [vmem:[%s18434_s17 + $0x594] ss:$8 sps:$4 sm:$0xff]  }
 0x416   : > { %8486 = vmatmul.mubr.bf16.gmra.mrb[92].mxu0 %v16627_v41  ;;  %v10123_v17 = vpop.permute.xlu1 %10122  ;;  %11622 = vrot.lane.b32.xlu0 %v9623_v11, %s17283_s29  ;;  %v9626_v59 = vpop.f32.mrb[242].mxu1 }
 0x417   : > { %10190 = vst.msk [vmem:[#allocation2 + $0x3a0] sm:$0xff] %vm10160_vm2, %v10123_v17  ;;  %8493 = vmatprep.mubr.bf16.mxu0 %v16632_v45  ;;  %v9628_v31 = vpop.f32.mrb[243].mxu1 }
 0x418   : > { %11624 = vrot.lane.b32.xlu1 %v9626_v59, %s17283_s29 }
 0x419   : > { %v8279_v38 = vpop.f32.mrb[244].mxu0 }
 0x41a   : > { %10277 = vrot.lane.b32.xlu0 %v8279_v38, %s17281_s27  ;;  %v8281_v37 = vpop.f32.mrb[245].mxu0  ;;  %v19232_v28 = vpop.f32.mrb[244].mxu1 }
 0x41b   : > { %v8282_v5 = vpop.f32.mrb[246].mxu0  ;;  %v9633_v41 = vpop.f32.mrb[245].mxu1  ;;  %v16633_v37 = vld [vmem:[%s18434_s17 + $0x590] ss:$8 sps:$4 sm:$0xff]  }
 0x41c   : > { %v10125_v63 = vpop.permute.xlu0 %10124  ;;  %10279 = vrot.lane.b32.xlu1 %v8282_v5, %s17281_s27  ;;  %v8284_v11 = vpop.f32.mrb[247].mxu0 }
 0x41d   : > { %10191 = vst.msk [vmem:[#allocation2 + $0x3c0] sm:$0xff] %vm10160_vm2, %v10125_v63  ;;  %v19237_v45 = vpop.f32.mrb[246].mxu1  ;;  %v16638_v11 = vld [vmem:[%s18434_s17 + $0x5a4] ss:$8 sps:$4 sm:$0xff]  }
 0x41e   : > { %8494 = vmatmul.mubr.bf16.gmra.mrb[96].mxu0 %v16630_v57  ;;  %v10127_v17 = vpop.permute.xlu1 %10126  ;;  %v9636_v59 = vpop.f32.mrb[247].mxu1 }
 0x41f   : > { %10192 = vst.msk [vmem:[#allocation2 + $0x3e0] sm:$0xff] %vm10160_vm2, %v10127_v17  ;;  %8501 = vmatprep.mubr.bf16.mxu0 %v16635_v13 }
 0x421   : > { %v8287_v31 = vpop.f32.mrb[248].mxu0 }
 0x422   : > { %10281 = vrot.lane.b32.xlu0 %v8287_v31, %s17281_s27  ;;  %v8289_v38 = vpop.f32.mrb[249].mxu0  ;;  %v19242_v41 = vpop.f32.mrb[248].mxu1 }
 0x423   : > { %v8290_v5 = vpop.f32.mrb[250].mxu0  ;;  %v9641_v63 = vpop.f32.mrb[249].mxu1 }
 0x424   : > { %v10226_v4 = vpop.permute.xlu0 %10225  ;;  %10283 = vrot.lane.b32.xlu1 %v8290_v5, %s17281_s27  ;;  %v8292_v57 = vpop.f32.mrb[251].mxu0  ;;  %v16636_v63 = vld [vmem:[%s18434_s17 + $0x5a0] ss:$8 sps:$4 sm:$0xff]   ;;  %v16641_v5 = vld [vmem:[%s18434_s17 + $0x5b4] ss:$8 sps:$4 sm:$0xff]  }
 0x425   : > { %10322 = vst.msk [vmem:[#allocation2] sm:$0xff] %vm10321_vm3, %v10226_v4  ;;  %v19247_v13 = vpop.f32.mrb[250].mxu1 }
 0x426   : > { %8502 = vmatmul.mubr.bf16.gmra.mrb[100].mxu0 %v16633_v37  ;;  %v10228_v17 = vpop.permute.xlu1 %10227  ;;  %v9644_v59 = vpop.f32.mrb[251].mxu1 }
 0x427   : > { %10323 = vst.msk [vmem:[#allocation2 + $0x20] sm:$0xff] %vm10321_vm3, %v10228_v17  ;;  %8509 = vmatprep.mubr.bf16.mxu0 %v16638_v11 }
 0x429   : > { %v8295_v31 = vpop.f32.mrb[252].mxu0 }
 0x42a   : > { %10285 = vrot.lane.b32.xlu0 %v8295_v31, %s17281_s27  ;;  %v8297_v38 = vpop.f32.mrb[253].mxu0  ;;  %v19252_v19 = vpop.f32.mrb[252].mxu1 }
 0x42b   : > { %v8298_v0 = vpop.f32.mrb[254].mxu0  ;;  %v9649_v57 = vpop.f32.mrb[253].mxu1 }
 0x42c   : > { %v10230_v4 = vpop.permute.xlu0 %10229  ;;  %10287 = vrot.lane.b32.xlu1 %v8298_v0, %s17281_s27  ;;  %v8300_v37 = vpop.f32.mrb[255].mxu0  ;;  %v16639_v57 = vld [vmem:[%s18434_s17 + $0x5b0] ss:$8 sps:$4 sm:$0xff]   ;;  %v16644_v0 = vld [vmem:[%s18434_s17 + $0x5c4] ss:$8 sps:$4 sm:$0xff]  }
 0x42d   : > { %10324 = vst.msk [vmem:[#allocation2 + $0x40] sm:$0xff] %vm10321_vm3, %v10230_v4  ;;  %v19257_v17 = vpop.f32.mrb[254].mxu1 }
 0x42e   : > { %8510 = vmatmul.mubr.bf16.gmra.mrb[104].mxu0 %v16636_v63  ;;  %v10232_v11 = vpop.permute.xlu1 %10231  ;;  %v9652_v59 = vpop.f32.mrb[255].mxu1 }
 0x42f   : > { %10325 = vst.msk [vmem:[#allocation2 + $0x60] sm:$0xff] %vm10321_vm3, %v10232_v11  ;;  %8517 = vmatprep.mubr.bf16.mxu0 %v16641_v5 }
 0x431   : > { %v8303_v31 = vpop.f32.mrb[0].mxu0 }
 0x432   : > { %10354 = vst.msk [vmem:[#allocation2 + $0x8] sm:$0xff] %vm9838_vm0, %v8303_v31  ;;  %v8305_v38 = vpop.f32.mrb[1].mxu0  ;;  %v19262_v52 = vpop.f32.mrb[0].mxu1 }
 0x433   : > { %v8306_v40 = vpop.f32.mrb[2].mxu0  ;;  %v9657_v37 = vpop.f32.mrb[1].mxu1 }
 0x434   : > { %10355 = vst.msk [vmem:[#allocation2 + $0x28] sm:$0xff] %vm9838_vm0, %v8306_v40  ;;  %v10234_v63 = vpop.permute.xlu0 %10233  ;;  %v8308_v4 = vpop.f32.mrb[3].mxu0  ;;  %v16642_v37 = vld [vmem:[%s18434_s17 + $0x5c0] ss:$8 sps:$4 sm:$0xff]  }
 0x435   : > { %10326 = vst.msk [vmem:[#allocation2 + $0x80] sm:$0xff] %vm10321_vm3, %v10234_v63  ;;  %v19267_v11 = vpop.f32.mrb[2].mxu1  ;;  %v16647_v4 = vld [vmem:[%s18434_s17 + $0x5d4] ss:$8 sps:$4 sm:$0xff]  }
 0x436   : > { %8518 = vmatmul.mubr.bf16.gmra.mrb[108].mxu0 %v16639_v57  ;;  %v10236_v5 = vpop.permute.xlu1 %10235  ;;  %v9660_v59 = vpop.f32.mrb[3].mxu1 }
 0x437   : > { %10327 = vst.msk [vmem:[#allocation2 + $0xa0] sm:$0xff] %vm10321_vm3, %v10236_v5  ;;  %8525 = vmatprep.mubr.bf16.mxu0 %v16644_v0 }
 0x439   : > { %v8311_v31 = vpop.f32.mrb[4].mxu0 }
 0x43a   : > { %10356 = vst.msk [vmem:[#allocation2 + $0x48] sm:$0xff] %vm9838_vm0, %v8311_v31  ;;  %v8313_v38 = vpop.f32.mrb[5].mxu0  ;;  %v19272_v56 = vpop.f32.mrb[4].mxu1 }
 0x43b   : > { %v8314_v40 = vpop.f32.mrb[6].mxu0  ;;  %v9665_v51 = vpop.f32.mrb[5].mxu1 }
 0x43c   : > { %10357 = vst.msk [vmem:[#allocation2 + $0x68] sm:$0xff] %vm9838_vm0, %v8314_v40  ;;  %v10238_v57 = vpop.permute.xlu0 %10237  ;;  %v8316_v63 = vpop.f32.mrb[7].mxu0  ;;  %v16645_v51 = vld [vmem:[%s18434_s17 + $0x5d0] ss:$8 sps:$4 sm:$0xff]  }
 0x43d   : > { %10328 = vst.msk [vmem:[#allocation2 + $0xc0] sm:$0xff] %vm10321_vm3, %v10238_v57  ;;  %v19277_v5 = vpop.f32.mrb[6].mxu1  ;;  %v16650_v63 = vld [vmem:[%s18434_s17 + $0x5e4] ss:$8 sps:$4 sm:$0xff]  }
 0x43e   : > { %8526 = vmatmul.mubr.bf16.gmra.mrb[112].mxu0 %v16642_v37  ;;  %v10240_v0 = vpop.permute.xlu1 %10239  ;;  %v9668_v59 = vpop.f32.mrb[7].mxu1 }
 0x43f   : > { %10329 = vst.msk [vmem:[#allocation2 + $0xe0] sm:$0xff] %vm10321_vm3, %v10240_v0  ;;  %8533 = vmatprep.mubr.bf16.mxu0 %v16647_v4 }
 0x441   : > { %v8319_v31 = vpop.f32.mrb[8].mxu0 }
 0x442   : > { %10358 = vst.msk [vmem:[#allocation2 + $0x88] sm:$0xff] %vm9838_vm0, %v8319_v31  ;;  %v8321_v38 = vpop.f32.mrb[9].mxu0  ;;  %v19282_v36 = vpop.f32.mrb[8].mxu1 }
 0x443   : > { %v8322_v40 = vpop.f32.mrb[10].mxu0  ;;  %v9673_v9 = vpop.f32.mrb[9].mxu1 }
 0x444   : > { %10359 = vst.msk [vmem:[#allocation2 + $0xa8] sm:$0xff] %vm9838_vm0, %v8322_v40  ;;  %v10242_v37 = vpop.permute.xlu0 %10241  ;;  %v8324_v57 = vpop.f32.mrb[11].mxu0  ;;  %v16648_v9 = vld [vmem:[%s18434_s17 + $0x5e0] ss:$8 sps:$4 sm:$0xff]  }
 0x445   : > { %10330 = vst.msk [vmem:[#allocation2 + $0x100] sm:$0xff] %vm10321_vm3, %v10242_v37  ;;  %v19287_v0 = vpop.f32.mrb[10].mxu1  ;;  %v16653_v57 = vld [vmem:[%s18434_s17 + $0x5f4] ss:$8 sps:$4 sm:$0xff]  }
 0x446   : > { %8534 = vmatmul.mubr.bf16.gmra.mrb[116].mxu0 %v16645_v51  ;;  %v10244_v4 = vpop.permute.xlu1 %10243  ;;  %v9676_v59 = vpop.f32.mrb[11].mxu1 }
 0x447   : > { %10331 = vst.msk [vmem:[#allocation2 + $0x120] sm:$0xff] %vm10321_vm3, %v10244_v4  ;;  %8541 = vmatprep.mubr.bf16.mxu0 %v16650_v63 }
 0x449   : > { %v8327_v31 = vpop.f32.mrb[12].mxu0 }
 0x44a   : > { %10360 = vst.msk [vmem:[#allocation2 + $0xc8] sm:$0xff] %vm9838_vm0, %v8327_v31  ;;  %v8329_v38 = vpop.f32.mrb[13].mxu0  ;;  %v19292_v33 = vpop.f32.mrb[12].mxu1 }
 0x44b   : > { %21504 = vst [vmem:[#allocation38_spill] sm:$0xff] %v19292_v33  ;;  %v8330_v40 = vpop.f32.mrb[14].mxu0  ;;  %v9681_v23 = vpop.f32.mrb[13].mxu1 }
 0x44c   : > { %10361 = vst.msk [vmem:[#allocation2 + $0xe8] sm:$0xff] %vm9838_vm0, %v8330_v40  ;;  %v10246_v51 = vpop.permute.xlu0 %10245  ;;  %v8332_v37 = vpop.f32.mrb[15].mxu0  ;;  %v16651_v23 = vld [vmem:[%s18434_s17 + $0x5f0] ss:$8 sps:$4 sm:$0xff]  }
 0x44d   : > { %10332 = vst.msk [vmem:[#allocation2 + $0x140] sm:$0xff] %vm10321_vm3, %v10246_v51  ;;  %v19297_v4 = vpop.f32.mrb[14].mxu1  ;;  %v16701_v51 = vld [vmem:[%s21455_s3 + $0x48] sm:$0xff]  }
 0x44e   : > { %21505 = vst [vmem:[#allocation39_spill] sm:$0xff] %v19297_v4  ;;  %8542 = vmatmul.mubr.bf16.gmra.mrb[120].mxu0 %v16648_v9  ;;  %v10248_v63 = vpop.permute.xlu1 %10247  ;;  %v9684_v59 = vpop.f32.mrb[15].mxu1  ;;  %15783 = vmatprep.subr.bf16.mxu1 %v16701_v51 }
 0x44f   : > { %10333 = vst.msk [vmem:[#allocation2 + $0x160] sm:$0xff] %vm10321_vm3, %v10248_v63  ;;  %8549 = vmatprep.mubr.bf16.mxu0 %v16653_v57  ;;  %v16705_v57 = vld [vmem:[%s21455_s3 + $0x8] sm:$0xff]  }
 0x450   : > { %15784 = vmatpush3.bf16.msra.mxu1 %v16705_v57 }
 0x451   : > { %v8335_v31 = vpop.f32.mrb[16].mxu0 }
 0x452   : > { %10362 = vst.msk [vmem:[#allocation2 + $0x108] sm:$0xff] %vm9838_vm0, %v8335_v31  ;;  %v8337_v38 = vpop.f32.mrb[17].mxu0  ;;  %v19302_v49 = vpop.f32.mrb[16].mxu1 }
 0x453   : > { %21506 = vst [vmem:[#allocation40_spill] sm:$0xff] %v19302_v49  ;;  %v8338_v40 = vpop.f32.mrb[18].mxu0  ;;  %v9689_v37 = vpop.f32.mrb[17].mxu1 }
 0x454   : > { %10363 = vst.msk [vmem:[#allocation2 + $0x128] sm:$0xff] %vm9838_vm0, %v8338_v40  ;;  %v10250_v9 = vpop.permute.xlu0 %10249  ;;  %v8340_v63 = vpop.f32.mrb[19].mxu0 }
 0x455   : > { %10334 = vst.msk [vmem:[#allocation2 + $0x180] sm:$0xff] %vm10321_vm3, %v10250_v9  ;;  %v19313_v59 = vpop.f32.mrb[18].mxu1  ;;  %v16654_v63 = vld [vmem:[%s18434_s17 + $0x600] ss:$8 sps:$4 sm:$0xff]  }
 0x456   : > { %21507 = vst [vmem:[#allocation41_spill] sm:$0xff] %v19313_v59  ;;  %8550 = vmatmul.mubr.bf16.gmra.mrb[124].mxu0 %v16651_v23  ;;  %v10252_v31 = vpop.permute.xlu1 %10251  ;;  %v9692_v38 = vpop.f32.mrb[19].mxu1 }
 0x457   : > { %10335 = vst.msk [vmem:[#allocation2 + $0x1a0] sm:$0xff] %vm10321_vm3, %v10252_v31  ;;  %8557 = vmatprep.mubr.bf16.mxu0 %v16656_v30 }
 0x459   : > { %v8343_v40 = vpop.f32.mrb[20].mxu0 }
 0x45a   : > { %10364 = vst.msk [vmem:[#allocation2 + $0x148] sm:$0xff] %vm9838_vm0, %v8343_v40  ;;  %v8345_v37 = vpop.f32.mrb[21].mxu0  ;;  %v19318_v49 = vpop.f32.mrb[20].mxu1 }
 0x45b   : > { %21508 = vst [vmem:[#allocation42_spill] sm:$0xff] %v19318_v49  ;;  %v8346_v44 = vpop.f32.mrb[22].mxu0  ;;  %v9697_v9 = vpop.f32.mrb[21].mxu1  ;;  %v16682_v49 = vld [vmem:[%s18434_s17 + $0x684] ss:$8 sps:$4 sm:$0xff]  }
 0x45c   : > { %10365 = vst.msk [vmem:[#allocation2 + $0x168] sm:$0xff] %vm9838_vm0, %v8346_v44  ;;  %v10254_v23 = vpop.permute.xlu0 %10253  ;;  %v8348_v51 = vpop.f32.mrb[23].mxu0  ;;  %v16657_v9 = vld [vmem:[%s18434_s17 + $0x610] ss:$8 sps:$4 sm:$0xff]  }
 0x45d   : > { %10336 = vst.msk [vmem:[#allocation2 + $0x1c0] sm:$0xff] %vm10321_vm3, %v10254_v23  ;;  %v19323_v57 = vpop.f32.mrb[22].mxu1 }
 0x45e   : > { %21509 = vst [vmem:[#allocation43_spill] sm:$0xff] %v19323_v57  ;;  %8558 = vmatmul.mubr.bf16.gmra.mrb[128].mxu0 %v16654_v63  ;;  %v10256_v30 = vpop.permute.xlu1 %10255  ;;  %v9700_v31 = vpop.f32.mrb[23].mxu1  ;;  %v16662_v63 = vld [vmem:[%s18434_s17 + $0x624] ss:$8 sps:$4 sm:$0xff]  }
 0x45f   : > { %10337 = vst.msk [vmem:[#allocation2 + $0x1e0] sm:$0xff] %vm10321_vm3, %v10256_v30  ;;  %8565 = vmatprep.mubr.bf16.mxu0 %v16659_v39 }
 0x460   : > { %v11603_v38 = vpop.permute.xlu0 %11602 }
 0x461   : > { %11698 = vst.msk [vmem:[#allocation2 + $0x18] sm:$0xff] %vm10160_vm2, %v11603_v38  ;;  %v8351_v40 = vpop.f32.mrb[24].mxu0 }
 0x462   : > { %10366 = vst.msk [vmem:[#allocation2 + $0x188] sm:$0xff] %vm9838_vm0, %v8351_v40  ;;  %v11605_v44 = vpop.permute.xlu1 %11604  ;;  %v8353_v37 = vpop.f32.mrb[25].mxu0 }
 0x463   : > { %11699 = vst.msk [vmem:[#allocation2 + $0x38] sm:$0xff] %vm10160_vm2, %v11605_v44  ;;  %v8354_v23 = vpop.f32.mrb[26].mxu0  ;;  %v19331_v51 = vpop.f32.mrb[24].mxu1  ;;  %v16714_v37 = vld [vmem:[%s18434_s17 + $0xf64] ss:$8 sps:$4 sm:$0xff]  }
 0x464   : > { %21510 = vst [vmem:[#allocation44_spill] sm:$0xff] %v19331_v51  ;;  %10367 = vst.msk [vmem:[#allocation2 + $0x1a8] sm:$0xff] %vm9838_vm0, %v8354_v23  ;;  %v10258_v39 = vpop.permute.xlu0 %10257  ;;  %v8356_v30 = vpop.f32.mrb[27].mxu0  ;;  %v16712_v51 = vld [vmem:[%s18434_s17 + $0xf60] ss:$8 sps:$4 sm:$0xff]   ;;  %9757 = vmatprep.mubr.bf16.mxu1 %v16714_v37 }
 0x465   : > { %10338 = vst.msk [vmem:[#allocation2 + $0x200] sm:$0xff] %vm10321_vm3, %v10258_v39  ;;  %v9705_v31 = vpop.f32.mrb[25].mxu1  ;;  %9758 = vmatmul.mubr.bf16.gmra.mrb[52].mxu1 %v16712_v51 }
 0x466   : > { %8566 = vmatmul.mubr.bf16.gmra.mrb[132].mxu0 %v16657_v9  ;;  %v10260_v38 = vpop.permute.xlu1 %10259  ;;  %v19335_v40 = vpop.f32.mrb[26].mxu1  ;;  %v16660_v9 = vld [vmem:[%s18434_s17 + $0x620] ss:$8 sps:$4 sm:$0xff]  }
 0x467   : > { %21511 = vst [vmem:[#allocation45_spill] sm:$0xff] %v19335_v40  ;;  %10339 = vst.msk [vmem:[#allocation2 + $0x220] sm:$0xff] %vm10321_vm3, %v10260_v38  ;;  %8573 = vmatprep.mubr.bf16.mxu0 %v16662_v63  ;;  %v9708_v44 = vpop.f32.mrb[27].mxu1  ;;  %v16665_v38 = vld [vmem:[%s18434_s17 + $0x634] ss:$8 sps:$4 sm:$0xff]  }
 0x468   : > { %v11607_v57 = vpop.permute.xlu0 %11606 }
 0x469   : > { %11700 = vst.msk [vmem:[#allocation2 + $0x58] sm:$0xff] %vm10160_vm2, %v11607_v57  ;;  %v8359_v23 = vpop.f32.mrb[28].mxu0 }
 0x46a   : > { %10368 = vst.msk [vmem:[#allocation2 + $0x1c8] sm:$0xff] %vm9838_vm0, %v8359_v23  ;;  %v11609_v39 = vpop.permute.xlu1 %11608  ;;  %v8361_v30 = vpop.f32.mrb[29].mxu0 }
 0x46b   : > { %11701 = vst.msk [vmem:[#allocation2 + $0x78] sm:$0xff] %vm10160_vm2, %v11609_v39  ;;  %v8362_v31 = vpop.f32.mrb[30].mxu0  ;;  %v9711_v40 = vpop.f32.mrb[28].mxu1 }
 0x46c   : > { %10369 = vst.msk [vmem:[#allocation2 + $0x1e8] sm:$0xff] %vm9838_vm0, %v8362_v31  ;;  %v10262_v63 = vpop.permute.xlu0 %10261  ;;  %v8364_v44 = vpop.f32.mrb[31].mxu0  ;;  %11762 = vrot.lane.b32.xlu0 %v9711_v40, %s17281_s27 }
 0x46d   : > { %10340 = vst.msk [vmem:[#allocation2 + $0x240] sm:$0xff] %vm10321_vm3, %v10262_v63  ;;  %v9713_v57 = vpop.f32.mrb[29].mxu1  ;;  %v16663_v63 = vld [vmem:[%s18434_s17 + $0x630] ss:$8 sps:$4 sm:$0xff]   ;;  %v16668_v44 = vld [vmem:[%s18434_s17 + $0x644] ss:$8 sps:$4 sm:$0xff]  }
 0x46e   : > { %8574 = vmatmul.mubr.bf16.gmra.mrb[136].mxu0 %v16660_v9  ;;  %v10264_v37 = vpop.permute.xlu1 %10263  ;;  %v9714_v23 = vpop.f32.mrb[30].mxu1 }
 0x46f   : > { %10341 = vst.msk [vmem:[#allocation2 + $0x260] sm:$0xff] %vm10321_vm3, %v10264_v37  ;;  %8581 = vmatprep.mubr.bf16.mxu0 %v16665_v38  ;;  %v9716_v51 = vpop.f32.mrb[31].mxu1  ;;  %11764 = vrot.lane.b32.xlu1 %v9714_v23, %s17281_s27 }
 0x470   : > { %v11611_v39 = vpop.permute.xlu0 %11610 }
 0x471   : > { %11702 = vst.msk [vmem:[#allocation2 + $0x98] sm:$0xff] %vm10160_vm2, %v11611_v39  ;;  %v8367_v30 = vpop.f32.mrb[32].mxu0 }
 0x472   : > { %10370 = vst.msk [vmem:[#allocation2 + $0x208] sm:$0xff] %vm9838_vm0, %v8367_v30  ;;  %v11613_v40 = vpop.permute.xlu1 %11612  ;;  %v8369_v31 = vpop.f32.mrb[33].mxu0 }
 0x473   : > { %11703 = vst.msk [vmem:[#allocation2 + $0xb8] sm:$0xff] %vm10160_vm2, %v11613_v40  ;;  %v8370_v9 = vpop.f32.mrb[34].mxu0  ;;  %v9719_v57 = vpop.f32.mrb[32].mxu1 }
 0x474   : > { %10371 = vst.msk [vmem:[#allocation2 + $0x228] sm:$0xff] %vm9838_vm0, %v8370_v9  ;;  %v10266_v38 = vpop.permute.xlu0 %10265  ;;  %v8372_v37 = vpop.f32.mrb[35].mxu0  ;;  %11766 = vrot.lane.b32.xlu0 %v9719_v57, %s17281_s27 }
 0x475   : > { %10342 = vst.msk [vmem:[#allocation2 + $0x280] sm:$0xff] %vm10321_vm3, %v10266_v38  ;;  %v9721_v23 = vpop.f32.mrb[33].mxu1  ;;  %v16666_v38 = vld [vmem:[%s18434_s17 + $0x640] ss:$8 sps:$4 sm:$0xff]   ;;  %v16673_v37 = vld [vmem:[%s18434_s17 + $0x654] ss:$8 sps:$4 sm:$0xff]  }
 0x476   : > { %8582 = vmatmul.mubr.bf16.gmra.mrb[140].mxu0 %v16663_v63  ;;  %v10268_v51 = vpop.permute.xlu1 %10267  ;;  %v9722_v39 = vpop.f32.mrb[34].mxu1 }
 0x477   : > { %10343 = vst.msk [vmem:[#allocation2 + $0x2a0] sm:$0xff] %vm10321_vm3, %v10268_v51  ;;  %8589 = vmatprep.mubr.bf16.mxu0 %v16668_v44  ;;  %v9724_v30 = vpop.f32.mrb[35].mxu1  ;;  %11768 = vrot.lane.b32.xlu1 %v9722_v39, %s17281_s27 }
 0x478   : > { %v11615_v40 = vpop.permute.xlu0 %11614 }
 0x479   : > { %11704 = vst.msk [vmem:[#allocation2 + $0xd8] sm:$0xff] %vm10160_vm2, %v11615_v40  ;;  %v8375_v31 = vpop.f32.mrb[36].mxu0 }
 0x47a   : > { %10372 = vst.msk [vmem:[#allocation2 + $0x248] sm:$0xff] %vm9838_vm0, %v8375_v31  ;;  %v11617_v9 = vpop.permute.xlu1 %11616  ;;  %v8377_v57 = vpop.f32.mrb[37].mxu0 }
 0x47b   : > { %11705 = vst.msk [vmem:[#allocation2 + $0xf8] sm:$0xff] %vm10160_vm2, %v11617_v9  ;;  %v8378_v63 = vpop.f32.mrb[38].mxu0  ;;  %v9727_v23 = vpop.f32.mrb[36].mxu1 }
 0x47c   : > { %10373 = vst.msk [vmem:[#allocation2 + $0x268] sm:$0xff] %vm9838_vm0, %v8378_v63  ;;  %v10270_v44 = vpop.permute.xlu0 %10269  ;;  %v8380_v51 = vpop.f32.mrb[39].mxu0  ;;  %11770 = vrot.lane.b32.xlu0 %v9727_v23, %s17281_s27 }
 0x47d   : > { %10344 = vst.msk [vmem:[#allocation2 + $0x2c0] sm:$0xff] %vm10321_vm3, %v10270_v44  ;;  %v9729_v39 = vpop.f32.mrb[37].mxu1  ;;  %v16671_v44 = vld [vmem:[%s18434_s17 + $0x650] ss:$8 sps:$4 sm:$0xff]   ;;  %v16676_v51 = vld [vmem:[%s18434_s17 + $0x664] ss:$8 sps:$4 sm:$0xff]  }
 0x47e   : > { %8590 = vmatmul.mubr.bf16.gmra.mrb[144].mxu0 %v16666_v38  ;;  %v10272_v30 = vpop.permute.xlu1 %10271  ;;  %v9730_v40 = vpop.f32.mrb[38].mxu1 }
 0x47f   : > { %10345 = vst.msk [vmem:[#allocation2 + $0x2e0] sm:$0xff] %vm10321_vm3, %v10272_v30  ;;  %8597 = vmatprep.mubr.bf16.mxu0 %v16673_v37  ;;  %v9732_v31 = vpop.f32.mrb[39].mxu1  ;;  %11772 = vrot.lane.b32.xlu1 %v9730_v40, %s17281_s27 }
 0x480   : > { %v11619_v9 = vpop.permute.xlu0 %11618 }
 0x481   : > { %11706 = vst.msk [vmem:[#allocation2 + $0x118] sm:$0xff] %vm10160_vm2, %v11619_v9  ;;  %v8383_v57 = vpop.f32.mrb[40].mxu0 }
 0x482   : > { %10374 = vst.msk [vmem:[#allocation2 + $0x288] sm:$0xff] %vm9838_vm0, %v8383_v57  ;;  %v11621_v63 = vpop.permute.xlu1 %11620  ;;  %v8385_v23 = vpop.f32.mrb[41].mxu0 }
 0x483   : > { %11707 = vst.msk [vmem:[#allocation2 + $0x138] sm:$0xff] %vm10160_vm2, %v11621_v63  ;;  %v8386_v38 = vpop.f32.mrb[42].mxu0  ;;  %v9735_v39 = vpop.f32.mrb[40].mxu1  ;;  %v16729_v63 = vld [vmem:[%s18434_s17 + $0xf74] ss:$8 sps:$4 sm:$0xff]  }
 0x484   : > { %10375 = vst.msk [vmem:[#allocation2 + $0x2a8] sm:$0xff] %vm9838_vm0, %v8386_v38  ;;  %v10274_v37 = vpop.permute.xlu0 %10273  ;;  %v8388_v30 = vpop.f32.mrb[43].mxu0  ;;  %11774 = vrot.lane.b32.xlu0 %v9735_v39, %s17281_s27  ;;  %v16727_v38 = vld [vmem:[%s18434_s17 + $0xf70] ss:$8 sps:$4 sm:$0xff]   ;;  %9765 = vmatprep.mubr.bf16.mxu1 %v16729_v63 }
 0x485   : > { %10346 = vst.msk [vmem:[#allocation2 + $0x300] sm:$0xff] %vm10321_vm3, %v10274_v37  ;;  %v9737_v40 = vpop.f32.mrb[41].mxu1  ;;  %v16674_v30 = vld [vmem:[%s18434_s17 + $0x660] ss:$8 sps:$4 sm:$0xff]   ;;  %9766 = vmatmul.mubr.bf16.gmra.mrb[56].mxu1 %v16727_v38 }
 0x486   : > { %8598 = vmatmul.mubr.bf16.gmra.mrb[148].mxu0 %v16671_v44  ;;  %v10276_v31 = vpop.permute.xlu1 %10275  ;;  %v9738_v9 = vpop.f32.mrb[42].mxu1  ;;  %v16679_v40 = vld [vmem:[%s18434_s17 + $0x674] ss:$8 sps:$4 sm:$0xff]  }
 0x487   : > { %10347 = vst.msk [vmem:[#allocation2 + $0x320] sm:$0xff] %vm10321_vm3, %v10276_v31  ;;  %8605 = vmatprep.mubr.bf16.mxu0 %v16676_v51  ;;  %v9740_v57 = vpop.f32.mrb[43].mxu1  ;;  %11776 = vrot.lane.b32.xlu1 %v9738_v9, %s17281_s27 }
 0x488   : > { %v11623_v23 = vpop.permute.xlu0 %11622 }
 0x489   : > { %11708 = vst.msk [vmem:[#allocation2 + $0x158] sm:$0xff] %vm10160_vm2, %v11623_v23  ;;  %v8391_v39 = vpop.f32.mrb[44].mxu0 }
 0x48a   : > { %10376 = vst.msk [vmem:[#allocation2 + $0x2c8] sm:$0xff] %vm9838_vm0, %v8391_v39  ;;  %v11625_v44 = vpop.permute.xlu1 %11624  ;;  %v8393_v37 = vpop.f32.mrb[45].mxu0 }
 0x48b   : > { %11709 = vst.msk [vmem:[#allocation2 + $0x178] sm:$0xff] %vm10160_vm2, %v11625_v44  ;;  %v8394_v51 = vpop.f32.mrb[46].mxu0  ;;  %v9743_v31 = vpop.f32.mrb[44].mxu1 }
 0x48c   : > { %10377 = vst.msk [vmem:[#allocation2 + $0x2e8] sm:$0xff] %vm9838_vm0, %v8394_v51  ;;  %v10278_v9 = vpop.permute.xlu0 %10277  ;;  %v8396_v57 = vpop.f32.mrb[47].mxu0  ;;  %11778 = vrot.lane.b32.xlu0 %v9743_v31, %s17281_s27  ;;  %v16677_v51 = vld [vmem:[%s18434_s17 + $0x670] ss:$8 sps:$4 sm:$0xff]  }
 0x48d   : > { %10348 = vst.msk [vmem:[#allocation2 + $0x340] sm:$0xff] %vm10321_vm3, %v10278_v9  ;;  %v9745_v63 = vpop.f32.mrb[45].mxu1 }
 0x48e   : > { %8606 = vmatmul.mubr.bf16.gmra.mrb[152].mxu0 %v16674_v30  ;;  %v10280_v23 = vpop.permute.xlu1 %10279  ;;  %v9746_v39 = vpop.f32.mrb[46].mxu1 }
 0x48f   : > { %10349 = vst.msk [vmem:[#allocation2 + $0x360] sm:$0xff] %vm10321_vm3, %v10280_v23  ;;  %8613 = vmatprep.mubr.bf16.mxu0 %v16679_v40  ;;  %v9748_v38 = vpop.f32.mrb[47].mxu1  ;;  %11780 = vrot.lane.b32.xlu1 %v9746_v39, %s17281_s27 }
 0x491   : > { %v8399_v44 = vpop.f32.mrb[48].mxu0 }
 0x492   : > { %10378 = vst.msk [vmem:[#allocation2 + $0x308] sm:$0xff] %vm9838_vm0, %v8399_v44  ;;  %v8401_v37 = vpop.f32.mrb[49].mxu0  ;;  %v9751_v57 = vpop.f32.mrb[48].mxu1 }
 0x493   : > { %v8402_v31 = vpop.f32.mrb[50].mxu0  ;;  %11782 = vrot.lane.b32.xlu0 %v9751_v57, %s17281_s27  ;;  %v9753_v30 = vpop.f32.mrb[49].mxu1  ;;  %v16680_v37 = vld [vmem:[%s18434_s17 + $0x680] ss:$8 sps:$4 sm:$0xff]  }
 0x494   : > { %10379 = vst.msk [vmem:[#allocation2 + $0x328] sm:$0xff] %vm9838_vm0, %v8402_v31  ;;  %v10282_v9 = vpop.permute.xlu0 %10281  ;;  %v8404_v40 = vpop.f32.mrb[51].mxu0  ;;  %v16685_v31 = vld [vmem:[%s18434_s17 + $0x694] ss:$8 sps:$4 sm:$0xff]  }
 0x495   : > { %10350 = vst.msk [vmem:[#allocation2 + $0x380] sm:$0xff] %vm10321_vm3, %v10282_v9  ;;  %v9754_v63 = vpop.f32.mrb[50].mxu1 }
 0x496   : > { %8614 = vmatmul.mubr.bf16.gmra.mrb[156].mxu0 %v16677_v51  ;;  %v10284_v23 = vpop.permute.xlu1 %10283  ;;  %11784 = vrot.lane.b32.xlu1 %v9754_v63, %s17281_s27  ;;  %v9756_v39 = vpop.f32.mrb[51].mxu1  ;;  %v16683_v63 = vld [vmem:[%s18434_s17 + $0x690] ss:$8 sps:$4 sm:$0xff]  }
 0x497   : > { %10351 = vst.msk [vmem:[#allocation2 + $0x3a0] sm:$0xff] %vm10321_vm3, %v10284_v23  ;;  %8621 = vmatprep.mubr.bf16.mxu0 %v16682_v49  ;;  %v16688_v39 = vld [vmem:[%s18434_s17 + $0x6a4] ss:$8 sps:$4 sm:$0xff]  }
 0x499   : > { %v8407_v38 = vpop.f32.mrb[52].mxu0 }
 0x49a   : > { %10380 = vst.msk [vmem:[#allocation2 + $0x348] sm:$0xff] %vm9838_vm0, %v8407_v38  ;;  %v8409_v44 = vpop.f32.mrb[53].mxu0 }
 0x49b   : > { %v8410_v57 = vpop.f32.mrb[54].mxu0 }
 0x49c   : > { %10381 = vst.msk [vmem:[#allocation2 + $0x368] sm:$0xff] %vm9838_vm0, %v8410_v57  ;;  %v10286_v30 = vpop.permute.xlu0 %10285  ;;  %v8412_v51 = vpop.f32.mrb[55].mxu0  ;;  %v16686_v57 = vld [vmem:[%s18434_s17 + $0x6a0] ss:$8 sps:$4 sm:$0xff]  }
 0x49d   : > { %10352 = vst.msk [vmem:[#allocation2 + $0x3c0] sm:$0xff] %vm10321_vm3, %v10286_v30  ;;  %v16691_v30 = vld [vmem:[%s18434_s17 + $0x6b4] ss:$8 sps:$4 sm:$0xff]  }
 0x49e   : > { %8622 = vmatmul.mubr.bf16.gmra.mrb[160].mxu0 %v16680_v37  ;;  %v10288_v9 = vpop.permute.xlu1 %10287  ;;  %v16742_v51 = vld [vmem:[%s21455_s3 + $0x50] sm:$0xff]  }
 0x49f   : > { %10353 = vst.msk [vmem:[#allocation2 + $0x3e0] sm:$0xff] %vm10321_vm3, %v10288_v9  ;;  %8629 = vmatprep.mubr.bf16.mxu0 %v16685_v31  ;;  %v16743_v9 = vld [vmem:[%s21455_s3 + $0x10] sm:$0xff]   ;;  %15785 = vmatprep.subr.bf16.mxu1 %v16742_v51 }
 0x4a0   : > { %15786 = vmatpush3.bf16.msra.mxu1 %v16743_v9  ;;  %v16697_v51 = vld [vmem:[%s18434_s17 + $0x6d4] ss:$8 sps:$4 sm:$0xff]  }
 0x4a1   : > { %v8415_v49 = vpop.f32.mrb[56].mxu0 }
 0x4a2   : > { %10382 = vst.msk [vmem:[#allocation2 + $0x388] sm:$0xff] %vm9838_vm0, %v8415_v49  ;;  %v8417_v40 = vpop.f32.mrb[57].mxu0 }
 0x4a3   : > { %v8418_v23 = vpop.f32.mrb[58].mxu0 }
 0x4a4   : > { %10383 = vst.msk [vmem:[#allocation2 + $0x3a8] sm:$0xff] %vm9838_vm0, %v8418_v23  ;;  %v8420_v38 = vpop.f32.mrb[59].mxu0  ;;  %v16689_v23 = vld [vmem:[%s18434_s17 + $0x6b0] ss:$8 sps:$4 sm:$0xff]  }
 0x4a5   : > { %v16694_v38 = vld [vmem:[%s18434_s17 + $0x6c4] ss:$8 sps:$4 sm:$0xff]  }
 0x4a6   : > { %8630 = vmatmul.mubr.bf16.gmra.mrb[164].mxu0 %v16683_v63 }
 0x4a7   : > { %8637 = vmatprep.mubr.bf16.mxu0 %v16688_v39 }
 0x4a9   : > { %v8423_v44 = vpop.f32.mrb[60].mxu0 }
 0x4aa   : > { %10384 = vst.msk [vmem:[#allocation2 + $0x3c8] sm:$0xff] %vm9838_vm0, %v8423_v44  ;;  %v8425_v37 = vpop.f32.mrb[61].mxu0 }
 0x4ab   : > { %v8426_v31 = vpop.f32.mrb[62].mxu0 }
 0x4ac   : > { %10385 = vst.msk [vmem:[#allocation2 + $0x3e8] sm:$0xff] %vm9838_vm0, %v8426_v31  ;;  %v8428_v49 = vpop.f32.mrb[63].mxu0  ;;  %v16692_v31 = vld [vmem:[%s18434_s17 + $0x6c0] ss:$8 sps:$4 sm:$0xff]  }
 0x4ae   : > { %8638 = vmatmul.mubr.bf16.gmra.mrb[168].mxu0 %v16686_v57 }
 0x4af   : > { %8645 = vmatprep.mubr.bf16.mxu0 %v16691_v30 }
 0x4b1   : > { %v8431_v40 = vpop.f32.mrb[64].mxu0 }
 0x4b2   : > { %10418 = vrot.lane.b32.xlu0 %v8431_v40, %s17282_s28  ;;  %v8433_v63 = vpop.f32.mrb[65].mxu0 }
 0x4b3   : > { %v8434_v39 = vpop.f32.mrb[66].mxu0  ;;  %v16695_v63 = vld [vmem:[%s18434_s17 + $0x6d0] ss:$8 sps:$4 sm:$0xff]  }
 0x4b4   : > { %v8436_v44 = vpop.f32.mrb[67].mxu0 }
 0x4b6   : > { %8646 = vmatmul.mubr.bf16.gmra.mrb[172].mxu0 %v16689_v23  ;;  %10420 = vrot.lane.b32.xlu0 %v8434_v39, %s17282_s28  ;;  %v16700_v39 = vld [vmem:[%s18434_s17 + $0x6e4] ss:$8 sps:$4 sm:$0xff]  }
 0x4b7   : > { %8653 = vmatprep.mubr.bf16.mxu0 %v16694_v38 }
 0x4b9   : > { %v8439_v37 = vpop.f32.mrb[68].mxu0 }
 0x4ba   : > { %10422 = vrot.lane.b32.xlu0 %v8439_v37, %s17282_s28  ;;  %v8441_v57 = vpop.f32.mrb[69].mxu0 }
 0x4bb   : > { %v8442_v30 = vpop.f32.mrb[70].mxu0  ;;  %v16698_v57 = vld [vmem:[%s18434_s17 + $0x6e0] ss:$8 sps:$4 sm:$0xff]  }
 0x4bc   : > { %10424 = vrot.lane.b32.xlu1 %v8442_v30, %s17282_s28  ;;  %v8444_v9 = vpop.f32.mrb[71].mxu0  ;;  %v16704_v30 = vld [vmem:[%s18434_s17 + $0x6f4] ss:$8 sps:$4 sm:$0xff]  }
 0x4be   : > { %8654 = vmatmul.mubr.bf16.gmra.mrb[176].mxu0 %v16692_v31 }
 0x4bf   : > { %8661 = vmatprep.mubr.bf16.mxu0 %v16697_v51 }
 0x4c1   : > { %v8447_v49 = vpop.f32.mrb[72].mxu0 }
 0x4c2   : > { %10426 = vrot.lane.b32.xlu0 %v8447_v49, %s17282_s28  ;;  %v8449_v40 = vpop.f32.mrb[73].mxu0 }
 0x4c3   : > { %v8450_v23 = vpop.f32.mrb[74].mxu0  ;;  %v16702_v40 = vld [vmem:[%s18434_s17 + $0x6f0] ss:$8 sps:$4 sm:$0xff]  }
 0x4c4   : > { %10428 = vrot.lane.b32.xlu1 %v8450_v23, %s17282_s28  ;;  %v8452_v38 = vpop.f32.mrb[75].mxu0  ;;  %v16708_v23 = vld [vmem:[%s18434_s17 + $0x704] ss:$8 sps:$4 sm:$0xff]  }
 0x4c6   : > { %8662 = vmatmul.mubr.bf16.gmra.mrb[180].mxu0 %v16695_v63 }
 0x4c7   : > { %8669 = vmatprep.mubr.bf16.mxu0 %v16700_v39 }
 0x4c9   : > { %v8455_v44 = vpop.f32.mrb[76].mxu0 }
 0x4ca   : > { %10430 = vrot.lane.b32.xlu0 %v8455_v44, %s17282_s28  ;;  %v8457_v37 = vpop.f32.mrb[77].mxu0 }
 0x4cb   : > { %v8458_v31 = vpop.f32.mrb[78].mxu0  ;;  %v16706_v37 = vld [vmem:[%s18434_s17 + $0x700] ss:$8 sps:$4 sm:$0xff]  }
 0x4cc   : > { %10432 = vrot.lane.b32.xlu1 %v8458_v31, %s17282_s28  ;;  %v8460_v51 = vpop.f32.mrb[79].mxu0  ;;  %v16711_v31 = vld [vmem:[%s18434_s17 + $0x714] ss:$8 sps:$4 sm:$0xff]  }
 0x4ce   : > { %8670 = vmatmul.mubr.bf16.gmra.mrb[184].mxu0 %v16698_v57 }
 0x4cf   : > { %8677 = vmatprep.mubr.bf16.mxu0 %v16704_v30 }
 0x4d1   : > { %v8463_v9 = vpop.f32.mrb[80].mxu0 }
 0x4d2   : > { %10434 = vrot.lane.b32.xlu0 %v8463_v9, %s17282_s28  ;;  %v8465_v49 = vpop.f32.mrb[81].mxu0 }
 0x4d3   : > { %v8466_v63 = vpop.f32.mrb[82].mxu0 }
 0x4d4   : > { %10436 = vrot.lane.b32.xlu1 %v8466_v63, %s17282_s28  ;;  %v8468_v39 = vpop.f32.mrb[83].mxu0  ;;  %v16709_v63 = vld [vmem:[%s18434_s17 + $0x710] ss:$8 sps:$4 sm:$0xff]  }
 0x4d5   : > { %v16717_v39 = vld [vmem:[%s18434_s17 + $0x724] ss:$8 sps:$4 sm:$0xff]  }
 0x4d6   : > { %8678 = vmatmul.mubr.bf16.gmra.mrb[188].mxu0 %v16702_v40 }
 0x4d7   : > { %8685 = vmatprep.mubr.bf16.mxu0 %v16708_v23 }
 0x4d9   : > { %v8471_v38 = vpop.f32.mrb[84].mxu0 }
 0x4da   : > { %10438 = vrot.lane.b32.xlu0 %v8471_v38, %s17282_s28  ;;  %v8473_v44 = vpop.f32.mrb[85].mxu0 }
 0x4db   : > { %v8474_v57 = vpop.f32.mrb[86].mxu0 }
 0x4dc   : > { %10440 = vrot.lane.b32.xlu1 %v8474_v57, %s17282_s28  ;;  %v8476_v30 = vpop.f32.mrb[87].mxu0 }
 0x4dd   : > { %v16715_v30 = vld [vmem:[%s18434_s17 + $0x720] ss:$8 sps:$4 sm:$0xff]  }
 0x4de   : > { %8686 = vmatmul.mubr.bf16.gmra.mrb[192].mxu0 %v16706_v37  ;;  %v11763_v51 = vpop.permute.xlu0 %11762 }
 0x4df   : > { %8693 = vmatprep.mubr.bf16.mxu0 %v16711_v31  ;;  %11858 = vst.msk [vmem:[#allocation2 + $0x18] sm:$0xff] %vm10321_vm3, %v11763_v51 }
 0x4e1   : > { %v8479_v9 = vpop.f32.mrb[88].mxu0  ;;  %v11765_v49 = vpop.permute.xlu1 %11764 }
 0x4e2   : > { %10442 = vrot.lane.b32.xlu0 %v8479_v9, %s17282_s28  ;;  %v8481_v40 = vpop.f32.mrb[89].mxu0  ;;  %11859 = vst.msk [vmem:[#allocation2 + $0x38] sm:$0xff] %vm10321_vm3, %v11765_v49  ;;  %v16720_v9 = vld [vmem:[%s18434_s17 + $0x734] ss:$8 sps:$4 sm:$0xff]  }
 0x4e3   : > { %v8482_v23 = vpop.f32.mrb[90].mxu0 }
 0x4e4   : > { %10444 = vrot.lane.b32.xlu1 %v8482_v23, %s17282_s28  ;;  %v8484_v38 = vpop.f32.mrb[91].mxu0 }
 0x4e5   : > { %v16718_v38 = vld [vmem:[%s18434_s17 + $0x730] ss:$8 sps:$4 sm:$0xff]  }
 0x4e6   : > { %8694 = vmatmul.mubr.bf16.gmra.mrb[196].mxu0 %v16709_v63  ;;  %v11767_v44 = vpop.permute.xlu0 %11766 }
 0x4e7   : > { %8701 = vmatprep.mubr.bf16.mxu0 %v16717_v39  ;;  %11860 = vst.msk [vmem:[#allocation2 + $0x58] sm:$0xff] %vm10321_vm3, %v11767_v44 }
 0x4e9   : > { %v8487_v37 = vpop.f32.mrb[92].mxu0  ;;  %v11769_v57 = vpop.permute.xlu1 %11768 }
 0x4ea   : > { %10446 = vrot.lane.b32.xlu0 %v8487_v37, %s17282_s28  ;;  %v8489_v31 = vpop.f32.mrb[93].mxu0  ;;  %11861 = vst.msk [vmem:[#allocation2 + $0x78] sm:$0xff] %vm10321_vm3, %v11769_v57  ;;  %v16723_v37 = vld [vmem:[%s18434_s17 + $0x744] ss:$8 sps:$4 sm:$0xff]  }
 0x4eb   : > { %v8490_v51 = vpop.f32.mrb[94].mxu0 }
 0x4ec   : > { %10448 = vrot.lane.b32.xlu1 %v8490_v51, %s17282_s28  ;;  %v8492_v49 = vpop.f32.mrb[95].mxu0 }
 0x4ed   : > { %v16721_v49 = vld [vmem:[%s18434_s17 + $0x740] ss:$8 sps:$4 sm:$0xff]  }
 0x4ee   : > { %8702 = vmatmul.mubr.bf16.gmra.mrb[200].mxu0 %v16715_v30  ;;  %v11771_v40 = vpop.permute.xlu0 %11770 }
 0x4ef   : > { %8709 = vmatprep.mubr.bf16.mxu0 %v16720_v9  ;;  %11862 = vst.msk [vmem:[#allocation2 + $0x98] sm:$0xff] %vm10321_vm3, %v11771_v40 }
 0x4f1   : > { %v8495_v63 = vpop.f32.mrb[96].mxu0  ;;  %v11773_v23 = vpop.permute.xlu1 %11772 }
 0x4f2   : > { %10450 = vrot.lane.b32.xlu0 %v8495_v63, %s17282_s28  ;;  %v8497_v39 = vpop.f32.mrb[97].mxu0  ;;  %11863 = vst.msk [vmem:[#allocation2 + $0xb8] sm:$0xff] %vm10321_vm3, %v11773_v23  ;;  %v16726_v63 = vld [vmem:[%s18434_s17 + $0x754] ss:$8 sps:$4 sm:$0xff]  }
 0x4f3   : > { %v8498_v44 = vpop.f32.mrb[98].mxu0 }
 0x4f4   : > { %10452 = vrot.lane.b32.xlu1 %v8498_v44, %s17282_s28  ;;  %v8500_v57 = vpop.f32.mrb[99].mxu0 }
 0x4f6   : > { %8710 = vmatmul.mubr.bf16.gmra.mrb[204].mxu0 %v16718_v38  ;;  %v11775_v31 = vpop.permute.xlu0 %11774 }
 0x4f7   : > { %8717 = vmatprep.mubr.bf16.mxu0 %v16723_v37  ;;  %11864 = vst.msk [vmem:[#allocation2 + $0xd8] sm:$0xff] %vm10321_vm3, %v11775_v31  ;;  %v16777_v37 = vld [vmem:[%s21455_s3 + $0x58] sm:$0xff]  }
 0x4f8   : > { %v16724_v31 = vld [vmem:[%s18434_s17 + $0x750] ss:$8 sps:$4 sm:$0xff]   ;;  %15787 = vmatprep.subr.bf16.mxu1 %v16777_v37  ;;  %v16735_v37 = vld [vmem:[%s18434_s17 + $0x774] ss:$8 sps:$4 sm:$0xff]  }
 0x4f9   : > { %v8503_v30 = vpop.f32.mrb[100].mxu0  ;;  %v11777_v51 = vpop.permute.xlu1 %11776 }
 0x4fa   : > { %10454 = vrot.lane.b32.xlu0 %v8503_v30, %s17282_s28  ;;  %v8505_v9 = vpop.f32.mrb[101].mxu0  ;;  %11865 = vst.msk [vmem:[#allocation2 + $0xf8] sm:$0xff] %vm10321_vm3, %v11777_v51  ;;  %v16732_v51 = vld [vmem:[%s18434_s17 + $0x764] ss:$8 sps:$4 sm:$0xff]  }
 0x4fb   : > { %v8506_v40 = vpop.f32.mrb[102].mxu0  ;;  %v16778_v9 = vld [vmem:[%s21455_s3 + $0x18] sm:$0xff]  }
 0x4fc   : > { %10456 = vrot.lane.b32.xlu1 %v8506_v40, %s17282_s28  ;;  %v8508_v23 = vpop.f32.mrb[103].mxu0  ;;  %15788 = vmatpush3.bf16.msra.mxu1 %v16778_v9 }
 0x4fe   : > { %8718 = vmatmul.mubr.bf16.gmra.mrb[208].mxu0 %v16721_v49  ;;  %v11779_v39 = vpop.permute.xlu0 %11778 }
 0x4ff   : > { %8725 = vmatprep.mubr.bf16.mxu0 %v16726_v63  ;;  %11866 = vst.msk [vmem:[#allocation2 + $0x118] sm:$0xff] %vm10321_vm3, %v11779_v39 }
 0x501   : > { %v8511_v38 = vpop.f32.mrb[104].mxu0  ;;  %v11781_v44 = vpop.permute.xlu1 %11780 }
 0x502   : > { %10458 = vrot.lane.b32.xlu0 %v8511_v38, %s17282_s28  ;;  %v8513_v57 = vpop.f32.mrb[105].mxu0  ;;  %11867 = vst.msk [vmem:[#allocation2 + $0x138] sm:$0xff] %vm10321_vm3, %v11781_v44  ;;  %v16730_v38 = vld [vmem:[%s18434_s17 + $0x760] ss:$8 sps:$4 sm:$0xff]  }
 0x503   : > { %v8514_v30 = vpop.f32.mrb[106].mxu0 }
 0x504   : > { %10460 = vrot.lane.b32.xlu1 %v8514_v30, %s17282_s28  ;;  %v8516_v49 = vpop.f32.mrb[107].mxu0 }
 0x505   : > { %v11783_v40 = vpop.permute.xlu0 %11782  ;;  %v16738_v49 = vld [vmem:[%s18434_s17 + $0x784] ss:$8 sps:$4 sm:$0xff]  }
 0x506   : > { %8726 = vmatmul.mubr.bf16.gmra.mrb[212].mxu0 %v16724_v31  ;;  %11868 = vst.msk [vmem:[#allocation2 + $0x158] sm:$0xff] %vm10321_vm3, %v11783_v40 }
 0x507   : > { %8733 = vmatprep.mubr.bf16.mxu0 %v16732_v51  ;;  %v16733_v51 = vld [vmem:[%s18434_s17 + $0x770] ss:$8 sps:$4 sm:$0xff]  }
 0x508   : > { %v11785_v63 = vpop.permute.xlu1 %11784 }
 0x509   : > { %v8519_v23 = vpop.f32.mrb[108].mxu0  ;;  %11869 = vst.msk [vmem:[#allocation2 + $0x178] sm:$0xff] %vm10321_vm3, %v11785_v63 }
 0x50a   : > { %10462 = vrot.lane.b32.xlu0 %v8519_v23, %s17282_s28  ;;  %v8521_v39 = vpop.f32.mrb[109].mxu0 }
 0x50b   : > { %v8522_v44 = vpop.f32.mrb[110].mxu0  ;;  %v16736_v39 = vld [vmem:[%s18434_s17 + $0x780] ss:$8 sps:$4 sm:$0xff]  }
 0x50c   : > { %10464 = vrot.lane.b32.xlu1 %v8522_v44, %s17282_s28  ;;  %v8524_v57 = vpop.f32.mrb[111].mxu0  ;;  %v16741_v44 = vld [vmem:[%s18434_s17 + $0x794] ss:$8 sps:$4 sm:$0xff]  }
 0x50e   : > { %8734 = vmatmul.mubr.bf16.gmra.mrb[216].mxu0 %v16730_v38 }
 0x50f   : > { %8741 = vmatprep.mubr.bf16.mxu0 %v16735_v37 }
 0x511   : > { %v8527_v31 = vpop.f32.mrb[112].mxu0 }
 0x512   : > { %10466 = vrot.lane.b32.xlu0 %v8527_v31, %s17282_s28  ;;  %v8529_v30 = vpop.f32.mrb[113].mxu0 }
 0x513   : > { %v8530_v9 = vpop.f32.mrb[114].mxu0  ;;  %v16739_v30 = vld [vmem:[%s18434_s17 + $0x790] ss:$8 sps:$4 sm:$0xff]  }
 0x514   : > { %10468 = vrot.lane.b32.xlu1 %v8530_v9, %s17282_s28  ;;  %v8532_v40 = vpop.f32.mrb[115].mxu0  ;;  %v16746_v9 = vld [vmem:[%s18434_s17 + $0x7a4] ss:$8 sps:$4 sm:$0xff]  }
 0x516   : > { %8742 = vmatmul.mubr.bf16.gmra.mrb[220].mxu0 %v16733_v51 }
 0x517   : > { %8749 = vmatprep.mubr.bf16.mxu0 %v16738_v49 }
 0x519   : > { %v8535_v63 = vpop.f32.mrb[116].mxu0 }
 0x51a   : > { %10470 = vrot.lane.b32.xlu0 %v8535_v63, %s17282_s28  ;;  %v8537_v23 = vpop.f32.mrb[117].mxu0 }
 0x51b   : > { %v8538_v38 = vpop.f32.mrb[118].mxu0 }
 0x51c   : > { %10472 = vrot.lane.b32.xlu1 %v8538_v38, %s17282_s28  ;;  %v8540_v37 = vpop.f32.mrb[119].mxu0  ;;  %v16744_v38 = vld [vmem:[%s18434_s17 + $0x7a0] ss:$8 sps:$4 sm:$0xff]  }
 0x51d   : > { %v16749_v37 = vld [vmem:[%s18434_s17 + $0x7b4] ss:$8 sps:$4 sm:$0xff]  }
 0x51e   : > { %8750 = vmatmul.mubr.bf16.gmra.mrb[224].mxu0 %v16736_v39 }
 0x51f   : > { %8757 = vmatprep.mubr.bf16.mxu0 %v16741_v44 }
 0x521   : > { %v8543_v57 = vpop.f32.mrb[120].mxu0 }
 0x522   : > { %10474 = vrot.lane.b32.xlu0 %v8543_v57, %s17282_s28  ;;  %v8545_v31 = vpop.f32.mrb[121].mxu0 }
 0x523   : > { %v8546_v51 = vpop.f32.mrb[122].mxu0 }
 0x524   : > { %v10419_v49 = vpop.permute.xlu0 %10418  ;;  %10476 = vrot.lane.b32.xlu1 %v8546_v51, %s17282_s28  ;;  %v8548_v40 = vpop.f32.mrb[123].mxu0 }
 0x525   : > { %10514 = vst.msk [vmem:[#allocation2 + $0x8] sm:$0xff] %vm9999_vm1, %v10419_v49  ;;  %v16747_v49 = vld [vmem:[%s18434_s17 + $0x7b0] ss:$8 sps:$4 sm:$0xff]  }
 0x526   : > { %8758 = vmatmul.mubr.bf16.gmra.mrb[228].mxu0 %v16739_v30 }
 0x527   : > { %8765 = vmatprep.mubr.bf16.mxu0 %v16746_v9 }
 0x528   : > { %v10421_v63 = vpop.permute.xlu0 %10420 }
 0x529   : > { %10515 = vst.msk [vmem:[#allocation2 + $0x28] sm:$0xff] %vm9999_vm1, %v10421_v63  ;;  %v8551_v23 = vpop.f32.mrb[124].mxu0  ;;  %v16752_v63 = vld [vmem:[%s18434_s17 + $0x7c4] ss:$8 sps:$4 sm:$0xff]  }
 0x52a   : > { %10478 = vrot.lane.b32.xlu0 %v8551_v23, %s17282_s28  ;;  %v8553_v39 = vpop.f32.mrb[125].mxu0 }
 0x52b   : > { %v8554_v44 = vpop.f32.mrb[126].mxu0 }
 0x52c   : > { %v10423_v57 = vpop.permute.xlu0 %10422  ;;  %10480 = vrot.lane.b32.xlu1 %v8554_v44, %s17282_s28  ;;  %v8556_v31 = vpop.f32.mrb[127].mxu0 }
 0x52d   : > { %10516 = vst.msk [vmem:[#allocation2 + $0x48] sm:$0xff] %vm9999_vm1, %v10423_v57  ;;  %v16750_v57 = vld [vmem:[%s18434_s17 + $0x7c0] ss:$8 sps:$4 sm:$0xff]  }
 0x52e   : > { %8766 = vmatmul.mubr.bf16.gmra.mrb[232].mxu0 %v16744_v38  ;;  %v10425_v30 = vpop.permute.xlu1 %10424 }
 0x52f   : > { %10517 = vst.msk [vmem:[#allocation2 + $0x68] sm:$0xff] %vm9999_vm1, %v10425_v30  ;;  %8773 = vmatprep.mubr.bf16.mxu0 %v16749_v37  ;;  %v16755_v30 = vld [vmem:[%s18434_s17 + $0x7d4] ss:$8 sps:$4 sm:$0xff]  }
 0x531   : > { %v8559_v51 = vpop.f32.mrb[128].mxu0 }
 0x532   : > { %10578 = vrot.lane.b32.xlu0 %v8559_v51, %s17283_s29  ;;  %v8561_v9 = vpop.f32.mrb[129].mxu0 }
 0x533   : > { %v8562_v40 = vpop.f32.mrb[130].mxu0 }
 0x534   : > { %v10427_v23 = vpop.permute.xlu0 %10426  ;;  %10580 = vrot.lane.b32.xlu1 %v8562_v40, %s17283_s29  ;;  %v8564_v39 = vpop.f32.mrb[131].mxu0 }
 0x535   : > { %10518 = vst.msk [vmem:[#allocation2 + $0x88] sm:$0xff] %vm9999_vm1, %v10427_v23 }
 0x536   : > { %8774 = vmatmul.mubr.bf16.gmra.mrb[236].mxu0 %v16747_v49  ;;  %v10429_v38 = vpop.permute.xlu1 %10428 }
 0x537   : > { %10519 = vst.msk [vmem:[#allocation2 + $0xa8] sm:$0xff] %vm9999_vm1, %v10429_v38  ;;  %8781 = vmatprep.mubr.bf16.mxu0 %v16752_v63 }
 0x538   : > { %v19517_v49 = vpop.f32.mrb[52].mxu1 }
 0x539   : > { %v8567_v44 = vpop.f32.mrb[132].mxu0  ;;  %v9761_v63 = vpop.f32.mrb[53].mxu1 }
 0x53a   : > { %10582 = vrot.lane.b32.xlu0 %v8567_v44, %s17283_s29  ;;  %v8569_v37 = vpop.f32.mrb[133].mxu0  ;;  %v19520_v23 = vpop.f32.mrb[54].mxu1 }
 0x53b   : > { %v8570_v31 = vpop.f32.mrb[134].mxu0  ;;  %v9764_v39 = vpop.f32.mrb[55].mxu1  ;;  %v16753_v37 = vld [vmem:[%s18434_s17 + $0x7d0] ss:$8 sps:$4 sm:$0xff]  }
 0x53c   : > { %v10431_v51 = vpop.permute.xlu0 %10430  ;;  %10584 = vrot.lane.b32.xlu1 %v8570_v31, %s17283_s29  ;;  %v8572_v9 = vpop.f32.mrb[135].mxu0  ;;  %v16756_v39 = vld [vmem:[%s18434_s17 + $0x7e0] ss:$8 sps:$4 sm:$0xff]  }
 0x53d   : > { %10520 = vst.msk [vmem:[#allocation2 + $0xc8] sm:$0xff] %vm9999_vm1, %v10431_v51  ;;  %v16758_v51 = vld [vmem:[%s18434_s17 + $0x7e4] ss:$8 sps:$4 sm:$0xff]  }
 0x53e   : > { %8782 = vmatmul.mubr.bf16.gmra.mrb[240].mxu0 %v16750_v57  ;;  %v10433_v40 = vpop.permute.xlu1 %10432 }
 0x53f   : > { %10521 = vst.msk [vmem:[#allocation2 + $0xe8] sm:$0xff] %vm9999_vm1, %v10433_v40  ;;  %8789 = vmatprep.mubr.bf16.mxu0 %v16755_v30 }
 0x541   : > { %v8575_v38 = vpop.f32.mrb[136].mxu0 }
 0x542   : > { %10586 = vrot.lane.b32.xlu0 %v8575_v38, %s17283_s29  ;;  %v8577_v44 = vpop.f32.mrb[137].mxu0 }
 0x543   : > { %v8578_v31 = vpop.f32.mrb[138].mxu0  ;;  %v16761_v44 = vld [vmem:[%s18434_s17 + $0x7f4] ss:$8 sps:$4 sm:$0xff]  }
 0x544   : > { %v10435_v9 = vpop.permute.xlu0 %10434  ;;  %10588 = vrot.lane.b32.xlu1 %v8578_v31, %s17283_s29  ;;  %v8580_v57 = vpop.f32.mrb[139].mxu0 }
 0x545   : > { %10522 = vst.msk [vmem:[#allocation2 + $0x108] sm:$0xff] %vm9999_vm1, %v10435_v9  ;;  %v16759_v57 = vld [vmem:[%s18434_s17 + $0x7f0] ss:$8 sps:$4 sm:$0xff]  }
 0x546   : > { %8790 = vmatmul.mubr.bf16.gmra.mrb[244].mxu0 %v16753_v37  ;;  %v10437_v30 = vpop.permute.xlu1 %10436 }
 0x547   : > { %10523 = vst.msk [vmem:[#allocation2 + $0x128] sm:$0xff] %vm9999_vm1, %v10437_v30  ;;  %8797 = vmatprep.mubr.bf16.mxu0 %v16758_v51 }
 0x549   : > { %v8583_v40 = vpop.f32.mrb[140].mxu0 }
 0x54a   : > { %10590 = vrot.lane.b32.xlu0 %v8583_v40, %s17283_s29  ;;  %v8585_v63 = vpop.f32.mrb[141].mxu0  ;;  %v16764_v40 = vld [vmem:[%s18434_s17 + $0x804] ss:$8 sps:$4 sm:$0xff]  }
 0x54b   : > { %v8586_v38 = vpop.f32.mrb[142].mxu0 }
 0x54c   : > { %v10439_v59 = vpop.permute.xlu0 %10438  ;;  %10592 = vrot.lane.b32.xlu1 %v8586_v38, %s17283_s29  ;;  %v8588_v31 = vpop.f32.mrb[143].mxu0 }
 0x54d   : > { %10524 = vst.msk [vmem:[#allocation2 + $0x148] sm:$0xff] %vm9999_vm1, %v10439_v59  ;;  %v16813_v31 = vld [vmem:[%s21455_s3 + $0x20] sm:$0xff]  }
 0x54e   : > { %8798 = vmatmul.mubr.bf16.gmra.mrb[248].mxu0 %v16756_v39  ;;  %v10441_v37 = vpop.permute.xlu1 %10440 }
 0x54f   : > { %10525 = vst.msk [vmem:[#allocation2 + $0x168] sm:$0xff] %vm9999_vm1, %v10441_v37  ;;  %8805 = vmatprep.mubr.bf16.mxu0 %v16761_v44  ;;  %v16812_v44 = vld [vmem:[%s21455_s3 + $0x60] sm:$0xff]  }
 0x550   : > { %15789 = vmatprep.subr.bf16.mxu1 %v16812_v44 }
 0x551   : > { %v8591_v51 = vpop.f32.mrb[144].mxu0  ;;  %15790 = vmatpush3.bf16.msra.mxu1 %v16813_v31 }
 0x552   : > { %10594 = vrot.lane.b32.xlu0 %v8591_v51, %s17283_s29  ;;  %v8593_v9 = vpop.f32.mrb[145].mxu0  ;;  %v16762_v51 = vld [vmem:[%s18434_s17 + $0x800] ss:$8 sps:$4 sm:$0xff]  }
 0x553   : > { %v8594_v30 = vpop.f32.mrb[146].mxu0 }
 0x554   : > { %v10443_v63 = vpop.permute.xlu0 %10442  ;;  %10596 = vrot.lane.b32.xlu1 %v8594_v30, %s17283_s29  ;;  %v8596_v38 = vpop.f32.mrb[147].mxu0  ;;  %v16767_v30 = vld [vmem:[%s18434_s17 + $0x814] ss:$8 sps:$4 sm:$0xff]  }
 0x555   : > { %10526 = vst.msk [vmem:[#allocation2 + $0x188] sm:$0xff] %vm9999_vm1, %v10443_v63 }
 0x556   : > { %8806 = vmatmul.mubr.bf16.gmra.mrb[252].mxu0 %v16759_v57  ;;  %v10445_v59 = vpop.permute.xlu1 %10444 }
 0x557   : > { %10527 = vst.msk [vmem:[#allocation2 + $0x1a8] sm:$0xff] %vm9999_vm1, %v10445_v59  ;;  %8813 = vmatprep.mubr.bf16.mxu0 %v16764_v40 }
 0x558   : > { %v19551_v63 = vpop.f32.mrb[56].mxu1 }
 0x559   : > { %v8599_v39 = vpop.f32.mrb[148].mxu0  ;;  %v9769_v59 = vpop.f32.mrb[57].mxu1 }
 0x55a   : > { %10598 = vrot.lane.b32.xlu0 %v8599_v39, %s17283_s29  ;;  %v8601_v37 = vpop.f32.mrb[149].mxu0  ;;  %v19554_v39 = vpop.f32.mrb[58].mxu1 }
 0x55b   : > { %v8602_v9 = vpop.f32.mrb[150].mxu0  ;;  %v9772_v44 = vpop.f32.mrb[59].mxu1 }
 0x55c   : > { %v10447_v57 = vpop.permute.xlu0 %10446  ;;  %10600 = vrot.lane.b32.xlu1 %v8602_v9, %s17283_s29  ;;  %v8604_v40 = vpop.f32.mrb[151].mxu0  ;;  %v16768_v44 = vld [vmem:[%s18434_s17 + $0x820] ss:$8 sps:$4 sm:$0xff]  }
 0x55d   : > { %10528 = vst.msk [vmem:[#allocation2 + $0x1c8] sm:$0xff] %vm9999_vm1, %v10447_v57  ;;  %v16765_v40 = vld [vmem:[%s18434_s17 + $0x810] ss:$8 sps:$4 sm:$0xff]   ;;  %v16770_v57 = vld [vmem:[%s18434_s17 + $0x824] ss:$8 sps:$4 sm:$0xff]  }
 0x55e   : > { %8814 = vmatmul.mubr.bf16.gmra.mrb[0].mxu0 %v16762_v51  ;;  %v10449_v38 = vpop.permute.xlu1 %10448 }
 0x55f   : > { %10529 = vst.msk [vmem:[#allocation2 + $0x1e8] sm:$0xff] %vm9999_vm1, %v10449_v38  ;;  %8821 = vmatprep.mubr.bf16.mxu0 %v16767_v30 }
 0x561   : > { %v8607_v37 = vpop.f32.mrb[152].mxu0 }
 0x562   : > { %10602 = vrot.lane.b32.xlu0 %v8607_v37, %s17283_s29  ;;  %v8609_v9 = vpop.f32.mrb[153].mxu0 }
 0x563   : > { %v8610_v31 = vpop.f32.mrb[154].mxu0  ;;  %v16773_v9 = vld [vmem:[%s18434_s17 + $0x834] ss:$8 sps:$4 sm:$0xff]  }
 0x564   : > { %v10451_v4 = vpop.permute.xlu0 %10450  ;;  %10604 = vrot.lane.b32.xlu1 %v8610_v31, %s17283_s29  ;;  %v8612_v51 = vpop.f32.mrb[155].mxu0 }
 0x565   : > { %10530 = vst.msk [vmem:[#allocation2 + $0x208] sm:$0xff] %vm9999_vm1, %v10451_v4  ;;  %v16771_v51 = vld [vmem:[%s18434_s17 + $0x830] ss:$8 sps:$4 sm:$0xff]  }
 0x566   : > { %8822 = vmatmul.mubr.bf16.gmra.mrb[4].mxu0 %v16765_v40  ;;  %v10453_v30 = vpop.permute.xlu1 %10452 }
 0x567   : > { %10531 = vst.msk [vmem:[#allocation2 + $0x228] sm:$0xff] %vm9999_vm1, %v10453_v30  ;;  %8829 = vmatprep.mubr.bf16.mxu0 %v16770_v57 }
 0x569   : > { %v8615_v38 = vpop.f32.mrb[156].mxu0 }
 0x56a   : > { %10606 = vrot.lane.b32.xlu0 %v8615_v38, %s17283_s29  ;;  %v8617_v59 = vpop.f32.mrb[157].mxu0  ;;  %v16776_v38 = vld [vmem:[%s18434_s17 + $0x844] ss:$8 sps:$4 sm:$0xff]  }
 0x56b   : > { %v8618_v37 = vpop.f32.mrb[158].mxu0  ;;  %v16828_v59 = vld [vmem:[%s18434_s17 + $0xf84] ss:$8 sps:$4 sm:$0xff]  }
 0x56c   : > { %v10455_v22 = vpop.permute.xlu0 %10454  ;;  %10608 = vrot.lane.b32.xlu1 %v8618_v37, %s17283_s29  ;;  %v8620_v31 = vpop.f32.mrb[159].mxu0  ;;  %9773 = vmatprep.mubr.bf16.mxu1 %v16828_v59 }
 0x56d   : > { %10532 = vst.msk [vmem:[#allocation2 + $0x248] sm:$0xff] %vm9999_vm1, %v10455_v22 }
 0x56e   : > { %8830 = vmatmul.mubr.bf16.gmra.mrb[8].mxu0 %v16768_v44  ;;  %v10457_v4 = vpop.permute.xlu1 %10456  ;;  %v16826_v44 = vld [vmem:[%s18434_s17 + $0xf80] ss:$8 sps:$4 sm:$0xff]  }
 0x56f   : > { %10533 = vst.msk [vmem:[#allocation2 + $0x268] sm:$0xff] %vm9999_vm1, %v10457_v4  ;;  %8837 = vmatprep.mubr.bf16.mxu0 %v16773_v9  ;;  %9774 = vmatmul.mubr.bf16.gmra.mrb[60].mxu1 %v16826_v44  ;;  %v16774_v4 = vld [vmem:[%s18434_s17 + $0x840] ss:$8 sps:$4 sm:$0xff]  }
 0x571   : > { %v8623_v40 = vpop.f32.mrb[160].mxu0 }
 0x572   : > { %10610 = vrot.lane.b32.xlu0 %v8623_v40, %s17283_s29  ;;  %v8625_v57 = vpop.f32.mrb[161].mxu0 }
 0x573   : > { %v8626_v30 = vpop.f32.mrb[162].mxu0  ;;  %v16781_v57 = vld [vmem:[%s18434_s17 + $0x854] ss:$8 sps:$4 sm:$0xff]  }
 0x574   : > { %v10459_v33 = vpop.permute.xlu0 %10458  ;;  %10612 = vrot.lane.b32.xlu1 %v8626_v30, %s17283_s29  ;;  %v8628_v22 = vpop.f32.mrb[163].mxu0  ;;  %v16834_v30 = vld [vmem:[%s18434_s17 + $0xf94] ss:$8 sps:$4 sm:$0xff]  }
 0x575   : > { %10534 = vst.msk [vmem:[#allocation2 + $0x288] sm:$0xff] %vm9999_vm1, %v10459_v33  ;;  %9781 = vmatprep.mubr.bf16.mxu1 %v16834_v30  ;;  %v16838_v30 = vld [vmem:[%s18434_s17 + $0xfa0] ss:$8 sps:$4 sm:$0xff]  }
 0x576   : > { %8838 = vmatmul.mubr.bf16.gmra.mrb[12].mxu0 %v16771_v51  ;;  %v10461_v37 = vpop.permute.xlu1 %10460  ;;  %v16832_v51 = vld [vmem:[%s18434_s17 + $0xf90] ss:$8 sps:$4 sm:$0xff]  }
 0x577   : > { %10535 = vst.msk [vmem:[#allocation2 + $0x2a8] sm:$0xff] %vm9999_vm1, %v10461_v37  ;;  %8845 = vmatprep.mubr.bf16.mxu0 %v16776_v38  ;;  %9782 = vmatmul.mubr.bf16.gmra.mrb[64].mxu1 %v16832_v51  ;;  %v16779_v37 = vld [vmem:[%s18434_s17 + $0x850] ss:$8 sps:$4 sm:$0xff]  }
 0x579   : > { %v8631_v9 = vpop.f32.mrb[164].mxu0 }
 0x57a   : > { %10614 = vrot.lane.b32.xlu0 %v8631_v9, %s17283_s29  ;;  %v8633_v31 = vpop.f32.mrb[165].mxu0 }
 0x57b   : > { %v8634_v40 = vpop.f32.mrb[166].mxu0  ;;  %v16784_v31 = vld [vmem:[%s18434_s17 + $0x864] ss:$8 sps:$4 sm:$0xff]  }
 0x57c   : > { %v10463_v22 = vpop.permute.xlu0 %10462  ;;  %10616 = vrot.lane.b32.xlu1 %v8634_v40, %s17283_s29  ;;  %v8636_v33 = vpop.f32.mrb[167].mxu0  ;;  %v16840_v40 = vld [vmem:[%s18434_s17 + $0xfa4] ss:$8 sps:$4 sm:$0xff]  }
 0x57d   : > { %10536 = vst.msk [vmem:[#allocation2 + $0x2c8] sm:$0xff] %vm9999_vm1, %v10463_v22  ;;  %9789 = vmatprep.mubr.bf16.mxu1 %v16840_v40  ;;  %v16844_v40 = vld [vmem:[%s18434_s17 + $0xfb0] ss:$8 sps:$4 sm:$0xff]  }
 0x57e   : > { %8846 = vmatmul.mubr.bf16.gmra.mrb[16].mxu0 %v16774_v4  ;;  %v10465_v38 = vpop.permute.xlu1 %10464 }
 0x57f   : > { %10537 = vst.msk [vmem:[#allocation2 + $0x2e8] sm:$0xff] %vm9999_vm1, %v10465_v38  ;;  %8853 = vmatprep.mubr.bf16.mxu0 %v16781_v57  ;;  %9790 = vmatmul.mubr.bf16.gmra.mrb[68].mxu1 %v16838_v30  ;;  %v16782_v38 = vld [vmem:[%s18434_s17 + $0x860] ss:$8 sps:$4 sm:$0xff]  }
 0x581   : > { %v8639_v59 = vpop.f32.mrb[168].mxu0 }
 0x582   : > { %10618 = vrot.lane.b32.xlu0 %v8639_v59, %s17283_s29  ;;  %v8641_v44 = vpop.f32.mrb[169].mxu0 }
 0x583   : > { %v8642_v9 = vpop.f32.mrb[170].mxu0  ;;  %v16787_v44 = vld [vmem:[%s18434_s17 + $0x874] ss:$8 sps:$4 sm:$0xff]  }
 0x584   : > { %v10467_v33 = vpop.permute.xlu0 %10466  ;;  %10620 = vrot.lane.b32.xlu1 %v8642_v9, %s17283_s29  ;;  %v8644_v4 = vpop.f32.mrb[171].mxu0  ;;  %v16846_v9 = vld [vmem:[%s18434_s17 + $0xfb4] ss:$8 sps:$4 sm:$0xff]  }
 0x585   : > { %10538 = vst.msk [vmem:[#allocation2 + $0x308] sm:$0xff] %vm9999_vm1, %v10467_v33  ;;  %9797 = vmatprep.mubr.bf16.mxu1 %v16846_v9  ;;  %v16850_v9 = vld [vmem:[%s18434_s17 + $0xfc0] ss:$8 sps:$4 sm:$0xff]  }
 0x586   : > { %8854 = vmatmul.mubr.bf16.gmra.mrb[20].mxu0 %v16779_v37  ;;  %v10469_v57 = vpop.permute.xlu1 %10468 }
 0x587   : > { %10539 = vst.msk [vmem:[#allocation2 + $0x328] sm:$0xff] %vm9999_vm1, %v10469_v57  ;;  %8861 = vmatprep.mubr.bf16.mxu0 %v16784_v31  ;;  %9798 = vmatmul.mubr.bf16.gmra.mrb[72].mxu1 %v16844_v40  ;;  %v16785_v57 = vld [vmem:[%s18434_s17 + $0x870] ss:$8 sps:$4 sm:$0xff]  }
 0x589   : > { %v8647_v22 = vpop.f32.mrb[172].mxu0 }
 0x58a   : > { %10622 = vrot.lane.b32.xlu0 %v8647_v22, %s17283_s29  ;;  %v8649_v51 = vpop.f32.mrb[173].mxu0 }
 0x58b   : > { %v8650_v59 = vpop.f32.mrb[174].mxu0  ;;  %v16790_v51 = vld [vmem:[%s18434_s17 + $0x884] ss:$8 sps:$4 sm:$0xff]  }
 0x58c   : > { %v10471_v4 = vpop.permute.xlu0 %10470  ;;  %10624 = vrot.lane.b32.xlu1 %v8650_v59, %s17283_s29  ;;  %v8652_v37 = vpop.f32.mrb[175].mxu0  ;;  %v16852_v59 = vld [vmem:[%s18434_s17 + $0xfc4] ss:$8 sps:$4 sm:$0xff]  }
 0x58d   : > { %10540 = vst.msk [vmem:[#allocation2 + $0x348] sm:$0xff] %vm9999_vm1, %v10471_v4  ;;  %9805 = vmatprep.mubr.bf16.mxu1 %v16852_v59  ;;  %v16856_v59 = vld [vmem:[%s18434_s17 + $0xfd0] ss:$8 sps:$4 sm:$0xff]  }
 0x58e   : > { %8862 = vmatmul.mubr.bf16.gmra.mrb[24].mxu0 %v16782_v38  ;;  %v10473_v31 = vpop.permute.xlu1 %10472 }
 0x58f   : > { %10541 = vst.msk [vmem:[#allocation2 + $0x368] sm:$0xff] %vm9999_vm1, %v10473_v31  ;;  %8869 = vmatprep.mubr.bf16.mxu0 %v16787_v44  ;;  %9806 = vmatmul.mubr.bf16.gmra.mrb[76].mxu1 %v16850_v9  ;;  %v16788_v31 = vld [vmem:[%s18434_s17 + $0x880] ss:$8 sps:$4 sm:$0xff]  }
 0x591   : > { %v8655_v33 = vpop.f32.mrb[176].mxu0 }
 0x592   : > { %10626 = vrot.lane.b32.xlu0 %v8655_v33, %s17283_s29  ;;  %v8657_v30 = vpop.f32.mrb[177].mxu0 }
 0x593   : > { %v8658_v22 = vpop.f32.mrb[178].mxu0  ;;  %v16793_v30 = vld [vmem:[%s18434_s17 + $0x894] ss:$8 sps:$4 sm:$0xff]  }
 0x594   : > { %v10475_v37 = vpop.permute.xlu0 %10474  ;;  %10628 = vrot.lane.b32.xlu1 %v8658_v22, %s17283_s29  ;;  %v8660_v38 = vpop.f32.mrb[179].mxu0  ;;  %v16858_v22 = vld [vmem:[%s18434_s17 + $0xfd4] ss:$8 sps:$4 sm:$0xff]  }
 0x595   : > { %10542 = vst.msk [vmem:[#allocation2 + $0x388] sm:$0xff] %vm9999_vm1, %v10475_v37  ;;  %9813 = vmatprep.mubr.bf16.mxu1 %v16858_v22 }
 0x596   : > { %8870 = vmatmul.mubr.bf16.gmra.mrb[28].mxu0 %v16785_v57  ;;  %v10477_v44 = vpop.permute.xlu1 %10476 }
 0x597   : > { %10543 = vst.msk [vmem:[#allocation2 + $0x3a8] sm:$0xff] %vm9999_vm1, %v10477_v44  ;;  %8877 = vmatprep.mubr.bf16.mxu0 %v16790_v51  ;;  %9814 = vmatmul.mubr.bf16.gmra.mrb[80].mxu1 %v16856_v59  ;;  %v16791_v44 = vld [vmem:[%s18434_s17 + $0x890] ss:$8 sps:$4 sm:$0xff]  }
 0x599   : > { %v8663_v4 = vpop.f32.mrb[180].mxu0 }
 0x59a   : > { %10630 = vrot.lane.b32.xlu0 %v8663_v4, %s17283_s29  ;;  %v8665_v40 = vpop.f32.mrb[181].mxu0 }
 0x59b   : > { %v8666_v33 = vpop.f32.mrb[182].mxu0  ;;  %v16796_v40 = vld [vmem:[%s18434_s17 + $0x8a4] ss:$8 sps:$4 sm:$0xff]  }
 0x59c   : > { %v10479_v38 = vpop.permute.xlu0 %10478  ;;  %10632 = vrot.lane.b32.xlu1 %v8666_v33, %s17283_s29  ;;  %v8668_v57 = vpop.f32.mrb[183].mxu0  ;;  %v16864_v33 = vld [vmem:[%s18434_s17 + $0xfe4] ss:$8 sps:$4 sm:$0xff]  }
 0x59d   : > { %10544 = vst.msk [vmem:[#allocation2 + $0x3c8] sm:$0xff] %vm9999_vm1, %v10479_v38  ;;  %v16862_v38 = vld [vmem:[%s18434_s17 + $0xfe0] ss:$8 sps:$4 sm:$0xff]   ;;  %9821 = vmatprep.mubr.bf16.mxu1 %v16864_v33  ;;  %v16872_v33 = vld [vmem:[%s18434_s17 + $0xff4] ss:$8 sps:$4 sm:$0xff]  }
 0x59e   : > { %8878 = vmatmul.mubr.bf16.gmra.mrb[32].mxu0 %v16788_v31  ;;  %v10481_v51 = vpop.permute.xlu1 %10480 }
 0x59f   : > { %10545 = vst.msk [vmem:[#allocation2 + $0x3e8] sm:$0xff] %vm9999_vm1, %v10481_v51  ;;  %8885 = vmatprep.mubr.bf16.mxu0 %v16793_v30  ;;  %9822 = vmatmul.mubr.bf16.gmra.mrb[84].mxu1 %v16862_v38  ;;  %v16865_v30 = vld [vmem:[%s21455_s3 + $0x68] sm:$0xff]   ;;  %v16873_v38 = vld [vmem:[%s21455_s3 + $0x70] sm:$0xff]  }
 0x5a0   : > { %v16866_v51 = vld [vmem:[%s21455_s3 + $0x28] sm:$0xff]   ;;  %15791 = vmatprep.subr.bf16.mxu1 %v16865_v30  ;;  %9829 = vmatprep.mubr.bf16.mxu1 %v16872_v33 }
 0x5a1   : > { %v8671_v37 = vpop.f32.mrb[184].mxu0  ;;  %15792 = vmatpush3.bf16.msra.mxu1 %v16866_v51 }
 0x5a2   : > { %10634 = vrot.lane.b32.xlu0 %v8671_v37, %s17283_s29  ;;  %v8673_v9 = vpop.f32.mrb[185].mxu0  ;;  %15793 = vmatprep.subr.bf16.mxu1 %v16873_v38 }
 0x5a3   : > { %v8674_v4 = vpop.f32.mrb[186].mxu0  ;;  %v16794_v9 = vld [vmem:[%s18434_s17 + $0x8a0] ss:$8 sps:$4 sm:$0xff]  }
 0x5a4   : > { %v10579_v57 = vpop.permute.xlu0 %10578  ;;  %10636 = vrot.lane.b32.xlu1 %v8674_v4, %s17283_s29  ;;  %v8676_v22 = vpop.f32.mrb[187].mxu0  ;;  %v16799_v4 = vld [vmem:[%s18434_s17 + $0x8b4] ss:$8 sps:$4 sm:$0xff]  }
 0x5a5   : > { %10674 = vst.msk [vmem:[#allocation2 + $0x8] sm:$0xff] %vm10160_vm2, %v10579_v57  ;;  %v16870_v22 = vld [vmem:[%s18434_s17 + $0xff0] ss:$8 sps:$4 sm:$0xff]  }
 0x5a6   : > { %8886 = vmatmul.mubr.bf16.gmra.mrb[36].mxu0 %v16791_v44  ;;  %v10581_v31 = vpop.permute.xlu1 %10580 }
 0x5a7   : > { %10675 = vst.msk [vmem:[#allocation2 + $0x28] sm:$0xff] %vm10160_vm2, %v10581_v31  ;;  %8893 = vmatprep.mubr.bf16.mxu0 %v16796_v40  ;;  %v16874_v31 = vld [vmem:[%s21455_s3 + $0x30] sm:$0xff]   ;;  %9830 = vmatmul.mubr.bf16.gmra.mrb[88].mxu1 %v16870_v22 }
 0x5a8   : > { %15794 = vmatpush3.bf16.msra.mxu1 %v16874_v31 }
 0x5a9   : > { %v8679_v59 = vpop.f32.mrb[188].mxu0 }
 0x5aa   : > { %10638 = vrot.lane.b32.xlu0 %v8679_v59, %s17283_s29  ;;  %v8681_v37 = vpop.f32.mrb[189].mxu0  ;;  %v16875_v59 = vld [vmem:[%s21455_s3 + $0x78] sm:$0xff]  }
 0x5ab   : > { %v8682_v44 = vpop.f32.mrb[190].mxu0  ;;  %v16876_v37 = vld [vmem:[%s21455_s3 + $0x38] sm:$0xff]   ;;  %15795 = vmatprep.subr.bf16.mxu1 %v16875_v59 }
 0x5ac   : > { %v10583_v57 = vpop.permute.xlu0 %10582  ;;  %10640 = vrot.lane.b32.xlu1 %v8682_v44, %s17283_s29  ;;  %v8684_v40 = vpop.f32.mrb[191].mxu0  ;;  %15796 = vmatpush3.bf16.msra.mxu1 %v16876_v37 }
 0x5ad   : > { %10676 = vst.msk [vmem:[#allocation2 + $0x48] sm:$0xff] %vm10160_vm2, %v10583_v57  ;;  %v16802_v57 = vld [vmem:[%s18434_s17 + $0x8c4] ss:$8 sps:$4 sm:$0xff]  }
 0x5ae   : > { %8894 = vmatmul.mubr.bf16.gmra.mrb[40].mxu0 %v16794_v9  ;;  %v10585_v30 = vpop.permute.xlu1 %10584  ;;  %v16797_v9 = vld [vmem:[%s18434_s17 + $0x8b0] ss:$8 sps:$4 sm:$0xff]  }
 0x5af   : > { %10677 = vst.msk [vmem:[#allocation2 + $0x68] sm:$0xff] %vm10160_vm2, %v10585_v30  ;;  %8901 = vmatprep.mubr.bf16.mxu0 %v16799_v4  ;;  %v16800_v30 = vld [vmem:[%s18434_s17 + $0x8c0] ss:$8 sps:$4 sm:$0xff]  }
 0x5b1   : > { %v8687_v51 = vpop.f32.mrb[192].mxu0 }
 0x5b2   : > { %10738 = vrot.lane.b32.xlu0 %v8687_v51, %s17281_s27  ;;  %v8689_v44 = vpop.f32.mrb[193].mxu0  ;;  %v16805_v51 = vld [vmem:[%s18434_s17 + $0x8d4] ss:$8 sps:$4 sm:$0xff]  }
 0x5b3   : > { %v8690_v33 = vpop.f32.mrb[194].mxu0 }
 0x5b4   : > { %v10587_v4 = vpop.permute.xlu0 %10586  ;;  %10740 = vrot.lane.b32.xlu1 %v8690_v33, %s17281_s27  ;;  %v8692_v40 = vpop.f32.mrb[195].mxu0  ;;  %v16803_v33 = vld [vmem:[%s18434_s17 + $0x8d0] ss:$8 sps:$4 sm:$0xff]  }
 0x5b5   : > { %10678 = vst.msk [vmem:[#allocation2 + $0x88] sm:$0xff] %vm10160_vm2, %v10587_v4  ;;  %v16808_v4 = vld [vmem:[%s18434_s17 + $0x8e4] ss:$8 sps:$4 sm:$0xff]  }
 0x5b6   : > { %8902 = vmatmul.mubr.bf16.gmra.mrb[44].mxu0 %v16797_v9  ;;  %v10589_v22 = vpop.permute.xlu1 %10588  ;;  %11626 = vrot.lane.b32.xlu0 %v19232_v28, %s17283_s29 }
 0x5b7   : > { %10679 = vst.msk [vmem:[#allocation2 + $0xa8] sm:$0xff] %vm10160_vm2, %v10589_v22  ;;  %8909 = vmatprep.mubr.bf16.mxu0 %v16802_v57 }
 0x5b8   : > { %11628 = vrot.lane.b32.xlu1 %v19237_v45, %s17283_s29 }
 0x5b9   : > { %v8695_v38 = vpop.f32.mrb[196].mxu0 }
 0x5ba   : > { %10742 = vrot.lane.b32.xlu0 %v8695_v38, %s17281_s27  ;;  %v8697_v31 = vpop.f32.mrb[197].mxu0 }
 0x5bb   : > { %v8698_v59 = vpop.f32.mrb[198].mxu0  ;;  %v16806_v31 = vld [vmem:[%s18434_s17 + $0x8e0] ss:$8 sps:$4 sm:$0xff]  }
 0x5bc   : > { %v10591_v37 = vpop.permute.xlu0 %10590  ;;  %10744 = vrot.lane.b32.xlu1 %v8698_v59, %s17281_s27  ;;  %v8700_v44 = vpop.f32.mrb[199].mxu0  ;;  %v16811_v59 = vld [vmem:[%s18434_s17 + $0x8f4] ss:$8 sps:$4 sm:$0xff]  }
 0x5bd   : > { %10680 = vst.msk [vmem:[#allocation2 + $0xc8] sm:$0xff] %vm10160_vm2, %v10591_v37 }
 0x5be   : > { %8910 = vmatmul.mubr.bf16.gmra.mrb[48].mxu0 %v16800_v30  ;;  %v10593_v28 = vpop.permute.xlu1 %10592  ;;  %11786 = vrot.lane.b32.xlu0 %v19517_v49, %s17281_s27 }
 0x5bf   : > { %10681 = vst.msk [vmem:[#allocation2 + $0xe8] sm:$0xff] %vm10160_vm2, %v10593_v28  ;;  %8917 = vmatprep.mubr.bf16.mxu0 %v16805_v51  ;;  %v16809_v28 = vld [vmem:[%s18434_s17 + $0x8f0] ss:$8 sps:$4 sm:$0xff]  }
 0x5c0   : > { %11788 = vrot.lane.b32.xlu1 %v19520_v23, %s17281_s27 }
 0x5c1   : > { %v8703_v45 = vpop.f32.mrb[200].mxu0 }
 0x5c2   : > { %10746 = vrot.lane.b32.xlu0 %v8703_v45, %s17281_s27  ;;  %v8705_v9 = vpop.f32.mrb[201].mxu0 }
 0x5c3   : > { %v8706_v57 = vpop.f32.mrb[202].mxu0  ;;  %v16816_v9 = vld [vmem:[%s18434_s17 + $0x904] ss:$8 sps:$4 sm:$0xff]  }
 0x5c4   : > { %v10595_v40 = vpop.permute.xlu0 %10594  ;;  %10748 = vrot.lane.b32.xlu1 %v8706_v57, %s17281_s27  ;;  %v8708_v22 = vpop.f32.mrb[203].mxu0 }
 0x5c5   : > { %10682 = vst.msk [vmem:[#allocation2 + $0x108] sm:$0xff] %vm10160_vm2, %v10595_v40  ;;  %v16814_v40 = vld [vmem:[%s18434_s17 + $0x900] ss:$8 sps:$4 sm:$0xff]  }
 0x5c6   : > { %8918 = vmatmul.mubr.bf16.gmra.mrb[52].mxu0 %v16803_v33  ;;  %v10597_v49 = vpop.permute.xlu1 %10596  ;;  %11274 = vrot.lane.b32.xlu0 %v18719_v50, %s17281_s27 }
 0x5c7   : > { %10683 = vst.msk [vmem:[#allocation2 + $0x128] sm:$0xff] %vm10160_vm2, %v10597_v49  ;;  %8925 = vmatprep.mubr.bf16.mxu0 %v16808_v4  ;;  %v16819_v49 = vld [vmem:[%s18434_s17 + $0x914] ss:$8 sps:$4 sm:$0xff]  }
 0x5c8   : > { %11276 = vrot.lane.b32.xlu1 %v18726_v60, %s17281_s27 }
 0x5c9   : > { %v8711_v23 = vpop.f32.mrb[204].mxu0 }
 0x5ca   : > { %10750 = vrot.lane.b32.xlu0 %v8711_v23, %s17281_s27  ;;  %v8713_v38 = vpop.f32.mrb[205].mxu0 }
 0x5cb   : > { %v8714_v30 = vpop.f32.mrb[206].mxu0 }
 0x5cc   : > { %v10599_v51 = vpop.permute.xlu0 %10598  ;;  %10752 = vrot.lane.b32.xlu1 %v8714_v30, %s17281_s27  ;;  %v8716_v37 = vpop.f32.mrb[207].mxu0  ;;  %v16817_v30 = vld [vmem:[%s18434_s17 + $0x910] ss:$8 sps:$4 sm:$0xff]  }
 0x5cd   : > { %10684 = vst.msk [vmem:[#allocation2 + $0x148] sm:$0xff] %vm10160_vm2, %v10599_v51  ;;  %v16822_v51 = vld [vmem:[%s18434_s17 + $0x924] ss:$8 sps:$4 sm:$0xff]  }
 0x5ce   : > { %8926 = vmatmul.mubr.bf16.gmra.mrb[56].mxu0 %v16806_v31  ;;  %v10601_v50 = vpop.permute.xlu1 %10600  ;;  %11470 = vrot.lane.b32.xlu0 %v19067_v16, %s17282_s28 }
 0x5cf   : > { %10685 = vst.msk [vmem:[#allocation2 + $0x168] sm:$0xff] %vm10160_vm2, %v10601_v50  ;;  %8933 = vmatprep.mubr.bf16.mxu0 %v16811_v59 }
 0x5d0   : > { %11472 = vrot.lane.b32.xlu1 %v19074_v47, %s17282_s28 }
 0x5d1   : > { %v8719_v60 = vpop.f32.mrb[208].mxu0 }
 0x5d2   : > { %10754 = vrot.lane.b32.xlu0 %v8719_v60, %s17281_s27  ;;  %v8721_v44 = vpop.f32.mrb[209].mxu0 }
 0x5d3   : > { %v8722_v45 = vpop.f32.mrb[210].mxu0  ;;  %v16820_v44 = vld [vmem:[%s18434_s17 + $0x920] ss:$8 sps:$4 sm:$0xff]  }
 0x5d4   : > { %v10603_v33 = vpop.permute.xlu0 %10602  ;;  %10756 = vrot.lane.b32.xlu1 %v8722_v45, %s17281_s27  ;;  %v8724_v57 = vpop.f32.mrb[211].mxu0  ;;  %v16825_v45 = vld [vmem:[%s18434_s17 + $0x934] ss:$8 sps:$4 sm:$0xff]  }
 0x5d5   : > { %10686 = vst.msk [vmem:[#allocation2 + $0x188] sm:$0xff] %vm10160_vm2, %v10603_v33 }
 0x5d6   : > { %8934 = vmatmul.mubr.bf16.gmra.mrb[60].mxu0 %v16809_v28  ;;  %v10605_v16 = vpop.permute.xlu1 %10604  ;;  %11630 = vrot.lane.b32.xlu0 %v19242_v41, %s17283_s29 }
 0x5d7   : > { %10687 = vst.msk [vmem:[#allocation2 + $0x1a8] sm:$0xff] %vm10160_vm2, %v10605_v16  ;;  %8941 = vmatprep.mubr.bf16.mxu0 %v16816_v9  ;;  %v16823_v16 = vld [vmem:[%s18434_s17 + $0x930] ss:$8 sps:$4 sm:$0xff]  }
 0x5d8   : > { %11632 = vrot.lane.b32.xlu1 %v19247_v13, %s17283_s29 }
 0x5d9   : > { %v8727_v47 = vpop.f32.mrb[212].mxu0 }
 0x5da   : > { %10758 = vrot.lane.b32.xlu0 %v8727_v47, %s17281_s27  ;;  %v8729_v4 = vpop.f32.mrb[213].mxu0 }
 0x5db   : > { %v8730_v22 = vpop.f32.mrb[214].mxu0  ;;  %v16831_v4 = vld [vmem:[%s18434_s17 + $0x944] ss:$8 sps:$4 sm:$0xff]  }
 0x5dc   : > { %v10607_v23 = vpop.permute.xlu0 %10606  ;;  %10760 = vrot.lane.b32.xlu1 %v8730_v22, %s17281_s27  ;;  %v8732_v38 = vpop.f32.mrb[215].mxu0 }
 0x5dd   : > { %10688 = vst.msk [vmem:[#allocation2 + $0x1c8] sm:$0xff] %vm10160_vm2, %v10607_v23  ;;  %v16829_v23 = vld [vmem:[%s18434_s17 + $0x940] ss:$8 sps:$4 sm:$0xff]  }
 0x5de   : > { %8942 = vmatmul.mubr.bf16.gmra.mrb[64].mxu0 %v16814_v40  ;;  %v10609_v41 = vpop.permute.xlu1 %10608  ;;  %11790 = vrot.lane.b32.xlu0 %v19551_v63, %s17281_s27 }
 0x5df   : > { %10689 = vst.msk [vmem:[#allocation2 + $0x1e8] sm:$0xff] %vm10160_vm2, %v10609_v41  ;;  %8949 = vmatprep.mubr.bf16.mxu0 %v16819_v49  ;;  %v16837_v41 = vld [vmem:[%s18434_s17 + $0x954] ss:$8 sps:$4 sm:$0xff]  }
 0x5e0   : > { %11792 = vrot.lane.b32.xlu1 %v19554_v39, %s17281_s27 }
 0x5e1   : > { %v8735_v13 = vpop.f32.mrb[216].mxu0 }
 0x5e2   : > { %10762 = vrot.lane.b32.xlu0 %v8735_v13, %s17281_s27  ;;  %v8737_v31 = vpop.f32.mrb[217].mxu0 }
 0x5e3   : > { %v8738_v59 = vpop.f32.mrb[218].mxu0 }
 0x5e4   : > { %v10611_v37 = vpop.permute.xlu0 %10610  ;;  %10764 = vrot.lane.b32.xlu1 %v8738_v59, %s17281_s27  ;;  %v8740_v50 = vpop.f32.mrb[219].mxu0 }
 0x5e5   : > { %10690 = vst.msk [vmem:[#allocation2 + $0x208] sm:$0xff] %vm10160_vm2, %v10611_v37  ;;  %v16835_v37 = vld [vmem:[%s18434_s17 + $0x950] ss:$8 sps:$4 sm:$0xff]  }
 0x5e6   : > { %8950 = vmatmul.mubr.bf16.gmra.mrb[68].mxu0 %v16817_v30  ;;  %v10613_v63 = vpop.permute.xlu1 %10612  ;;  %11278 = vrot.lane.b32.xlu0 %v18729_v1, %s17281_s27 }
 0x5e7   : > { %10691 = vst.msk [vmem:[#allocation2 + $0x228] sm:$0xff] %vm10160_vm2, %v10613_v63  ;;  %8957 = vmatprep.mubr.bf16.mxu0 %v16822_v51  ;;  %v16843_v63 = vld [vmem:[%s18434_s17 + $0x964] ss:$8 sps:$4 sm:$0xff]  }
 0x5e8   : > { %11280 = vrot.lane.b32.xlu1 %v18736_v12, %s17281_s27 }
 0x5e9   : > { %v8743_v39 = vpop.f32.mrb[220].mxu0 }
 0x5ea   : > { %10766 = vrot.lane.b32.xlu0 %v8743_v39, %s17281_s27  ;;  %v8745_v60 = vpop.f32.mrb[221].mxu0 }
 0x5eb   : > { %v8746_v28 = vpop.f32.mrb[222].mxu0 }
 0x5ec   : > { %v10615_v9 = vpop.permute.xlu0 %10614  ;;  %10768 = vrot.lane.b32.xlu1 %v8746_v28, %s17281_s27  ;;  %v8748_v33 = vpop.f32.mrb[223].mxu0 }
 0x5ed   : > { %10692 = vst.msk [vmem:[#allocation2 + $0x248] sm:$0xff] %vm10160_vm2, %v10615_v9  ;;  %v16841_v9 = vld [vmem:[%s18434_s17 + $0x960] ss:$8 sps:$4 sm:$0xff]  }
 0x5ee   : > { %8958 = vmatmul.mubr.bf16.gmra.mrb[72].mxu0 %v16820_v44  ;;  %v10617_v1 = vpop.permute.xlu1 %10616  ;;  %11474 = vrot.lane.b32.xlu0 %v19079_v61, %s17282_s28 }
 0x5ef   : > { %10693 = vst.msk [vmem:[#allocation2 + $0x268] sm:$0xff] %vm10160_vm2, %v10617_v1  ;;  %8965 = vmatprep.mubr.bf16.mxu0 %v16825_v45  ;;  %v16849_v1 = vld [vmem:[%s18434_s17 + $0x974] ss:$8 sps:$4 sm:$0xff]  }
 0x5f0   : > { %11476 = vrot.lane.b32.xlu1 %v19086_v35, %s17282_s28 }
 0x5f1   : > { %v8751_v12 = vpop.f32.mrb[224].mxu0 }
 0x5f2   : > { %10770 = vrot.lane.b32.xlu0 %v8751_v12, %s17281_s27  ;;  %v8753_v57 = vpop.f32.mrb[225].mxu0 }
 0x5f3   : > { %v8754_v47 = vpop.f32.mrb[226].mxu0 }
 0x5f4   : > { %v10619_v40 = vpop.permute.xlu0 %10618  ;;  %10772 = vrot.lane.b32.xlu1 %v8754_v47, %s17281_s27  ;;  %v8756_v22 = vpop.f32.mrb[227].mxu0 }
 0x5f5   : > { %10694 = vst.msk [vmem:[#allocation2 + $0x288] sm:$0xff] %vm10160_vm2, %v10619_v40  ;;  %v16847_v40 = vld [vmem:[%s18434_s17 + $0x970] ss:$8 sps:$4 sm:$0xff]  }
 0x5f6   : > { %8966 = vmatmul.mubr.bf16.gmra.mrb[76].mxu0 %v16823_v16  ;;  %v10621_v61 = vpop.permute.xlu1 %10620 }
 0x5f7   : > { %10695 = vst.msk [vmem:[#allocation2 + $0x2a8] sm:$0xff] %vm10160_vm2, %v10621_v61  ;;  %8973 = vmatprep.mubr.bf16.mxu0 %v16831_v4  ;;  %v16855_v61 = vld [vmem:[%s18434_s17 + $0x984] ss:$8 sps:$4 sm:$0xff]  }
 0x5f9   : > { %v8759_v35 = vpop.f32.mrb[228].mxu0 }
 0x5fa   : > { %10774 = vrot.lane.b32.xlu0 %v8759_v35, %s17281_s27  ;;  %v8761_v49 = vpop.f32.mrb[229].mxu0 }
 0x5fb   : > { %v8762_v38 = vpop.f32.mrb[230].mxu0 }
 0x5fc   : > { %v10623_v13 = vpop.permute.xlu0 %10622  ;;  %10776 = vrot.lane.b32.xlu1 %v8762_v38, %s17281_s27  ;;  %v8764_v31 = vpop.f32.mrb[231].mxu0 }
 0x5fd   : > { %10696 = vst.msk [vmem:[#allocation2 + $0x2c8] sm:$0xff] %vm10160_vm2, %v10623_v13  ;;  %v16853_v13 = vld [vmem:[%s18434_s17 + $0x980] ss:$8 sps:$4 sm:$0xff]  }
 0x5fe   : > { %8974 = vmatmul.mubr.bf16.gmra.mrb[80].mxu0 %v16829_v23  ;;  %v10625_v30 = vpop.permute.xlu1 %10624 }
 0x5ff   : > { %10697 = vst.msk [vmem:[#allocation2 + $0x2e8] sm:$0xff] %vm10160_vm2, %v10625_v30  ;;  %8981 = vmatprep.mubr.bf16.mxu0 %v16837_v41  ;;  %v16861_v30 = vld [vmem:[%s18434_s17 + $0x994] ss:$8 sps:$4 sm:$0xff]  }
 0x601   : > { %v8767_v59 = vpop.f32.mrb[232].mxu0 }
 0x602   : > { %10778 = vrot.lane.b32.xlu0 %v8767_v59, %s17281_s27  ;;  %v8769_v51 = vpop.f32.mrb[233].mxu0 }
 0x603   : > { %v8770_v50 = vpop.f32.mrb[234].mxu0 }
 0x604   : > { %v10627_v39 = vpop.permute.xlu0 %10626  ;;  %10780 = vrot.lane.b32.xlu1 %v8770_v50, %s17281_s27  ;;  %v8772_v60 = vpop.f32.mrb[235].mxu0 }
 0x605   : > { %10698 = vst.msk [vmem:[#allocation2 + $0x308] sm:$0xff] %vm10160_vm2, %v10627_v39 }
 0x606   : > { %8982 = vmatmul.mubr.bf16.gmra.mrb[84].mxu0 %v16835_v37  ;;  %v10629_v44 = vpop.permute.xlu1 %10628  ;;  %v12020_v37 = vlaneseq }
 0x607   : > { %10699 = vst.msk [vmem:[#allocation2 + $0x328] sm:$0xff] %vm10160_vm2, %v10629_v44  ;;  %8989 = vmatprep.mubr.bf16.mxu0 %v16843_v63  ;;  %v16859_v44 = vld [vmem:[%s18434_s17 + $0x990] ss:$8 sps:$4 sm:$0xff]  }
 0x608   : > { %v19766_v39 = vshrl.u32 %v12020_v37, 7 }
 0x609   : > { %v8775_v28 = vpop.f32.mrb[236].mxu0 }
 0x60a   : > { %10782 = vrot.lane.b32.xlu0 %v8775_v28, %s17281_s27  ;;  %v8777_v45 = vpop.f32.mrb[237].mxu0 }
 0x60b   : > { %v8778_v33 = vpop.f32.mrb[238].mxu0  ;;  %v16869_v45 = vld [vmem:[%s18434_s17 + $0x9a4] ss:$8 sps:$4 sm:$0xff]  }
 0x60c   : > { %v10631_v12 = vpop.permute.xlu0 %10630  ;;  %10784 = vrot.lane.b32.xlu1 %v8778_v33, %s17281_s27  ;;  %v8780_v57 = vpop.f32.mrb[239].mxu0 }
 0x60d   : > { %10700 = vst.msk [vmem:[#allocation2 + $0x348] sm:$0xff] %vm10160_vm2, %v10631_v12  ;;  %v19777_v12 = vsub.s32 0, %v19766_v39 }
 0x60e   : > { %8990 = vmatmul.mubr.bf16.gmra.mrb[88].mxu0 %v16841_v9  ;;  %v10633_v16 = vpop.permute.xlu1 %10632 }
 0x60f   : > { %10701 = vst.msk [vmem:[#allocation2 + $0x368] sm:$0xff] %vm10160_vm2, %v10633_v16  ;;  %8997 = vmatprep.mubr.bf16.mxu0 %v16849_v1  ;;  %v19774_v1 = vsub.s32 1, %v19766_v39  ;;  %21513 = vst [vmem:[#allocation47_spill] sm:$0xff] %v19777_v12  ;;  %v19782_v16 = vld [vmem:[%s21454_s2] sm:$0xf] }
 0x611   : > { %v8783_v47 = vpop.f32.mrb[240].mxu0  ;;  %21512 = vst [vmem:[#allocation46_spill] sm:$0xff] %v19774_v1 }
 0x612   : > { %10786 = vrot.lane.b32.xlu0 %v8783_v47, %s17281_s27  ;;  %v8785_v4 = vpop.f32.mrb[241].mxu0 }
 0x613   : > { %v8786_v22 = vpop.f32.mrb[242].mxu0  ;;  %v11894_v4 = vld [vmem:[#allocation2 + $0x20] sm:$0xff] }
 0x614   : > { %v10635_v35 = vpop.permute.xlu0 %10634  ;;  %10788 = vrot.lane.b32.xlu1 %v8786_v22, %s17281_s27  ;;  %v8788_v49 = vpop.f32.mrb[243].mxu0  ;;  %v19788_v22 = vrot.slane %v19782_v16, %v19774_v1  ;;  %v11954_v1 = vld [vmem:[#allocation2 + $0x200] sm:$0xff] }
 0x615   : > { %10702 = vst.msk [vmem:[#allocation2 + $0x388] sm:$0xff] %vm10160_vm2, %v10635_v35 }
 0x616   : > { %8998 = vmatmul.mubr.bf16.gmra.mrb[92].mxu0 %v16847_v40  ;;  %v10637_v23 = vpop.permute.xlu1 %10636 }
 0x617   : > { %10703 = vst.msk [vmem:[#allocation2 + $0x3a8] sm:$0xff] %vm10160_vm2, %v10637_v23  ;;  %9005 = vmatprep.mubr.bf16.mxu0 %v16855_v61  ;;  %v19792_v61 = vrot.slane %v19782_v16, %v19777_v12  ;;  %v16867_v23 = vld [vmem:[%s18434_s17 + $0x9a0] ss:$8 sps:$4 sm:$0xff]  }
 0x619   : > { %v8791_v38 = vpop.f32.mrb[244].mxu0 }
 0x61a   : > { %10790 = vrot.lane.b32.xlu0 %v8791_v38, %s17281_s27  ;;  %v8793_v41 = vpop.f32.mrb[245].mxu0  ;;  %v11890_v38 = vld [vmem:[#allocation2] sm:$0xff] }
 0x61b   : > { %v8794_v31 = vpop.f32.mrb[246].mxu0 }
 0x61c   : > { %v10639_v59 = vpop.permute.xlu0 %10638  ;;  %10792 = vrot.lane.b32.xlu1 %v8794_v31, %s17281_s27  ;;  %v8796_v51 = vpop.f32.mrb[247].mxu0  ;;  %v12044_v31 = vadd.f32 %v19792_v61, %v11894_v4 }
 0x61d   : > { %10704 = vst.msk [vmem:[#allocation2 + $0x3c8] sm:$0xff] %vm10160_vm2, %v10639_v59 }
 0x61e   : > { %9006 = vmatmul.mubr.bf16.gmra.mrb[96].mxu0 %v16853_v13  ;;  %v10641_v50 = vpop.permute.xlu1 %10640  ;;  %v16879_v13 = vld [vmem:[%s18434_s17 + $0x9b4] ss:$8 sps:$4 sm:$0xff]  }
 0x61f   : > { %10705 = vst.msk [vmem:[#allocation2 + $0x3e8] sm:$0xff] %vm10160_vm2, %v10641_v50  ;;  %9013 = vmatprep.mubr.bf16.mxu0 %v16861_v30  ;;  %v12040_v50 = vadd.f32 %v19792_v61, %v11890_v38 }
 0x621   : > { %v8799_v63 = vpop.f32.mrb[248].mxu0  ;;  %v12168_v4 = vmax.f32 %v12040_v50, 0.0 }
 0x622   : > { %10794 = vrot.lane.b32.xlu0 %v8799_v63, %s17281_s27  ;;  %v8801_v60 = vpop.f32.mrb[249].mxu0 }
 0x623   : > { %v8802_v28 = vpop.f32.mrb[250].mxu0 }
 0x624   : > { %v10739_v9 = vpop.permute.xlu0 %10738  ;;  %10796 = vrot.lane.b32.xlu1 %v8802_v28, %s17281_s27  ;;  %v8804_v33 = vpop.f32.mrb[251].mxu0  ;;  %v12172_v28 = vmax.f32 %v12044_v31, 0.0 }
 0x625   : > { %10834 = vst.msk [vmem:[#allocation2 + $0x8] sm:$0xff] %vm10321_vm3, %v10739_v9 }
 0x626   : > { %9014 = vmatmul.mubr.bf16.gmra.mrb[100].mxu0 %v16859_v44  ;;  %v10741_v57 = vpop.permute.xlu1 %10740  ;;  %v12296_v31 = vpack.c.bf16 %v12172_v28, %v12168_v4  ;;  %v11910_v4 = vld [vmem:[#allocation2 + $0xa0] sm:$0xff] }
 0x627   : > { %10835 = vst.msk [vmem:[#allocation2 + $0x28] sm:$0xff] %vm10321_vm3, %v10741_v57  ;;  %9021 = vmatprep.mubr.bf16.mxu0 %v16869_v45 }
 0x628   : > { %v11627_v47 = vpop.permute.xlu0 %11626 }
 0x629   : > { %11710 = vst.msk [vmem:[#allocation2 + $0x198] sm:$0xff] %vm10160_vm2, %v11627_v47  ;;  %v8807_v40 = vpop.f32.mrb[252].mxu0  ;;  %v11902_v47 = vld [vmem:[#allocation2 + $0x60] sm:$0xff] }
 0x62a   : > { %v11629_v35 = vpop.permute.xlu1 %11628  ;;  %10798 = vrot.lane.b32.xlu0 %v8807_v40, %s17281_s27  ;;  %v8809_v49 = vpop.f32.mrb[253].mxu0 }
 0x62b   : > { %11711 = vst.msk [vmem:[#allocation2 + $0x1b8] sm:$0xff] %vm10160_vm2, %v11629_v35  ;;  %v8810_v41 = vpop.f32.mrb[254].mxu0  ;;  %v16877_v49 = vld [vmem:[%s18434_s17 + $0x9b0] ss:$8 sps:$4 sm:$0xff]  }
 0x62c   : > { %v10743_v30 = vpop.permute.xlu0 %10742  ;;  %10800 = vrot.lane.b32.xlu1 %v8810_v41, %s17281_s27  ;;  %v8812_v59 = vpop.f32.mrb[255].mxu0  ;;  %v11891_v51 = vld [vmem:[#allocation2 + $0x8] sm:$0xff] }
 0x62d   : > { %10836 = vst.msk [vmem:[#allocation2 + $0x48] sm:$0xff] %vm10321_vm3, %v10743_v30  ;;  %v12041_v37 = vadd.f32 %v19788_v22, %v11891_v51  ;;  %v16882_v41 = vld [vmem:[%s18434_s17 + $0x9c4] ss:$8 sps:$4 sm:$0xff]  }
 0x62e   : > { %9022 = vmatmul.mubr.bf16.gmra.mrb[104].mxu0 %v16867_v23  ;;  %v10745_v63 = vpop.permute.xlu1 %10744  ;;  %v11895_v60 = vld [vmem:[#allocation2 + $0x28] sm:$0xff] }
 0x62f   : > { %10837 = vst.msk [vmem:[#allocation2 + $0x68] sm:$0xff] %vm10321_vm3, %v10745_v63  ;;  %9029 = vmatprep.mubr.bf16.mxu0 %v16879_v13  ;;  %v12045_v44 = vadd.f32 %v19788_v22, %v11895_v60  ;;  %v12169_v33 = vmax.f32 %v12041_v37, 0.0  ;;  %v11898_v13 = vld [vmem:[#allocation2 + $0x40] sm:$0xff]  ;;  %v12052_v37 = vadd.f32 %v19792_v61, %v11902_v47 }
 0x630   : > { %v11787_v45 = vpop.permute.xlu0 %11786 }
 0x631   : > { %11870 = vst.msk [vmem:[#allocation2 + $0x198] sm:$0xff] %vm10321_vm3, %v11787_v45  ;;  %v8815_v9 = vpop.f32.mrb[0].mxu0  ;;  %v12173_v57 = vmax.f32 %v12045_v44, 0.0  ;;  %v12048_v44 = vadd.f32 %v19792_v61, %v11898_v13 }
 0x632   : > { %10866 = vst.msk [vmem:[#allocation2 + $0x10] sm:$0xff] %vm9838_vm0, %v8815_v9  ;;  %v11789_v40 = vpop.permute.xlu1 %11788  ;;  %v8817_v35 = vpop.f32.mrb[1].mxu0  ;;  %v12180_v9 = vmax.f32 %v12052_v37, 0.0 }
 0x633   : > { %11871 = vst.msk [vmem:[#allocation2 + $0x1b8] sm:$0xff] %vm10321_vm3, %v11789_v40  ;;  %v8818_v23 = vpop.f32.mrb[2].mxu0  ;;  %v12297_v38 = vpack.c.bf16 %v12173_v57, %v12169_v33 }
 0x634   : > { %10867 = vst.msk [vmem:[#allocation2 + $0x30] sm:$0xff] %vm9838_vm0, %v8818_v23  ;;  %v10747_v30 = vpop.permute.xlu0 %10746  ;;  %v8820_v59 = vpop.f32.mrb[3].mxu0  ;;  %v11899_v51 = vld [vmem:[#allocation2 + $0x48] sm:$0xff]  ;;  %v12176_v23 = vmax.f32 %v12048_v44, 0.0 }
 0x635   : > { %10838 = vst.msk [vmem:[#allocation2 + $0x88] sm:$0xff] %vm10321_vm3, %v10747_v30  ;;  %12655 = vmatprep.mubr.bf16.mxu1 %v12297_v38  ;;  %v12049_v50 = vadd.f32 %v19788_v22, %v11899_v51 }
 0x636   : > { %9030 = vmatmul.mubr.bf16.gmra.mrb[108].mxu0 %v16877_v49  ;;  %12656 = vmatmul.mubr.bf16.vlgmr.msra.gmra.mrb[92].mxu1 %v12296_v31  ;;  %v10749_v63 = vpop.permute.xlu1 %10748  ;;  %v11903_v60 = vld [vmem:[#allocation2 + $0x68] sm:$0xff]  ;;  %v16885_v31 = vld [vmem:[%s18434_s17 + $0x9d4] ss:$8 sps:$4 sm:$0xff]   ;;  %v12300_v51 = vpack.c.bf16 %v12180_v9, %v12176_v23 }
 0x637   : > { %10839 = vst.msk [vmem:[#allocation2 + $0xa8] sm:$0xff] %vm10321_vm3, %v10749_v63  ;;  %9037 = vmatprep.mubr.bf16.mxu0 %v16882_v41  ;;  %v12053_v28 = vadd.f32 %v19788_v22, %v11903_v60  ;;  %v12177_v57 = vmax.f32 %v12049_v50, 0.0  ;;  %v16880_v49 = vld [vmem:[%s18434_s17 + $0x9c0] ss:$8 sps:$4 sm:$0xff]   ;;  %v12060_v50 = vadd.f32 %v19792_v61, %v11910_v4 }
 0x638   : > { %v19817_v45 = vpop.permute.xlu0 %11274  ;;  %v11906_v41 = vld [vmem:[#allocation2 + $0x80] sm:$0xff] }
 0x639   : > { %21514 = vst [vmem:[#allocation48_spill] sm:$0xff] %v19817_v45  ;;  %v8823_v33 = vpop.f32.mrb[4].mxu0  ;;  %v12181_v47 = vmax.f32 %v12053_v28, 0.0  ;;  %v12056_v28 = vadd.f32 %v19792_v61, %v11906_v41 }
 0x63a   : > { %10868 = vst.msk [vmem:[#allocation2 + $0x50] sm:$0xff] %vm9838_vm0, %v8823_v33  ;;  %v19820_v40 = vpop.permute.xlu1 %11276  ;;  %v8825_v35 = vpop.f32.mrb[5].mxu0 }
 0x63b   : > { %21515 = vst [vmem:[#allocation49_spill] sm:$0xff] %v19820_v40  ;;  %v8826_v38 = vpop.f32.mrb[6].mxu0  ;;  %v12301_v13 = vpack.c.bf16 %v12181_v47, %v12177_v57  ;;  %v12188_v57 = vmax.f32 %v12060_v50, 0.0  ;;  %v12184_v41 = vmax.f32 %v12056_v28, 0.0 }
 0x63c   : > { %10869 = vst.msk [vmem:[#allocation2 + $0x70] sm:$0xff] %vm9838_vm0, %v8826_v38  ;;  %v10751_v30 = vpop.permute.xlu0 %10750  ;;  %v8828_v59 = vpop.f32.mrb[7].mxu0  ;;  %v11907_v37 = vld [vmem:[#allocation2 + $0x88] sm:$0xff] }
 0x63d   : > { %10840 = vst.msk [vmem:[#allocation2 + $0xc8] sm:$0xff] %vm10321_vm3, %v10751_v30  ;;  %12663 = vmatprep.mubr.bf16.mxu1 %v12301_v13  ;;  %v12057_v63 = vadd.f32 %v19788_v22, %v11907_v37  ;;  %v16883_v13 = vld [vmem:[%s18434_s17 + $0x9d0] ss:$8 sps:$4 sm:$0xff]   ;;  %v16888_v59 = vld [vmem:[%s18434_s17 + $0x9e4] ss:$8 sps:$4 sm:$0xff]  }
 0x63e   : > { %9038 = vmatmul.mubr.bf16.gmra.mrb[112].mxu0 %v16880_v49  ;;  %12664 = vmatmul.mubr.bf16.gmra.mrb[96].mxu1 %v12300_v51  ;;  %v10753_v60 = vpop.permute.xlu1 %10752  ;;  %v11911_v44 = vld [vmem:[#allocation2 + $0xa8] sm:$0xff]  ;;  %v11918_v49 = vld [vmem:[#allocation2 + $0xe0] sm:$0xff] }
 0x63f   : > { %10841 = vst.msk [vmem:[#allocation2 + $0xe8] sm:$0xff] %vm10321_vm3, %v10753_v60  ;;  %9045 = vmatprep.mubr.bf16.mxu0 %v16885_v31  ;;  %v12061_v9 = vadd.f32 %v19788_v22, %v11911_v44  ;;  %v12185_v4 = vmax.f32 %v12057_v63, 0.0  ;;  %v11914_v51 = vld [vmem:[#allocation2 + $0xc0] sm:$0xff]  ;;  %v12304_v60 = vpack.c.bf16 %v12188_v57, %v12184_v41  ;;  %v12068_v44 = vadd.f32 %v19792_v61, %v11918_v49 }
 0x640   : > { %v11471_v33 = vpop.permute.xlu0 %11470 }
 0x641   : > { %11552 = vst.msk [vmem:[#allocation2 + $0x1d8] sm:$0xff] %vm9999_vm1, %v11471_v33  ;;  %v8831_v47 = vpop.f32.mrb[8].mxu0  ;;  %v12189_v35 = vmax.f32 %v12061_v9, 0.0 }
 0x642   : > { %10870 = vst.msk [vmem:[#allocation2 + $0x90] sm:$0xff] %vm9838_vm0, %v8831_v47  ;;  %v11473_v23 = vpop.permute.xlu1 %11472  ;;  %v8833_v38 = vpop.f32.mrb[9].mxu0  ;;  %v12064_v47 = vadd.f32 %v19792_v61, %v11914_v51 }
 0x643   : > { %11553 = vst.msk [vmem:[#allocation2 + $0x1f8] sm:$0xff] %vm9999_vm1, %v11473_v23  ;;  %v8834_v31 = vpop.f32.mrb[10].mxu0  ;;  %v12305_v30 = vpack.c.bf16 %v12189_v35, %v12185_v4  ;;  %v12196_v35 = vmax.f32 %v12068_v44, 0.0 }
 0x644   : > { %10871 = vst.msk [vmem:[#allocation2 + $0xb0] sm:$0xff] %vm9838_vm0, %v8834_v31  ;;  %v10755_v37 = vpop.permute.xlu0 %10754  ;;  %v8836_v50 = vpop.f32.mrb[11].mxu0  ;;  %v11915_v63 = vld [vmem:[#allocation2 + $0xc8] sm:$0xff]  ;;  %v12192_v51 = vmax.f32 %v12064_v47, 0.0 }
 0x645   : > { %10842 = vst.msk [vmem:[#allocation2 + $0x108] sm:$0xff] %vm10321_vm3, %v10755_v37  ;;  %12671 = vmatprep.mubr.bf16.mxu1 %v12305_v30  ;;  %v12065_v9 = vadd.f32 %v19788_v22, %v11915_v63  ;;  %v16886_v30 = vld [vmem:[%s18434_s17 + $0x9e0] ss:$8 sps:$4 sm:$0xff]   ;;  %v16891_v50 = vld [vmem:[%s18434_s17 + $0x9f4] ss:$8 sps:$4 sm:$0xff]  }
 0x646   : > { %9046 = vmatmul.mubr.bf16.gmra.mrb[116].mxu0 %v16883_v13  ;;  %12672 = vmatmul.mubr.bf16.gmra.mrb[100].mxu1 %v12304_v60  ;;  %v10757_v28 = vpop.permute.xlu1 %10756  ;;  %v11919_v33 = vld [vmem:[#allocation2 + $0xe8] sm:$0xff]  ;;  %v11926_v13 = vld [vmem:[#allocation2 + $0x120] sm:$0xff] }
 0x647   : > { %10843 = vst.msk [vmem:[#allocation2 + $0x128] sm:$0xff] %vm10321_vm3, %v10757_v28  ;;  %9053 = vmatprep.mubr.bf16.mxu0 %v16888_v59  ;;  %v12069_v57 = vadd.f32 %v19788_v22, %v11919_v33  ;;  %v12193_v23 = vmax.f32 %v12065_v9, 0.0  ;;  %v11922_v60 = vld [vmem:[#allocation2 + $0x100] sm:$0xff]  ;;  %v12308_v28 = vpack.c.bf16 %v12196_v35, %v12192_v51  ;;  %v12076_v33 = vadd.f32 %v19792_v61, %v11926_v13 }
 0x648   : > { %v11631_v4 = vpop.permute.xlu0 %11630 }
 0x649   : > { %11712 = vst.msk [vmem:[#allocation2 + $0x1d8] sm:$0xff] %vm10160_vm2, %v11631_v4  ;;  %v8839_v49 = vpop.f32.mrb[12].mxu0  ;;  %v12197_v38 = vmax.f32 %v12069_v57, 0.0 }
 0x64a   : > { %10872 = vst.msk [vmem:[#allocation2 + $0xd0] sm:$0xff] %vm9838_vm0, %v8839_v49  ;;  %v11633_v41 = vpop.permute.xlu1 %11632  ;;  %v8841_v31 = vpop.f32.mrb[13].mxu0  ;;  %v12072_v49 = vadd.f32 %v19792_v61, %v11922_v60 }
 0x64b   : > { %11713 = vst.msk [vmem:[#allocation2 + $0x1f8] sm:$0xff] %vm10160_vm2, %v11633_v41  ;;  %v8842_v59 = vpop.f32.mrb[14].mxu0  ;;  %v12309_v37 = vpack.c.bf16 %v12197_v38, %v12193_v23  ;;  %v12204_v38 = vmax.f32 %v12076_v33, 0.0 }
 0x64c   : > { %10873 = vst.msk [vmem:[#allocation2 + $0xf0] sm:$0xff] %vm9838_vm0, %v8842_v59  ;;  %v10759_v63 = vpop.permute.xlu0 %10758  ;;  %v8844_v44 = vpop.f32.mrb[15].mxu0  ;;  %v11923_v9 = vld [vmem:[#allocation2 + $0x108] sm:$0xff]  ;;  %v12200_v60 = vmax.f32 %v12072_v49, 0.0 }
 0x64d   : > { %10844 = vst.msk [vmem:[#allocation2 + $0x148] sm:$0xff] %vm10321_vm3, %v10759_v63  ;;  %12679 = vmatprep.mubr.bf16.mxu1 %v12309_v37  ;;  %v12073_v57 = vadd.f32 %v19788_v22, %v11923_v9  ;;  %v16889_v37 = vld [vmem:[%s18434_s17 + $0x9f0] ss:$8 sps:$4 sm:$0xff]   ;;  %v16894_v44 = vld [vmem:[%s18434_s17 + $0xa04] ss:$8 sps:$4 sm:$0xff]  }
 0x64e   : > { %9054 = vmatmul.mubr.bf16.gmra.mrb[120].mxu0 %v16886_v30  ;;  %12680 = vmatmul.mubr.bf16.gmra.mrb[104].mxu1 %v12308_v28  ;;  %v10761_v47 = vpop.permute.xlu1 %10760  ;;  %v11927_v4 = vld [vmem:[#allocation2 + $0x128] sm:$0xff]  ;;  %v11934_v30 = vld [vmem:[#allocation2 + $0x160] sm:$0xff] }
 0x64f   : > { %10845 = vst.msk [vmem:[#allocation2 + $0x168] sm:$0xff] %vm10321_vm3, %v10761_v47  ;;  %9061 = vmatprep.mubr.bf16.mxu0 %v16891_v50  ;;  %v12077_v35 = vadd.f32 %v19788_v22, %v11927_v4  ;;  %v12201_v41 = vmax.f32 %v12073_v57, 0.0  ;;  %v11930_v28 = vld [vmem:[#allocation2 + $0x140] sm:$0xff]  ;;  %v12312_v47 = vpack.c.bf16 %v12204_v38, %v12200_v60  ;;  %v12084_v4 = vadd.f32 %v19792_v61, %v11934_v30 }
 0x650   : > { %v11791_v23 = vpop.permute.xlu0 %11790  ;;  %v11942_v60 = vld [vmem:[#allocation2 + $0x1a0] sm:$0xff] }
 0x651   : > { %11872 = vst.msk [vmem:[#allocation2 + $0x1d8] sm:$0xff] %vm10321_vm3, %v11791_v23  ;;  %v8847_v13 = vpop.f32.mrb[16].mxu0  ;;  %v12205_v31 = vmax.f32 %v12077_v35, 0.0 }
 0x652   : > { %10874 = vst.msk [vmem:[#allocation2 + $0x110] sm:$0xff] %vm9838_vm0, %v8847_v13  ;;  %v11793_v51 = vpop.permute.xlu1 %11792  ;;  %v8849_v59 = vpop.f32.mrb[17].mxu0  ;;  %v12080_v13 = vadd.f32 %v19792_v61, %v11930_v28 }
 0x653   : > { %11873 = vst.msk [vmem:[#allocation2 + $0x1f8] sm:$0xff] %vm10321_vm3, %v11793_v51  ;;  %v8850_v50 = vpop.f32.mrb[18].mxu0  ;;  %v12313_v63 = vpack.c.bf16 %v12205_v31, %v12201_v41  ;;  %v12212_v31 = vmax.f32 %v12084_v4, 0.0 }
 0x654   : > { %10875 = vst.msk [vmem:[#allocation2 + $0x130] sm:$0xff] %vm9838_vm0, %v8850_v50  ;;  %v10763_v9 = vpop.permute.xlu0 %10762  ;;  %v8852_v33 = vpop.f32.mrb[19].mxu0  ;;  %v11931_v57 = vld [vmem:[#allocation2 + $0x148] sm:$0xff]  ;;  %v12208_v28 = vmax.f32 %v12080_v13, 0.0 }
 0x655   : > { %10846 = vst.msk [vmem:[#allocation2 + $0x188] sm:$0xff] %vm10321_vm3, %v10763_v9  ;;  %12687 = vmatprep.mubr.bf16.mxu1 %v12313_v63  ;;  %v12081_v35 = vadd.f32 %v19788_v22, %v11931_v57  ;;  %v16892_v63 = vld [vmem:[%s18434_s17 + $0xa00] ss:$8 sps:$4 sm:$0xff]  }
 0x656   : > { %9062 = vmatmul.mubr.bf16.gmra.mrb[124].mxu0 %v16889_v37  ;;  %12688 = vmatmul.mubr.bf16.gmra.mrb[108].mxu1 %v12312_v47  ;;  %v10765_v49 = vpop.permute.xlu1 %10764  ;;  %v11935_v23 = vld [vmem:[#allocation2 + $0x168] sm:$0xff]  ;;  %v16897_v47 = vld [vmem:[%s18434_s17 + $0xa14] ss:$8 sps:$4 sm:$0xff]   ;;  %v12316_v4 = vpack.c.bf16 %v12212_v31, %v12208_v28 }
 0x657   : > { %10847 = vst.msk [vmem:[#allocation2 + $0x1a8] sm:$0xff] %vm10321_vm3, %v10765_v49  ;;  %9069 = vmatprep.mubr.bf16.mxu0 %v16894_v44  ;;  %v12085_v38 = vadd.f32 %v19788_v22, %v11935_v23  ;;  %v12209_v51 = vmax.f32 %v12081_v35, 0.0  ;;  %v11938_v44 = vld [vmem:[#allocation2 + $0x180] sm:$0xff]  ;;  %v12092_v35 = vadd.f32 %v19792_v61, %v11942_v60 }
 0x658   : > { %v19867_v41 = vpop.permute.xlu0 %11278 }
 0x659   : > { %21516 = vst [vmem:[#allocation50_spill] sm:$0xff] %v19867_v41  ;;  %v8855_v30 = vpop.f32.mrb[20].mxu0  ;;  %v12213_v59 = vmax.f32 %v12085_v38, 0.0  ;;  %v12220_v60 = vmax.f32 %v12092_v35, 0.0 }
 0x65a   : > { %10876 = vst.msk [vmem:[#allocation2 + $0x150] sm:$0xff] %vm9838_vm0, %v8855_v30  ;;  %v19870_v37 = vpop.permute.xlu1 %11280  ;;  %v8857_v50 = vpop.f32.mrb[21].mxu0 }
 0x65b   : > { %21517 = vst [vmem:[#allocation51_spill] sm:$0xff] %v19870_v37  ;;  %v8858_v9 = vpop.f32.mrb[22].mxu0  ;;  %v12317_v33 = vpack.c.bf16 %v12213_v59, %v12209_v51  ;;  %v12088_v51 = vadd.f32 %v19792_v61, %v11938_v44 }
 0x65c   : > { %10877 = vst.msk [vmem:[#allocation2 + $0x170] sm:$0xff] %vm9838_vm0, %v8858_v9  ;;  %v10767_v57 = vpop.permute.xlu0 %10766  ;;  %v8860_v49 = vpop.f32.mrb[23].mxu0  ;;  %v11939_v23 = vld [vmem:[#allocation2 + $0x188] sm:$0xff] }
 0x65d   : > { %10848 = vst.msk [vmem:[#allocation2 + $0x1c8] sm:$0xff] %vm10321_vm3, %v10767_v57  ;;  %12695 = vmatprep.mubr.bf16.mxu1 %v12317_v33  ;;  %v12089_v38 = vadd.f32 %v19788_v22, %v11939_v23  ;;  %v16895_v49 = vld [vmem:[%s18434_s17 + $0xa10] ss:$8 sps:$4 sm:$0xff]   ;;  %v12216_v44 = vmax.f32 %v12088_v51, 0.0  ;;  %v16900_v23 = vld [vmem:[%s18434_s17 + $0xa24] ss:$8 sps:$4 sm:$0xff]  }
 0x65e   : > { %9070 = vmatmul.mubr.bf16.gmra.mrb[128].mxu0 %v16892_v63  ;;  %12696 = vmatmul.mubr.bf16.gmra.mrb[112].mxu1 %v12316_v4  ;;  %v10769_v13 = vpop.permute.xlu1 %10768  ;;  %v11943_v30 = vld [vmem:[#allocation2 + $0x1a8] sm:$0xff]  ;;  %v11950_v63 = vld [vmem:[#allocation2 + $0x1e0] sm:$0xff] }
 0x65f   : > { %10849 = vst.msk [vmem:[#allocation2 + $0x1e8] sm:$0xff] %vm10321_vm3, %v10769_v13  ;;  %9077 = vmatprep.mubr.bf16.mxu0 %v16897_v47  ;;  %v12093_v31 = vadd.f32 %v19788_v22, %v11943_v30  ;;  %v12217_v28 = vmax.f32 %v12089_v38, 0.0  ;;  %v11946_v13 = vld [vmem:[#allocation2 + $0x1c0] sm:$0xff] }
 0x660   : > { %v11475_v59 = vpop.permute.xlu0 %11474 }
 0x661   : > { %11554 = vst.msk [vmem:[#allocation2 + $0x218] sm:$0xff] %vm9999_vm1, %v11475_v59  ;;  %v8863_v50 = vpop.f32.mrb[24].mxu0  ;;  %v12221_v9 = vmax.f32 %v12093_v31, 0.0  ;;  %v12320_v59 = vpack.c.bf16 %v12220_v60, %v12216_v44  ;;  %v12100_v31 = vadd.f32 %v19792_v61, %v11950_v63 }
 0x662   : > { %10878 = vst.msk [vmem:[#allocation2 + $0x190] sm:$0xff] %vm9838_vm0, %v8863_v50  ;;  %v11477_v33 = vpop.permute.xlu1 %11476  ;;  %v8865_v57 = vpop.f32.mrb[25].mxu0 }
 0x663   : > { %11555 = vst.msk [vmem:[#allocation2 + $0x238] sm:$0xff] %vm9999_vm1, %v11477_v33  ;;  %v8866_v47 = vpop.f32.mrb[26].mxu0  ;;  %v12321_v4 = vpack.c.bf16 %v12221_v9, %v12217_v28  ;;  %v12096_v9 = vadd.f32 %v19792_v61, %v11946_v13  ;;  %v12228_v33 = vmax.f32 %v12100_v31, 0.0 }
 0x664   : > { %10879 = vst.msk [vmem:[#allocation2 + $0x1b0] sm:$0xff] %vm9838_vm0, %v8866_v47  ;;  %v10771_v35 = vpop.permute.xlu0 %10770  ;;  %v8868_v30 = vpop.f32.mrb[27].mxu0  ;;  %v11947_v38 = vld [vmem:[#allocation2 + $0x1c8] sm:$0xff]  ;;  %v11958_v47 = vld [vmem:[#allocation2 + $0x220] sm:$0xff] }
 0x665   : > { %10850 = vst.msk [vmem:[#allocation2 + $0x208] sm:$0xff] %vm10321_vm3, %v10771_v35  ;;  %12703 = vmatprep.mubr.bf16.mxu1 %v12321_v4  ;;  %v12097_v50 = vadd.f32 %v19788_v22, %v11947_v38  ;;  %v19893_v4 = vpop.f32.mrb[60].mxu1  ;;  %v16898_v35 = vld [vmem:[%s18434_s17 + $0xa20] ss:$8 sps:$4 sm:$0xff]   ;;  %v12224_v30 = vmax.f32 %v12096_v9, 0.0  ;;  %v12108_v12 = vadd.f32 %v19792_v61, %v11958_v47 }
 0x666   : > { %9078 = vmatmul.mubr.bf16.gmra.mrb[132].mxu0 %v16895_v49  ;;  %12704 = vmatmul.mubr.bf16.gmra.mrb[116].mxu1 %v12320_v59  ;;  %v10773_v51 = vpop.permute.xlu1 %10772  ;;  %v11951_v28 = vld [vmem:[#allocation2 + $0x1e8] sm:$0xff]  ;;  %v9777_v59 = vpop.f32.mrb[61].mxu1 }
 0x667   : > { %10851 = vst.msk [vmem:[#allocation2 + $0x228] sm:$0xff] %vm10321_vm3, %v10773_v51  ;;  %9085 = vmatprep.mubr.bf16.mxu0 %v16900_v23  ;;  %v12101_v60 = vadd.f32 %v19788_v22, %v11951_v28  ;;  %v12225_v57 = vmax.f32 %v12097_v50, 0.0  ;;  %v16903_v51 = vld [vmem:[%s18434_s17 + $0xa34] ss:$8 sps:$4 sm:$0xff]   ;;  %v19898_v23 = vpop.f32.mrb[62].mxu1  ;;  %v12324_v28 = vpack.c.bf16 %v12228_v33, %v12224_v30  ;;  %v12236_v30 = vmax.f32 %v12108_v12, 0.0 }
 0x669   : > { %v8871_v63 = vpop.f32.mrb[28].mxu0  ;;  %v12229_v44 = vmax.f32 %v12101_v60, 0.0 }
 0x66a   : > { %10880 = vst.msk [vmem:[#allocation2 + $0x1d0] sm:$0xff] %vm9838_vm0, %v8871_v63  ;;  %v8873_v49 = vpop.f32.mrb[29].mxu0  ;;  %v9780_v63 = vpop.f32.mrb[63].mxu1 }
 0x66b   : > { %v8874_v13 = vpop.f32.mrb[30].mxu0  ;;  %v12325_v38 = vpack.c.bf16 %v12229_v44, %v12225_v57  ;;  %v12104_v49 = vadd.f32 %v19792_v61, %v11954_v1  ;;  %v19905_v59 = vpop.f32.mrb[64].mxu1 }
 0x66c   : > { %10881 = vst.msk [vmem:[#allocation2 + $0x1f0] sm:$0xff] %vm9838_vm0, %v8874_v13  ;;  %v10775_v31 = vpop.permute.xlu0 %10774  ;;  %v8876_v50 = vpop.f32.mrb[31].mxu0  ;;  %v11955_v60 = vld [vmem:[#allocation2 + $0x208] sm:$0xff] }
 0x66d   : > { %10852 = vst.msk [vmem:[#allocation2 + $0x248] sm:$0xff] %vm10321_vm3, %v10775_v31  ;;  %12711 = vmatprep.mubr.bf16.mxu1 %v12325_v38  ;;  %v12105_v9 = vadd.f32 %v19788_v22, %v11955_v60  ;;  %v9785_v47 = vpop.f32.mrb[65].mxu1  ;;  %v11966_v50 = vld [vmem:[#allocation2 + $0x260] sm:$0xff]  ;;  %v16901_v60 = vld [vmem:[%s18434_s17 + $0xa30] ss:$8 sps:$4 sm:$0xff]   ;;  %v12232_v63 = vmax.f32 %v12104_v49, 0.0 }
 0x66e   : > { %9086 = vmatmul.mubr.bf16.gmra.mrb[136].mxu0 %v16898_v35  ;;  %12712 = vmatmul.mubr.bf16.gmra.mrb[120].mxu1 %v12324_v28  ;;  %v10777_v57 = vpop.permute.xlu1 %10776  ;;  %v11959_v44 = vld [vmem:[#allocation2 + $0x228] sm:$0xff]  ;;  %v19909_v13 = vpop.f32.mrb[66].mxu1 }
 0x66f   : > { %10853 = vst.msk [vmem:[#allocation2 + $0x268] sm:$0xff] %vm10321_vm3, %v10777_v57  ;;  %9093 = vmatprep.mubr.bf16.mxu0 %v16903_v51  ;;  %v12109_v33 = vadd.f32 %v19788_v22, %v11959_v44  ;;  %v12233_v35 = vmax.f32 %v12105_v9, 0.0  ;;  %v9788_v28 = vpop.f32.mrb[67].mxu1  ;;  %v11962_v44 = vld [vmem:[#allocation2 + $0x240] sm:$0xff]  ;;  %v12328_v9 = vpack.c.bf16 %v12236_v30, %v12232_v63 }
 0x670   : > { %v19913_v37 = vpop.f32.mrb[68].mxu1  ;;  %v16906_v47 = vld [vmem:[%s18434_s17 + $0xa44] ss:$8 sps:$4 sm:$0xff]   ;;  %v12116_v28 = vadd.f32 %v19792_v61, %v11966_v50 }
 0x671   : > { %v8879_v38 = vpop.f32.mrb[32].mxu0  ;;  %v12237_v31 = vmax.f32 %v12109_v33, 0.0  ;;  %v9793_v41 = vpop.f32.mrb[69].mxu1 }
 0x672   : > { %10882 = vst.msk [vmem:[#allocation2 + $0x210] sm:$0xff] %vm9838_vm0, %v8879_v38  ;;  %v8881_v1 = vpop.f32.mrb[33].mxu0  ;;  %v19920_v38 = vpop.f32.mrb[70].mxu1  ;;  %v12112_v41 = vadd.f32 %v19792_v61, %v11962_v44  ;;  %v12244_v50 = vmax.f32 %v12116_v28, 0.0 }
 0x673   : > { %v8882_v51 = vpop.f32.mrb[34].mxu0  ;;  %v12329_v57 = vpack.c.bf16 %v12237_v31, %v12233_v35  ;;  %v9796_v1 = vpop.f32.mrb[71].mxu1 }
 0x674   : > { %10883 = vst.msk [vmem:[#allocation2 + $0x230] sm:$0xff] %vm9838_vm0, %v8882_v51  ;;  %v10779_v12 = vpop.permute.xlu0 %10778  ;;  %v8884_v40 = vpop.f32.mrb[35].mxu0  ;;  %v11963_v33 = vld [vmem:[#allocation2 + $0x248] sm:$0xff] }
 0x675   : > { %10854 = vst.msk [vmem:[#allocation2 + $0x288] sm:$0xff] %vm10321_vm3, %v10779_v12  ;;  %12719 = vmatprep.mubr.bf16.mxu1 %v12329_v57  ;;  %v12113_v49 = vadd.f32 %v19788_v22, %v11963_v33  ;;  %v19925_v30 = vpop.f32.mrb[72].mxu1  ;;  %v11974_v12 = vld [vmem:[#allocation2 + $0x2a0] sm:$0xff]  ;;  %v12240_v33 = vmax.f32 %v12112_v41, 0.0 }
 0x676   : > { %9094 = vmatmul.mubr.bf16.gmra.mrb[140].mxu0 %v16901_v60  ;;  %12720 = vmatmul.mubr.bf16.gmra.mrb[124].mxu1 %v12328_v9  ;;  %v10781_v35 = vpop.permute.xlu1 %10780  ;;  %v11967_v31 = vld [vmem:[#allocation2 + $0x268] sm:$0xff]  ;;  %v9801_v63 = vpop.f32.mrb[73].mxu1  ;;  %v12124_v24 = vadd.f32 %v19792_v61, %v11974_v12 }
 0x677   : > { %10855 = vst.msk [vmem:[#allocation2 + $0x2a8] sm:$0xff] %vm10321_vm3, %v10781_v35  ;;  %v12117_v40 = vadd.f32 %v19788_v22, %v11967_v31  ;;  %9101 = vmatprep.mubr.bf16.mxu0 %v16906_v47  ;;  %v12241_v57 = vmax.f32 %v12113_v49, 0.0  ;;  %v19927_v9 = vpop.f32.mrb[74].mxu1  ;;  %v16904_v1 = vld [vmem:[%s18434_s17 + $0xa40] ss:$8 sps:$4 sm:$0xff]  }
 0x678   : > { %v9804_v35 = vpop.f32.mrb[75].mxu1  ;;  %v11970_v47 = vld [vmem:[#allocation2 + $0x280] sm:$0xff] }
 0x679   : > { %v8887_v51 = vpop.f32.mrb[36].mxu0  ;;  %v12245_v60 = vmax.f32 %v12117_v40, 0.0  ;;  %v19932_v53 = vpop.f32.mrb[76].mxu1  ;;  %v12332_v40 = vpack.c.bf16 %v12244_v50, %v12240_v33  ;;  %v12252_v33 = vmax.f32 %v12124_v24, 0.0 }
 0x67a   : > { %10884 = vst.msk [vmem:[#allocation2 + $0x250] sm:$0xff] %vm9838_vm0, %v8887_v51  ;;  %v8889_v44 = vpop.f32.mrb[37].mxu0  ;;  %21518 = vst [vmem:[#allocation52_spill] sm:$0xff] %v19932_v53  ;;  %v9809_v51 = vpop.f32.mrb[77].mxu1 }
 0x67b   : > { %v8890_v45 = vpop.f32.mrb[38].mxu0  ;;  %v12333_v31 = vpack.c.bf16 %v12245_v60, %v12241_v57  ;;  %v12120_v44 = vadd.f32 %v19792_v61, %v11970_v47  ;;  %v16907_v51 = vld [vmem:[%s18434_s17 + $0xa50] ss:$8 sps:$4 sm:$0xff]  }
 0x67c   : > { %10885 = vst.msk [vmem:[#allocation2 + $0x270] sm:$0xff] %vm9838_vm0, %v8890_v45  ;;  %v10783_v28 = vpop.permute.xlu0 %10782  ;;  %v8892_v49 = vpop.f32.mrb[39].mxu0  ;;  %v11971_v63 = vld [vmem:[#allocation2 + $0x288] sm:$0xff] }
 0x67d   : > { %10856 = vst.msk [vmem:[#allocation2 + $0x2c8] sm:$0xff] %vm10321_vm3, %v10783_v28  ;;  %12727 = vmatprep.mubr.bf16.mxu1 %v12333_v31  ;;  %v12121_v41 = vadd.f32 %v19788_v22, %v11971_v63  ;;  %v19939_v45 = vpop.f32.mrb[78].mxu1  ;;  %v12248_v47 = vmax.f32 %v12120_v44, 0.0 }
 0x67e   : > { %12728 = vmatmul.mubr.bf16.gmra.mrb[128].mxu1 %v12332_v40  ;;  %v10785_v57 = vpop.permute.xlu1 %10784  ;;  %v11975_v60 = vld [vmem:[#allocation2 + $0x2a8] sm:$0xff]  ;;  %9102 = vmatmul.mubr.bf16.gmra.mrb[144].mxu0 %v16904_v1  ;;  %21519 = vst [vmem:[#allocation53_spill] sm:$0xff] %v19939_v45  ;;  %v9812_v12 = vpop.f32.mrb[79].mxu1  ;;  %v11982_v40 = vld [vmem:[#allocation2 + $0x2e0] sm:$0xff] }
 0x67f   : > { %10857 = vst.msk [vmem:[#allocation2 + $0x2e8] sm:$0xff] %vm10321_vm3, %v10785_v57  ;;  %v12125_v50 = vadd.f32 %v19788_v22, %v11975_v60  ;;  %9109 = vmatprep.mubr.bf16.mxu0 %v16909_v55  ;;  %v19943_v35 = vpop.f32.mrb[80].mxu1  ;;  %v12249_v28 = vmax.f32 %v12121_v41, 0.0  ;;  %v11978_v55 = vld [vmem:[#allocation2 + $0x2c0] sm:$0xff]  ;;  %v12336_v41 = vpack.c.bf16 %v12252_v33, %v12248_v47 }
 0x680   : > { %21520 = vst [vmem:[#allocation54_spill] sm:$0xff] %v19943_v35  ;;  %v9817_v63 = vpop.f32.mrb[81].mxu1  ;;  %v16912_v12 = vld [vmem:[%s18434_s17 + $0xa64] ss:$8 sps:$4 sm:$0xff]  }
 0x681   : > { %v8895_v31 = vpop.f32.mrb[40].mxu0  ;;  %v12253_v49 = vmax.f32 %v12125_v50, 0.0  ;;  %v19947_v45 = vpop.f32.mrb[82].mxu1  ;;  %v12132_v63 = vadd.f32 %v19792_v61, %v11982_v40 }
 0x682   : > { %10886 = vst.msk [vmem:[#allocation2 + $0x290] sm:$0xff] %vm9838_vm0, %v8895_v31  ;;  %v8897_v1 = vpop.f32.mrb[41].mxu0  ;;  %21521 = vst [vmem:[#allocation55_spill] sm:$0xff] %v19947_v45  ;;  %v9820_v53 = vpop.f32.mrb[83].mxu1  ;;  %v16915_v45 = vld [vmem:[%s18434_s17 + $0xa74] ss:$8 sps:$4 sm:$0xff]  }
 0x683   : > { %v8898_v57 = vpop.f32.mrb[42].mxu0  ;;  %v12337_v60 = vpack.c.bf16 %v12253_v49, %v12249_v28  ;;  %v19954_v31 = vpop.f32.mrb[84].mxu1  ;;  %v12128_v53 = vadd.f32 %v19792_v61, %v11978_v55  ;;  %v12260_v40 = vmax.f32 %v12132_v63, 0.0 }
 0x684   : > { %10887 = vst.msk [vmem:[#allocation2 + $0x2b0] sm:$0xff] %vm9838_vm0, %v8898_v57  ;;  %v10787_v24 = vpop.permute.xlu0 %10786  ;;  %v8900_v35 = vpop.f32.mrb[43].mxu0  ;;  %v11979_v50 = vld [vmem:[#allocation2 + $0x2c8] sm:$0xff]  ;;  %21522 = vst [vmem:[#allocation56_spill] sm:$0xff] %v19954_v31 }
 0x685   : > { %10858 = vst.msk [vmem:[#allocation2 + $0x308] sm:$0xff] %vm10321_vm3, %v10787_v24  ;;  %12735 = vmatprep.mubr.bf16.mxu1 %v12337_v60  ;;  %v12129_v44 = vadd.f32 %v19788_v22, %v11979_v50  ;;  %v9825_v1 = vpop.f32.mrb[85].mxu1  ;;  %v12256_v55 = vmax.f32 %v12128_v53, 0.0 }
 0x686   : > { %12736 = vmatmul.mubr.bf16.gmra.mrb[132].mxu1 %v12336_v41  ;;  %v10789_v28 = vpop.permute.xlu1 %10788  ;;  %v11983_v49 = vld [vmem:[#allocation2 + $0x2e8] sm:$0xff]  ;;  %9110 = vmatmul.mubr.bf16.gmra.mrb[148].mxu0 %v16907_v51  ;;  %v19959_v35 = vpop.f32.mrb[86].mxu1  ;;  %v11990_v41 = vld [vmem:[#allocation2 + $0x320] sm:$0xff] }
 0x687   : > { %10859 = vst.msk [vmem:[#allocation2 + $0x328] sm:$0xff] %vm10321_vm3, %v10789_v28  ;;  %v12133_v33 = vadd.f32 %v19788_v22, %v11983_v49  ;;  %9117 = vmatprep.mubr.bf16.mxu0 %v16912_v12  ;;  %21523 = vst [vmem:[#allocation57_spill] sm:$0xff] %v19959_v35  ;;  %v9828_v47 = vpop.f32.mrb[87].mxu1  ;;  %v12257_v60 = vmax.f32 %v12129_v44, 0.0  ;;  %v16910_v1 = vld [vmem:[%s18434_s17 + $0xa60] ss:$8 sps:$4 sm:$0xff]  }
 0x688   : > { %v19961_v50 = vpop.f32.mrb[88].mxu1  ;;  %v11986_v12 = vld [vmem:[#allocation2 + $0x300] sm:$0xff] }
 0x689   : > { %v8903_v57 = vpop.f32.mrb[44].mxu0  ;;  %v12261_v24 = vmax.f32 %v12133_v33, 0.0  ;;  %21524 = vst [vmem:[#allocation58_spill] sm:$0xff] %v19961_v50  ;;  %v9833_v28 = vpop.f32.mrb[89].mxu1  ;;  %v12340_v33 = vpack.c.bf16 %v12260_v40, %v12256_v55  ;;  %v12140_v50 = vadd.f32 %v19792_v61, %v11990_v41 }
 0x68a   : > { %10888 = vst.msk [vmem:[#allocation2 + $0x2d0] sm:$0xff] %vm9838_vm0, %v8903_v57  ;;  %v8905_v51 = vpop.f32.mrb[45].mxu0  ;;  %v19966_v35 = vpop.f32.mrb[90].mxu1 }
 0x68b   : > { %v8906_v31 = vpop.f32.mrb[46].mxu0  ;;  %v12341_v49 = vpack.c.bf16 %v12261_v24, %v12257_v60  ;;  %21525 = vst [vmem:[#allocation59_spill] sm:$0xff] %v19966_v35  ;;  %v9836_v57 = vpop.f32.mrb[91].mxu1  ;;  %v12136_v51 = vadd.f32 %v19792_v61, %v11986_v12  ;;  %v12268_v40 = vmax.f32 %v12140_v50, 0.0  ;;  %v11994_v12 = vld [vmem:[#allocation2 + $0x340] sm:$0xff] }
 0x68c   : > { %10889 = vst.msk [vmem:[#allocation2 + $0x2f0] sm:$0xff] %vm9838_vm0, %v8906_v31  ;;  %v10791_v63 = vpop.permute.xlu0 %10790  ;;  %v8908_v44 = vpop.f32.mrb[47].mxu0  ;;  %v11987_v47 = vld [vmem:[#allocation2 + $0x308] sm:$0xff] }
 0x68d   : > { %10860 = vst.msk [vmem:[#allocation2 + $0x348] sm:$0xff] %vm10321_vm3, %v10791_v63  ;;  %12743 = vmatprep.mubr.bf16.mxu1 %v12341_v49  ;;  %v12137_v53 = vadd.f32 %v19788_v22, %v11987_v47  ;;  %v11998_v49 = vld [vmem:[#allocation2 + $0x360] sm:$0xff]  ;;  %v12264_v44 = vmax.f32 %v12136_v51, 0.0 }
 0x68e   : > { %12744 = vmatmul.mubr.bf16.gmra.mrb[136].mxu1 %v12340_v33  ;;  %v10793_v60 = vpop.permute.xlu1 %10792  ;;  %v11991_v24 = vld [vmem:[#allocation2 + $0x328] sm:$0xff]  ;;  %9118 = vmatmul.mubr.bf16.gmra.mrb[152].mxu0 %v16910_v1  ;;  %v16913_v33 = vld [vmem:[%s18434_s17 + $0xa70] ss:$8 sps:$4 sm:$0xff]   ;;  %v12148_v50 = vadd.f32 %v19792_v61, %v11998_v49 }
 0x68f   : > { %10861 = vst.msk [vmem:[#allocation2 + $0x368] sm:$0xff] %vm10321_vm3, %v10793_v60  ;;  %v12141_v31 = vadd.f32 %v19788_v22, %v11991_v24  ;;  %9125 = vmatprep.mubr.bf16.mxu0 %v16915_v45  ;;  %v12265_v55 = vmax.f32 %v12137_v53, 0.0  ;;  %v16918_v1 = vld [vmem:[%s18434_s17 + $0xa84] ss:$8 sps:$4 sm:$0xff]   ;;  %v12344_v24 = vpack.c.bf16 %v12268_v40, %v12264_v44 }
 0x690   : > { %v12276_v40 = vmax.f32 %v12148_v50, 0.0 }
 0x691   : > { %v8911_v41 = vpop.f32.mrb[48].mxu0  ;;  %v12269_v28 = vmax.f32 %v12141_v31, 0.0 }
 0x692   : > { %10890 = vst.msk [vmem:[#allocation2 + $0x310] sm:$0xff] %vm9838_vm0, %v8911_v41  ;;  %v8913_v63 = vpop.f32.mrb[49].mxu0  ;;  %v12144_v41 = vadd.f32 %v19792_v61, %v11994_v12 }
 0x693   : > { %v8914_v47 = vpop.f32.mrb[50].mxu0  ;;  %v12345_v57 = vpack.c.bf16 %v12269_v28, %v12265_v55  ;;  %v12006_v63 = vld [vmem:[#allocation2 + $0x3a0] sm:$0xff] }
 0x694   : > { %10891 = vst.msk [vmem:[#allocation2 + $0x330] sm:$0xff] %vm9838_vm0, %v8914_v47  ;;  %v10795_v60 = vpop.permute.xlu0 %10794  ;;  %v8916_v35 = vpop.f32.mrb[51].mxu0  ;;  %v11995_v45 = vld [vmem:[#allocation2 + $0x348] sm:$0xff]  ;;  %v12272_v47 = vmax.f32 %v12144_v41, 0.0 }
 0x695   : > { %10862 = vst.msk [vmem:[#allocation2 + $0x388] sm:$0xff] %vm10321_vm3, %v10795_v60  ;;  %12751 = vmatprep.mubr.bf16.mxu1 %v12345_v57  ;;  %v12145_v53 = vadd.f32 %v19788_v22, %v11995_v45  ;;  %v16916_v57 = vld [vmem:[%s18434_s17 + $0xa80] ss:$8 sps:$4 sm:$0xff]  }
 0x696   : > { %12752 = vmatmul.mubr.bf16.gmra.mrb[140].mxu1 %v12344_v24  ;;  %v10797_v51 = vpop.permute.xlu1 %10796  ;;  %v11999_v31 = vld [vmem:[#allocation2 + $0x368] sm:$0xff]  ;;  %9126 = vmatmul.mubr.bf16.gmra.mrb[156].mxu0 %v16913_v33  ;;  %v12002_v45 = vld [vmem:[#allocation2 + $0x380] sm:$0xff] }
 0x697   : > { %10863 = vst.msk [vmem:[#allocation2 + $0x3a8] sm:$0xff] %vm10321_vm3, %v10797_v51  ;;  %v12149_v35 = vadd.f32 %v19788_v22, %v11999_v31  ;;  %9133 = vmatprep.mubr.bf16.mxu0 %v16918_v1  ;;  %v12273_v28 = vmax.f32 %v12145_v53, 0.0  ;;  %v12348_v51 = vpack.c.bf16 %v12276_v40, %v12272_v47  ;;  %v12156_v1 = vadd.f32 %v19792_v61, %v12006_v63  ;;  %v12014_v47 = vld [vmem:[#allocation2 + $0x3e0] sm:$0xff] }
 0x698   : > { %v21468_v53 = vsub.s32 3, %v19766_v39 }
 0x699   : > { %v8919_v55 = vpop.f32.mrb[52].mxu0  ;;  %v12277_v49 = vmax.f32 %v12149_v35, 0.0 }
 0x69a   : > { %10892 = vst.msk [vmem:[#allocation2 + $0x350] sm:$0xff] %vm9838_vm0, %v8919_v55  ;;  %v8921_v44 = vpop.f32.mrb[53].mxu0  ;;  %v12152_v55 = vadd.f32 %v19792_v61, %v12002_v45  ;;  %v11893_v45 = vld [vmem:[#allocation2 + $0x18] sm:$0xff] }
 0x69b   : > { %v8922_v60 = vpop.f32.mrb[54].mxu0  ;;  %v12349_v24 = vpack.c.bf16 %v12277_v49, %v12273_v28  ;;  %v12284_v28 = vmax.f32 %v12156_v1, 0.0 }
 0x69c   : > { %10893 = vst.msk [vmem:[#allocation2 + $0x370] sm:$0xff] %vm9838_vm0, %v8922_v60  ;;  %v10799_v33 = vpop.permute.xlu0 %10798  ;;  %v8924_v12 = vpop.f32.mrb[55].mxu0  ;;  %v12003_v31 = vld [vmem:[#allocation2 + $0x388] sm:$0xff]  ;;  %v19998_v60 = vrot.slane %v19782_v16, %v21468_v53 }
 0x69d   : > { %10864 = vst.msk [vmem:[#allocation2 + $0x3c8] sm:$0xff] %vm10321_vm3, %v10799_v33  ;;  %12759 = vmatprep.mubr.bf16.mxu1 %v12349_v24  ;;  %v12153_v50 = vadd.f32 %v19788_v22, %v12003_v31  ;;  %v12280_v33 = vmax.f32 %v12152_v55, 0.0  ;;  %v12010_v31 = vld [vmem:[#allocation2 + $0x3c0] sm:$0xff] }
 0x69e   : > { %12760 = vmatmul.mubr.bf16.gmra.mrb[144].mxu1 %v12348_v51  ;;  %v10801_v41 = vpop.permute.xlu1 %10800  ;;  %v12007_v35 = vld [vmem:[#allocation2 + $0x3a8] sm:$0xff]  ;;  %9134 = vmatmul.mubr.bf16.gmra.mrb[160].mxu0 %v16916_v57  ;;  %21526 = vst [vmem:[#allocation60_spill] sm:$0xff] %v19998_v60  ;;  %v11897_v57 = vld [vmem:[#allocation2 + $0x38] sm:$0xff] }
 0x69f   : > { %10865 = vst.msk [vmem:[#allocation2 + $0x3e8] sm:$0xff] %vm10321_vm3, %v10801_v41  ;;  %v12157_v40 = vadd.f32 %v19788_v22, %v12007_v35  ;;  %v12281_v63 = vmax.f32 %v12153_v50, 0.0  ;;  %v12352_v50 = vpack.c.bf16 %v12284_v28, %v12280_v33  ;;  %v12164_v35 = vadd.f32 %v19792_v61, %v12014_v47 }
 0x6a1   : > { %v8927_v49 = vpop.f32.mrb[56].mxu0  ;;  %v12285_v44 = vmax.f32 %v12157_v40, 0.0  ;;  %v12043_v40 = vadd.f32 %v19998_v60, %v11893_v45 }
 0x6a2   : > { %10894 = vst.msk [vmem:[#allocation2 + $0x390] sm:$0xff] %vm9838_vm0, %v8927_v49  ;;  %v8929_v24 = vpop.f32.mrb[57].mxu0  ;;  %v12047_v49 = vadd.f32 %v19998_v60, %v11897_v57 }
 0x6a3   : > { %v8930_v12 = vpop.f32.mrb[58].mxu0  ;;  %v12353_v51 = vpack.c.bf16 %v12285_v44, %v12281_v63  ;;  %v12160_v24 = vadd.f32 %v19792_v61, %v12010_v31  ;;  %v12292_v44 = vmax.f32 %v12164_v35, 0.0  ;;  %v12171_v33 = vmax.f32 %v12043_v40, 0.0  ;;  %v16919_v40 = vld [vmem:[%s21455_s3 + $0xc0] sm:$0xff]  }
 0x6a4   : > { %10895 = vst.msk [vmem:[#allocation2 + $0x3b0] sm:$0xff] %vm9838_vm0, %v8930_v12  ;;  %v8932_v1 = vpop.f32.mrb[59].mxu0  ;;  %v12011_v41 = vld [vmem:[#allocation2 + $0x3c8] sm:$0xff]  ;;  %v12175_v53 = vmax.f32 %v12047_v49, 0.0  ;;  %v16920_v49 = vld [vmem:[%s21455_s3 + $0x80] sm:$0xff]   ;;  %15893 = vmatprep.subr.bf16.mxu1 %v16919_v40 }
 0x6a5   : > { %12767 = vmatprep.mubr.bf16.mxu1 %v12353_v51  ;;  %v12161_v16 = vadd.f32 %v19788_v22, %v12011_v41  ;;  %v12288_v51 = vmax.f32 %v12160_v24, 0.0  ;;  %15894 = vmatpush3.bf16.msra.mxu1 %v16920_v49 }
 0x6a6   : > { %12768 = vmatmul.mubr.bf16.gmra.mrb[148].mxu1 %v12352_v50  ;;  %v12015_v55 = vld [vmem:[#allocation2 + $0x3e8] sm:$0xff]  ;;  %v12299_v61 = vpack.c.bf16 %v12175_v53, %v12171_v33 }
 0x6a7   : > { %v12165_v63 = vadd.f32 %v19788_v22, %v12015_v55  ;;  %v12289_v1 = vmax.f32 %v12161_v16, 0.0  ;;  %v12356_v50 = vpack.c.bf16 %v12292_v44, %v12288_v51  ;;  %v16921_v33 = vld [vmem:[%s21455_s3 + $0xc8] sm:$0xff]  }
 0x6a8   : > { %15895 = vmatprep.subr.bf16.mxu1 %v16921_v33 }
 0x6a9   : > { %v8935_v12 = vpop.f32.mrb[60].mxu0  ;;  %v12293_v28 = vmax.f32 %v12165_v63, 0.0 }
 0x6aa   : > { %10896 = vst.msk [vmem:[#allocation2 + $0x3d0] sm:$0xff] %vm9838_vm0, %v8935_v12  ;;  %v8937_v47 = vpop.f32.mrb[61].mxu0 }
 0x6ab   : > { %v8938_v41 = vpop.f32.mrb[62].mxu0  ;;  %v12357_v45 = vpack.c.bf16 %v12293_v28, %v12289_v1  ;;  %v16922_v47 = vld [vmem:[%s21455_s3 + $0x88] sm:$0xff]  }
 0x6ac   : > { %10897 = vst.msk [vmem:[#allocation2 + $0x3f0] sm:$0xff] %vm9838_vm0, %v8938_v41  ;;  %v8940_v57 = vpop.f32.mrb[63].mxu0  ;;  %15896 = vmatpush3.bf16.msra.mxu1 %v16922_v47 }
 0x6ad   : > { %12775 = vmatprep.mubr.bf16.mxu1 %v12357_v45 }
 0x6ae   : > { %12776 = vmatmul.mubr.bf16.gmra.mrb[152].mxu1 %v12356_v50 }
 0x6af   : > { %12816 = vmatprep.mubr.bf16.mxu1 %v12299_v61 }
 0x6b1   : > { %v8943_v22 = vpop.f32.mrb[64].mxu0 }
 0x6b2   : > { %10930 = vrot.lane.b32.xlu0 %v8943_v22, %s17282_s28  ;;  %v8945_v31 = vpop.f32.mrb[65].mxu0 }
 0x6b3   : > { %v8946_v35 = vpop.f32.mrb[66].mxu0 }
 0x6b4   : > { %10932 = vrot.lane.b32.xlu1 %v8946_v35, %s17282_s28  ;;  %v8948_v16 = vpop.f32.mrb[67].mxu0  ;;  %v16923_v35 = vld [vmem:[%s21455_s3 + $0xd0] sm:$0xff]  }
 0x6b5   : > { %v16924_v16 = vld [vmem:[%s21455_s3 + $0x90] sm:$0xff]   ;;  %15897 = vmatprep.subr.bf16.mxu1 %v16923_v35 }
 0x6b6   : > { %15898 = vmatpush3.bf16.msra.mxu1 %v16924_v16 }
 0x6b9   : > { %v8951_v55 = vpop.f32.mrb[68].mxu0 }
 0x6ba   : > { %10934 = vrot.lane.b32.xlu0 %v8951_v55, %s17282_s28  ;;  %v8953_v53 = vpop.f32.mrb[69].mxu0 }
 0x6bb   : > { %v8954_v24 = vpop.f32.mrb[70].mxu0 }
 0x6bc   : > { %10936 = vrot.lane.b32.xlu1 %v8954_v24, %s17282_s28  ;;  %v8956_v63 = vpop.f32.mrb[71].mxu0 }
 0x6c1   : > { %v8959_v44 = vpop.f32.mrb[72].mxu0 }
 0x6c2   : > { %10938 = vrot.lane.b32.xlu0 %v8959_v44, %s17282_s28  ;;  %v8961_v12 = vpop.f32.mrb[73].mxu0 }
 0x6c3   : > { %v8962_v1 = vpop.f32.mrb[74].mxu0 }
 0x6c4   : > { %10940 = vrot.lane.b32.xlu1 %v8962_v1, %s17282_s28  ;;  %v8964_v28 = vpop.f32.mrb[75].mxu0  ;;  %v16925_v1 = vld [vmem:[%s21455_s3 + $0xd8] sm:$0xff]  }
 0x6c5   : > { %v16926_v28 = vld [vmem:[%s21455_s3 + $0x98] sm:$0xff]   ;;  %15899 = vmatprep.subr.bf16.mxu1 %v16925_v1 }
 0x6c6   : > { %15900 = vmatpush3.bf16.msra.mxu1 %v16926_v28 }
 0x6c9   : > { %v8967_v51 = vpop.f32.mrb[76].mxu0 }
 0x6ca   : > { %10942 = vrot.lane.b32.xlu0 %v8967_v51, %s17282_s28  ;;  %v8969_v41 = vpop.f32.mrb[77].mxu0 }
 0x6cb   : > { %v8970_v45 = vpop.f32.mrb[78].mxu0 }
 0x6cc   : > { %10944 = vrot.lane.b32.xlu1 %v8970_v45, %s17282_s28  ;;  %v8972_v57 = vpop.f32.mrb[79].mxu0 }
 0x6d1   : > { %v8975_v50 = vpop.f32.mrb[80].mxu0 }
 0x6d2   : > { %10946 = vrot.lane.b32.xlu0 %v8975_v50, %s17282_s28  ;;  %v8977_v61 = vpop.f32.mrb[81].mxu0 }
 0x6d3   : > { %v8978_v22 = vpop.f32.mrb[82].mxu0 }
 0x6d4   : > { %10948 = vrot.lane.b32.xlu1 %v8978_v22, %s17282_s28  ;;  %v8980_v31 = vpop.f32.mrb[83].mxu0  ;;  %v16927_v22 = vld [vmem:[%s21455_s3 + $0xe0] sm:$0xff]  }
 0x6d5   : > { %v16928_v31 = vld [vmem:[%s21455_s3 + $0xa0] sm:$0xff]   ;;  %15901 = vmatprep.subr.bf16.mxu1 %v16927_v22 }
 0x6d6   : > { %15902 = vmatpush3.bf16.msra.mxu1 %v16928_v31 }
 0x6d9   : > { %v8983_v40 = vpop.f32.mrb[84].mxu0 }
 0x6da   : > { %10950 = vrot.lane.b32.xlu0 %v8983_v40, %s17282_s28  ;;  %v8985_v49 = vpop.f32.mrb[85].mxu0 }
 0x6db   : > { %v8986_v55 = vpop.f32.mrb[86].mxu0 }
 0x6dc   : > { %10952 = vrot.lane.b32.xlu1 %v8986_v55, %s17282_s28  ;;  %v8988_v53 = vpop.f32.mrb[87].mxu0 }
 0x6e1   : > { %v8991_v24 = vpop.f32.mrb[88].mxu0 }
 0x6e2   : > { %10954 = vrot.lane.b32.xlu0 %v8991_v24, %s17282_s28  ;;  %v8993_v63 = vpop.f32.mrb[89].mxu0 }
 0x6e3   : > { %v8994_v44 = vpop.f32.mrb[90].mxu0 }
 0x6e4   : > { %10956 = vrot.lane.b32.xlu1 %v8994_v44, %s17282_s28  ;;  %v8996_v12 = vpop.f32.mrb[91].mxu0  ;;  %v16929_v44 = vld [vmem:[%s21455_s3 + $0xe8] sm:$0xff]  }
 0x6e5   : > { %v16930_v12 = vld [vmem:[%s21455_s3 + $0xa8] sm:$0xff]   ;;  %15903 = vmatprep.subr.bf16.mxu1 %v16929_v44 }
 0x6e6   : > { %15904 = vmatpush3.bf16.msra.mxu1 %v16930_v12 }
 0x6e9   : > { %v8999_v33 = vpop.f32.mrb[92].mxu0 }
 0x6ea   : > { %10958 = vrot.lane.b32.xlu0 %v8999_v33, %s17282_s28  ;;  %v9001_v47 = vpop.f32.mrb[93].mxu0 }
 0x6eb   : > { %v9002_v51 = vpop.f32.mrb[94].mxu0 }
 0x6ec   : > { %10960 = vrot.lane.b32.xlu1 %v9002_v51, %s17282_s28  ;;  %v9004_v41 = vpop.f32.mrb[95].mxu0 }
 0x6f1   : > { %v20050_v45 = vpop.f32.mrb[96].mxu0 }
 0x6f2   : > { %v9009_v57 = vpop.f32.mrb[97].mxu0 }
 0x6f3   : > { %v20052_v50 = vpop.f32.mrb[98].mxu0 }
 0x6f4   : > { %v9012_v61 = vpop.f32.mrb[99].mxu0 }
 0x6f9   : > { %v20060_v35 = vpop.f32.mrb[100].mxu0 }
 0x6fa   : > { %v9017_v16 = vpop.f32.mrb[101].mxu0 }
 0x6fb   : > { %v20062_v40 = vpop.f32.mrb[102].mxu0 }
 0x6fc   : > { %v9020_v49 = vpop.f32.mrb[103].mxu0 }
 0x701   : > { %v20064_v55 = vpop.f32.mrb[104].mxu0 }
 0x702   : > { %v9025_v53 = vpop.f32.mrb[105].mxu0 }
 0x703   : > { %v20066_v24 = vpop.f32.mrb[106].mxu0 }
 0x704   : > { %v9028_v63 = vpop.f32.mrb[107].mxu0 }
 0x709   : > { %v20074_v1 = vpop.f32.mrb[108].mxu0  ;;  %v15797_v28 = vpop.f32.mrb[92].mxu1 }
 0x70a   : > { %v9033_v33 = vpop.f32.mrb[109].mxu0  ;;  %v15798_v47 = vpop.f32.mrb[93].mxu1 }
 0x70b   : > { %v20076_v51 = vadd.f32 %v15798_v47, %v15797_v28  ;;  %v20078_v41 = vpop.f32.mrb[110].mxu0  ;;  %v15800_v57 = vpop.f32.mrb[94].mxu1  ;;  %v16931_v47 = vld [vmem:[%s21455_s3 + $0xf0] sm:$0xff]  }
 0x70c   : > { %v9036_v61 = vpop.f32.mrb[111].mxu0  ;;  %v15801_v22 = vpop.f32.mrb[95].mxu1  ;;  %15905 = vmatprep.subr.bf16.mxu1 %v16931_v47 }
 0x70d   : > { %21527 = vst [vmem:[#allocation61_spill] sm:$0xff] %v20076_v51  ;;  %v20080_v31 = vadd.f32 %v15801_v22, %v15800_v57  ;;  %v16932_v57 = vld [vmem:[%s21455_s3 + $0xb0] sm:$0xff]  }
 0x70e   : > { %15906 = vmatpush3.bf16.msra.mxu1 %v16932_v57 }
 0x70f   : > { %21528 = vst [vmem:[#allocation62_spill] sm:$0xff] %v20080_v31 }
 0x711   : > { %v20082_v16 = vpop.f32.mrb[112].mxu0  ;;  %v15803_v49 = vpop.f32.mrb[96].mxu1 }
 0x712   : > { %21529 = vst [vmem:[#allocation63_spill] sm:$0xff] %v20082_v16  ;;  %v9041_v53 = vpop.f32.mrb[113].mxu0  ;;  %v15804_v63 = vpop.f32.mrb[97].mxu1 }
 0x713   : > { %v20084_v60 = vadd.f32 %v15804_v63, %v15803_v49  ;;  %v20086_v44 = vpop.f32.mrb[114].mxu0  ;;  %v15806_v33 = vpop.f32.mrb[98].mxu1 }
 0x714   : > { %21531 = vst [vmem:[#allocation65_spill] sm:$0xff] %v20086_v44  ;;  %v9044_v12 = vpop.f32.mrb[115].mxu0  ;;  %v15807_v28 = vpop.f32.mrb[99].mxu1 }
 0x715   : > { %21530 = vst [vmem:[#allocation64_spill] sm:$0xff] %v20084_v60  ;;  %v20094_v61 = vadd.f32 %v15807_v28, %v15806_v33 }
 0x717   : > { %21532 = vst [vmem:[#allocation66_spill] sm:$0xff] %v20094_v61 }
 0x719   : > { %v20096_v22 = vpop.f32.mrb[116].mxu0  ;;  %v15809_v49 = vpop.f32.mrb[100].mxu1 }
 0x71a   : > { %21533 = vst [vmem:[#allocation67_spill] sm:$0xff] %v20096_v22  ;;  %v9049_v53 = vpop.f32.mrb[117].mxu0  ;;  %v15810_v63 = vpop.f32.mrb[101].mxu1 }
 0x71b   : > { %v20098_v60 = vadd.f32 %v15810_v63, %v15809_v49  ;;  %v20100_v12 = vpop.f32.mrb[118].mxu0  ;;  %v15812_v31 = vpop.f32.mrb[102].mxu1 }
 0x71c   : > { %v9052_v51 = vpop.f32.mrb[119].mxu0  ;;  %v15813_v44 = vpop.f32.mrb[103].mxu1 }
 0x71d   : > { %21534 = vst [vmem:[#allocation68_spill] sm:$0xff] %v20098_v60  ;;  %v20102_v16 = vadd.f32 %v15813_v44, %v15812_v31 }
 0x71f   : > { %21535 = vst [vmem:[#allocation69_spill] sm:$0xff] %v20102_v16 }
 0x721   : > { %v20104_v21 = vpop.f32.mrb[120].mxu0  ;;  %v15815_v33 = vpop.f32.mrb[104].mxu1 }
 0x722   : > { %21536 = vst [vmem:[#allocation70_spill] sm:$0xff] %v20104_v21  ;;  %v9057_v28 = vpop.f32.mrb[121].mxu0  ;;  %v15816_v47 = vpop.f32.mrb[105].mxu1 }
 0x723   : > { %v20106_v57 = vadd.f32 %v15816_v47, %v15815_v33  ;;  %v20108_v61 = vpop.f32.mrb[122].mxu0  ;;  %v15818_v53 = vpop.f32.mrb[106].mxu1 }
 0x724   : > { %21538 = vst [vmem:[#allocation72_spill] sm:$0xff] %v20108_v61  ;;  %v15819_v22 = vpop.f32.mrb[107].mxu1  ;;  %v10931_v49 = vpop.permute.xlu0 %10930 }
 0x725   : > { %21537 = vst [vmem:[#allocation71_spill] sm:$0xff] %v20106_v57  ;;  %v20110_v63 = vadd.f32 %v15819_v22, %v15818_v53  ;;  %11026 = vst.msk [vmem:[#allocation2 + $0x10] sm:$0xff] %vm9999_vm1, %v10931_v49  ;;  %v9060_v51 = vpop.f32.mrb[123].mxu0 }
 0x726   : > { %v10933_v60 = vpop.permute.xlu1 %10932 }
 0x727   : > { %21539 = vst [vmem:[#allocation73_spill] sm:$0xff] %v20110_v63  ;;  %11027 = vst.msk [vmem:[#allocation2 + $0x30] sm:$0xff] %vm9999_vm1, %v10933_v60  ;;  %v16933_v60 = vld [vmem:[%s21455_s3 + $0xf8] sm:$0xff]  }
 0x728   : > { %15907 = vmatprep.subr.bf16.mxu1 %v16933_v60 }
 0x729   : > { %v20114_v31 = vpop.f32.mrb[124].mxu0  ;;  %v15821_v44 = vpop.f32.mrb[108].mxu1 }
 0x72a   : > { %v9065_v28 = vpop.f32.mrb[125].mxu0  ;;  %v15822_v16 = vpop.f32.mrb[109].mxu1 }
 0x72b   : > { %v20116_v33 = vadd.f32 %v15822_v16, %v15821_v44  ;;  %v20118_v47 = vpop.f32.mrb[126].mxu0  ;;  %v15824_v57 = vpop.f32.mrb[110].mxu1  ;;  %v16934_v16 = vld [vmem:[%s21455_s3 + $0xb8] sm:$0xff]  }
 0x72c   : > { %21541 = vst [vmem:[#allocation75_spill] sm:$0xff] %v20118_v47  ;;  %v15825_v61 = vpop.f32.mrb[111].mxu1  ;;  %v10935_v21 = vpop.permute.xlu0 %10934  ;;  %15908 = vmatpush3.bf16.msra.mxu1 %v16934_v16 }
 0x72d   : > { %21540 = vst [vmem:[#allocation74_spill] sm:$0xff] %v20116_v33  ;;  %v20120_v22 = vadd.f32 %v15825_v61, %v15824_v57  ;;  %11028 = vst.msk [vmem:[#allocation2 + $0x50] sm:$0xff] %vm9999_vm1, %v10935_v21  ;;  %v9068_v53 = vpop.f32.mrb[127].mxu0 }
 0x72e   : > { %v10937_v49 = vpop.permute.xlu1 %10936 }
 0x72f   : > { %21542 = vst [vmem:[#allocation76_spill] sm:$0xff] %v20120_v22  ;;  %11029 = vst.msk [vmem:[#allocation2 + $0x70] sm:$0xff] %vm9999_vm1, %v10937_v49 }
 0x731   : > { %v9071_v51 = vpop.f32.mrb[128].mxu0  ;;  %v15827_v44 = vpop.f32.mrb[112].mxu1 }
 0x732   : > { %v15828_v28 = vpop.f32.mrb[113].mxu1  ;;  %11090 = vrot.lane.b32.xlu0 %v9071_v51, %s17283_s29  ;;  %v9073_v61 = vpop.f32.mrb[129].mxu0 }
 0x733   : > { %v20131_v21 = vadd.f32 %v15828_v28, %v15827_v44  ;;  %v9074_v57 = vpop.f32.mrb[130].mxu0  ;;  %v15830_v53 = vpop.f32.mrb[114].mxu1 }
 0x734   : > { %v15831_v49 = vpop.f32.mrb[115].mxu1  ;;  %v10939_v22 = vpop.permute.xlu0 %10938  ;;  %11092 = vrot.lane.b32.xlu1 %v9074_v57, %s17283_s29 }
 0x735   : > { %v20134_v33 = vadd.f32 %v15831_v49, %v15830_v53  ;;  %11030 = vst.msk [vmem:[#allocation2 + $0x90] sm:$0xff] %vm9999_vm1, %v10939_v22  ;;  %v9076_v63 = vpop.f32.mrb[131].mxu0 }
 0x736   : > { %v10941_v47 = vpop.permute.xlu1 %10940  ;;  %10962 = vrot.lane.b32.xlu0 %v20050_v45, %s17282_s28 }
 0x737   : > { %11031 = vst.msk [vmem:[#allocation2 + $0xb0] sm:$0xff] %vm9999_vm1, %v10941_v47 }
 0x738   : > { %10964 = vrot.lane.b32.xlu1 %v20052_v50, %s17282_s28 }
 0x739   : > { %v9079_v60 = vpop.f32.mrb[132].mxu0  ;;  %v15833_v16 = vpop.f32.mrb[116].mxu1 }
 0x73a   : > { %v15834_v51 = vpop.f32.mrb[117].mxu1  ;;  %11094 = vrot.lane.b32.xlu0 %v9079_v60, %s17283_s29  ;;  %v9081_v44 = vpop.f32.mrb[133].mxu0 }
 0x73b   : > { %v20143_v28 = vadd.f32 %v15834_v51, %v15833_v16  ;;  %v9082_v61 = vpop.f32.mrb[134].mxu0  ;;  %v15836_v22 = vpop.f32.mrb[118].mxu1 }
 0x73c   : > { %v15837_v63 = vpop.f32.mrb[119].mxu1  ;;  %v10943_v57 = vpop.permute.xlu0 %10942  ;;  %11096 = vrot.lane.b32.xlu1 %v9082_v61, %s17283_s29 }
 0x73d   : > { %v20146_v45 = vadd.f32 %v15837_v63, %v15836_v22  ;;  %11032 = vst.msk [vmem:[#allocation2 + $0xd0] sm:$0xff] %vm9999_vm1, %v10943_v57  ;;  %v9084_v47 = vpop.f32.mrb[135].mxu0 }
 0x73e   : > { %v10945_v50 = vpop.permute.xlu1 %10944  ;;  %11634 = vrot.lane.b32.xlu0 %v19252_v19, %s17283_s29 }
 0x73f   : > { %11033 = vst.msk [vmem:[#allocation2 + $0xf0] sm:$0xff] %vm9999_vm1, %v10945_v50 }
 0x740   : > { %11636 = vrot.lane.b32.xlu1 %v19257_v17, %s17283_s29 }
 0x741   : > { %v9087_v53 = vpop.f32.mrb[136].mxu0  ;;  %v15839_v49 = vpop.f32.mrb[120].mxu1 }
 0x742   : > { %v15840_v60 = vpop.f32.mrb[121].mxu1  ;;  %11098 = vrot.lane.b32.xlu0 %v9087_v53, %s17283_s29  ;;  %v9089_v16 = vpop.f32.mrb[137].mxu0 }
 0x743   : > { %v20155_v51 = vadd.f32 %v15840_v60, %v15839_v49  ;;  %v9090_v44 = vpop.f32.mrb[138].mxu0  ;;  %v15842_v61 = vpop.f32.mrb[122].mxu1 }
 0x744   : > { %v15843_v22 = vpop.f32.mrb[123].mxu1  ;;  %v10947_v63 = vpop.permute.xlu0 %10946  ;;  %11100 = vrot.lane.b32.xlu1 %v9090_v44, %s17283_s29 }
 0x745   : > { %v20158_v19 = vadd.f32 %v15843_v22, %v15842_v61  ;;  %11034 = vst.msk [vmem:[#allocation2 + $0x110] sm:$0xff] %vm9999_vm1, %v10947_v63  ;;  %v9092_v57 = vpop.f32.mrb[139].mxu0 }
 0x746   : > { %v10949_v17 = vpop.permute.xlu1 %10948  ;;  %11794 = vrot.lane.b32.xlu0 %v19893_v4, %s17281_s27 }
 0x747   : > { %11035 = vst.msk [vmem:[#allocation2 + $0x130] sm:$0xff] %vm9999_vm1, %v10949_v17 }
 0x748   : > { %11796 = vrot.lane.b32.xlu1 %v19898_v23, %s17281_s27 }
 0x749   : > { %v9095_v47 = vpop.f32.mrb[140].mxu0  ;;  %v15845_v50 = vpop.f32.mrb[124].mxu1 }
 0x74a   : > { %v15846_v53 = vpop.f32.mrb[125].mxu1  ;;  %11102 = vrot.lane.b32.xlu0 %v9095_v47, %s17283_s29  ;;  %v9097_v49 = vpop.f32.mrb[141].mxu0 }
 0x74b   : > { %v20167_v60 = vadd.f32 %v15846_v53, %v15845_v50  ;;  %v9098_v16 = vpop.f32.mrb[142].mxu0  ;;  %v15848_v44 = vpop.f32.mrb[126].mxu1 }
 0x74c   : > { %v15849_v61 = vpop.f32.mrb[127].mxu1  ;;  %v10951_v22 = vpop.permute.xlu0 %10950  ;;  %11104 = vrot.lane.b32.xlu1 %v9098_v16, %s17283_s29 }
 0x74d   : > { %v20170_v4 = vadd.f32 %v15849_v61, %v15848_v44  ;;  %11036 = vst.msk [vmem:[#allocation2 + $0x150] sm:$0xff] %vm9999_vm1, %v10951_v22  ;;  %v9100_v63 = vpop.f32.mrb[143].mxu0 }
 0x74e   : > { %v10953_v23 = vpop.permute.xlu1 %10952  ;;  %11282 = vrot.lane.b32.xlu0 %v18739_v18, %s17281_s27 }
 0x74f   : > { %11037 = vst.msk [vmem:[#allocation2 + $0x170] sm:$0xff] %vm9999_vm1, %v10953_v23 }
 0x750   : > { %11284 = vrot.lane.b32.xlu1 %v18746_v29, %s17281_s27 }
 0x751   : > { %v15851_v57 = vpop.f32.mrb[128].mxu1  ;;  %v20178_v17 = vpop.f32.mrb[144].mxu0 }
 0x752   : > { %v15852_v47 = vpop.f32.mrb[129].mxu1  ;;  %11478 = vrot.lane.b32.xlu0 %v19091_v7, %s17282_s28  ;;  %v9105_v50 = vpop.f32.mrb[145].mxu0 }
 0x753   : > { %v20182_v53 = vadd.f32 %v15852_v47, %v15851_v57  ;;  %v15854_v49 = vpop.f32.mrb[130].mxu1  ;;  %v20184_v16 = vpop.f32.mrb[146].mxu0 }
 0x754   : > { %v15855_v44 = vpop.f32.mrb[131].mxu1  ;;  %v10955_v18 = vpop.permute.xlu0 %10954  ;;  %11480 = vrot.lane.b32.xlu1 %v19098_v6, %s17282_s28 }
 0x755   : > { %v20188_v61 = vadd.f32 %v15855_v44, %v15854_v49  ;;  %11038 = vst.msk [vmem:[#allocation2 + $0x190] sm:$0xff] %vm9999_vm1, %v10955_v18  ;;  %v9108_v29 = vpop.f32.mrb[147].mxu0 }
 0x756   : > { %v10957_v22 = vpop.permute.xlu1 %10956  ;;  %10966 = vrot.lane.b32.xlu0 %v20060_v35, %s17282_s28 }
 0x757   : > { %11039 = vst.msk [vmem:[#allocation2 + $0x1b0] sm:$0xff] %vm9999_vm1, %v10957_v22 }
 0x758   : > { %10968 = vrot.lane.b32.xlu1 %v20062_v40, %s17282_s28 }
 0x759   : > { %v15857_v7 = vpop.f32.mrb[132].mxu1  ;;  %v9111_v63 = vpop.f32.mrb[148].mxu0 }
 0x75a   : > { %v15858_v23 = vpop.f32.mrb[133].mxu1  ;;  %11638 = vrot.lane.b32.xlu0 %v19262_v52, %s17283_s29  ;;  %v9113_v6 = vpop.f32.mrb[149].mxu0 }
 0x75b   : > { %v20198_v57 = vadd.f32 %v15858_v23, %v15857_v7  ;;  %v15860_v47 = vpop.f32.mrb[134].mxu1  ;;  %v9114_v50 = vpop.f32.mrb[150].mxu0 }
 0x75c   : > { %v15861_v49 = vpop.f32.mrb[135].mxu1  ;;  %v10959_v44 = vpop.permute.xlu0 %10958  ;;  %11640 = vrot.lane.b32.xlu1 %v19267_v11, %s17283_s29 }
 0x75d   : > { %v20202_v35 = vadd.f32 %v15861_v49, %v15860_v47  ;;  %11040 = vst.msk [vmem:[#allocation2 + $0x1d0] sm:$0xff] %vm9999_vm1, %v10959_v44  ;;  %v9116_v40 = vpop.f32.mrb[151].mxu0 }
 0x75e   : > { %v10961_v18 = vpop.permute.xlu1 %10960  ;;  %11126 = vrot.lane.b32.xlu0 %v18604_v3, %s17283_s29 }
 0x75f   : > { %11041 = vst.msk [vmem:[#allocation2 + $0x1f0] sm:$0xff] %vm9999_vm1, %v10961_v18 }
 0x760   : > { %11128 = vrot.lane.b32.xlu1 %v18608_v8, %s17283_s29 }
 0x761   : > { %v15863_v52 = vpop.f32.mrb[136].mxu1  ;;  %v9119_v29 = vpop.f32.mrb[152].mxu0 }
 0x762   : > { %v15864_v22 = vpop.f32.mrb[137].mxu1  ;;  %11798 = vrot.lane.b32.xlu0 %v19905_v59, %s17281_s27  ;;  %v9121_v11 = vpop.f32.mrb[153].mxu0 }
 0x763   : > { %v20212_v7 = vadd.f32 %v15864_v22, %v15863_v52  ;;  %v15866_v23 = vpop.f32.mrb[138].mxu1  ;;  %v9122_v6 = vpop.f32.mrb[154].mxu0 }
 0x764   : > { %v15867_v47 = vpop.f32.mrb[139].mxu1  ;;  %11800 = vrot.lane.b32.xlu1 %v19909_v13, %s17281_s27  ;;  %v9124_v3 = vpop.f32.mrb[155].mxu0 }
 0x765   : > { %v20216_v49 = vadd.f32 %v15867_v47, %v15866_v23 }
 0x766   : > { %11286 = vrot.lane.b32.xlu0 %v18749_v34, %s17281_s27 }
 0x768   : > { %11288 = vrot.lane.b32.xlu1 %v18755_v42, %s17281_s27 }
 0x769   : > { %v15869_v8 = vpop.f32.mrb[140].mxu1  ;;  %v9127_v59 = vpop.f32.mrb[156].mxu0 }
 0x76a   : > { %v15870_v44 = vpop.f32.mrb[141].mxu1  ;;  %11482 = vrot.lane.b32.xlu0 %v19103_v43, %s17282_s28  ;;  %v9129_v40 = vpop.f32.mrb[157].mxu0 }
 0x76b   : > { %v20224_v18 = vadd.f32 %v15870_v44, %v15869_v8  ;;  %v15872_v52 = vpop.f32.mrb[142].mxu1  ;;  %v9130_v13 = vpop.f32.mrb[158].mxu0 }
 0x76c   : > { %v15873_v22 = vpop.f32.mrb[143].mxu1  ;;  %11484 = vrot.lane.b32.xlu1 %v19109_v25, %s17282_s28  ;;  %v9132_v11 = vpop.f32.mrb[159].mxu0 }
 0x76d   : > { %v20228_v34 = vadd.f32 %v15873_v22, %v15872_v52 }
 0x76e   : > { %10970 = vrot.lane.b32.xlu0 %v20064_v55, %s17282_s28 }
 0x770   : > { %10972 = vrot.lane.b32.xlu1 %v20066_v24, %s17282_s28 }
 0x771   : > { %v15875_v42 = vpop.f32.mrb[144].mxu1  ;;  %v20234_v43 = vpop.f32.mrb[160].mxu0 }
 0x772   : > { %v15876_v23 = vpop.f32.mrb[145].mxu1  ;;  %11106 = vrot.lane.b32.xlu0 %v20178_v17, %s17283_s29  ;;  %v9137_v47 = vpop.f32.mrb[161].mxu0 }
 0x773   : > { %v20238_v3 = vadd.f32 %v15876_v23, %v15875_v42  ;;  %v15878_v25 = vpop.f32.mrb[146].mxu1  ;;  %v20240_v8 = vpop.f32.mrb[162].mxu0 }
 0x774   : > { %v15879_v44 = vpop.f32.mrb[147].mxu1  ;;  %11108 = vrot.lane.b32.xlu1 %v20184_v16, %s17283_s29  ;;  %v9140_v55 = vpop.f32.mrb[163].mxu0 }
 0x775   : > { %v20244_v40 = vadd.f32 %v15879_v44, %v15878_v25 }
 0x776   : > { %11642 = vrot.lane.b32.xlu0 %v19272_v56, %s17283_s29 }
 0x778   : > { %11644 = vrot.lane.b32.xlu1 %v19277_v5, %s17283_s29 }
 0x779   : > { %v15881_v24 = vpop.f32.mrb[148].mxu1 }
 0x77a   : > { %v15882_v17 = vpop.f32.mrb[149].mxu1  ;;  %11110 = vrot.lane.b32.xlu0 %v9111_v63, %s17283_s29 }
 0x77b   : > { %v20251_v52 = vadd.f32 %v15882_v17, %v15881_v24  ;;  %v15884_v22 = vpop.f32.mrb[150].mxu1  ;;  %v11909_v24 = vld [vmem:[#allocation2 + $0x98] sm:$0xff] }
 0x77c   : > { %v15885_v11 = vpop.f32.mrb[151].mxu1  ;;  %11112 = vrot.lane.b32.xlu1 %v9114_v50, %s17283_s29  ;;  %v21547_v50 = vld [vmem:[#allocation21_spill] sm:$0xff]  ;;  %v11913_v17 = vld [vmem:[#allocation2 + $0xb8] sm:$0xff] }
 0x77d   : > { %v20254_v16 = vadd.f32 %v15885_v11, %v15884_v22 }
 0x77e   : > { %11130 = vrot.lane.b32.xlu0 %v18614_v15, %s17283_s29 }
 0x780   : > { %11132 = vrot.lane.b32.xlu1 %v18618_v20, %s17283_s29  ;;  %v12030_v20 = vsub.s32 2, %v19766_v39 }
 0x781   : > { %v15887_v56 = vpop.f32.mrb[152].mxu1 }
 0x782   : > { %v15888_v5 = vpop.f32.mrb[153].mxu1  ;;  %11114 = vrot.lane.b32.xlu0 %v9119_v29, %s17283_s29 }
 0x783   : > { %v20261_v42 = vadd.f32 %v15888_v5, %v15887_v56  ;;  %v15890_v63 = vpop.f32.mrb[154].mxu1 }
 0x784   : > { %v15891_v23 = vpop.f32.mrb[155].mxu1  ;;  %11116 = vrot.lane.b32.xlu1 %v9122_v6, %s17283_s29  ;;  %v21548_v6 = vld [vmem:[#allocation65_spill] sm:$0xff] }
 0x785   : > { %v20264_v47 = vadd.f32 %v15891_v23, %v15890_v63 }
 0x786   : > { %11802 = vrot.lane.b32.xlu0 %v19913_v37, %s17281_s27 }
 0x788   : > { %11804 = vrot.lane.b32.xlu1 %v19920_v38, %s17281_s27 }
 0x78a   : > { %11118 = vrot.lane.b32.xlu0 %v9127_v59, %s17283_s29 }
 0x78c   : > { %11120 = vrot.lane.b32.xlu1 %v9130_v13, %s17283_s29 }
 0x78e   : > { %11290 = vrot.lane.b32.xlu0 %v18759_v48, %s17281_s27 }
 0x790   : > { %11292 = vrot.lane.b32.xlu1 %v18765_v58, %s17281_s27 }
 0x792   : > { %11486 = vrot.lane.b32.xlu0 %v19114_v62, %s17282_s28 }
 0x794   : > { %11488 = vrot.lane.b32.xlu1 %v19119_v46, %s17282_s28 }
 0x796   : > { %10974 = vrot.lane.b32.xlu0 %v20074_v1, %s17282_s28 }
 0x798   : > { %10976 = vrot.lane.b32.xlu1 %v20078_v41, %s17282_s28 }
 0x79a   : > { %11646 = vrot.lane.b32.xlu0 %v19282_v36, %s17283_s29  ;;  %v21544_v36 = vld [vmem:[#allocation60_spill] sm:$0xff] }
 0x79b   : > { %v12059_v63 = vadd.f32 %v21544_v36, %v11909_v24  ;;  %v12063_v23 = vadd.f32 %v21544_v36, %v11913_v17  ;;  %v21557_v17 = vld [vmem:[#allocation24_spill] sm:$0xff] }
 0x79c   : > { %11648 = vrot.lane.b32.xlu1 %v19287_v0, %s17283_s29 }
 0x79e   : > { %11134 = vrot.lane.b32.xlu0 %v18624_v27, %s17283_s29 }
 0x7a0   : > { %11136 = vrot.lane.b32.xlu1 %v18628_v32, %s17283_s29  ;;  %v17255_v32 = vld [vmem:[%s21454_s2] sm:$0xf] }
 0x7a1   : > { %v20313_v58 = vrot.slane %v17255_v32, %v12030_v20  ;;  %v21551_v32 = vld [vmem:[#allocation22_spill] sm:$0xff] }
 0x7a2   : > { %11806 = vrot.lane.b32.xlu0 %v19925_v30, %s17281_s27  ;;  %v21545_v30 = vld [vmem:[#allocation23_spill] sm:$0xff] }
 0x7a4   : > { %v11091_v15 = vpop.permute.xlu0 %11090  ;;  %11808 = vrot.lane.b32.xlu1 %v19927_v9, %s17281_s27  ;;  %v21546_v9 = vld [vmem:[#allocation63_spill] sm:$0xff] }
 0x7a5   : > { %11186 = vst.msk [vmem:[#allocation2 + $0x10] sm:$0xff] %vm10160_vm2, %v11091_v15  ;;  %v21549_v15 = vld [vmem:[#allocation25_spill] sm:$0xff] }
 0x7a6   : > { %11346 = vst.msk [vmem:[#allocation2 + $0x10] sm:$0xff] %vm10321_vm3, %v18847_v54  ;;  %v11093_v48 = vpop.permute.xlu1 %11092  ;;  %11294 = vrot.lane.b32.xlu0 %v18769_v2, %s17281_s27  ;;  %v11901_v54 = vld [vmem:[#allocation2 + $0x58] sm:$0xff] }
 0x7a7   : > { %11187 = vst.msk [vmem:[#allocation2 + $0x30] sm:$0xff] %vm10160_vm2, %v11093_v48  ;;  %v12051_v0 = vadd.f32 %v21544_v36, %v11901_v54  ;;  %v21550_v48 = vld [vmem:[#allocation38_spill] sm:$0xff]  ;;  %v21552_v54 = vld [vmem:[#allocation39_spill] sm:$0xff] }
 0x7a8   : > { %11347 = vst.msk [vmem:[#allocation2 + $0x30] sm:$0xff] %vm10321_vm3, %v18835_v26  ;;  %v10963_v27 = vpop.permute.xlu0 %10962  ;;  %11296 = vrot.lane.b32.xlu1 %v18775_v14, %s17281_s27  ;;  %v11905_v26 = vld [vmem:[#allocation2 + $0x78] sm:$0xff]  ;;  %v21543_v14 = vld [vmem:[#allocation31_spill] sm:$0xff] }
 0x7a9   : > { %11042 = vst.msk [vmem:[#allocation2 + $0x210] sm:$0xff] %vm9999_vm1, %v10963_v27  ;;  %v12055_v37 = vadd.f32 %v21544_v36, %v11905_v26  ;;  %v12179_v59 = vmax.f32 %v12051_v0, 0.0  ;;  %v21553_v0 = vld [vmem:[#allocation5_spill] sm:$0xff] }
 0x7aa   : > { %v10965_v2 = vpop.permute.xlu1 %10964  ;;  %11490 = vrot.lane.b32.xlu0 %v19124_v10, %s17282_s28 }
 0x7ab   : > { %11043 = vst.msk [vmem:[#allocation2 + $0x230] sm:$0xff] %vm9999_vm1, %v10965_v2  ;;  %v12183_v13 = vmax.f32 %v12055_v37, 0.0 }
 0x7ac   : > { %v11095_v62 = vpop.permute.xlu0 %11094  ;;  %11492 = vrot.lane.b32.xlu1 %v21543_v14, %s17282_s28  ;;  %v12191_v14 = vmax.f32 %v12063_v23, 0.0 }
 0x7ad   : > { %v11892_v46 = vld [vmem:[#allocation2 + $0x10] sm:$0xff]  ;;  %11188 = vst.msk [vmem:[#allocation2 + $0x50] sm:$0xff] %vm10160_vm2, %v11095_v62  ;;  %v12303_v56 = vpack.c.bf16 %v12183_v13, %v12179_v59  ;;  %v12187_v62 = vmax.f32 %v12059_v63, 0.0 }
 0x7ae   : > { %v12042_v38 = vadd.f32 %v20313_v58, %v11892_v46  ;;  %11348 = vst.msk [vmem:[#allocation2 + $0x50] sm:$0xff] %vm10321_vm3, %v21545_v30  ;;  %v11097_v10 = vpop.permute.xlu1 %11096  ;;  %10978 = vrot.lane.b32.xlu0 %v21546_v9, %s17282_s28  ;;  %v11917_v30 = vld [vmem:[#allocation2 + $0xd8] sm:$0xff]  ;;  %v21555_v13 = vld [vmem:[#allocation27_spill] sm:$0xff] }
 0x7af   : > { %v11896_v1 = vld [vmem:[#allocation2 + $0x30] sm:$0xff]  ;;  %11189 = vst.msk [vmem:[#allocation2 + $0x70] sm:$0xff] %vm10160_vm2, %v11097_v10  ;;  %v11921_v10 = vld [vmem:[#allocation2 + $0xf8] sm:$0xff] }
 0x7b0   : > { %v12046_v41 = vadd.f32 %v20313_v58, %v11896_v1  ;;  %11349 = vst.msk [vmem:[#allocation2 + $0x70] sm:$0xff] %vm10321_vm3, %v21547_v50  ;;  %v11635_v29 = vpop.permute.xlu0 %11634  ;;  %10980 = vrot.lane.b32.xlu1 %v21548_v6, %s17282_s28  ;;  %v12170_v25 = vmax.f32 %v12042_v38, 0.0  ;;  %v21554_v1 = vld [vmem:[#allocation6_spill] sm:$0xff]  ;;  %v12307_v50 = vpack.c.bf16 %v12191_v14, %v12187_v62  ;;  %v12067_v6 = vadd.f32 %v21544_v36, %v11917_v30 }
 0x7b1   : > { %11714 = vst.msk [vmem:[#allocation2 + $0x218] sm:$0xff] %vm10160_vm2, %v11635_v29  ;;  %v12071_v59 = vadd.f32 %v21544_v36, %v11921_v10 }
 0x7b2   : > { %v12174_v44 = vmax.f32 %v12046_v41, 0.0  ;;  %v11637_v55 = vpop.permute.xlu1 %11636  ;;  %11122 = vrot.lane.b32.xlu0 %v20234_v43, %s17283_s29 }
 0x7b3   : > { %11715 = vst.msk [vmem:[#allocation2 + $0x238] sm:$0xff] %vm10160_vm2, %v11637_v55  ;;  %v12199_v63 = vmax.f32 %v12071_v59, 0.0 }
 0x7b4   : > { %v12298_v22 = vpack.c.bf16 %v12174_v44, %v12170_v25  ;;  %v11099_v11 = vpop.permute.xlu0 %11098  ;;  %11124 = vrot.lane.b32.xlu1 %v20240_v8, %s17283_s29  ;;  %v21556_v44 = vld [vmem:[#allocation52_spill] sm:$0xff] }
 0x7b5   : > { %11190 = vst.msk [vmem:[#allocation2 + $0x90] sm:$0xff] %vm10160_vm2, %v11099_v11  ;;  %v11900_v5 = vld [vmem:[#allocation2 + $0x50] sm:$0xff]  ;;  %v21558_v11 = vld [vmem:[#allocation53_spill] sm:$0xff] }
 0x7b6   : > { %11350 = vst.msk [vmem:[#allocation2 + $0x90] sm:$0xff] %vm10321_vm3, %v21549_v15  ;;  %12817 = vmatmul.mubr.bf16.vlgmr.msra.gmra.mrb[156].mxu1 %v12298_v22  ;;  %v11101_v43 = vpop.permute.xlu1 %11100  ;;  %11650 = vrot.lane.b32.xlu0 %v21550_v48, %s17283_s29  ;;  %v12050_v27 = vadd.f32 %v20313_v58, %v11900_v5  ;;  %v12195_v5 = vmax.f32 %v12067_v6, 0.0  ;;  %v21559_v15 = vld [vmem:[#allocation13_spill] sm:$0xff]  ;;  %v21563_v6 = vld [vmem:[#allocation67_spill] sm:$0xff] }
 0x7b7   : > { %11191 = vst.msk [vmem:[#allocation2 + $0xb0] sm:$0xff] %vm10160_vm2, %v11101_v43  ;;  %12824 = vmatprep.mubr.bf16.mxu1 %v12303_v56  ;;  %v11904_v8 = vld [vmem:[#allocation2 + $0x70] sm:$0xff] }
 0x7b8   : > { %11351 = vst.msk [vmem:[#allocation2 + $0xb0] sm:$0xff] %vm10321_vm3, %v21551_v32  ;;  %v11795_v2 = vpop.permute.xlu0 %11794  ;;  %11652 = vrot.lane.b32.xlu1 %v21552_v54, %s17283_s29  ;;  %v12054_v26 = vadd.f32 %v20313_v58, %v11904_v8  ;;  %v12178_v37 = vmax.f32 %v12050_v27, 0.0  ;;  %v11925_v27 = vld [vmem:[#allocation2 + $0x118] sm:$0xff] }
 0x7b9   : > { %11874 = vst.msk [vmem:[#allocation2 + $0x218] sm:$0xff] %vm10321_vm3, %v11795_v2  ;;  %v11929_v8 = vld [vmem:[#allocation2 + $0x138] sm:$0xff]  ;;  %v21560_v2 = vld [vmem:[#allocation14_spill] sm:$0xff]  ;;  %v12075_v14 = vadd.f32 %v21544_v36, %v11925_v27 }
 0x7ba   : > { %v11797_v46 = vpop.permute.xlu1 %11796  ;;  %11138 = vrot.lane.b32.xlu0 %v21553_v0, %s17283_s29  ;;  %v12182_v38 = vmax.f32 %v12054_v26, 0.0  ;;  %v12311_v26 = vpack.c.bf16 %v12199_v63, %v12195_v5 }
 0x7bb   : > { %11875 = vst.msk [vmem:[#allocation2 + $0x238] sm:$0xff] %vm10321_vm3, %v11797_v46  ;;  %v12079_v46 = vadd.f32 %v21544_v36, %v11929_v8  ;;  %v21569_v8 = vld [vmem:[#allocation55_spill] sm:$0xff] }
 0x7bc   : > { %v11103_v9 = vpop.permute.xlu0 %11102  ;;  %11140 = vrot.lane.b32.xlu1 %v21554_v1, %s17283_s29  ;;  %v12302_v41 = vpack.c.bf16 %v12182_v38, %v12178_v37  ;;  %v21561_v37 = vld [vmem:[#allocation32_spill] sm:$0xff] }
 0x7bd   : > { %11192 = vst.msk [vmem:[#allocation2 + $0xd0] sm:$0xff] %vm10160_vm2, %v11103_v9  ;;  %v11908_v29 = vld [vmem:[#allocation2 + $0x90] sm:$0xff]  ;;  %v21562_v9 = vld [vmem:[#allocation33_spill] sm:$0xff] }
 0x7be   : > { %11352 = vst.msk [vmem:[#allocation2 + $0xd0] sm:$0xff] %vm10321_vm3, %v21555_v13  ;;  %12825 = vmatmul.mubr.bf16.gmra.mrb[160].mxu1 %v12302_v41  ;;  %v11105_v25 = vpop.permute.xlu1 %11104  ;;  %11810 = vrot.lane.b32.xlu0 %v21556_v44, %s17281_s27  ;;  %v12058_v55 = vadd.f32 %v20313_v58, %v11908_v29  ;;  %v12203_v41 = vmax.f32 %v12075_v14, 0.0  ;;  %v21572_v14 = vld [vmem:[#allocation34_spill] sm:$0xff] }
 0x7bf   : > { %11193 = vst.msk [vmem:[#allocation2 + $0xf0] sm:$0xff] %vm10160_vm2, %v11105_v25  ;;  %12832 = vmatprep.mubr.bf16.mxu1 %v12307_v50  ;;  %v11912_v24 = vld [vmem:[#allocation2 + $0xb0] sm:$0xff]  ;;  %v12207_v50 = vmax.f32 %v12079_v46, 0.0 }
 0x7c0   : > { %11353 = vst.msk [vmem:[#allocation2 + $0xf0] sm:$0xff] %vm10321_vm3, %v21557_v17  ;;  %v20371_v22 = vpop.permute.xlu0 %11282  ;;  %11812 = vrot.lane.b32.xlu1 %v21558_v11, %s17281_s27  ;;  %v12062_v56 = vadd.f32 %v20313_v58, %v11912_v24  ;;  %v12186_v43 = vmax.f32 %v12058_v55, 0.0  ;;  %v21564_v17 = vld [vmem:[#allocation40_spill] sm:$0xff] }
 0x7c1   : > { %v12315_v55 = vpack.c.bf16 %v12207_v50, %v12203_v41  ;;  %v21577_v41 = vld [vmem:[#allocation42_spill] sm:$0xff] }
 0x7c2   : > { %v20376_v23 = vpop.permute.xlu1 %11284  ;;  %11298 = vrot.lane.b32.xlu0 %v21559_v15, %s17281_s27  ;;  %v12190_v48 = vmax.f32 %v12062_v56, 0.0  ;;  %v21565_v56 = vld [vmem:[#allocation41_spill] sm:$0xff]  ;;  %v21567_v15 = vld [vmem:[#allocation8_spill] sm:$0xff]  ;;  %v21578_v50 = vld [vmem:[#allocation26_spill] sm:$0xff] }
 0x7c4   : > { %v11479_v32 = vpop.permute.xlu0 %11478  ;;  %11300 = vrot.lane.b32.xlu1 %v21560_v2, %s17281_s27  ;;  %v12306_v54 = vpack.c.bf16 %v12190_v48, %v12186_v43  ;;  %v21568_v48 = vld [vmem:[#allocation54_spill] sm:$0xff]  ;;  %v21570_v2 = vld [vmem:[#allocation15_spill] sm:$0xff] }
 0x7c5   : > { %11556 = vst.msk [vmem:[#allocation2 + $0x258] sm:$0xff] %vm9999_vm1, %v11479_v32  ;;  %v11916_v62 = vld [vmem:[#allocation2 + $0xd0] sm:$0xff] }
 0x7c6   : > { %12833 = vmatmul.mubr.bf16.gmra.mrb[164].mxu1 %v12306_v54  ;;  %v11481_v0 = vpop.permute.xlu1 %11480  ;;  %11494 = vrot.lane.b32.xlu0 %v21561_v37, %s17282_s28  ;;  %v12066_v38 = vadd.f32 %v20313_v58, %v11916_v62 }
 0x7c7   : > { %11557 = vst.msk [vmem:[#allocation2 + $0x278] sm:$0xff] %vm9999_vm1, %v11481_v0  ;;  %12840 = vmatprep.mubr.bf16.mxu1 %v12311_v26  ;;  %v11920_v30 = vld [vmem:[#allocation2 + $0xf0] sm:$0xff]  ;;  %v21571_v26 = vld [vmem:[#allocation16_spill] sm:$0xff] }
 0x7c8   : > { %v10967_v10 = vpop.permute.xlu0 %10966  ;;  %11496 = vrot.lane.b32.xlu1 %v21562_v9, %s17282_s28  ;;  %v12070_v1 = vadd.f32 %v20313_v58, %v11920_v30  ;;  %v12194_v59 = vmax.f32 %v12066_v38, 0.0  ;;  %v21573_v0 = vld [vmem:[#allocation35_spill] sm:$0xff]  ;;  %v21574_v38 = vld [vmem:[#allocation70_spill] sm:$0xff]  ;;  %v21576_v9 = vld [vmem:[#allocation29_spill] sm:$0xff] }
 0x7c9   : > { %11044 = vst.msk [vmem:[#allocation2 + $0x250] sm:$0xff] %vm9999_vm1, %v10967_v10  ;;  %v21575_v10 = vld [vmem:[#allocation72_spill] sm:$0xff] }
 0x7ca   : > { %v10969_v29 = vpop.permute.xlu1 %10968  ;;  %10982 = vrot.lane.b32.xlu0 %v21563_v6, %s17282_s28  ;;  %v12198_v13 = vmax.f32 %v12070_v1, 0.0  ;;  %v21579_v6 = vld [vmem:[#allocation43_spill] sm:$0xff] }
 0x7cb   : > { %11045 = vst.msk [vmem:[#allocation2 + $0x270] sm:$0xff] %vm9999_vm1, %v10969_v29 }
 0x7cc   : > { %v11639_v25 = vpop.permute.xlu0 %11638  ;;  %10984 = vrot.lane.b32.xlu1 %v20100_v12, %s17282_s28  ;;  %v12310_v44 = vpack.c.bf16 %v12198_v13, %v12194_v59  ;;  %v21566_v12 = vld [vmem:[#allocation7_spill] sm:$0xff]  ;;  %v21580_v13 = vld [vmem:[#allocation9_spill] sm:$0xff] }
 0x7cd   : > { %11716 = vst.msk [vmem:[#allocation2 + $0x258] sm:$0xff] %vm10160_vm2, %v11639_v25  ;;  %v11933_v25 = vld [vmem:[#allocation2 + $0x158] sm:$0xff] }
 0x7ce   : > { %12841 = vmatmul.mubr.bf16.gmra.mrb[168].mxu1 %v12310_v44  ;;  %v11641_v24 = vpop.permute.xlu1 %11640  ;;  %11654 = vrot.lane.b32.xlu0 %v21564_v17, %s17283_s29  ;;  %v11937_v44 = vld [vmem:[#allocation2 + $0x178] sm:$0xff] }
 0x7cf   : > { %11717 = vst.msk [vmem:[#allocation2 + $0x278] sm:$0xff] %vm10160_vm2, %v11641_v24  ;;  %12848 = vmatprep.mubr.bf16.mxu1 %v12315_v55  ;;  %v21581_v24 = vld [vmem:[#allocation10_spill] sm:$0xff] }
 0x7d0   : > { %v11127_v11 = vpop.permute.xlu0 %11126  ;;  %11656 = vrot.lane.b32.xlu1 %v21565_v56, %s17283_s29  ;;  %v12087_v56 = vadd.f32 %v21544_v36, %v11937_v44  ;;  %v21590_v44 = vld [vmem:[#allocation49_spill] sm:$0xff] }
 0x7d1   : > { %11204 = vst.msk [vmem:[#allocation2 + $0x250] sm:$0xff] %vm10160_vm2, %v11127_v11  ;;  %v12083_v11 = vadd.f32 %v21544_v36, %v11933_v25 }
 0x7d2   : > { %v11129_v5 = vpop.permute.xlu1 %11128  ;;  %11142 = vrot.lane.b32.xlu0 %v21566_v12, %s17283_s29 }
 0x7d3   : > { %11205 = vst.msk [vmem:[#allocation2 + $0x270] sm:$0xff] %vm10160_vm2, %v11129_v5  ;;  %v21582_v5 = vld [vmem:[#allocation30_spill] sm:$0xff] }
 0x7d4   : > { %v11799_v63 = vpop.permute.xlu0 %11798  ;;  %11144 = vrot.lane.b32.xlu1 %v21567_v15, %s17283_s29 }
 0x7d5   : > { %11876 = vst.msk [vmem:[#allocation2 + $0x258] sm:$0xff] %vm10321_vm3, %v11799_v63  ;;  %v21583_v63 = vld [vmem:[#allocation56_spill] sm:$0xff] }
 0x7d6   : > { %v11801_v43 = vpop.permute.xlu1 %11800  ;;  %11814 = vrot.lane.b32.xlu0 %v21568_v48, %s17281_s27  ;;  %v21584_v48 = vld [vmem:[#allocation28_spill] sm:$0xff] }
 0x7d7   : > { %11877 = vst.msk [vmem:[#allocation2 + $0x278] sm:$0xff] %vm10321_vm3, %v11801_v43 }
 0x7d8   : > { %v11287_v27 = vpop.permute.xlu0 %11286  ;;  %11816 = vrot.lane.b32.xlu1 %v21569_v8, %s17281_s27  ;;  %v21585_v8 = vld [vmem:[#allocation57_spill] sm:$0xff] }
 0x7d9   : > { %11364 = vst.msk [vmem:[#allocation2 + $0x250] sm:$0xff] %vm10321_vm3, %v11287_v27 }
 0x7da   : > { %v11289_v32 = vpop.permute.xlu1 %11288  ;;  %11302 = vrot.lane.b32.xlu0 %v21570_v2, %s17281_s27  ;;  %v12211_v2 = vmax.f32 %v12083_v11, 0.0 }
 0x7db   : > { %11365 = vst.msk [vmem:[#allocation2 + $0x270] sm:$0xff] %vm10321_vm3, %v11289_v32 }
 0x7dc   : > { %v11483_v54 = vpop.permute.xlu0 %11482  ;;  %11304 = vrot.lane.b32.xlu1 %v21571_v26, %s17281_s27 }
 0x7dd   : > { %11558 = vst.msk [vmem:[#allocation2 + $0x298] sm:$0xff] %vm9999_vm1, %v11483_v54  ;;  %v12215_v54 = vmax.f32 %v12087_v56, 0.0 }
 0x7de   : > { %v11485_v62 = vpop.permute.xlu1 %11484  ;;  %11498 = vrot.lane.b32.xlu0 %v21572_v14, %s17282_s28 }
 0x7df   : > { %11559 = vst.msk [vmem:[#allocation2 + $0x2b8] sm:$0xff] %vm9999_vm1, %v11485_v62  ;;  %v21586_v62 = vld [vmem:[#allocation17_spill] sm:$0xff] }
 0x7e0   : > { %v10971_v46 = vpop.permute.xlu0 %10970  ;;  %11500 = vrot.lane.b32.xlu1 %v21573_v0, %s17282_s28  ;;  %v11941_v0 = vld [vmem:[#allocation2 + $0x198] sm:$0xff] }
 0x7e1   : > { %11046 = vst.msk [vmem:[#allocation2 + $0x290] sm:$0xff] %vm9999_vm1, %v10971_v46 }
 0x7e2   : > { %v10973_v37 = vpop.permute.xlu1 %10972  ;;  %10986 = vrot.lane.b32.xlu0 %v21574_v38, %s17282_s28 }
 0x7e3   : > { %11047 = vst.msk [vmem:[#allocation2 + $0x2b0] sm:$0xff] %vm9999_vm1, %v10973_v37  ;;  %v11945_v37 = vld [vmem:[#allocation2 + $0x1b8] sm:$0xff] }
 0x7e4   : > { %v11107_v30 = vpop.permute.xlu0 %11106  ;;  %10988 = vrot.lane.b32.xlu1 %v21575_v10, %s17282_s28 }
 0x7e5   : > { %11194 = vst.msk [vmem:[#allocation2 + $0x110] sm:$0xff] %vm10160_vm2, %v11107_v30  ;;  %v21587_v30 = vld [vmem:[#allocation18_spill] sm:$0xff] }
 0x7e6   : > { %11354 = vst.msk [vmem:[#allocation2 + $0x110] sm:$0xff] %vm10321_vm3, %v21576_v9  ;;  %v11109_v1 = vpop.permute.xlu1 %11108  ;;  %11658 = vrot.lane.b32.xlu0 %v21577_v41, %s17283_s29  ;;  %v12319_v9 = vpack.c.bf16 %v12215_v54, %v12211_v2  ;;  %v12091_v41 = vadd.f32 %v21544_v36, %v11941_v0 }
 0x7e7   : > { %11195 = vst.msk [vmem:[#allocation2 + $0x130] sm:$0xff] %vm10160_vm2, %v11109_v1 }
 0x7e8   : > { %11355 = vst.msk [vmem:[#allocation2 + $0x130] sm:$0xff] %vm10321_vm3, %v21578_v50  ;;  %v11643_v29 = vpop.permute.xlu0 %11642  ;;  %11660 = vrot.lane.b32.xlu1 %v21579_v6, %s17283_s29  ;;  %v12095_v50 = vadd.f32 %v21544_v36, %v11945_v37  ;;  %v12219_v11 = vmax.f32 %v12091_v41, 0.0  ;;  %v21595_v37 = vld [vmem:[#allocation51_spill] sm:$0xff] }
 0x7e9   : > { %11718 = vst.msk [vmem:[#allocation2 + $0x298] sm:$0xff] %vm10160_vm2, %v11643_v29  ;;  %v21588_v29 = vld [vmem:[#allocation48_spill] sm:$0xff] }
 0x7ea   : > { %v11645_v59 = vpop.permute.xlu1 %11644  ;;  %11146 = vrot.lane.b32.xlu0 %v21580_v13, %s17283_s29  ;;  %v12223_v56 = vmax.f32 %v12095_v50, 0.0  ;;  %v21597_v50 = vld [vmem:[#allocation11_spill] sm:$0xff] }
 0x7eb   : > { %11719 = vst.msk [vmem:[#allocation2 + $0x2b8] sm:$0xff] %vm10160_vm2, %v11645_v59  ;;  %v21589_v59 = vld [vmem:[#allocation36_spill] sm:$0xff] }
 0x7ec   : > { %v11111_v55 = vpop.permute.xlu0 %11110  ;;  %11148 = vrot.lane.b32.xlu1 %v21581_v24, %s17283_s29  ;;  %v21591_v24 = vld [vmem:[#allocation37_spill] sm:$0xff] }
 0x7ed   : > { %11196 = vst.msk [vmem:[#allocation2 + $0x150] sm:$0xff] %vm10160_vm2, %v11111_v55  ;;  %v11924_v17 = vld [vmem:[#allocation2 + $0x110] sm:$0xff] }
 0x7ee   : > { %11356 = vst.msk [vmem:[#allocation2 + $0x150] sm:$0xff] %vm10321_vm3, %v21582_v5  ;;  %v11113_v12 = vpop.permute.xlu1 %11112  ;;  %11818 = vrot.lane.b32.xlu0 %v21583_v63, %s17281_s27  ;;  %v12074_v15 = vadd.f32 %v20313_v58, %v11924_v17 }
 0x7ef   : > { %11197 = vst.msk [vmem:[#allocation2 + $0x170] sm:$0xff] %vm10160_vm2, %v11113_v12  ;;  %v11928_v43 = vld [vmem:[#allocation2 + $0x130] sm:$0xff] }
 0x7f0   : > { %11357 = vst.msk [vmem:[#allocation2 + $0x170] sm:$0xff] %vm10321_vm3, %v21584_v48  ;;  %v11131_v27 = vpop.permute.xlu0 %11130  ;;  %11820 = vrot.lane.b32.xlu1 %v21585_v8, %s17281_s27  ;;  %v12078_v32 = vadd.f32 %v20313_v58, %v11928_v43  ;;  %v12202_v14 = vmax.f32 %v12074_v15, 0.0  ;;  %v11949_v15 = vld [vmem:[#allocation2 + $0x1d8] sm:$0xff] }
 0x7f1   : > { %11206 = vst.msk [vmem:[#allocation2 + $0x290] sm:$0xff] %vm10160_vm2, %v11131_v27  ;;  %v11953_v43 = vld [vmem:[#allocation2 + $0x1f8] sm:$0xff]  ;;  %v21592_v27 = vld [vmem:[#allocation75_spill] sm:$0xff]  ;;  %v12099_v54 = vadd.f32 %v21544_v36, %v11949_v15 }
 0x7f2   : > { %v11133_v26 = vpop.permute.xlu1 %11132  ;;  %11306 = vrot.lane.b32.xlu0 %v21586_v62, %s17281_s27  ;;  %v12206_v46 = vmax.f32 %v12078_v32, 0.0  ;;  %v12323_v32 = vpack.c.bf16 %v12223_v56, %v12219_v11 }
 0x7f3   : > { %11207 = vst.msk [vmem:[#allocation2 + $0x2b0] sm:$0xff] %vm10160_vm2, %v11133_v26  ;;  %v12103_v26 = vadd.f32 %v21544_v36, %v11953_v43 }
 0x7f4   : > { %v11115_v38 = vpop.permute.xlu0 %11114  ;;  %11308 = vrot.lane.b32.xlu1 %v21587_v30, %s17281_s27  ;;  %v12314_v10 = vpack.c.bf16 %v12206_v46, %v12202_v14  ;;  %v21594_v14 = vld [vmem:[#allocation44_spill] sm:$0xff]  ;;  %v21596_v30 = vld [vmem:[#allocation45_spill] sm:$0xff] }
 0x7f5   : > { %11198 = vst.msk [vmem:[#allocation2 + $0x190] sm:$0xff] %vm10160_vm2, %v11115_v38  ;;  %v11932_v1 = vld [vmem:[#allocation2 + $0x150] sm:$0xff] }
 0x7f6   : > { %11358 = vst.msk [vmem:[#allocation2 + $0x190] sm:$0xff] %vm10321_vm3, %v21588_v29  ;;  %12849 = vmatmul.mubr.bf16.gmra.mrb[172].mxu1 %v12314_v10  ;;  %v11117_v6 = vpop.permute.xlu1 %11116  ;;  %11502 = vrot.lane.b32.xlu0 %v21589_v59, %s17282_s28  ;;  %v12082_v13 = vadd.f32 %v20313_v58, %v11932_v1  ;;  %v12231_v1 = vmax.f32 %v12103_v26, 0.0  ;;  %v11961_v59 = vld [vmem:[#allocation2 + $0x238] sm:$0xff] }
 0x7f7   : > { %11199 = vst.msk [vmem:[#allocation2 + $0x1b0] sm:$0xff] %vm10160_vm2, %v11117_v6  ;;  %12856 = vmatprep.mubr.bf16.mxu1 %v12319_v9  ;;  %v11936_v25 = vld [vmem:[#allocation2 + $0x170] sm:$0xff]  ;;  %v12227_v9 = vmax.f32 %v12099_v54, 0.0  ;;  %v12111_v11 = vadd.f32 %v21544_v36, %v11961_v59 }
 0x7f8   : > { %11359 = vst.msk [vmem:[#allocation2 + $0x1b0] sm:$0xff] %vm10321_vm3, %v21590_v44  ;;  %v11803_v55 = vpop.permute.xlu0 %11802  ;;  %11504 = vrot.lane.b32.xlu1 %v21591_v24, %s17282_s28  ;;  %v12086_v17 = vadd.f32 %v20313_v58, %v11936_v25  ;;  %v12210_v12 = vmax.f32 %v12082_v13, 0.0  ;;  %v21598_v25 = vld [vmem:[#allocation12_spill] sm:$0xff] }
 0x7f9   : > { %11878 = vst.msk [vmem:[#allocation2 + $0x298] sm:$0xff] %vm10321_vm3, %v11803_v55  ;;  %v11957_v55 = vld [vmem:[#allocation2 + $0x218] sm:$0xff]  ;;  %v12327_v24 = vpack.c.bf16 %v12231_v1, %v12227_v9 }
 0x7fa   : > { %v11805_v5 = vpop.permute.xlu1 %11804  ;;  %10990 = vrot.lane.b32.xlu0 %v20114_v31, %s17282_s28  ;;  %v12214_v63 = vmax.f32 %v12086_v17, 0.0  ;;  %v21593_v31 = vld [vmem:[#allocation50_spill] sm:$0xff]  ;;  %v12107_v15 = vadd.f32 %v21544_v36, %v11957_v55 }
 0x7fb   : > { %11879 = vst.msk [vmem:[#allocation2 + $0x2b8] sm:$0xff] %vm10321_vm3, %v11805_v5  ;;  %v21599_v5 = vld [vmem:[#allocation58_spill] sm:$0xff] }
 0x7fc   : > { %v11119_v48 = vpop.permute.xlu0 %11118  ;;  %10992 = vrot.lane.b32.xlu1 %v21592_v27, %s17282_s28  ;;  %v12318_v8 = vpack.c.bf16 %v12214_v63, %v12210_v12  ;;  %v16935_v55 = vld [vmem:[%s21457_s5] ss:$8 sps:$4 sm:$0xff]  }
 0x7fd   : > { %11200 = vst.msk [vmem:[#allocation2 + $0x1d0] sm:$0xff] %vm10160_vm2, %v11119_v48  ;;  %v11940_v2 = vld [vmem:[#allocation2 + $0x190] sm:$0xff] }
 0x7fe   : > { %11360 = vst.msk [vmem:[#allocation2 + $0x1d0] sm:$0xff] %vm10321_vm3, %v21593_v31  ;;  %12857 = vmatmul.mubr.bf16.gmra.mrb[176].mxu1 %v12318_v8  ;;  %v11121_v62 = vpop.permute.xlu1 %11120  ;;  %11662 = vrot.lane.b32.xlu0 %v21594_v14, %s17283_s29  ;;  %v12090_v46 = vadd.f32 %v20313_v58, %v11940_v2  ;;  %v21600_v48 = vld [vmem:[#allocation59_spill] sm:$0xff]  ;;  %v12239_v8 = vmax.f32 %v12111_v11, 0.0  ;;  %v12235_v31 = vmax.f32 %v12107_v15, 0.0  ;;  %v21602_v14 = vld [vmem:[#allocation20_spill] sm:$0xff] }
 0x7ff   : > { %11201 = vst.msk [vmem:[#allocation2 + $0x1f0] sm:$0xff] %vm10160_vm2, %v11121_v62  ;;  %12864 = vmatprep.mubr.bf16.mxu1 %v12323_v32  ;;  %v11944_v0 = vld [vmem:[#allocation2 + $0x1b0] sm:$0xff]  ;;  %v11969_v11 = vld [vmem:[#allocation2 + $0x278] sm:$0xff] }
 0x800   : > { %11361 = vst.msk [vmem:[#allocation2 + $0x1f0] sm:$0xff] %vm10321_vm3, %v21595_v37  ;;  %v11291_v38 = vpop.permute.xlu0 %11290  ;;  %11664 = vrot.lane.b32.xlu1 %v21596_v30, %s17283_s29  ;;  %v12094_v10 = vadd.f32 %v20313_v58, %v11944_v0  ;;  %v12218_v29 = vmax.f32 %v12090_v46, 0.0  ;;  %v21601_v2 = vld [vmem:[#allocation19_spill] sm:$0xff]  ;;  %v12331_v0 = vpack.c.bf16 %v12239_v8, %v12235_v31 }
 0x801   : > { %11366 = vst.msk [vmem:[#allocation2 + $0x290] sm:$0xff] %vm10321_vm3, %v11291_v38 }
 0x802   : > { %v11293_v41 = vpop.permute.xlu1 %11292  ;;  %11150 = vrot.lane.b32.xlu0 %v21597_v50, %s17283_s29  ;;  %v12222_v6 = vmax.f32 %v12094_v10, 0.0 }
 0x803   : > { %11367 = vst.msk [vmem:[#allocation2 + $0x2b0] sm:$0xff] %vm10321_vm3, %v11293_v41 }
 0x804   : > { %v11487_v13 = vpop.permute.xlu0 %11486  ;;  %11152 = vrot.lane.b32.xlu1 %v21598_v25, %s17283_s29  ;;  %v12322_v44 = vpack.c.bf16 %v12222_v6, %v12218_v29 }
 0x805   : > { %11560 = vst.msk [vmem:[#allocation2 + $0x2d8] sm:$0xff] %vm9999_vm1, %v11487_v13  ;;  %v11948_v17 = vld [vmem:[#allocation2 + $0x1d0] sm:$0xff] }
 0x806   : > { %12865 = vmatmul.mubr.bf16.gmra.mrb[180].mxu1 %v12322_v44  ;;  %v11489_v56 = vpop.permute.xlu1 %11488  ;;  %11822 = vrot.lane.b32.xlu0 %v21599_v5, %s17281_s27  ;;  %v12098_v12 = vadd.f32 %v20313_v58, %v11948_v17  ;;  %v12119_v5 = vadd.f32 %v21544_v36, %v11969_v11 }
 0x807   : > { %11561 = vst.msk [vmem:[#allocation2 + $0x2f8] sm:$0xff] %vm9999_vm1, %v11489_v56  ;;  %12872 = vmatprep.mubr.bf16.mxu1 %v12327_v24  ;;  %v11952_v63 = vld [vmem:[#allocation2 + $0x1f0] sm:$0xff]  ;;  %v16937_v24 = vld [vmem:[%s21457_s5 + $0x4] ss:$8 sps:$4 sm:$0xff]   ;;  %v11965_v56 = vld [vmem:[#allocation2 + $0x258] sm:$0xff] }
 0x808   : > { %v10975_v43 = vpop.permute.xlu0 %10974  ;;  %11824 = vrot.lane.b32.xlu1 %v21600_v48, %s17281_s27  ;;  %v12102_v27 = vadd.f32 %v20313_v58, %v11952_v63  ;;  %v12226_v54 = vmax.f32 %v12098_v12, 0.0  ;;  %13879 = vmatprep.subr.bf16.mxu1 %v16937_v24  ;;  %v16938_v48 = vld [vmem:[%s21457_s5 + $0x10] ss:$8 sps:$4 sm:$0xff]  }
 0x809   : > { %11048 = vst.msk [vmem:[#allocation2 + $0x2d0] sm:$0xff] %vm9999_vm1, %v10975_v43  ;;  %13880 = vmatpush1.bf16.msra.mxu1 %v16935_v55  ;;  %v12115_v43 = vadd.f32 %v21544_v36, %v11965_v56 }
 0x80a   : > { %v10977_v32 = vpop.permute.xlu1 %10976  ;;  %11310 = vrot.lane.b32.xlu0 %v21601_v2, %s17281_s27  ;;  %v12230_v26 = vmax.f32 %v12102_v27, 0.0  ;;  %v16940_v27 = vld [vmem:[%s21457_s5 + $0x14] ss:$8 sps:$4 sm:$0xff]   ;;  %v16943_v2 = vld [vmem:[%s21457_s5 + $0x24] ss:$8 sps:$4 sm:$0xff]  }
 0x80b   : > { %11049 = vst.msk [vmem:[#allocation2 + $0x2f0] sm:$0xff] %vm9999_vm1, %v10977_v32  ;;  %13881 = vmatprep.subr.bf16.mxu1 %v16940_v27 }
 0x80c   : > { %v11647_v62 = vpop.permute.xlu0 %11646  ;;  %11312 = vrot.lane.b32.xlu1 %v21602_v14, %s17281_s27  ;;  %v12326_v46 = vpack.c.bf16 %v12230_v26, %v12226_v54  ;;  %v12247_v54 = vmax.f32 %v12119_v5, 0.0  ;;  %v11968_v26 = vld [vmem:[#allocation2 + $0x270] sm:$0xff] }
 0x80d   : > { %11720 = vst.msk [vmem:[#allocation2 + $0x2d8] sm:$0xff] %vm10160_vm2, %v11647_v62  ;;  %13882 = vmatpush1.bf16.msra.mxu1 %v16938_v48  ;;  %v11972_v5 = vld [vmem:[#allocation2 + $0x290] sm:$0xff] }
 0x80e   : > { %12873 = vmatmul.mubr.bf16.gmra.mrb[184].mxu1 %v12326_v46  ;;  %v11649_v37 = vpop.permute.xlu1 %11648  ;;  %v11977_v46 = vld [vmem:[#allocation2 + $0x2b8] sm:$0xff]  ;;  %13883 = vmatprep.subr.bf16.mxu1 %v16943_v2 }
 0x80f   : > { %11721 = vst.msk [vmem:[#allocation2 + $0x2f8] sm:$0xff] %vm10160_vm2, %v11649_v37  ;;  %12880 = vmatprep.mubr.bf16.mxu1 %v12331_v0  ;;  %v12243_v0 = vmax.f32 %v12115_v43, 0.0  ;;  %v11964_v37 = vld [vmem:[#allocation2 + $0x250] sm:$0xff] }
 0x810   : > { %v11135_v38 = vpop.permute.xlu0 %11134 }
 0x811   : > { %11208 = vst.msk [vmem:[#allocation2 + $0x2d0] sm:$0xff] %vm10160_vm2, %v11135_v38  ;;  %v16941_v38 = vld [vmem:[%s21457_s5 + $0x20] ss:$8 sps:$4 sm:$0xff]  }
 0x812   : > { %v11137_v30 = vpop.permute.xlu1 %11136  ;;  %13884 = vmatpush1.bf16.msra.mxu1 %v16941_v38 }
 0x813   : > { %11209 = vst.msk [vmem:[#allocation2 + $0x2f0] sm:$0xff] %vm10160_vm2, %v11137_v30 }
 0x814   : > { %v11807_v10 = vpop.permute.xlu0 %11806 }
 0x815   : > { %11880 = vst.msk [vmem:[#allocation2 + $0x2d8] sm:$0xff] %vm10321_vm3, %v11807_v10 }
 0x816   : > { %v11809_v9 = vpop.permute.xlu1 %11808 }
 0x817   : > { %11881 = vst.msk [vmem:[#allocation2 + $0x2f8] sm:$0xff] %vm10321_vm3, %v11809_v9  ;;  %v12118_v9 = vadd.f32 %v20313_v58, %v11968_v26 }
 0x818   : > { %v11295_v1 = vpop.permute.xlu0 %11294 }
 0x819   : > { %11368 = vst.msk [vmem:[#allocation2 + $0x2d0] sm:$0xff] %vm10321_vm3, %v11295_v1  ;;  %v11973_v1 = vld [vmem:[#allocation2 + $0x298] sm:$0xff]  ;;  %v12246_v55 = vmax.f32 %v12118_v9, 0.0 }
 0x81a   : > { %v11297_v41 = vpop.permute.xlu1 %11296 }
 0x81b   : > { %11369 = vst.msk [vmem:[#allocation2 + $0x2f0] sm:$0xff] %vm10321_vm3, %v11297_v41  ;;  %v16946_v41 = vld [vmem:[%s21457_s5 + $0x34] ss:$8 sps:$4 sm:$0xff]  }
 0x81c   : > { %v11491_v50 = vpop.permute.xlu0 %11490  ;;  %13885 = vmatprep.subr.bf16.mxu1 %v16946_v41  ;;  %v11981_v43 = vld [vmem:[#allocation2 + $0x2d8] sm:$0xff] }
 0x81d   : > { %11562 = vst.msk [vmem:[#allocation2 + $0x318] sm:$0xff] %vm9999_vm1, %v11491_v50  ;;  %v12335_v50 = vpack.c.bf16 %v12247_v54, %v12243_v0  ;;  %v12131_v2 = vadd.f32 %v21544_v36, %v11981_v43  ;;  %v16947_v43 = vld [vmem:[%s21457_s5 + $0x40] ss:$8 sps:$4 sm:$0xff]  }
 0x81e   : > { %v11493_v29 = vpop.permute.xlu1 %11492  ;;  %v11985_v56 = vld [vmem:[#allocation2 + $0x2f8] sm:$0xff] }
 0x81f   : > { %11563 = vst.msk [vmem:[#allocation2 + $0x338] sm:$0xff] %vm9999_vm1, %v11493_v29  ;;  %v12127_v29 = vadd.f32 %v21544_v36, %v11977_v46  ;;  %v12135_v27 = vadd.f32 %v21544_v36, %v11985_v56 }
 0x820   : > { %v10979_v6 = vpop.permute.xlu0 %10978  ;;  %v11980_v38 = vld [vmem:[#allocation2 + $0x2d0] sm:$0xff] }
 0x821   : > { %11050 = vst.msk [vmem:[#allocation2 + $0x310] sm:$0xff] %vm9999_vm1, %v10979_v6  ;;  %v12255_v24 = vmax.f32 %v12127_v29, 0.0 }
 0x822   : > { %v10981_v59 = vpop.permute.xlu1 %10980 }
 0x823   : > { %11051 = vst.msk [vmem:[#allocation2 + $0x330] sm:$0xff] %vm9999_vm1, %v10981_v59  ;;  %v12114_v59 = vadd.f32 %v20313_v58, %v11964_v37  ;;  %v12259_v37 = vmax.f32 %v12131_v2, 0.0 }
 0x824   : > { %v11123_v13 = vpop.permute.xlu0 %11122 }
 0x825   : > { %11202 = vst.msk [vmem:[#allocation2 + $0x210] sm:$0xff] %vm10160_vm2, %v11123_v13  ;;  %v12123_v13 = vadd.f32 %v21544_v36, %v11973_v1 }
 0x826   : > { %11362 = vst.msk [vmem:[#allocation2 + $0x210] sm:$0xff] %vm10321_vm3, %v20371_v22  ;;  %v11125_v25 = vpop.permute.xlu1 %11124 }
 0x827   : > { %11203 = vst.msk [vmem:[#allocation2 + $0x230] sm:$0xff] %vm10160_vm2, %v11125_v25  ;;  %v16944_v25 = vld [vmem:[%s21457_s5 + $0x30] ss:$8 sps:$4 sm:$0xff]  }
 0x828   : > { %11363 = vst.msk [vmem:[#allocation2 + $0x230] sm:$0xff] %vm10321_vm3, %v20376_v23  ;;  %v11651_v44 = vpop.permute.xlu0 %11650  ;;  %13886 = vmatpush1.bf16.msra.mxu1 %v16944_v25 }
 0x829   : > { %11722 = vst.msk [vmem:[#allocation2 + $0x318] sm:$0xff] %vm10160_vm2, %v11651_v44 }
 0x82a   : > { %v11653_v17 = vpop.permute.xlu1 %11652 }
 0x82b   : > { %11723 = vst.msk [vmem:[#allocation2 + $0x338] sm:$0xff] %vm10160_vm2, %v11653_v17  ;;  %v11976_v17 = vld [vmem:[#allocation2 + $0x2b0] sm:$0xff] }
 0x82c   : > { %v11139_v22 = vpop.permute.xlu0 %11138 }
 0x82d   : > { %11210 = vst.msk [vmem:[#allocation2 + $0x310] sm:$0xff] %vm10160_vm2, %v11139_v22  ;;  %v11956_v23 = vld [vmem:[#allocation2 + $0x210] sm:$0xff]  ;;  %v12242_v22 = vmax.f32 %v12114_v59, 0.0 }
 0x82e   : > { %v11141_v12 = vpop.permute.xlu1 %11140  ;;  %v12106_v63 = vadd.f32 %v20313_v58, %v11956_v23  ;;  %v12251_v23 = vmax.f32 %v12123_v13, 0.0 }
 0x82f   : > { %11211 = vst.msk [vmem:[#allocation2 + $0x330] sm:$0xff] %vm10160_vm2, %v11141_v12  ;;  %v11960_v15 = vld [vmem:[#allocation2 + $0x230] sm:$0xff] }
 0x830   : > { %v11811_v8 = vpop.permute.xlu0 %11810  ;;  %v12110_v32 = vadd.f32 %v20313_v58, %v11960_v15  ;;  %v12234_v62 = vmax.f32 %v12106_v63, 0.0  ;;  %v12334_v63 = vpack.c.bf16 %v12246_v55, %v12242_v22  ;;  %v12126_v15 = vadd.f32 %v20313_v58, %v11976_v17 }
 0x831   : > { %11882 = vst.msk [vmem:[#allocation2 + $0x318] sm:$0xff] %vm10321_vm3, %v11811_v8  ;;  %v12339_v48 = vpack.c.bf16 %v12255_v24, %v12251_v23 }
 0x832   : > { %v11813_v31 = vpop.permute.xlu1 %11812  ;;  %v12238_v14 = vmax.f32 %v12110_v32, 0.0  ;;  %v12122_v32 = vadd.f32 %v20313_v58, %v11972_v5  ;;  %v12254_v26 = vmax.f32 %v12126_v15, 0.0 }
 0x833   : > { %11883 = vst.msk [vmem:[#allocation2 + $0x338] sm:$0xff] %vm10321_vm3, %v11813_v31  ;;  %v12263_v31 = vmax.f32 %v12135_v27, 0.0 }
 0x834   : > { %v11299_v30 = vpop.permute.xlu0 %11298  ;;  %v12330_v10 = vpack.c.bf16 %v12238_v14, %v12234_v62  ;;  %v11984_v62 = vld [vmem:[#allocation2 + $0x2f0] sm:$0xff]  ;;  %v12250_v46 = vmax.f32 %v12122_v32, 0.0 }
 0x835   : > { %11370 = vst.msk [vmem:[#allocation2 + $0x310] sm:$0xff] %vm10321_vm3, %v11299_v30  ;;  %v12134_v9 = vadd.f32 %v20313_v58, %v11984_v62  ;;  %v12343_v41 = vpack.c.bf16 %v12263_v31, %v12259_v37 }
 0x836   : > { %12881 = vmatmul.mubr.bf16.gmra.mrb[188].mxu1 %v12330_v10  ;;  %v11301_v6 = vpop.permute.xlu1 %11300  ;;  %v12338_v10 = vpack.c.bf16 %v12254_v26, %v12250_v46 }
 0x837   : > { %11371 = vst.msk [vmem:[#allocation2 + $0x330] sm:$0xff] %vm10321_vm3, %v11301_v6  ;;  %12888 = vmatprep.mubr.bf16.mxu1 %v12335_v50  ;;  %v12130_v6 = vadd.f32 %v20313_v58, %v11980_v38  ;;  %v12262_v25 = vmax.f32 %v12134_v9, 0.0 }
 0x838   : > { %v11495_v44 = vpop.permute.xlu0 %11494  ;;  %v11989_v1 = vld [vmem:[#allocation2 + $0x318] sm:$0xff] }
 0x839   : > { %11564 = vst.msk [vmem:[#allocation2 + $0x358] sm:$0xff] %vm9999_vm1, %v11495_v44  ;;  %v12139_v59 = vadd.f32 %v21544_v36, %v11989_v1  ;;  %v12258_v17 = vmax.f32 %v12130_v6, 0.0 }
 0x83a   : > { %v11497_v11 = vpop.permute.xlu1 %11496  ;;  %v11993_v0 = vld [vmem:[#allocation2 + $0x338] sm:$0xff] }
 0x83b   : > { %11565 = vst.msk [vmem:[#allocation2 + $0x378] sm:$0xff] %vm9999_vm1, %v11497_v11  ;;  %v12143_v50 = vadd.f32 %v21544_v36, %v11993_v0  ;;  %v12267_v11 = vmax.f32 %v12139_v59, 0.0  ;;  %v12342_v23 = vpack.c.bf16 %v12262_v25, %v12258_v17  ;;  %v16953_v17 = vld [vmem:[%s21457_s5 + $0x60] ss:$8 sps:$4 sm:$0xff]  }
 0x83c   : > { %v10983_v12 = vpop.permute.xlu0 %10982  ;;  %v11988_v22 = vld [vmem:[#allocation2 + $0x310] sm:$0xff] }
 0x83d   : > { %11052 = vst.msk [vmem:[#allocation2 + $0x350] sm:$0xff] %vm9999_vm1, %v10983_v12  ;;  %v12271_v44 = vmax.f32 %v12143_v50, 0.0  ;;  %v12138_v15 = vadd.f32 %v20313_v58, %v11988_v22  ;;  %v16950_v50 = vld [vmem:[%s21457_s5 + $0x50] ss:$8 sps:$4 sm:$0xff]  }
 0x83e   : > { %12889 = vmatmul.mubr.bf16.gmra.mrb[192].mxu1 %v12334_v63  ;;  %v10985_v8 = vpop.permute.xlu1 %10984  ;;  %v11992_v55 = vld [vmem:[#allocation2 + $0x330] sm:$0xff] }
 0x83f   : > { %11053 = vst.msk [vmem:[#allocation2 + $0x370] sm:$0xff] %vm9999_vm1, %v10985_v8  ;;  %12896 = vmatprep.mubr.bf16.mxu1 %v12339_v48  ;;  %v12142_v5 = vadd.f32 %v20313_v58, %v11992_v55  ;;  %v12347_v12 = vpack.c.bf16 %v12271_v44, %v12267_v11  ;;  %v16949_v48 = vld [vmem:[%s21457_s5 + $0x44] ss:$8 sps:$4 sm:$0xff]   ;;  %v12266_v26 = vmax.f32 %v12138_v15, 0.0 }
 0x840   : > { %v11655_v54 = vpop.permute.xlu0 %11654  ;;  %13887 = vmatprep.subr.bf16.mxu1 %v16949_v48  ;;  %v16955_v11 = vld [vmem:[%s21457_s5 + $0x64] ss:$8 sps:$4 sm:$0xff]  }
 0x841   : > { %11724 = vst.msk [vmem:[#allocation2 + $0x358] sm:$0xff] %vm10160_vm2, %v11655_v54  ;;  %v12270_v8 = vmax.f32 %v12142_v5, 0.0  ;;  %13888 = vmatpush1.bf16.msra.mxu1 %v16947_v43 }
 0x842   : > { %v11657_v14 = vpop.permute.xlu1 %11656 }
 0x843   : > { %11725 = vst.msk [vmem:[#allocation2 + $0x378] sm:$0xff] %vm10160_vm2, %v11657_v14  ;;  %v12346_v46 = vpack.c.bf16 %v12270_v8, %v12266_v26 }
 0x844   : > { %v11143_v30 = vpop.permute.xlu0 %11142 }
 0x845   : > { %11212 = vst.msk [vmem:[#allocation2 + $0x350] sm:$0xff] %vm10160_vm2, %v11143_v30 }
 0x846   : > { %12897 = vmatmul.mubr.bf16.gmra.mrb[196].mxu1 %v12338_v10  ;;  %v11145_v29 = vpop.permute.xlu1 %11144 }
 0x847   : > { %11213 = vst.msk [vmem:[#allocation2 + $0x370] sm:$0xff] %vm10160_vm2, %v11145_v29  ;;  %12904 = vmatprep.mubr.bf16.mxu1 %v12343_v41  ;;  %v16952_v29 = vld [vmem:[%s21457_s5 + $0x54] ss:$8 sps:$4 sm:$0xff]  }
 0x848   : > { %v11815_v13 = vpop.permute.xlu0 %11814  ;;  %13889 = vmatprep.subr.bf16.mxu1 %v16952_v29 }
 0x849   : > { %11884 = vst.msk [vmem:[#allocation2 + $0x358] sm:$0xff] %vm10321_vm3, %v11815_v13  ;;  %13890 = vmatpush1.bf16.msra.mxu1 %v16950_v50 }
 0x84a   : > { %v11817_v24 = vpop.permute.xlu1 %11816  ;;  %13891 = vmatprep.subr.bf16.mxu1 %v16955_v11 }
 0x84b   : > { %11885 = vst.msk [vmem:[#allocation2 + $0x378] sm:$0xff] %vm10321_vm3, %v11817_v24 }
 0x84c   : > { %v11303_v56 = vpop.permute.xlu0 %11302 }
 0x84d   : > { %11372 = vst.msk [vmem:[#allocation2 + $0x350] sm:$0xff] %vm10321_vm3, %v11303_v56  ;;  %13892 = vmatpush1.bf16.msra.mxu1 %v16953_v17 }
 0x84e   : > { %12905 = vmatmul.mubr.bf16.gmra.mrb[200].mxu1 %v12342_v23  ;;  %v11305_v63 = vpop.permute.xlu1 %11304 }
 0x84f   : > { %11373 = vst.msk [vmem:[#allocation2 + $0x370] sm:$0xff] %vm10321_vm3, %v11305_v63  ;;  %12912 = vmatprep.mubr.bf16.mxu1 %v12347_v12  ;;  %v16956_v12 = vld [vmem:[%s21457_s5 + $0x70] ss:$8 sps:$4 sm:$0xff]   ;;  %v16958_v63 = vld [vmem:[%s21457_s5 + $0x74] ss:$8 sps:$4 sm:$0xff]  }
 0x850   : > { %v11499_v27 = vpop.permute.xlu0 %11498  ;;  %v11997_v32 = vld [vmem:[#allocation2 + $0x358] sm:$0xff]  ;;  %13893 = vmatprep.subr.bf16.mxu1 %v16958_v63 }
 0x851   : > { %11566 = vst.msk [vmem:[#allocation2 + $0x398] sm:$0xff] %vm9999_vm1, %v11499_v27  ;;  %v12147_v2 = vadd.f32 %v21544_v36, %v11997_v32  ;;  %v16961_v27 = vld [vmem:[%s21457_s5 + $0x84] ss:$8 sps:$4 sm:$0xff]   ;;  %13894 = vmatpush1.bf16.msra.mxu1 %v16956_v12 }
 0x852   : > { %v11501_v54 = vpop.permute.xlu1 %11500  ;;  %v12001_v31 = vld [vmem:[#allocation2 + $0x378] sm:$0xff]  ;;  %13895 = vmatprep.subr.bf16.mxu1 %v16961_v27 }
 0x853   : > { %11567 = vst.msk [vmem:[#allocation2 + $0x3b8] sm:$0xff] %vm9999_vm1, %v11501_v54  ;;  %v12151_v62 = vadd.f32 %v21544_v36, %v12001_v31  ;;  %v12275_v37 = vmax.f32 %v12147_v2, 0.0  ;;  %v16959_v2 = vld [vmem:[%s21457_s5 + $0x80] ss:$8 sps:$4 sm:$0xff]  }
 0x854   : > { %v10987_v14 = vpop.permute.xlu0 %10986  ;;  %v11996_v0 = vld [vmem:[#allocation2 + $0x350] sm:$0xff] }
 0x855   : > { %11054 = vst.msk [vmem:[#allocation2 + $0x390] sm:$0xff] %vm9999_vm1, %v10987_v14  ;;  %v12279_v38 = vmax.f32 %v12151_v62, 0.0  ;;  %v12146_v30 = vadd.f32 %v20313_v58, %v11996_v0  ;;  %13896 = vmatpush1.bf16.msra.mxu1 %v16959_v2 }
 0x856   : > { %12913 = vmatmul.mubr.bf16.gmra.mrb[204].mxu1 %v12346_v46  ;;  %v10989_v10 = vpop.permute.xlu1 %10988  ;;  %v12000_v9 = vld [vmem:[#allocation2 + $0x370] sm:$0xff] }
 0x857   : > { %11055 = vst.msk [vmem:[#allocation2 + $0x3b0] sm:$0xff] %vm9999_vm1, %v10989_v10  ;;  %v12351_v1 = vpack.c.bf16 %v12279_v38, %v12275_v37  ;;  %v12150_v41 = vadd.f32 %v20313_v58, %v12000_v9  ;;  %v12274_v59 = vmax.f32 %v12146_v30, 0.0  ;;  %v16962_v10 = vld [vmem:[%s21457_s5 + $0x90] ss:$8 sps:$4 sm:$0xff]   ;;  %v16964_v9 = vld [vmem:[%s21457_s5 + $0x94] ss:$8 sps:$4 sm:$0xff]  }
 0x858   : > { %v11659_v6 = vpop.permute.xlu0 %11658  ;;  %13897 = vmatprep.subr.bf16.mxu1 %v16964_v9 }
 0x859   : > { %11726 = vst.msk [vmem:[#allocation2 + $0x398] sm:$0xff] %vm10160_vm2, %v11659_v6  ;;  %12920 = vmatprep.mubr.bf16.mxu1 %v12351_v1  ;;  %v12278_v13 = vmax.f32 %v12150_v41, 0.0  ;;  %v16967_v41 = vld [vmem:[%s21457_s5 + $0xa4] ss:$8 sps:$4 sm:$0xff]   ;;  %13898 = vmatpush1.bf16.msra.mxu1 %v16962_v10 }
 0x85a   : > { %v11661_v25 = vpop.permute.xlu1 %11660  ;;  %13899 = vmatprep.subr.bf16.mxu1 %v16967_v41  ;;  %v21604_v10 = vld [vmem:[#allocation62_spill] sm:$0xff] }
 0x85b   : > { %11727 = vst.msk [vmem:[#allocation2 + $0x3b8] sm:$0xff] %vm10160_vm2, %v11661_v25  ;;  %v12350_v44 = vpack.c.bf16 %v12278_v13, %v12274_v59  ;;  %v16965_v59 = vld [vmem:[%s21457_s5 + $0xa0] ss:$8 sps:$4 sm:$0xff]   ;;  %v16970_v25 = vld [vmem:[%s21457_s5 + $0xb4] ss:$8 sps:$4 sm:$0xff]  }
 0x85c   : > { %v11147_v55 = vpop.permute.xlu0 %11146 }
 0x85d   : > { %11214 = vst.msk [vmem:[#allocation2 + $0x390] sm:$0xff] %vm10160_vm2, %v11147_v55  ;;  %13900 = vmatpush1.bf16.msra.mxu1 %v16965_v59 }
 0x85e   : > { %12921 = vmatmul.mubr.bf16.gmra.mrb[208].mxu1 %v12350_v44  ;;  %v11149_v24 = vpop.permute.xlu1 %11148  ;;  %13901 = vmatprep.subr.bf16.mxu1 %v16970_v25 }
 0x85f   : > { %11215 = vst.msk [vmem:[#allocation2 + $0x3b0] sm:$0xff] %vm10160_vm2, %v11149_v24  ;;  %v16968_v24 = vld [vmem:[%s21457_s5 + $0xb0] ss:$8 sps:$4 sm:$0xff]  }
 0x860   : > { %v11819_v22 = vpop.permute.xlu0 %11818 }
 0x861   : > { %11886 = vst.msk [vmem:[#allocation2 + $0x398] sm:$0xff] %vm10321_vm3, %v11819_v22  ;;  %13902 = vmatpush1.bf16.msra.mxu1 %v16968_v24 }
 0x862   : > { %v11821_v56 = vpop.permute.xlu1 %11820 }
 0x863   : > { %11887 = vst.msk [vmem:[#allocation2 + $0x3b8] sm:$0xff] %vm10321_vm3, %v11821_v56 }
 0x864   : > { %v11307_v23 = vpop.permute.xlu0 %11306 }
 0x865   : > { %11374 = vst.msk [vmem:[#allocation2 + $0x390] sm:$0xff] %vm10321_vm3, %v11307_v23 }
 0x866   : > { %v11309_v5 = vpop.permute.xlu1 %11308 }
 0x867   : > { %11375 = vst.msk [vmem:[#allocation2 + $0x3b0] sm:$0xff] %vm10321_vm3, %v11309_v5 }
 0x868   : > { %v11503_v15 = vpop.permute.xlu0 %11502  ;;  %v12005_v43 = vld [vmem:[#allocation2 + $0x398] sm:$0xff] }
 0x869   : > { %11568 = vst.msk [vmem:[#allocation2 + $0x3d8] sm:$0xff] %vm9999_vm1, %v11503_v15  ;;  %v12155_v48 = vadd.f32 %v21544_v36, %v12005_v43 }
 0x86a   : > { %v11505_v8 = vpop.permute.xlu1 %11504  ;;  %v12009_v32 = vld [vmem:[#allocation2 + $0x3b8] sm:$0xff] }
 0x86b   : > { %11569 = vst.msk [vmem:[#allocation2 + $0x3f8] sm:$0xff] %vm9999_vm1, %v11505_v8  ;;  %v12159_v54 = vadd.f32 %v21544_v36, %v12009_v32  ;;  %v12283_v62 = vmax.f32 %v12155_v48, 0.0 }
 0x86c   : > { %v10991_v26 = vpop.permute.xlu0 %10990  ;;  %v12004_v31 = vld [vmem:[#allocation2 + $0x390] sm:$0xff] }
 0x86d   : > { %11056 = vst.msk [vmem:[#allocation2 + $0x3d0] sm:$0xff] %vm9999_vm1, %v10991_v26  ;;  %v12287_v14 = vmax.f32 %v12159_v54, 0.0  ;;  %v12154_v46 = vadd.f32 %v20313_v58, %v12004_v31  ;;  %v20693_v54 = vld [vmem:[%s21456_s4] ss:$0 sm:$0xff] }
 0x86e   : > { %v10993_v0 = vpop.permute.xlu1 %10992  ;;  %v12008_v37 = vld [vmem:[#allocation2 + $0x3b0] sm:$0xff] }
 0x86f   : > { %11057 = vst.msk [vmem:[#allocation2 + $0x3f0] sm:$0xff] %vm9999_vm1, %v10993_v0  ;;  %v12355_v38 = vpack.c.bf16 %v12287_v14, %v12283_v62  ;;  %v12158_v30 = vadd.f32 %v20313_v58, %v12008_v37  ;;  %v12282_v50 = vmax.f32 %v12154_v46, 0.0 }
 0x870   : > { %v11663_v1 = vpop.permute.xlu0 %11662 }
 0x871   : > { %11728 = vst.msk [vmem:[#allocation2 + $0x3d8] sm:$0xff] %vm10160_vm2, %v11663_v1  ;;  %12928 = vmatprep.mubr.bf16.mxu1 %v12355_v38  ;;  %v12286_v29 = vmax.f32 %v12158_v30, 0.0 }
 0x872   : > { %v11665_v6 = vpop.permute.xlu1 %11664 }
 0x873   : > { %11729 = vst.msk [vmem:[#allocation2 + $0x3f8] sm:$0xff] %vm10160_vm2, %v11665_v6  ;;  %v12354_v13 = vpack.c.bf16 %v12286_v29, %v12282_v50  ;;  %v16971_v29 = vld [vmem:[%s21457_s5 + $0xc0] ss:$8 sps:$4 sm:$0xff]   ;;  %v16973_v6 = vld [vmem:[%s21457_s5 + $0xc4] ss:$8 sps:$4 sm:$0xff]  }
 0x874   : > { %v11151_v44 = vpop.permute.xlu0 %11150  ;;  %13903 = vmatprep.subr.bf16.mxu1 %v16973_v6  ;;  %v21610_v6 = vld [vmem:[#allocation73_spill] sm:$0xff] }
 0x875   : > { %11216 = vst.msk [vmem:[#allocation2 + $0x3d0] sm:$0xff] %vm10160_vm2, %v11151_v44  ;;  %12929 = vmatmul.mubr.bf16.gmra.mrb[212].mxu1 %v12354_v13  ;;  %v21605_v44 = vld [vmem:[#allocation64_spill] sm:$0xff] }
 0x876   : > { %v11153_v55 = vpop.permute.xlu1 %11152  ;;  %13904 = vmatpush1.bf16.msra.mxu1 %v16971_v29 }
 0x877   : > { %11217 = vst.msk [vmem:[#allocation2 + $0x3f0] sm:$0xff] %vm10160_vm2, %v11153_v55  ;;  %v12666_v55 = vadd.f32 %v21605_v44, %v20693_v54  ;;  %v16982_v44 = vld [vmem:[%s21457_s5 + $0xf4] ss:$8 sps:$4 sm:$0xff]  }
 0x878   : > { %v11823_v17 = vpop.permute.xlu0 %11822 }
 0x879   : > { %11888 = vst.msk [vmem:[#allocation2 + $0x3d8] sm:$0xff] %vm10321_vm3, %v11823_v17 }
 0x87a   : > { %v11825_v11 = vpop.permute.xlu1 %11824 }
 0x87b   : > { %11889 = vst.msk [vmem:[#allocation2 + $0x3f8] sm:$0xff] %vm10321_vm3, %v11825_v11 }
 0x87c   : > { %v11311_v22 = vpop.permute.xlu0 %11310 }
 0x87d   : > { %11376 = vst.msk [vmem:[#allocation2 + $0x3d0] sm:$0xff] %vm10321_vm3, %v11311_v22  ;;  %v21606_v22 = vld [vmem:[#allocation66_spill] sm:$0xff] }
 0x87e   : > { %v11313_v56 = vpop.permute.xlu1 %11312 }
 0x87f   : > { %11377 = vst.msk [vmem:[#allocation2 + $0x3f0] sm:$0xff] %vm10321_vm3, %v11313_v56  ;;  %v12669_v56 = vadd.f32 %v21606_v22, %v20693_v54  ;;  %v16985_v22 = vld [vmem:[%s21457_s5 + $0x104] ss:$8 sps:$4 sm:$0xff]  }
 0x880   : > { %v12013_v23 = vld [vmem:[#allocation2 + $0x3d8] sm:$0xff] }
 0x881   : > { %v12163_v5 = vadd.f32 %v21544_v36, %v12013_v23 }
 0x882   : > { %v12017_v12 = vld [vmem:[#allocation2 + $0x3f8] sm:$0xff] }
 0x883   : > { %v12167_v63 = vadd.f32 %v21544_v36, %v12017_v12  ;;  %v12291_v43 = vmax.f32 %v12163_v5, 0.0  ;;  %v21603_v36 = vld [vmem:[#allocation61_spill] sm:$0xff] }
 0x884   : > { %v12012_v15 = vld [vmem:[#allocation2 + $0x3d0] sm:$0xff]  ;;  %v12658_v46 = vadd.f32 %v21603_v36, %v20693_v54 }
 0x885   : > { %v12295_v48 = vmax.f32 %v12167_v63, 0.0  ;;  %v12162_v27 = vadd.f32 %v20313_v58, %v12012_v15  ;;  %v16974_v63 = vld [vmem:[%s21457_s5 + $0xd0] ss:$8 sps:$4 sm:$0xff]   ;;  %v16976_v15 = vld [vmem:[%s21457_s5 + $0xd4] ss:$8 sps:$4 sm:$0xff]  }
 0x886   : > { %v12016_v8 = vld [vmem:[#allocation2 + $0x3f0] sm:$0xff]  ;;  %13905 = vmatprep.subr.bf16.mxu1 %v16976_v15 }
 0x887   : > { %v12359_v32 = vpack.c.bf16 %v12295_v48, %v12291_v43  ;;  %v12166_v2 = vadd.f32 %v20313_v58, %v12016_v8  ;;  %v12290_v31 = vmax.f32 %v12162_v27, 0.0  ;;  %v12661_v58 = vadd.f32 %v21604_v10, %v20693_v54  ;;  %13906 = vmatpush1.bf16.msra.mxu1 %v16974_v63  ;;  %v21607_v27 = vld [vmem:[#allocation68_spill] sm:$0xff] }
 0x888   : > { %v12674_v8 = vadd.f32 %v21607_v27, %v20693_v54 }
 0x889   : > { %v15909_v26 = vpop.f32.mrb[156].mxu1  ;;  %12936 = vmatprep.mubr.bf16.mxu1 %v12359_v32  ;;  %v12294_v62 = vmax.f32 %v12166_v2, 0.0 }
 0x88a   : > { %v15910_v14 = vpop.f32.mrb[157].mxu1 }
 0x88b   : > { %v15911_v0 = vadd.f32 %v15910_v14, %v15909_v26  ;;  %v15912_v37 = vpop.f32.mrb[158].mxu1  ;;  %v12358_v38 = vpack.c.bf16 %v12294_v62, %v12290_v31  ;;  %v21608_v31 = vld [vmem:[#allocation69_spill] sm:$0xff] }
 0x88c   : > { %v15913_v30 = vpop.f32.mrb[159].mxu1  ;;  %v12677_v62 = vadd.f32 %v21608_v31, %v20693_v54 }
 0x88d   : > { %v12819_v9 = vadd.f32 %v15911_v0, %v12658_v46  ;;  %v15914_v1 = vadd.f32 %v15913_v30, %v15912_v37  ;;  %12937 = vmatmul.mubr.bf16.gmra.mrb[216].mxu1 %v12358_v38  ;;  %v16977_v37 = vld [vmem:[%s21457_s5 + $0xe0] ss:$8 sps:$4 sm:$0xff]   ;;  %v16979_v38 = vld [vmem:[%s21457_s5 + $0xe4] ss:$8 sps:$4 sm:$0xff]  }
 0x88e   : > { %13907 = vmatprep.subr.bf16.mxu1 %v16979_v38 }
 0x88f   : > { %v12945_v41 = vmax.f32 %v12819_v9, 0.0  ;;  %v12822_v50 = vadd.f32 %v15914_v1, %v12661_v58  ;;  %13908 = vmatpush1.bf16.msra.mxu1 %v16977_v37  ;;  %v21609_v9 = vld [vmem:[#allocation71_spill] sm:$0xff] }
 0x890   : > { %v12682_v1 = vadd.f32 %v21609_v9, %v20693_v54  ;;  %13909 = vmatprep.subr.bf16.mxu1 %v16982_v44 }
 0x891   : > { %v12946_v59 = vmax.f32 %v12822_v50, 0.0  ;;  %v15915_v13 = vpop.f32.mrb[160].mxu1  ;;  %12978 = vst.msk [vmem:[#allocation3] sm:$0xff] %vm12977_vm4, %v12945_v41 }
 0x892   : > { %v15916_v25 = vpop.f32.mrb[161].mxu1 }
 0x893   : > { %v15917_v24 = vadd.f32 %v15916_v25, %v15915_v13  ;;  %v15918_v17 = vpop.f32.mrb[162].mxu1  ;;  %12979 = vst.msk [vmem:[#allocation3 + $0x40] sm:$0xff] %vm12977_vm4, %v12946_v59  ;;  %v12685_v59 = vadd.f32 %v21610_v6, %v20693_v54 }
 0x894   : > { %v15919_v11 = vpop.f32.mrb[163].mxu1 }
 0x895   : > { %v12827_v23 = vadd.f32 %v15917_v24, %v12666_v55  ;;  %v15920_v5 = vadd.f32 %v15919_v11, %v15918_v17  ;;  %v16980_v17 = vld [vmem:[%s21457_s5 + $0xf0] ss:$8 sps:$4 sm:$0xff]  }
 0x896   : > { %13910 = vmatpush1.bf16.msra.mxu1 %v16980_v17 }
 0x897   : > { %v12830_v12 = vadd.f32 %v15920_v5, %v12669_v56  ;;  %v12947_v56 = vmax.f32 %v12827_v23, 0.0  ;;  %13922 = vmatprep.subr.bf16.mxu1 %v16985_v22  ;;  %v12714_v22 = vadd.f32 %v20155_v51, %v20693_v54 }
 0x899   : > { %v15921_v43 = vpop.f32.mrb[164].mxu1  ;;  %v12948_v5 = vmax.f32 %v12830_v12, 0.0 }
 0x89a   : > { %v15922_v48 = vpop.f32.mrb[165].mxu1 }
 0x89b   : > { %v15923_v32 = vadd.f32 %v15922_v48, %v15921_v43  ;;  %v15924_v2 = vpop.f32.mrb[166].mxu1  ;;  %v21611_v43 = vld [vmem:[#allocation74_spill] sm:$0xff] }
 0x89c   : > { %v15925_v26 = vpop.f32.mrb[167].mxu1  ;;  %v12690_v48 = vadd.f32 %v21611_v43, %v20693_v54 }
 0x89d   : > { %v12835_v14 = vadd.f32 %v15923_v32, %v12674_v8  ;;  %v15926_v36 = vadd.f32 %v15925_v26, %v15924_v2  ;;  %v21612_v2 = vld [vmem:[#allocation76_spill] sm:$0xff] }
 0x89e   : > { %v12693_v26 = vadd.f32 %v21612_v2, %v20693_v54 }
 0x89f   : > { %v12949_v46 = vmax.f32 %v12835_v14, 0.0  ;;  %v12838_v0 = vadd.f32 %v15926_v36, %v12677_v62 }
 0x8a1   : > { %v12950_v30 = vmax.f32 %v12838_v0, 0.0  ;;  %v15927_v10 = vpop.f32.mrb[168].mxu1  ;;  %12991 = vst.msk [vmem:[#allocation3 + $0x8] sm:$0xff] %vm12977_vm4, %v12949_v46  ;;  %v12698_v0 = vadd.f32 %v20131_v21, %v20693_v54  ;;  %v12709_v21 = vadd.f32 %v20146_v45, %v20693_v54  ;;  %v12717_v45 = vadd.f32 %v20158_v19, %v20693_v54 }
 0x8a2   : > { %v15928_v58 = vpop.f32.mrb[169].mxu1  ;;  %v12722_v19 = vadd.f32 %v20167_v60, %v20693_v54 }
 0x8a3   : > { %v15929_v41 = vadd.f32 %v15928_v58, %v15927_v10  ;;  %v15930_v50 = vpop.f32.mrb[170].mxu1  ;;  %12992 = vst.msk [vmem:[#allocation3 + $0x48] sm:$0xff] %vm12977_vm4, %v12950_v30  ;;  %v12701_v10 = vadd.f32 %v20134_v33, %v20693_v54 }
 0x8a4   : > { %v15931_v29 = vpop.f32.mrb[171].mxu1 }
 0x8a5   : > { %v12843_v13 = vadd.f32 %v15929_v41, %v12682_v1  ;;  %v15932_v25 = vadd.f32 %v15931_v29, %v15930_v50  ;;  %v12706_v29 = vadd.f32 %v20143_v28, %v20693_v54 }
 0x8a7   : > { %v12951_v55 = vmax.f32 %v12843_v13, 0.0  ;;  %v12846_v24 = vadd.f32 %v15932_v25, %v12685_v59 }
 0x8a9   : > { %v12952_v11 = vmax.f32 %v12846_v24, 0.0  ;;  %12995 = vrot.lane.b32.xlu0 %v12951_v55, %s17283_s29 }
 0x8ab   : > { %12997 = vrot.lane.b32.xlu1 %v12952_v11, %s17283_s29 }
 0x8ad   : > { %12982 = vrot.lane.b32.xlu0 %v12947_v56, %s17283_s29 }
 0x8af   : > { %12984 = vrot.lane.b32.xlu1 %v12948_v5, %s17283_s29 }
 0x8c9   : > { %v15933_v63 = vpop.f32.mrb[172].mxu1 }
 0x8ca   : > { %v15934_v15 = vpop.f32.mrb[173].mxu1 }
 0x8cb   : > { %v15935_v27 = vadd.f32 %v15934_v15, %v15933_v63  ;;  %v15936_v8 = vpop.f32.mrb[174].mxu1 }
 0x8cc   : > { %v15937_v32 = vpop.f32.mrb[175].mxu1 }
 0x8cd   : > { %v12851_v23 = vadd.f32 %v15935_v27, %v12690_v48  ;;  %v15938_v31 = vadd.f32 %v15937_v32, %v15936_v8 }
 0x8cf   : > { %v12953_v62 = vmax.f32 %v12851_v23, 0.0  ;;  %v12854_v14 = vadd.f32 %v15938_v31, %v12693_v26 }
 0x8d1   : > { %v12954_v12 = vmax.f32 %v12854_v14, 0.0  ;;  %v15939_v36 = vpop.f32.mrb[176].mxu1  ;;  %13003 = vst.msk [vmem:[#allocation3 + $0x10] sm:$0xff] %vm12977_vm4, %v12953_v62  ;;  %v12725_v62 = vadd.f32 %v20170_v4, %v20693_v54  ;;  %v12733_v4 = vadd.f32 %v20188_v61, %v20693_v54 }
 0x8d2   : > { %v15940_v46 = vpop.f32.mrb[177].mxu1 }
 0x8d3   : > { %v15941_v37 = vadd.f32 %v15940_v46, %v15939_v36  ;;  %v15942_v38 = vpop.f32.mrb[178].mxu1  ;;  %13004 = vst.msk [vmem:[#allocation3 + $0x50] sm:$0xff] %vm12977_vm4, %v12954_v12 }
 0x8d4   : > { %v15943_v30 = vpop.f32.mrb[179].mxu1 }
 0x8d5   : > { %v12859_v58 = vadd.f32 %v15941_v37, %v12698_v0  ;;  %v15944_v9 = vadd.f32 %v15943_v30, %v15942_v38  ;;  %v12730_v30 = vadd.f32 %v20182_v53, %v20693_v54 }
 0x8d7   : > { %v12862_v1 = vadd.f32 %v15944_v9, %v12701_v10  ;;  %v12955_v8 = vmax.f32 %v12859_v58, 0.0 }
 0x8d9   : > { %v15945_v41 = vpop.f32.mrb[180].mxu1  ;;  %v12956_v32 = vmax.f32 %v12862_v1, 0.0 }
 0x8da   : > { %v15946_v50 = vpop.f32.mrb[181].mxu1 }
 0x8db   : > { %v15947_v6 = vadd.f32 %v15946_v50, %v15945_v41  ;;  %v15948_v59 = vpop.f32.mrb[182].mxu1 }
 0x8dc   : > { %v15949_v13 = vpop.f32.mrb[183].mxu1 }
 0x8dd   : > { %v12867_v25 = vadd.f32 %v15947_v6, %v12706_v29  ;;  %v15950_v44 = vadd.f32 %v15949_v13, %v15948_v59  ;;  %v12738_v6 = vadd.f32 %v20198_v57, %v20693_v54 }
 0x8df   : > { %v12957_v55 = vmax.f32 %v12867_v25, 0.0  ;;  %v12870_v24 = vadd.f32 %v15950_v44, %v12709_v21  ;;  %v12741_v25 = vadd.f32 %v20202_v35, %v20693_v54  ;;  %v12746_v35 = vadd.f32 %v20212_v7, %v20693_v54 }
 0x8e1   : > { %v12958_v17 = vmax.f32 %v12870_v24, 0.0  ;;  %v15951_v33 = vpop.f32.mrb[184].mxu1  ;;  %13015 = vst.msk [vmem:[#allocation3 + $0x18] sm:$0xff] %vm12977_vm4, %v12957_v55 }
 0x8e2   : > { %v15952_v11 = vpop.f32.mrb[185].mxu1 }
 0x8e3   : > { %v15953_v56 = vadd.f32 %v15952_v11, %v15951_v33  ;;  %v15954_v28 = vpop.f32.mrb[186].mxu1  ;;  %13016 = vst.msk [vmem:[#allocation3 + $0x58] sm:$0xff] %vm12977_vm4, %v12958_v17 }
 0x8e4   : > { %v15955_v5 = vpop.f32.mrb[187].mxu1 }
 0x8e5   : > { %v12875_v63 = vadd.f32 %v15953_v56, %v12714_v22  ;;  %v15956_v15 = vadd.f32 %v15955_v5, %v15954_v28 }
 0x8e7   : > { %v12959_v43 = vmax.f32 %v12875_v63, 0.0  ;;  %v12878_v48 = vadd.f32 %v15956_v15, %v12717_v45  ;;  %v12749_v63 = vadd.f32 %v20216_v49, %v20693_v54 }
 0x8e9   : > { %v12960_v27 = vmax.f32 %v12878_v48, 0.0  ;;  %13019 = vrot.lane.b32.xlu0 %v12959_v43, %s17283_s29 }
 0x8eb   : > { %13021 = vrot.lane.b32.xlu1 %v12960_v27, %s17283_s29 }
 0x8ed   : > { %13007 = vrot.lane.b32.xlu0 %v12955_v8, %s17283_s29 }
 0x8ef   : > { %13009 = vrot.lane.b32.xlu1 %v12956_v32, %s17283_s29 }
 0x909   : > { %v15957_v51 = vpop.f32.mrb[188].mxu1 }
 0x90a   : > { %v15958_v2 = vpop.f32.mrb[189].mxu1 }
 0x90b   : > { %v15959_v26 = vadd.f32 %v15958_v2, %v15957_v51  ;;  %v15960_v23 = vpop.f32.mrb[190].mxu1 }
 0x90c   : > { %v15961_v31 = vpop.f32.mrb[191].mxu1 }
 0x90d   : > { %v12883_v14 = vadd.f32 %v15959_v26, %v12722_v19  ;;  %v15962_v12 = vadd.f32 %v15961_v31, %v15960_v23  ;;  %v16983_v23 = vld [vmem:[%s21457_s5 + $0x100] ss:$8 sps:$4 sm:$0xff]  }
 0x90f   : > { %v12961_v36 = vmax.f32 %v12883_v14, 0.0  ;;  %v12886_v46 = vadd.f32 %v15962_v12, %v12725_v62  ;;  %v16988_v62 = vld [vmem:[%s21457_s5 + $0x114] ss:$8 sps:$4 sm:$0xff]   ;;  %v12754_v14 = vadd.f32 %v20224_v18, %v20693_v54  ;;  %v16986_v18 = vld [vmem:[%s21457_s5 + $0x110] ss:$8 sps:$4 sm:$0xff]  }
 0x911   : > { %v12962_v0 = vmax.f32 %v12886_v46, 0.0  ;;  %v15963_v37 = vpop.f32.mrb[192].mxu1  ;;  %13027 = vst.msk [vmem:[#allocation3 + $0x20] sm:$0xff] %vm12977_vm4, %v12961_v36 }
 0x912   : > { %v15964_v38 = vpop.f32.mrb[193].mxu1 }
 0x913   : > { %v15965_v10 = vadd.f32 %v15964_v38, %v15963_v37  ;;  %v15966_v60 = vpop.f32.mrb[194].mxu1  ;;  %13028 = vst.msk [vmem:[#allocation3 + $0x60] sm:$0xff] %vm12977_vm4, %v12962_v0  ;;  %v12757_v37 = vadd.f32 %v20228_v34, %v20693_v54 }
 0x914   : > { %v15967_v58 = vpop.f32.mrb[195].mxu1 }
 0x915   : > { %v12891_v9 = vadd.f32 %v15965_v10, %v12730_v30  ;;  %v15968_v1 = vadd.f32 %v15967_v58, %v15966_v60  ;;  %v16991_v60 = vld [vmem:[%s21457_s5 + $0x124] ss:$8 sps:$4 sm:$0xff]  }
 0x917   : > { %v20780_v41 = vadd.f32 %v15968_v1, %v12733_v4  ;;  %v12963_v12 = vmax.f32 %v12891_v9, 0.0  ;;  %v16989_v1 = vld [vmem:[%s21457_s5 + $0x120] ss:$8 sps:$4 sm:$0xff]  }
 0x919   : > { %v15969_v50 = vpop.f32.mrb[196].mxu1  ;;  %v12964_v38 = vmax.f32 %v20780_v41, 0.0 }
 0x91a   : > { %v15970_v29 = vpop.f32.mrb[197].mxu1 }
 0x91b   : > { %v15971_v59 = vadd.f32 %v15970_v29, %v15969_v50  ;;  %v12996_v53 = vpop.permute.xlu0 %12995  ;;  %v15972_v13 = vpop.f32.mrb[198].mxu1  ;;  %v16994_v50 = vld [vmem:[%s21457_s5 + $0x134] ss:$8 sps:$4 sm:$0xff]   ;;  %v12762_v29 = vadd.f32 %v20238_v3, %v20693_v54  ;;  %v16997_v3 = vld [vmem:[%s21457_s5 + $0x144] ss:$8 sps:$4 sm:$0xff]  }
 0x91c   : > { %13001 = vst.msk [vmem:[#allocation3 + $0x8] sm:$0xff] %vm12988_vm5, %v12996_v53  ;;  %v15973_v21 = vpop.f32.mrb[199].mxu1 }
 0x91d   : > { %v12899_v61 = vadd.f32 %v15971_v59, %v12738_v6  ;;  %v15974_v44 = vadd.f32 %v15973_v21, %v15972_v13  ;;  %v12998_v55 = vpop.permute.xlu1 %12997  ;;  %v12765_v13 = vadd.f32 %v20244_v40, %v20693_v54  ;;  %v16995_v40 = vld [vmem:[%s21457_s5 + $0x140] ss:$8 sps:$4 sm:$0xff]  }
 0x91e   : > { %13002 = vst.msk [vmem:[#allocation3 + $0x48] sm:$0xff] %vm12988_vm5, %v12998_v55  ;;  %v17000_v55 = vld [vmem:[%s21457_s5 + $0x154] ss:$8 sps:$4 sm:$0xff]  }
 0x91f   : > { %v12965_v24 = vmax.f32 %v12899_v61, 0.0  ;;  %v12902_v17 = vadd.f32 %v15974_v44, %v12741_v25  ;;  %v12983_v33 = vpop.permute.xlu0 %12982  ;;  %v16992_v61 = vld [vmem:[%s21457_s5 + $0x130] ss:$8 sps:$4 sm:$0xff]  }
 0x920   : > { %12989 = vst.msk [vmem:[#allocation3] sm:$0xff] %vm12988_vm5, %v12983_v33  ;;  %v17001_v33 = vld [vmem:[%s21457_s5 + $0x160] ss:$8 sps:$4 sm:$0xff]  }
 0x921   : > { %13039 = vst.msk [vmem:[#allocation3 + $0x28] sm:$0xff] %vm12977_vm4, %v12965_v24  ;;  %v12966_v57 = vmax.f32 %v12902_v17, 0.0  ;;  %v15975_v11 = vpop.f32.mrb[200].mxu1  ;;  %v12985_v22 = vpop.permute.xlu1 %12984  ;;  %v16998_v24 = vld [vmem:[%s21457_s5 + $0x150] ss:$8 sps:$4 sm:$0xff]  }
 0x922   : > { %12990 = vst.msk [vmem:[#allocation3 + $0x40] sm:$0xff] %vm12988_vm5, %v12985_v22  ;;  %v15976_v56 = vpop.f32.mrb[201].mxu1  ;;  %v17003_v17 = vld [vmem:[%s21457_s5 + $0x164] ss:$8 sps:$4 sm:$0xff]  }
 0x923   : > { %13040 = vst.msk [vmem:[#allocation3 + $0x68] sm:$0xff] %vm12977_vm4, %v12966_v57  ;;  %v15977_v28 = vadd.f32 %v15976_v56, %v15975_v11  ;;  %v15978_v5 = vpop.f32.mrb[202].mxu1  ;;  %v13076_v48 = vld [vmem:[#allocation3 + $0x8] sm:$0xff]  ;;  %v17006_v57 = vld [vmem:[%s21457_s5 + $0x174] ss:$8 sps:$4 sm:$0xff]  }
 0x924   : > { %v15979_v45 = vpop.f32.mrb[203].mxu1  ;;  %v17004_v11 = vld [vmem:[%s21457_s5 + $0x170] ss:$8 sps:$4 sm:$0xff]   ;;  %v17009_v22 = vld [vmem:[%s21457_s5 + $0x184] ss:$8 sps:$4 sm:$0xff]  }
 0x925   : > { %v12907_v15 = vadd.f32 %v15977_v28, %v12746_v35  ;;  %v15980_v43 = vadd.f32 %v15979_v45, %v15978_v5  ;;  %v13084_v27 = vld [vmem:[#allocation3 + $0x48] sm:$0xff]  ;;  %v12770_v5 = vadd.f32 %v20251_v52, %v20693_v54 }
 0x926   : > { %v13092_v8 = vpack.c.bf16 %v13084_v27, %v13076_v48  ;;  %v17007_v28 = vld [vmem:[%s21457_s5 + $0x180] ss:$8 sps:$4 sm:$0xff]   ;;  %v12773_v48 = vadd.f32 %v20254_v16, %v20693_v54 }
 0x927   : > { %v12967_v32 = vmax.f32 %v12907_v15, 0.0  ;;  %v12910_v51 = vadd.f32 %v15980_v43, %v12749_v63  ;;  %v13075_v2 = vld [vmem:[#allocation3] sm:$0xff]  ;;  %v17012_v15 = vld [vmem:[%s21457_s5 + $0x194] ss:$8 sps:$4 sm:$0xff]  }
 0x928   : > { %13911 = vmatprep.mubr.bf16.mxu1 %v13092_v8  ;;  %v17013_v16 = vld [vmem:[%s21457_s5 + $0x1a0] ss:$8 sps:$4 sm:$0xff]  }
 0x929   : > { %v13083_v19 = vld [vmem:[#allocation3 + $0x40] sm:$0xff]  ;;  %v12968_v26 = vmax.f32 %v12910_v51, 0.0  ;;  %13043 = vrot.lane.b32.xlu0 %v12967_v32, %s17283_s29  ;;  %v15981_v7 = vpop.f32.mrb[204].mxu1  ;;  %v17010_v32 = vld [vmem:[%s21457_s5 + $0x190] ss:$8 sps:$4 sm:$0xff]  }
 0x92a   : > { %v13091_v31 = vpack.c.bf16 %v13083_v19, %v13075_v2  ;;  %v15982_v49 = vpop.f32.mrb[205].mxu1  ;;  %v17015_v2 = vld [vmem:[%s21457_s5 + $0x1a4] ss:$8 sps:$4 sm:$0xff]  }
 0x92b   : > { %v15983_v36 = vadd.f32 %v15982_v49, %v15981_v7  ;;  %13045 = vrot.lane.b32.xlu1 %v12968_v26, %s17283_s29  ;;  %v15984_v46 = vpop.f32.mrb[206].mxu1  ;;  %v17018_v26 = vld [vmem:[%s21457_s5 + $0x1b4] ss:$8 sps:$4 sm:$0xff]   ;;  %v17016_v7 = vld [vmem:[%s21457_s5 + $0x1b0] ss:$8 sps:$4 sm:$0xff]  }
 0x92c   : > { %v15985_v0 = vpop.f32.mrb[207].mxu1  ;;  %13912 = vmatmul.mubr.bf16.vlgmr.msra.gmra.mrb[220].mxu1 %v13091_v31  ;;  %v17019_v31 = vld [vmem:[%s21457_s5 + $0x1c0] ss:$8 sps:$4 sm:$0xff]   ;;  %v17024_v49 = vld [vmem:[%s21457_s5 + $0x1d4] ss:$8 sps:$4 sm:$0xff]  }
 0x92d   : > { %v12915_v30 = vadd.f32 %v15983_v36, %v12754_v14  ;;  %v15986_v10 = vadd.f32 %v15985_v0, %v15984_v46  ;;  %13923 = vmatpush1.bf16.msra.mxu1 %v16983_v23  ;;  %13031 = vrot.lane.b32.xlu0 %v12963_v12, %s17283_s29  ;;  %v17021_v23 = vld [vmem:[%s21457_s5 + $0x1c4] ss:$8 sps:$4 sm:$0xff]   ;;  %v17022_v12 = vld [vmem:[%s21457_s5 + $0x1d0] ss:$8 sps:$4 sm:$0xff]  }
 0x92e   : > { %13924 = vmatprep.subr.bf16.mxu1 %v16988_v62  ;;  %v17027_v36 = vld [vmem:[%s21457_s5 + $0x1e4] ss:$8 sps:$4 sm:$0xff]  }
 0x92f   : > { %v12969_v58 = vmax.f32 %v12915_v30, 0.0  ;;  %v12918_v4 = vadd.f32 %v15986_v10, %v12757_v37  ;;  %13033 = vrot.lane.b32.xlu1 %v12964_v38, %s17283_s29  ;;  %v17025_v30 = vld [vmem:[%s21457_s5 + $0x1e0] ss:$8 sps:$4 sm:$0xff]   ;;  %v12778_v10 = vadd.f32 %v20261_v42, %v20693_v54  ;;  %v17028_v42 = vld [vmem:[%s21457_s5 + $0x1f0] ss:$8 sps:$4 sm:$0xff]  }
 0x931   : > { %13051 = vst.msk [vmem:[#allocation3 + $0x30] sm:$0xff] %vm12977_vm4, %v12969_v58  ;;  %v12970_v34 = vmax.f32 %v12918_v4, 0.0  ;;  %13925 = vmatpush1.bf16.msra.mxu1 %v16986_v18  ;;  %v15987_v9 = vpop.f32.mrb[208].mxu1  ;;  %v17030_v58 = vld [vmem:[%s21457_s5 + $0x1f4] ss:$8 sps:$4 sm:$0xff]  }
 0x932   : > { %v15988_v41 = vpop.f32.mrb[209].mxu1  ;;  %13926 = vmatprep.subr.bf16.mxu1 %v16991_v60 }
 0x933   : > { %13052 = vst.msk [vmem:[#allocation3 + $0x70] sm:$0xff] %vm12977_vm4, %v12970_v34  ;;  %v15989_v6 = vadd.f32 %v15988_v41, %v15987_v9  ;;  %v15990_v59 = vpop.f32.mrb[210].mxu1  ;;  %v12781_v34 = vadd.f32 %v20264_v47, %v20693_v54  ;;  %v17031_v47 = vld [vmem:[%s21457_s5 + $0x200] ss:$8 sps:$4 sm:$0xff]  }
 0x934   : > { %v15991_v53 = vpop.f32.mrb[211].mxu1 }
 0x935   : > { %v20829_v21 = vadd.f32 %v15989_v6, %v12762_v29  ;;  %v15992_v25 = vadd.f32 %v15991_v53, %v15990_v59  ;;  %13927 = vmatpush1.bf16.msra.mxu1 %v16989_v1  ;;  %v17033_v53 = vld [vmem:[%s21457_s5 + $0x204] ss:$8 sps:$4 sm:$0xff]  }
 0x936   : > { %13928 = vmatprep.subr.bf16.mxu1 %v16994_v50 }
 0x937   : > { %v20837_v44 = vadd.f32 %v15992_v25, %v12765_v13 }
 0x939   : > { %13929 = vmatpush1.bf16.msra.mxu1 %v16992_v61  ;;  %v12971_v61 = vmax.f32 %v20829_v21, 0.0  ;;  %v17039_v21 = vld [vmem:[%s21457_s5 + $0x224] ss:$8 sps:$4 sm:$0xff]  }
 0x93a   : > { %13930 = vmatprep.subr.bf16.mxu1 %v16997_v3 }
 0x93d   : > { %13931 = vmatpush1.bf16.msra.mxu1 %v16995_v40  ;;  %v17036_v40 = vld [vmem:[%s21457_s5 + $0x214] ss:$8 sps:$4 sm:$0xff]  }
 0x93e   : > { %13932 = vmatprep.subr.bf16.mxu1 %v17000_v55  ;;  %v12972_v55 = vmax.f32 %v20837_v44, 0.0  ;;  %v17037_v44 = vld [vmem:[%s21457_s5 + $0x220] ss:$8 sps:$4 sm:$0xff]  }
 0x941   : > { %13933 = vmatpush1.bf16.msra.mxu1 %v16998_v24  ;;  %v17034_v24 = vld [vmem:[%s21457_s5 + $0x210] ss:$8 sps:$4 sm:$0xff]  }
 0x942   : > { %13934 = vmatprep.subr.bf16.mxu1 %v17003_v17  ;;  %v17042_v17 = vld [vmem:[%s21457_s5 + $0x234] ss:$8 sps:$4 sm:$0xff]  }
 0x945   : > { %13935 = vmatpush1.bf16.msra.mxu1 %v17001_v33  ;;  %v17040_v33 = vld [vmem:[%s21457_s5 + $0x230] ss:$8 sps:$4 sm:$0xff]  }
 0x946   : > { %13936 = vmatprep.subr.bf16.mxu1 %v17006_v57  ;;  %v17045_v57 = vld [vmem:[%s21457_s5 + $0x244] ss:$8 sps:$4 sm:$0xff]  }
 0x948   : > { %v15993_v56 = vpop.f32.mrb[212].mxu1 }
 0x949   : > { %13937 = vmatpush1.bf16.msra.mxu1 %v17004_v11  ;;  %v15994_v35 = vpop.f32.mrb[213].mxu1  ;;  %v17043_v11 = vld [vmem:[%s21457_s5 + $0x240] ss:$8 sps:$4 sm:$0xff]  }
 0x94a   : > { %v15995_v45 = vadd.f32 %v15994_v35, %v15993_v56  ;;  %v15996_v63 = vpop.f32.mrb[214].mxu1  ;;  %13938 = vmatprep.subr.bf16.mxu1 %v17009_v22  ;;  %v17048_v22 = vld [vmem:[%s21457_s5 + $0x254] ss:$8 sps:$4 sm:$0xff]   ;;  %v17046_v56 = vld [vmem:[%s21457_s5 + $0x250] ss:$8 sps:$4 sm:$0xff]  }
 0x94b   : > { %v15997_v43 = vpop.f32.mrb[215].mxu1  ;;  %v17051_v35 = vld [vmem:[%s21457_s5 + $0x264] ss:$8 sps:$4 sm:$0xff]  }
 0x94c   : > { %v12931_v27 = vadd.f32 %v15995_v45, %v12770_v5  ;;  %v15998_v8 = vadd.f32 %v15997_v43, %v15996_v63  ;;  %v17054_v5 = vld [vmem:[%s21457_s5 + $0x274] ss:$8 sps:$4 sm:$0xff]   ;;  %v17052_v45 = vld [vmem:[%s21457_s5 + $0x270] ss:$8 sps:$4 sm:$0xff]   ;;  %v17057_v63 = vld [vmem:[%s21457_s5 + $0x284] ss:$8 sps:$4 sm:$0xff]  }
 0x94d   : > { %13939 = vmatpush1.bf16.msra.mxu1 %v17007_v28  ;;  %v17049_v28 = vld [vmem:[%s21457_s5 + $0x260] ss:$8 sps:$4 sm:$0xff]   ;;  %v17060_v43 = vld [vmem:[%s21457_s5 + $0x294] ss:$8 sps:$4 sm:$0xff]  }
 0x94e   : > { %v12973_v51 = vmax.f32 %v12931_v27, 0.0  ;;  %v12934_v52 = vadd.f32 %v15998_v8, %v12773_v48  ;;  %13940 = vmatprep.subr.bf16.mxu1 %v17012_v15  ;;  %v17055_v15 = vld [vmem:[%s21457_s5 + $0x280] ss:$8 sps:$4 sm:$0xff]   ;;  %v17058_v48 = vld [vmem:[%s21457_s5 + $0x290] ss:$8 sps:$4 sm:$0xff]  }
 0x94f   : > { %v17063_v27 = vld [vmem:[%s21457_s5 + $0x2a4] ss:$8 sps:$4 sm:$0xff]   ;;  %v17061_v8 = vld [vmem:[%s21457_s5 + $0x2a0] ss:$8 sps:$4 sm:$0xff]  }
 0x950   : > { %13063 = vst.msk [vmem:[#allocation3 + $0x38] sm:$0xff] %vm12977_vm4, %v12973_v51  ;;  %v12974_v19 = vmax.f32 %v12934_v52, 0.0  ;;  %v17064_v51 = vld [vmem:[%s21457_s5 + $0x2b0] ss:$8 sps:$4 sm:$0xff]   ;;  %v17069_v52 = vld [vmem:[%s21457_s5 + $0x2c4] ss:$8 sps:$4 sm:$0xff]  }
 0x951   : > { %13941 = vmatpush1.bf16.msra.mxu1 %v17010_v32  ;;  %v17066_v32 = vld [vmem:[%s21457_s5 + $0x2b4] ss:$8 sps:$4 sm:$0xff]  }
 0x952   : > { %13064 = vst.msk [vmem:[#allocation3 + $0x78] sm:$0xff] %vm12977_vm4, %v12974_v19  ;;  %13942 = vmatprep.subr.bf16.mxu1 %v17015_v2  ;;  %v17067_v2 = vld [vmem:[%s21457_s5 + $0x2c0] ss:$8 sps:$4 sm:$0xff]   ;;  %v17072_v19 = vld [vmem:[%s21457_s5 + $0x2d4] ss:$8 sps:$4 sm:$0xff]  }
 0x955   : > { %13943 = vmatpush1.bf16.msra.mxu1 %v17013_v16 }
 0x956   : > { %13944 = vmatprep.subr.bf16.mxu1 %v17018_v26 }
 0x959   : > { %13945 = vmatpush1.bf16.msra.mxu1 %v17016_v7  ;;  %v17070_v7 = vld [vmem:[%s21457_s5 + $0x2d0] ss:$8 sps:$4 sm:$0xff]  }
 0x95a   : > { %13946 = vmatprep.subr.bf16.mxu1 %v17021_v23  ;;  %v17075_v23 = vld [vmem:[%s21457_s5 + $0x2e4] ss:$8 sps:$4 sm:$0xff]  }
 0x95b   : > { %v13020_v62 = vpop.permute.xlu0 %13019 }
 0x95c   : > { %13025 = vst.msk [vmem:[#allocation3 + $0x18] sm:$0xff] %vm12988_vm5, %v13020_v62  ;;  %v17073_v62 = vld [vmem:[%s21457_s5 + $0x2e0] ss:$8 sps:$4 sm:$0xff]  }
 0x95d   : > { %13947 = vmatpush1.bf16.msra.mxu1 %v17019_v31  ;;  %v13022_v14 = vpop.permute.xlu1 %13021 }
 0x95e   : > { %13026 = vst.msk [vmem:[#allocation3 + $0x58] sm:$0xff] %vm12988_vm5, %v13022_v14  ;;  %13948 = vmatprep.subr.bf16.mxu1 %v17024_v49  ;;  %v17078_v14 = vld [vmem:[%s21457_s5 + $0x2f4] ss:$8 sps:$4 sm:$0xff]  }
 0x95f   : > { %v13008_v46 = vpop.permute.xlu0 %13007 }
 0x960   : > { %13013 = vst.msk [vmem:[#allocation3 + $0x10] sm:$0xff] %vm12988_vm5, %v13008_v46  ;;  %v15999_v0 = vpop.f32.mrb[216].mxu1 }
 0x961   : > { %13949 = vmatpush1.bf16.msra.mxu1 %v17022_v12  ;;  %v16000_v37 = vpop.f32.mrb[217].mxu1  ;;  %v13010_v38 = vpop.permute.xlu1 %13009  ;;  %v17076_v12 = vld [vmem:[%s21457_s5 + $0x2f0] ss:$8 sps:$4 sm:$0xff]  }
 0x962   : > { %v16001_v18 = vadd.f32 %v16000_v37, %v15999_v0  ;;  %13014 = vst.msk [vmem:[#allocation3 + $0x50] sm:$0xff] %vm12988_vm5, %v13010_v38  ;;  %v16002_v60 = vpop.f32.mrb[218].mxu1  ;;  %13950 = vmatprep.subr.bf16.mxu1 %v17027_v36  ;;  %v17081_v37 = vld [vmem:[%s21457_s5 + $0x304] ss:$8 sps:$4 sm:$0xff]   ;;  %v17079_v38 = vld [vmem:[%s21457_s5 + $0x300] ss:$8 sps:$4 sm:$0xff]  }
 0x963   : > { %v16003_v4 = vpop.f32.mrb[219].mxu1  ;;  %v13078_v41 = vld [vmem:[#allocation3 + $0x18] sm:$0xff] }
 0x964   : > { %v12939_v9 = vadd.f32 %v16001_v18, %v12778_v10  ;;  %v16004_v1 = vadd.f32 %v16003_v4, %v16002_v60  ;;  %v17084_v60 = vld [vmem:[%s21457_s5 + $0x314] ss:$8 sps:$4 sm:$0xff]   ;;  %v17087_v4 = vld [vmem:[%s21457_s5 + $0x324] ss:$8 sps:$4 sm:$0xff]  }
 0x965   : > { %13951 = vmatpush1.bf16.msra.mxu1 %v17025_v30  ;;  %v13086_v50 = vld [vmem:[#allocation3 + $0x58] sm:$0xff] }
 0x966   : > { %v12975_v29 = vmax.f32 %v12939_v9, 0.0  ;;  %v12942_v6 = vadd.f32 %v16004_v1, %v12781_v34  ;;  %13952 = vmatprep.subr.bf16.mxu1 %v17030_v58  ;;  %v13094_v59 = vpack.c.bf16 %v13086_v50, %v13078_v41  ;;  %v17082_v58 = vld [vmem:[%s21457_s5 + $0x310] ss:$8 sps:$4 sm:$0xff]   ;;  %v17085_v34 = vld [vmem:[%s21457_s5 + $0x320] ss:$8 sps:$4 sm:$0xff]  }
 0x967   : > { %v13077_v54 = vld [vmem:[#allocation3 + $0x10] sm:$0xff]  ;;  %v17091_v41 = vld [vmem:[%s21457_s5 + $0x340] ss:$8 sps:$4 sm:$0xff]  }
 0x968   : > { %v12976_v13 = vmax.f32 %v12942_v6, 0.0  ;;  %13067 = vrot.lane.b32.xlu0 %v12975_v29, %s17283_s29  ;;  %13954 = vmatprep.mubr.bf16.mxu1 %v13094_v59  ;;  %v17090_v9 = vld [vmem:[%s21457_s5 + $0x334] ss:$8 sps:$4 sm:$0xff]   ;;  %v17088_v1 = vld [vmem:[%s21457_s5 + $0x330] ss:$8 sps:$4 sm:$0xff]  }
 0x969   : > { %13953 = vmatpush1.bf16.msra.mxu1 %v17028_v42  ;;  %v13085_v25 = vld [vmem:[#allocation3 + $0x50] sm:$0xff]  ;;  %v17093_v42 = vld [vmem:[%s21457_s5 + $0x344] ss:$8 sps:$4 sm:$0xff]   ;;  %v17097_v59 = vld [vmem:[%s21457_s5 + $0x360] ss:$8 sps:$4 sm:$0xff]  }
 0x96a   : > { %13069 = vrot.lane.b32.xlu1 %v12976_v13, %s17283_s29  ;;  %13965 = vmatprep.subr.bf16.mxu1 %v17033_v53  ;;  %v13093_v3 = vpack.c.bf16 %v13085_v25, %v13077_v54  ;;  %v17096_v50 = vld [vmem:[%s21457_s5 + $0x354] ss:$8 sps:$4 sm:$0xff]   ;;  %v17094_v29 = vld [vmem:[%s21457_s5 + $0x350] ss:$8 sps:$4 sm:$0xff]   ;;  %v17099_v6 = vld [vmem:[%s21457_s5 + $0x364] ss:$8 sps:$4 sm:$0xff]  }
 0x96b   : > { %v17102_v53 = vld [vmem:[%s21457_s5 + $0x374] ss:$8 sps:$4 sm:$0xff]   ;;  %v17100_v13 = vld [vmem:[%s21457_s5 + $0x370] ss:$8 sps:$4 sm:$0xff]   ;;  %v17103_v54 = vld [vmem:[%s21457_s5 + $0x380] ss:$8 sps:$4 sm:$0xff]  }
 0x96c   : > { %13055 = vrot.lane.b32.xlu0 %v12971_v61, %s17283_s29  ;;  %13955 = vmatmul.mubr.bf16.vlgmr.msra.gmra.mrb[220].mxu1 %v13093_v3  ;;  %v17108_v25 = vld [vmem:[%s21457_s5 + $0x394] ss:$8 sps:$4 sm:$0xff]   ;;  %v17106_v61 = vld [vmem:[%s21457_s5 + $0x390] ss:$8 sps:$4 sm:$0xff]   ;;  %v17111_v3 = vld [vmem:[%s21457_s5 + $0x3a4] ss:$8 sps:$4 sm:$0xff]  }
 0x96d   : > { %13966 = vmatpush1.bf16.msra.mxu1 %v17031_v47  ;;  %v17105_v47 = vld [vmem:[%s21457_s5 + $0x384] ss:$8 sps:$4 sm:$0xff]  }
 0x96e   : > { %13057 = vrot.lane.b32.xlu1 %v12972_v55, %s17283_s29  ;;  %13967 = vmatprep.subr.bf16.mxu1 %v17036_v40  ;;  %v17109_v40 = vld [vmem:[%s21457_s5 + $0x3a0] ss:$8 sps:$4 sm:$0xff]   ;;  %v17114_v55 = vld [vmem:[%s21457_s5 + $0x3b4] ss:$8 sps:$4 sm:$0xff]   ;;  %s14989_s29 = sshll.u32 %s14979_s20, 1 }
 0x96f   : > { %p4551_p8 = scmp.lt.s32.totalorder %s14989_s29, 3 }
 0x971   : > { %13968 = vmatpush1.bf16.msra.mxu1 %v17034_v24  ;;  %v17112_v24 = vld [vmem:[%s21457_s5 + $0x3b0] ss:$8 sps:$4 sm:$0xff]   ;;  %s21620_s29 = smov (!%p4551_p8, %s14989_s29), 3 }
 0x972   : > { %13969 = vmatprep.subr.bf16.mxu1 %v17039_v21  ;;  %v17117_v21 = vld [vmem:[%s21457_s5 + $0x3c4] ss:$8 sps:$4 sm:$0xff]   ;;  %s14990_s23 = sshll.u32 %s21620_s29, 3 }
 0x973   : > { %s4554_s30 = scalar_lea.vmem %s21463_s11, %s14990_s23 }
 0x975   : > { %13970 = vmatpush1.bf16.msra.mxu1 %v17037_v44  ;;  %v17115_v44 = vld [vmem:[%s21457_s5 + $0x3c0] ss:$8 sps:$4 sm:$0xff]  }
 0x976   : > { %13971 = vmatprep.subr.bf16.mxu1 %v17042_v17 }
 0x979   : > { %13972 = vmatpush1.bf16.msra.mxu1 %v17040_v33  ;;  %v17120_v33 = vld [vmem:[%s21457_s5 + $0x3d4] ss:$8 sps:$4 sm:$0xff]  }
 0x97a   : > { %13973 = vmatprep.subr.bf16.mxu1 %v17045_v57 }
 0x97d   : > { %13974 = vmatpush1.bf16.msra.mxu1 %v17043_v11  ;;  %v17118_v11 = vld [vmem:[%s21457_s5 + $0x3d0] ss:$8 sps:$4 sm:$0xff]  }
 0x97e   : > { %13975 = vmatprep.subr.bf16.mxu1 %v17048_v22 }
 0x981   : > { %13976 = vmatpush1.bf16.msra.mxu1 %v17046_v56  ;;  %v17123_v56 = vld [vmem:[%s21457_s5 + $0x3e4] ss:$8 sps:$4 sm:$0xff]  }
 0x982   : > { %13977 = vmatprep.subr.bf16.mxu1 %v17051_v35 }
 0x985   : > { %13978 = vmatpush1.bf16.msra.mxu1 %v17049_v28  ;;  %v17121_v28 = vld [vmem:[%s21457_s5 + $0x3e0] ss:$8 sps:$4 sm:$0xff]  }
 0x986   : > { %13979 = vmatprep.subr.bf16.mxu1 %v17054_v5  ;;  %v17126_v5 = vld [vmem:[%s21457_s5 + $0x3f4] ss:$8 sps:$4 sm:$0xff]  }
 0x989   : > { %13980 = vmatpush1.bf16.msra.mxu1 %v17052_v45 }
 0x98a   : > { %13981 = vmatprep.subr.bf16.mxu1 %v17057_v63 }
 0x98d   : > { %13982 = vmatpush1.bf16.msra.mxu1 %v17055_v15  ;;  %v17124_v15 = vld [vmem:[%s21457_s5 + $0x3f0] ss:$8 sps:$4 sm:$0xff]  }
 0x98e   : > { %13983 = vmatprep.subr.bf16.mxu1 %v17060_v43 }
 0x991   : > { %13984 = vmatpush1.bf16.msra.mxu1 %v17058_v48  ;;  %v17129_v48 = vld [vmem:[%s21459_s7 + $0x4] ss:$16 sps:$4 sm:$0xff]  }
 0x992   : > { %13985 = vmatprep.subr.bf16.mxu1 %v17063_v27 }
 0x995   : > { %13986 = vmatpush1.bf16.msra.mxu1 %v17061_v8 }
 0x996   : > { %13987 = vmatprep.subr.bf16.mxu1 %v17066_v32 }
 0x999   : > { %13988 = vmatpush1.bf16.msra.mxu1 %v17064_v51  ;;  %v17127_v51 = vld [vmem:[%s21459_s7] ss:$16 sps:$4 sm:$0xff]  }
 0x99a   : > { %13989 = vmatprep.subr.bf16.mxu1 %v17069_v52  ;;  %v17132_v52 = vld [vmem:[%s21459_s7 + $0x24] ss:$16 sps:$4 sm:$0xff]  }
 0x99b   : > { %v13044_v16 = vpop.permute.xlu0 %13043 }
 0x99c   : > { %13049 = vst.msk [vmem:[#allocation3 + $0x28] sm:$0xff] %vm12988_vm5, %v13044_v16  ;;  %v17133_v16 = vld [vmem:[%s21459_s7 + $0x40] ss:$16 sps:$4 sm:$0xff]  }
 0x99d   : > { %13990 = vmatpush1.bf16.msra.mxu1 %v17067_v2  ;;  %v13046_v26 = vpop.permute.xlu1 %13045  ;;  %v17130_v2 = vld [vmem:[%s21459_s7 + $0x20] ss:$16 sps:$4 sm:$0xff]  }
 0x99e   : > { %13050 = vst.msk [vmem:[#allocation3 + $0x68] sm:$0xff] %vm12988_vm5, %v13046_v26  ;;  %13991 = vmatprep.subr.bf16.mxu1 %v17072_v19  ;;  %v17135_v19 = vld [vmem:[%s21459_s7 + $0x44] ss:$16 sps:$4 sm:$0xff]  }
 0x99f   : > { %v13032_v31 = vpop.permute.xlu0 %13031  ;;  %v17138_v26 = vld [vmem:[%s21459_s7 + $0x64] ss:$16 sps:$4 sm:$0xff]  }
 0x9a0   : > { %13037 = vst.msk [vmem:[#allocation3 + $0x20] sm:$0xff] %vm12988_vm5, %v13032_v31  ;;  %v17139_v31 = vld [vmem:[%s21459_s7 + $0x80] ss:$16 sps:$4 sm:$0xff]  }
 0x9a1   : > { %13992 = vmatpush1.bf16.msra.mxu1 %v17070_v7  ;;  %v13034_v49 = vpop.permute.xlu1 %13033  ;;  %v17136_v7 = vld [vmem:[%s21459_s7 + $0x60] ss:$16 sps:$4 sm:$0xff]  }
 0x9a2   : > { %13038 = vst.msk [vmem:[#allocation3 + $0x60] sm:$0xff] %vm12988_vm5, %v13034_v49  ;;  %13993 = vmatprep.subr.bf16.mxu1 %v17075_v23  ;;  %v17141_v23 = vld [vmem:[%s21459_s7 + $0x84] ss:$16 sps:$4 sm:$0xff]  }
 0x9a3   : > { %v13080_v36 = vld [vmem:[#allocation3 + $0x28] sm:$0xff]  ;;  %v17144_v49 = vld [vmem:[%s21459_s7 + $0xa4] ss:$16 sps:$4 sm:$0xff]  }
 0x9a5   : > { %13994 = vmatpush1.bf16.msra.mxu1 %v17073_v62  ;;  %v13088_v46 = vld [vmem:[#allocation3 + $0x68] sm:$0xff]  ;;  %v17142_v62 = vld [vmem:[%s21459_s7 + $0xa0] ss:$16 sps:$4 sm:$0xff]  }
 0x9a6   : > { %13995 = vmatprep.subr.bf16.mxu1 %v17078_v14  ;;  %v13096_v0 = vpack.c.bf16 %v13088_v46, %v13080_v36  ;;  %v17147_v14 = vld [vmem:[%s21459_s7 + $0xc4] ss:$16 sps:$4 sm:$0xff]   ;;  %v17148_v46 = vld [vmem:[%s21459_s7 + $0xe0] ss:$16 sps:$4 sm:$0xff]  }
 0x9a7   : > { %v13079_v30 = vld [vmem:[#allocation3 + $0x20] sm:$0xff] }
 0x9a8   : > { %13997 = vmatprep.mubr.bf16.mxu1 %v13096_v0  ;;  %v17150_v36 = vld [vmem:[%s21459_s7 + $0xe4] ss:$16 sps:$4 sm:$0xff]  }
 0x9a9   : > { %13996 = vmatpush1.bf16.msra.mxu1 %v17076_v12  ;;  %v13087_v10 = vld [vmem:[#allocation3 + $0x60] sm:$0xff] }
 0x9aa   : > { %14008 = vmatprep.subr.bf16.mxu1 %v17081_v37  ;;  %v13095_v18 = vpack.c.bf16 %v13087_v10, %v13079_v30  ;;  %v17145_v12 = vld [vmem:[%s21459_s7 + $0xc0] ss:$16 sps:$4 sm:$0xff]   ;;  %v17153_v0 = vld [vmem:[%s21459_s7 + $0x104] ss:$16 sps:$4 sm:$0xff]  }
 0x9ab   : > { %v17151_v37 = vld [vmem:[%s21459_s7 + $0x100] ss:$16 sps:$4 sm:$0xff]   ;;  %v17159_v10 = vld [vmem:[%s21459_s7 + $0x144] ss:$16 sps:$4 sm:$0xff]  }
 0x9ac   : > { %13998 = vmatmul.mubr.bf16.vlgmr.msra.gmra.mrb[220].mxu1 %v13095_v18  ;;  %v17154_v30 = vld [vmem:[%s21459_s7 + $0x120] ss:$16 sps:$4 sm:$0xff]  }
 0x9ad   : > { %14009 = vmatpush1.bf16.msra.mxu1 %v17079_v38  ;;  %v17156_v38 = vld [vmem:[%s21459_s7 + $0x124] ss:$16 sps:$4 sm:$0xff]   ;;  %v17157_v18 = vld [vmem:[%s21459_s7 + $0x140] ss:$16 sps:$4 sm:$0xff]  }
 0x9ae   : > { %14010 = vmatprep.subr.bf16.mxu1 %v17084_v60  ;;  %v17162_v60 = vld [vmem:[%s21459_s7 + $0x164] ss:$16 sps:$4 sm:$0xff]  }
 0x9b1   : > { %14011 = vmatpush1.bf16.msra.mxu1 %v17082_v58  ;;  %v17160_v58 = vld [vmem:[%s21459_s7 + $0x160] ss:$16 sps:$4 sm:$0xff]  }
 0x9b2   : > { %14012 = vmatprep.subr.bf16.mxu1 %v17087_v4  ;;  %v17165_v4 = vld [vmem:[%s21459_s7 + $0x184] ss:$16 sps:$4 sm:$0xff]  }
 0x9b5   : > { %14013 = vmatpush1.bf16.msra.mxu1 %v17085_v34  ;;  %v17163_v34 = vld [vmem:[%s21459_s7 + $0x180] ss:$16 sps:$4 sm:$0xff]  }
 0x9b6   : > { %14014 = vmatprep.subr.bf16.mxu1 %v17090_v9  ;;  %v17168_v9 = vld [vmem:[%s21459_s7 + $0x1a4] ss:$16 sps:$4 sm:$0xff]  }
 0x9b9   : > { %14015 = vmatpush1.bf16.msra.mxu1 %v17088_v1  ;;  %v17166_v1 = vld [vmem:[%s21459_s7 + $0x1a0] ss:$16 sps:$4 sm:$0xff]  }
 0x9ba   : > { %14016 = vmatprep.subr.bf16.mxu1 %v17093_v42  ;;  %v17171_v42 = vld [vmem:[%s21459_s7 + $0x1c4] ss:$16 sps:$4 sm:$0xff]  }
 0x9bd   : > { %14017 = vmatpush1.bf16.msra.mxu1 %v17091_v41  ;;  %v17169_v41 = vld [vmem:[%s21459_s7 + $0x1c0] ss:$16 sps:$4 sm:$0xff]  }
 0x9be   : > { %14018 = vmatprep.subr.bf16.mxu1 %v17096_v50  ;;  %v17174_v50 = vld [vmem:[%s21459_s7 + $0x1e4] ss:$16 sps:$4 sm:$0xff]  }
 0x9c1   : > { %14019 = vmatpush1.bf16.msra.mxu1 %v17094_v29  ;;  %v17172_v29 = vld [vmem:[%s21459_s7 + $0x1e0] ss:$16 sps:$4 sm:$0xff]  }
 0x9c2   : > { %14020 = vmatprep.subr.bf16.mxu1 %v17099_v6  ;;  %v17177_v6 = vld [vmem:[%s21459_s7 + $0xc] ss:$16 sps:$4 sm:$0xff]  }
 0x9c5   : > { %14021 = vmatpush1.bf16.msra.mxu1 %v17097_v59  ;;  %v13227_v59 = vld [vmem:[%s21458_s6] sm:$0x3] }
 0x9c6   : > { %14022 = vmatprep.subr.bf16.mxu1 %v17102_v53  ;;  %v21613_v53 = vld [vmem:[#allocation47_spill] sm:$0xff] }
 0x9c9   : > { %14023 = vmatpush1.bf16.msra.mxu1 %v17100_v13  ;;  %v13232_v13 = vrot.slane %v13227_v59, %v21613_v53 }
 0x9ca   : > { %14024 = vmatprep.subr.bf16.mxu1 %v17105_v47  ;;  %v21614_v47 = vld [vmem:[#allocation46_spill] sm:$0xff] }
 0x9cd   : > { %14025 = vmatpush1.bf16.msra.mxu1 %v17103_v54  ;;  %v13236_v54 = vrot.slane %v13227_v59, %v21614_v47  ;;  %v17235_v59 = vld [vmem:[%s21461_s9 + $0x70] sm:$0xff]  }
 0x9ce   : > { %14026 = vmatprep.subr.bf16.mxu1 %v17108_v25 }
 0x9d1   : > { %14027 = vmatpush1.bf16.msra.mxu1 %v17106_v61 }
 0x9d2   : > { %14028 = vmatprep.subr.bf16.mxu1 %v17111_v3 }
 0x9d5   : > { %14029 = vmatpush1.bf16.msra.mxu1 %v17109_v40 }
 0x9d6   : > { %14030 = vmatprep.subr.bf16.mxu1 %v17114_v55 }
 0x9d9   : > { %14031 = vmatpush1.bf16.msra.mxu1 %v17112_v24 }
 0x9da   : > { %v13068_v17 = vpop.permute.xlu0 %13067  ;;  %14032 = vmatprep.subr.bf16.mxu1 %v17117_v21 }
 0x9db   : > { %13073 = vst.msk [vmem:[#allocation3 + $0x38] sm:$0xff] %vm12988_vm5, %v13068_v17 }
 0x9dc   : > { %v13070_v57 = vpop.permute.xlu1 %13069 }
 0x9dd   : > { %14033 = vmatpush1.bf16.msra.mxu1 %v17115_v44  ;;  %13074 = vst.msk [vmem:[#allocation3 + $0x78] sm:$0xff] %vm12988_vm5, %v13070_v57 }
 0x9de   : > { %v13056_v22 = vpop.permute.xlu0 %13055  ;;  %14034 = vmatprep.subr.bf16.mxu1 %v17120_v33 }
 0x9df   : > { %13061 = vst.msk [vmem:[#allocation3 + $0x30] sm:$0xff] %vm12988_vm5, %v13056_v22 }
 0x9e0   : > { %v13058_v35 = vpop.permute.xlu1 %13057 }
 0x9e1   : > { %14035 = vmatpush1.bf16.msra.mxu1 %v17118_v11  ;;  %13062 = vst.msk [vmem:[#allocation3 + $0x70] sm:$0xff] %vm12988_vm5, %v13058_v35  ;;  %v17175_v35 = vld [vmem:[%s21459_s7 + $0x8] ss:$16 sps:$4 sm:$0xff]  }
 0x9e2   : > { %14036 = vmatprep.subr.bf16.mxu1 %v17123_v56  ;;  %v13082_v45 = vld [vmem:[#allocation3 + $0x38] sm:$0xff] }
 0x9e4   : > { %v13090_v63 = vld [vmem:[#allocation3 + $0x78] sm:$0xff] }
 0x9e5   : > { %14037 = vmatpush1.bf16.msra.mxu1 %v17121_v28  ;;  %v13098_v43 = vpack.c.bf16 %v13090_v63, %v13082_v45  ;;  %v17180_v28 = vld [vmem:[%s21459_s7 + $0x2c] ss:$16 sps:$4 sm:$0xff]   ;;  %v17181_v63 = vld [vmem:[%s21459_s7 + $0x48] ss:$16 sps:$4 sm:$0xff]  }
 0x9e6   : > { %14038 = vmatprep.subr.bf16.mxu1 %v17126_v5  ;;  %v13081_v27 = vld [vmem:[#allocation3 + $0x30] sm:$0xff]  ;;  %v17178_v5 = vld [vmem:[%s21459_s7 + $0x28] ss:$16 sps:$4 sm:$0xff]   ;;  %v17183_v45 = vld [vmem:[%s21459_s7 + $0x4c] ss:$16 sps:$4 sm:$0xff]  }
 0x9e7   : > { %14040 = vmatprep.mubr.bf16.mxu1 %v13098_v43  ;;  %v17184_v43 = vld [vmem:[%s21459_s7 + $0x68] ss:$16 sps:$4 sm:$0xff]  }
 0x9e8   : > { %v13089_v8 = vld [vmem:[#allocation3 + $0x70] sm:$0xff] }
 0x9e9   : > { %14039 = vmatpush1.bf16.msra.mxu1 %v17124_v15  ;;  %v13097_v32 = vpack.c.bf16 %v13089_v8, %v13081_v27  ;;  %v17186_v15 = vld [vmem:[%s21459_s7 + $0x6c] ss:$16 sps:$4 sm:$0xff]   ;;  %v17187_v27 = vld [vmem:[%s21459_s7 + $0x88] ss:$16 sps:$4 sm:$0xff]  }
 0x9ea   : > { %14463 = vmatprep.subr.bf16.mxu1 %v17129_v48  ;;  %v17189_v48 = vld [vmem:[%s21459_s7 + $0x8c] ss:$16 sps:$4 sm:$0xff]  }
 0x9eb   : > { %v17192_v8 = vld [vmem:[%s21459_s7 + $0xac] ss:$16 sps:$4 sm:$0xff]  }
 0x9ec   : > { %14041 = vmatmul.mubr.bf16.vlgmr.msra.gmra.mrb[220].mxu1 %v13097_v32  ;;  %v17190_v32 = vld [vmem:[%s21459_s7 + $0xa8] ss:$16 sps:$4 sm:$0xff]  }
 0x9ed   : > { %14464 = vmatpush1.bf16.msra.mxu1 %v17127_v51  ;;  %v17195_v51 = vld [vmem:[%s21459_s7 + $0xcc] ss:$16 sps:$4 sm:$0xff]  }
 0x9ee   : > { %14465 = vmatprep.subr.bf16.mxu1 %v17132_v52  ;;  %v17193_v52 = vld [vmem:[%s21459_s7 + $0xc8] ss:$16 sps:$4 sm:$0xff]  }
 0x9f1   : > { %14466 = vmatpush1.bf16.msra.mxu1 %v17130_v2  ;;  %v17198_v2 = vld [vmem:[%s21459_s7 + $0xec] ss:$16 sps:$4 sm:$0xff]  }
 0x9f2   : > { %14467 = vmatprep.subr.bf16.mxu1 %v17135_v19  ;;  %v17196_v19 = vld [vmem:[%s21459_s7 + $0xe8] ss:$16 sps:$4 sm:$0xff]  }
 0x9f5   : > { %14468 = vmatpush1.bf16.msra.mxu1 %v17133_v16  ;;  %v17201_v16 = vld [vmem:[%s21459_s7 + $0x10c] ss:$16 sps:$4 sm:$0xff]  }
 0x9f6   : > { %14469 = vmatprep.subr.bf16.mxu1 %v17138_v26  ;;  %v17199_v26 = vld [vmem:[%s21459_s7 + $0x108] ss:$16 sps:$4 sm:$0xff]  }
 0x9f9   : > { %14470 = vmatpush1.bf16.msra.mxu1 %v17136_v7  ;;  %v17204_v7 = vld [vmem:[%s21459_s7 + $0x12c] ss:$16 sps:$4 sm:$0xff]  }
 0x9fa   : > { %14471 = vmatprep.subr.bf16.mxu1 %v17141_v23  ;;  %v17202_v23 = vld [vmem:[%s21459_s7 + $0x128] ss:$16 sps:$4 sm:$0xff]  }
 0x9fd   : > { %14472 = vmatpush1.bf16.msra.mxu1 %v17139_v31  ;;  %v17207_v31 = vld [vmem:[%s21459_s7 + $0x14c] ss:$16 sps:$4 sm:$0xff]  }
 0x9fe   : > { %14473 = vmatprep.subr.bf16.mxu1 %v17144_v49  ;;  %v17205_v49 = vld [vmem:[%s21459_s7 + $0x148] ss:$16 sps:$4 sm:$0xff]  }
 0xa01   : > { %14474 = vmatpush1.bf16.msra.mxu1 %v17142_v62  ;;  %v17210_v62 = vld [vmem:[%s21459_s7 + $0x16c] ss:$16 sps:$4 sm:$0xff]  }
 0xa02   : > { %14475 = vmatprep.subr.bf16.mxu1 %v17147_v14  ;;  %v17208_v14 = vld [vmem:[%s21459_s7 + $0x168] ss:$16 sps:$4 sm:$0xff]  }
 0xa05   : > { %14476 = vmatpush1.bf16.msra.mxu1 %v17145_v12  ;;  %v17213_v12 = vld [vmem:[%s21459_s7 + $0x18c] ss:$16 sps:$4 sm:$0xff]  }
 0xa06   : > { %14477 = vmatprep.subr.bf16.mxu1 %v17150_v36  ;;  %v17211_v36 = vld [vmem:[%s21459_s7 + $0x188] ss:$16 sps:$4 sm:$0xff]  }
 0xa09   : > { %14478 = vmatpush1.bf16.msra.mxu1 %v17148_v46  ;;  %v17216_v46 = vld [vmem:[%s21459_s7 + $0x1ac] ss:$16 sps:$4 sm:$0xff]  }
 0xa0a   : > { %14479 = vmatprep.subr.bf16.mxu1 %v17153_v0  ;;  %v17214_v0 = vld [vmem:[%s21459_s7 + $0x1a8] ss:$16 sps:$4 sm:$0xff]  }
 0xa0d   : > { %14480 = vmatpush1.bf16.msra.mxu1 %v17151_v37  ;;  %v17219_v37 = vld [vmem:[%s21459_s7 + $0x1cc] ss:$16 sps:$4 sm:$0xff]  }
 0xa0e   : > { %14481 = vmatprep.subr.bf16.mxu1 %v17156_v38  ;;  %v17217_v38 = vld [vmem:[%s21459_s7 + $0x1c8] ss:$16 sps:$4 sm:$0xff]  }
 0xa11   : > { %14482 = vmatpush1.bf16.msra.mxu1 %v17154_v30  ;;  %v17222_v30 = vld [vmem:[%s21459_s7 + $0x1ec] ss:$16 sps:$4 sm:$0xff]  }
 0xa12   : > { %14483 = vmatprep.subr.bf16.mxu1 %v17159_v10  ;;  %v17220_v10 = vld [vmem:[%s21459_s7 + $0x1e8] ss:$16 sps:$4 sm:$0xff]  }
 0xa15   : > { %14484 = vmatpush1.bf16.msra.mxu1 %v17157_v18  ;;  %v17223_v18 = vld [vmem:[%s21461_s9 + $0x40] sm:$0xff]  }
 0xa16   : > { %14485 = vmatprep.subr.bf16.mxu1 %v17162_v60  ;;  %v17224_v60 = vld [vmem:[%s21461_s9] sm:$0xff]  }
 0xa19   : > { %14486 = vmatpush1.bf16.msra.mxu1 %v17160_v58  ;;  %v17225_v58 = vld [vmem:[%s21461_s9 + $0x48] sm:$0xff]  }
 0xa1a   : > { %14487 = vmatprep.subr.bf16.mxu1 %v17165_v4  ;;  %v17226_v4 = vld [vmem:[%s21461_s9 + $0x8] sm:$0xff]  }
 0xa1d   : > { %14488 = vmatpush1.bf16.msra.mxu1 %v17163_v34  ;;  %v17227_v34 = vld [vmem:[%s21461_s9 + $0x50] sm:$0xff]  }
 0xa1e   : > { %14489 = vmatprep.subr.bf16.mxu1 %v17168_v9  ;;  %v17228_v9 = vld [vmem:[%s21461_s9 + $0x10] sm:$0xff]  }
 0xa21   : > { %14490 = vmatpush1.bf16.msra.mxu1 %v17166_v1  ;;  %v17229_v1 = vld [vmem:[%s21461_s9 + $0x58] sm:$0xff]  }
 0xa22   : > { %14491 = vmatprep.subr.bf16.mxu1 %v17171_v42  ;;  %v17230_v42 = vld [vmem:[%s21461_s9 + $0x18] sm:$0xff]  }
 0xa25   : > { %14492 = vmatpush1.bf16.msra.mxu1 %v17169_v41  ;;  %v17231_v41 = vld [vmem:[%s21461_s9 + $0x60] sm:$0xff]  }
 0xa26   : > { %14493 = vmatprep.subr.bf16.mxu1 %v17174_v50  ;;  %v17232_v50 = vld [vmem:[%s21461_s9 + $0x20] sm:$0xff]  }
 0xa29   : > { %14494 = vmatpush1.bf16.msra.mxu1 %v17172_v29  ;;  %v17233_v29 = vld [vmem:[%s21461_s9 + $0x68] sm:$0xff]  }
 0xa2a   : > { %14506 = vmatprep.subr.bf16.mxu1 %v17177_v6  ;;  %v17234_v6 = vld [vmem:[%s21461_s9 + $0x28] sm:$0xff]  }
 0xabf   : > { %v14042_v25 = vpop.f32.mrb[220].mxu1 }
 0xac0   : > { %v16081_v61 = vadd.f32 %v14042_v25, %v13232_v13  ;;  %v14044_v3 = vpop.f32.mrb[221].mxu1  ;;  %v17238_v25 = vld [vmem:[%s21461_s9 + $0x38] sm:$0xff]  }
 0xac1   : > { %v16082_v40 = vadd.f32 %v14044_v3, %v13236_v54  ;;  %v14046_v55 = vpop.f32.mrb[222].mxu1  ;;  %v14121_v3 = vld [vmem:[%s21460_s8] sm:$0xf] }
 0xac2   : > { %v16083_v24 = vadd.f32 %v14046_v55, %v13232_v13  ;;  %v14048_v21 = vpop.f32.mrb[223].mxu1  ;;  %v14051_v17 = vmax.f32 %v16081_v61, 0.0  ;;  %v17236_v13 = vld [vmem:[%s21461_s9 + $0x30] sm:$0xff]   ;;  %v17239_v61 = vld [vmem:[%s21461_s9 + $0xc0] sm:$0xff]   ;;  %v14130_v55 = vrot.slane %v14121_v3, %v21614_v47  ;;  %v17241_v47 = vld [vmem:[%s21461_s9 + $0xc8] sm:$0xff]  }
 0xac3   : > { %v16084_v44 = vadd.f32 %v14048_v21, %v13236_v54  ;;  %v14052_v57 = vmax.f32 %v16082_v40, 0.0  ;;  %v17237_v54 = vld [vmem:[%s21461_s9 + $0x78] sm:$0xff]   ;;  %v14126_v40 = vrot.slane %v14121_v3, %v21613_v53  ;;  %v17240_v53 = vld [vmem:[%s21461_s9 + $0x80] sm:$0xff]  }
 0xac4   : > { %v14053_v33 = vmax.f32 %v16083_v24, 0.0 }
 0xac5   : > { %v14054_v11 = vmax.f32 %v16084_v44, 0.0 }
 0xac6   : > { %v21232_v22 = vpack.c.bf16 %v14053_v33, %v14051_v17 }
 0xac7   : > { %v14056_v56 = vpack.c.bf16 %v14054_v11, %v14052_v57 }
 0xac9   : > { %14495 = vmatprep.mubr.bf16.mxu1 %v14056_v56 }
 0xaca   : > { %14496 = vmatmul.mubr.bf16.vlgmr.msra.gmra.mrb[224].mxu1 %v21232_v22 }
 0xacb   : > { %14507 = vmatpush1.bf16.msra.mxu1 %v17175_v35  ;;  %14538 = vmatprep.mubr.bf16.mxu1 %v14056_v56 }
 0xacc   : > { %14508 = vmatprep.subr.bf16.mxu1 %v17180_v28 }
 0xacf   : > { %14509 = vmatpush1.bf16.msra.mxu1 %v17178_v5 }
 0xad0   : > { %14510 = vmatprep.subr.bf16.mxu1 %v17183_v45 }
 0xad3   : > { %14511 = vmatpush1.bf16.msra.mxu1 %v17181_v63 }
 0xad4   : > { %14512 = vmatprep.subr.bf16.mxu1 %v17186_v15  ;;  %v17242_v15 = vld [vmem:[%s21461_s9 + $0x88] sm:$0xff]  }
 0xad7   : > { %14513 = vmatpush1.bf16.msra.mxu1 %v17184_v43  ;;  %v17243_v43 = vld [vmem:[%s21461_s9 + $0xd0] sm:$0xff]  }
 0xad8   : > { %14514 = vmatprep.subr.bf16.mxu1 %v17189_v48  ;;  %v17244_v48 = vld [vmem:[%s21461_s9 + $0x90] sm:$0xff]  }
 0xadb   : > { %14515 = vmatpush1.bf16.msra.mxu1 %v17187_v27  ;;  %v17245_v27 = vld [vmem:[%s21461_s9 + $0xd8] sm:$0xff]  }
 0xadc   : > { %14516 = vmatprep.subr.bf16.mxu1 %v17192_v8  ;;  %v17246_v8 = vld [vmem:[%s21461_s9 + $0x98] sm:$0xff]  }
 0xadf   : > { %14517 = vmatpush1.bf16.msra.mxu1 %v17190_v32  ;;  %v17247_v32 = vld [vmem:[%s21461_s9 + $0xe0] sm:$0xff]  }
 0xae0   : > { %14518 = vmatprep.subr.bf16.mxu1 %v17195_v51  ;;  %v17248_v51 = vld [vmem:[%s21461_s9 + $0xa0] sm:$0xff]  }
 0xae3   : > { %14519 = vmatpush1.bf16.msra.mxu1 %v17193_v52  ;;  %v17249_v52 = vld [vmem:[%s21461_s9 + $0xe8] sm:$0xff]  }
 0xae4   : > { %14520 = vmatprep.subr.bf16.mxu1 %v17198_v2  ;;  %v17250_v2 = vld [vmem:[%s21461_s9 + $0xa8] sm:$0xff]  }
 0xae7   : > { %14521 = vmatpush1.bf16.msra.mxu1 %v17196_v19  ;;  %v17251_v19 = vld [vmem:[%s21461_s9 + $0xf0] sm:$0xff]  }
 0xae8   : > { %14522 = vmatprep.subr.bf16.mxu1 %v17201_v16  ;;  %v17252_v16 = vld [vmem:[%s21461_s9 + $0xb0] sm:$0xff]  }
 0xaeb   : > { %14523 = vmatpush1.bf16.msra.mxu1 %v17199_v26  ;;  %v17253_v26 = vld [vmem:[%s21461_s9 + $0xf8] sm:$0xff]  }
 0xaec   : > { %14524 = vmatprep.subr.bf16.mxu1 %v17204_v7  ;;  %v17254_v7 = vld [vmem:[%s21461_s9 + $0xb8] sm:$0xff]  }
 0xaef   : > { %14525 = vmatpush1.bf16.msra.mxu1 %v17202_v23  ;;  %v14134_v23 = vrot.slane %v14121_v3, %v12030_v20 }
 0xaf0   : > { %14526 = vmatprep.subr.bf16.mxu1 %v17207_v31  ;;  %v21615_v31 = vsub.s32 3, %v19766_v39 }
 0xaf3   : > { %14527 = vmatpush1.bf16.msra.mxu1 %v17205_v49  ;;  %v14138_v49 = vrot.slane %v14121_v3, %v21615_v31 }
 0xaf4   : > { %14528 = vmatprep.subr.bf16.mxu1 %v17210_v62 }
 0xaf7   : > { %14529 = vmatpush1.bf16.msra.mxu1 %v17208_v14 }
 0xaf8   : > { %14530 = vmatprep.subr.bf16.mxu1 %v17213_v12 }
 0xafb   : > { %14531 = vmatpush1.bf16.msra.mxu1 %v17211_v36 }
 0xafc   : > { %14532 = vmatprep.subr.bf16.mxu1 %v17216_v46 }
 0xaff   : > { %14533 = vmatpush1.bf16.msra.mxu1 %v17214_v0 }
 0xb00   : > { %14534 = vmatprep.subr.bf16.mxu1 %v17219_v37 }
 0xb03   : > { %14535 = vmatpush1.bf16.msra.mxu1 %v17217_v38 }
 0xb04   : > { %14536 = vmatprep.subr.bf16.mxu1 %v17222_v30 }
 0xb07   : > { %14537 = vmatpush1.bf16.msra.mxu1 %v17220_v10 }
 0xb08   : > { %16005 = vmatprep.subr.bf16.mxu1 %v17223_v18 }
 0xb0a   : > { %14539 = vmatmul.mubr.bf16.vlgmr.msra.gmra.mrb[228].mxu1 %v21232_v22 }
 0xb0b   : > { %16006 = vmatpush3.bf16.msra.mxu1 %v17224_v60 }
 0xb0c   : > { %16007 = vmatprep.subr.bf16.mxu1 %v17225_v58 }
 0xb0f   : > { %16008 = vmatpush3.bf16.msra.mxu1 %v17226_v4 }
 0xb10   : > { %16009 = vmatprep.subr.bf16.mxu1 %v17227_v34 }
 0xb13   : > { %16010 = vmatpush3.bf16.msra.mxu1 %v17228_v9 }
 0xb14   : > { %16011 = vmatprep.subr.bf16.mxu1 %v17229_v1 }
 0xb17   : > { %16012 = vmatpush3.bf16.msra.mxu1 %v17230_v42 }
 0xb18   : > { %16013 = vmatprep.subr.bf16.mxu1 %v17231_v41  ;;  %v15744_v41 = vld [vmem:[%s21462_s10] ss:$0 sm:$0xff] }
 0xb1b   : > { %16014 = vmatpush3.bf16.msra.mxu1 %v17232_v50 }
 0xb1c   : > { %16015 = vmatprep.subr.bf16.mxu1 %v17233_v29 }
 0xb1f   : > { %16016 = vmatpush3.bf16.msra.mxu1 %v17234_v6 }
 0xb20   : > { %16017 = vmatprep.subr.bf16.mxu1 %v17235_v59 }
 0xb23   : > { %16018 = vmatpush3.bf16.msra.mxu1 %v17236_v13 }
 0xb24   : > { %16019 = vmatprep.subr.bf16.mxu1 %v17237_v54 }
 0xb27   : > { %16020 = vmatpush3.bf16.msra.mxu1 %v17238_v25 }
 0xb28   : > { %16027 = vmatprep.subr.bf16.mxu1 %v17239_v61 }
 0xb9d   : > { %v14497_v24 = vpop.f32.mrb[224].mxu1 }
 0xb9e   : > { %v14498_v21 = vadd.f32 %v14497_v24, %v14126_v40  ;;  %v14499_v44 = vpop.f32.mrb[225].mxu1 }
 0xb9f   : > { %v14500_v17 = vadd.f32 %v14499_v44, %v14130_v55  ;;  %v14501_v33 = vpop.f32.mrb[226].mxu1 }
 0xba0   : > { %v14502_v57 = vadd.f32 %v14501_v33, %v14126_v40  ;;  %v14503_v11 = vpop.f32.mrb[227].mxu1  ;;  %v14549_v56 = vmax.f32 %v14498_v21, 0.0 }
 0xba1   : > { %v14504_v22 = vadd.f32 %v14503_v11, %v14130_v55  ;;  %v14550_v28 = vmax.f32 %v14500_v17, 0.0 }
 0xba2   : > { %v14553_v35 = vmax.f32 %v14502_v57, 0.0 }
 0xba3   : > { %v14554_v5 = vmax.f32 %v14504_v22, 0.0 }
 0xba4   : > { %v14557_v45 = vpack.c.bf16 %v14553_v35, %v14549_v56 }
 0xba5   : > { %v14558_v63 = vpack.c.bf16 %v14554_v5, %v14550_v28 }
 0xba7   : > { %14856 = vmatprep.mubr.bf16.mxu1 %v14558_v63 }
 0xba8   : > { %14857 = vmatmul.mubr.bf16.vlgmr.msra.gmra.mrb[232].mxu1 %v14557_v45 }
 0xba9   : > { %16028 = vmatpush3.bf16.msra.mxu1 %v17240_v53 }
 0xbaa   : > { %16029 = vmatprep.subr.bf16.mxu1 %v17241_v47 }
 0xbad   : > { %16030 = vmatpush3.bf16.msra.mxu1 %v17242_v15 }
 0xbae   : > { %16031 = vmatprep.subr.bf16.mxu1 %v17243_v43 }
 0xbb1   : > { %16032 = vmatpush3.bf16.msra.mxu1 %v17244_v48 }
 0xbb2   : > { %16033 = vmatprep.subr.bf16.mxu1 %v17245_v27 }
 0xbb5   : > { %16034 = vmatpush3.bf16.msra.mxu1 %v17246_v8 }
 0xbb6   : > { %16035 = vmatprep.subr.bf16.mxu1 %v17247_v32 }
 0xbb9   : > { %16036 = vmatpush3.bf16.msra.mxu1 %v17248_v51 }
 0xbba   : > { %16037 = vmatprep.subr.bf16.mxu1 %v17249_v52 }
 0xbbd   : > { %16038 = vmatpush3.bf16.msra.mxu1 %v17250_v2 }
 0xbbe   : > { %16039 = vmatprep.subr.bf16.mxu1 %v17251_v19 }
 0xbc1   : > { %16040 = vmatpush3.bf16.msra.mxu1 %v17252_v16 }
 0xbc2   : > { %16041 = vmatprep.subr.bf16.mxu1 %v17253_v26 }
 0xbc5   : > { %16042 = vmatpush3.bf16.msra.mxu1 %v17254_v7 }
 0xbdd   : > { %v14540_v62 = vpop.f32.mrb[228].mxu1 }
 0xbde   : > { %v14541_v14 = vadd.f32 %v14540_v62, %v14134_v23  ;;  %v14542_v12 = vpop.f32.mrb[229].mxu1 }
 0xbdf   : > { %v14543_v36 = vadd.f32 %v14542_v12, %v14138_v49  ;;  %v14544_v46 = vpop.f32.mrb[230].mxu1 }
 0xbe0   : > { %v14545_v0 = vadd.f32 %v14544_v46, %v14134_v23  ;;  %v14546_v37 = vpop.f32.mrb[231].mxu1  ;;  %v14551_v30 = vmax.f32 %v14541_v14, 0.0 }
 0xbe1   : > { %v14547_v38 = vadd.f32 %v14546_v37, %v14138_v49  ;;  %v14552_v18 = vmax.f32 %v14543_v36, 0.0 }
 0xbe2   : > { %v14555_v10 = vmax.f32 %v14545_v0, 0.0 }
 0xbe3   : > { %v14556_v60 = vmax.f32 %v14547_v38, 0.0 }
 0xbe4   : > { %v14559_v58 = vpack.c.bf16 %v14555_v10, %v14551_v30 }
 0xbe5   : > { %v14560_v4 = vpack.c.bf16 %v14556_v60, %v14552_v18 }
 0xbe7   : > { %14897 = vmatprep.mubr.bf16.mxu1 %v14560_v4 }
 0xbe8   : > { %14898 = vmatmul.mubr.bf16.vlgmr.msra.gmra.mrb[236].mxu1 %v14559_v58 }
 0xc7b   : > { %v16021_v20 = vpop.f32.mrb[232].mxu1 }
 0xc7c   : > { %v16022_v39 = vpop.f32.mrb[233].mxu1 }
 0xc7d   : > { %v16023_v34 = vadd.f32 %v16022_v39, %v16021_v20  ;;  %v16024_v9 = vpop.f32.mrb[234].mxu1 }
 0xc7e   : > { %v16025_v1 = vpop.f32.mrb[235].mxu1 }
 0xc7f   : > { %v16026_v42 = vadd.f32 %v16025_v1, %v16024_v9  ;;  %v14859_v6 = vadd.f32 %v16023_v34, %v15744_v41 }
 0xc81   : > { %v14862_v25 = vadd.f32 %v16026_v42, %v15744_v41 }
 0xcbb   : > { %v16043_v50 = vpop.f32.mrb[236].mxu1 }
 0xcbc   : > { %v16044_v29 = vpop.f32.mrb[237].mxu1 }
 0xcbd   : > { %v16045_v59 = vadd.f32 %v16044_v29, %v16043_v50  ;;  %v16046_v13 = vpop.f32.mrb[238].mxu1 }
 0xcbe   : > { %v16047_v54 = vpop.f32.mrb[239].mxu1 }
 0xcbf   : > { %v14900_v61 = vadd.f32 %v16045_v59, %v14859_v6  ;;  %v16048_v3 = vadd.f32 %v16047_v54, %v16046_v13 }
 0xcc1   : > { %14906 = vst [vmem:[%s4554_s30] sm:$0xff] %v14900_v61  ;;  %v14903_v40 = vadd.f32 %v16048_v3, %v14862_v25 }
 0xcc3   : > { %14907 = vst [vmem:[%s4554_s30 + $0x8] sm:$0xff] %v14903_v40 }
 0xcc4 PF: > { %p18_p9 = scmp.ge.s32.totalorder %s17361_s21, 4   ;;  %s21616_s17 = smov %s17274_s18 }
 0xcc5   : > { %s21617_s18 = smov %s17370_s24  ;;  %s21618_s19 = smov %s17361_s21 }
 0xcc6   :  { %20 = sbr.rel (!%p18_p9) target bundleno = 2 (0x2), region = 157 }

</bundles_post_ra>
